<compile_context>
chip_gen: v7x
topology: tpu7x:2x2x1
jax: 0.10.0
libtpu: 0.0.40
codegen_flags: <defaults>
</compile_context>

<pallas_src>
import functools

import jax
import jax.numpy as jnp
from jax.experimental import pallas as pl
from jax.experimental.pallas import tpu as pltpu

BN_EPS = 1e-5
BN_SCALE = float(1.0 / (1.0 + BN_EPS) ** 0.5)   # eval-mode BN folds to a scale
LRELU_SLOPE = 0.01                              # PyTorch default negative_slope


# ----------------------------------------------------------------------------
# Small in-kernel helpers
# ----------------------------------------------------------------------------
def _lrelu(y):
    # maximum instead of where: one fewer VALU op per element
    return jnp.maximum(y, LRELU_SLOPE * y)


def _l2n(x):
    """L2-normalize columns (channel axis 0). Matches F.normalize(dim=1, eps=1e-12)."""
    ssq = jnp.sum(x * x, axis=0, keepdims=True)
    return x * jax.lax.rsqrt(jnp.maximum(ssq, 1e-24))


def _softmax_last(x):
    """Softmax over the last axis; divide moved to the EUP via pl.reciprocal."""
    m = jnp.max(x, axis=-1, keepdims=True)
    e = jnp.exp(x - m)
    return e * pl.reciprocal(jnp.sum(e, axis=-1, keepdims=True), approx=True)


def _mm(w, x):
    """(Cout, Cin) @ (Cin, N) — bf16 MXU operands, f32 accumulation."""
    return jax.lax.dot_general(
        w.astype(jnp.bfloat16), x.astype(jnp.bfloat16),
        (((1,), (0,)), ((), ())), preferred_element_type=jnp.float32)


def _dot_c0(a, b):
    """Contract axis 0 of both -> (a.shape[1], b.shape[1]); bf16 MXU, f32 acc."""
    return jax.lax.dot_general(
        a.astype(jnp.bfloat16), b.astype(jnp.bfloat16),
        (((0,), (0,)), ((), ())), preferred_element_type=jnp.float32)


def _dot_c1(a, b):
    """Contract axis 1 of both -> (a.shape[0], b.shape[0]); bf16 MXU, f32 acc."""
    return jax.lax.dot_general(
        a.astype(jnp.bfloat16), b.astype(jnp.bfloat16),
        (((1,), (1,)), ((), ())), preferred_element_type=jnp.float32)


# ----------------------------------------------------------------------------
# Kernel 1: emb_nn1 stand-in + feature_interaction + emb_nn2 + score_nn
#            (one grid point = one (side, batch) pair; side 0 = src, 1 = tgt)
# ----------------------------------------------------------------------------
def _branch_kernel(xs_ref, xt_ref, we_ref, be_ref,
                   w1_ref, b1_ref, w2_ref, b2_ref,
                   ws1_ref, bs1_ref, ws2_ref, bs2_ref,
                   ws3_ref, bs3_ref, ws4t_ref, bs4_ref,
                   emb_ref, score_ref):
    # --- emb_nn1 stand-in: pointwise Conv1d(3 -> E1) + LeakyReLU -------------
    # Cin = 3: VPU broadcast-MAC (an MXU push here would be >97% padding).
    we = we_ref[...].astype(jnp.float32)           # (E1, 3)
    be = be_ref[...]                               # (E1, 1)

    def emb1(x):                                   # (3, N) -> (E1, N)
        y = (we[:, 0:1] * x[0:1, :]
             + we[:, 1:2] * x[1:2, :]
             + we[:, 2:3] * x[2:3, :]) + be
        return _lrelu(y)

    src = emb1(xs_ref[0])                          # (E1, Ns)  own side
    tgt = emb1(xt_ref[0])                          # (E1, Nt)  other side
    e1 = src.shape[0]

    # --- feature_interaction --------------------------------------------------
    src_n = _l2n(src)
    tgt_n = _l2n(tgt)
    simi = _dot_c0(src_n, tgt_n)                   # (Ns, Nt) cosine similarity
    p = _softmax_last(simi)                        # softmax over target points
    glob_tar_t = _dot_c1(tgt, p)                   # (E1, Ns) == (p @ tgt^T)^T
    glob_src = jnp.max(src, axis=1, keepdims=True) # (E1, 1)

    # --- emb_nn2 layer 1: the 4-way concat [src; glob_tar; glob_src; diff]
    #     is folded into static slices of the weight (no concatenate,
    #     no broadcast tensor, glob_src handled as a rank-1 column). -----------
    w1 = w1_ref[0]                                 # (2*E1, 4*E1)
    w1a = w1[:, 0 * e1:1 * e1]
    w1b = w1[:, 1 * e1:2 * e1]
    w1c = w1[:, 2 * e1:3 * e1]
    w1d = w1[:, 3 * e1:4 * e1]
    y = (_mm(w1a, src)
         + _mm(w1b + w1d, glob_tar_t)
         + _mm(w1c - w1d, glob_src)                # (2*E1, 1) broadcasts over Ns
         + b1_ref[0])
    y = _lrelu(y)

    # --- emb_nn2 layer 2 ------------------------------------------------------
    y = _lrelu(_mm(w2_ref[0], y) + b2_ref[0])      # (E, Ns)
    emb_ref[0] = y.astype(emb_ref.dtype)

    # --- score_nn -------------------------------------------------------------
    s = _lrelu(_mm(ws1_ref[0], y) + bs1_ref[0])    # (512, Ns)
    s = _lrelu(_mm(ws2_ref[0], s) + bs2_ref[0])    # (128, Ns)
    s = _lrelu(_mm(ws3_ref[0], s) + bs3_ref[0])    # (128, Ns)
    # Last layer has Cout=1: VPU multiply + sublane reduce instead of an MXU
    # push that would be almost entirely padding. Weight stored pre-transposed.
    s = jnp.sum(ws4t_ref[0].astype(jnp.float32) * s,
                axis=0, keepdims=True) + bs4_ref[0]        # (1, Ns)
    score_ref[0] = jax.nn.sigmoid(s).astype(score_ref.dtype)


def fused_branch(points, params, B):
    """emb_nn1 + feature_interaction + emb_nn2 + score_nn for BOTH sides in a
    single pallas_call.  points: (2B, 3, N) = [src; tgt] concatenated."""
    twoB, _, N = points.shape
    E1 = params["emb1_w"].shape[0]
    E = params["w2"].shape[1]
    weights = [params[k] for k in ("w1", "b1", "w2", "b2",
                                   "ws1", "bs1", "ws2", "bs2",
                                   "ws3", "bs3", "ws4t", "bs4")]
    # Per-side weights are stacked (2, ...) and selected by the side grid axis;
    # with side as the outer grid axis each weight is DMA'd only twice.
    w_specs = [pl.BlockSpec((1,) + w.shape[1:], lambda s, i: (s, 0, 0))
               for w in weights]
    own = pl.BlockSpec((1, 3, N), lambda s, i: (s * B + i, 0, 0))
    oth = pl.BlockSpec((1, 3, N), lambda s, i: ((1 - s) * B + i, 0, 0))
    return pl.pallas_call(
        _branch_kernel,
        out_shape=(jax.ShapeDtypeStruct((twoB, E, N), jnp.float32),
                   jax.ShapeDtypeStruct((twoB, 1, N), jnp.float32)),
        grid=(2, B),
        in_specs=[own, oth,
                  pl.BlockSpec((E1, 3), lambda s, i: (0, 0)),
                  pl.BlockSpec((E1, 1), lambda s, i: (0, 0))] + w_specs,
        out_specs=(pl.BlockSpec((1, E, N), lambda s, i: (s * B + i, 0, 0)),
                   pl.BlockSpec((1, 1, N), lambda s, i: (s * B + i, 0, 0))),
        compiler_params=pltpu.CompilerParams(
            dimension_semantics=("parallel", "parallel")),
    )(points, points, params["emb1_w"], params["emb1_b"], *weights)


# ----------------------------------------------------------------------------
# Kernel 2: score-weighted cos-simi (emitted transposed) + mask_nn (5 layers)
#           + channel softmax of the 2-class output folded to sigmoid(x1-x0)
# ----------------------------------------------------------------------------
def _mask_kernel(qry_ref, key_ref, score_ref,
                 wm1_ref, bm1_ref, wm2_ref, bm2_ref, wm3_ref, bm3_ref,
                 wm4_ref, bm4_ref, wm5_ref, bm5_ref, o_ref, ms_ref):
    qry = qry_ref[0]                               # (E, Ns)  own embedding
    key = key_ref[0]                               # (E, Nt)  other embedding
    raw = score_ref[0]                             # (1, Nt)  sigmoid score (key side)

    qn = _l2n(qry)
    kn = _l2n(key)
    # Similarity produced ALREADY transposed: simi_t[m, n] = cos(key_m, qry_n)
    # -> (Nt, Ns). This is exactly simi.permute(0,2,1) of the reference, but it
    # comes straight from the MXU (different dimension numbers), so the wrapper
    # never has to transpose the full matrix in HBM.
    simi_t = _dot_c0(kn, qn)                       # (Nt, Ns)

    sc = _softmax_last(raw)                        # (1, Nt)  softmax(score)
    # Fold the per-point score scaling into the columns of the first mask
    # weight: sum_m (W[i,m]*sc[m]) * simi_t[m,n]  ==  W @ (simi_t * sc^T).
    w1s = wm1_ref[0].astype(jnp.float32) * sc      # (1024, Nt)

    h = _lrelu(_mm(w1s, simi_t) + bm1_ref[0])            # (1024, Ns)
    h = _lrelu(_mm(wm2_ref[0], h) + bm2_ref[0])           # (512, Ns)
    h = _lrelu(_mm(wm3_ref[0], h) + bm3_ref[0])           # (128, Ns)
    h = _lrelu(_mm(wm4_ref[0], h) + bm4_ref[0])           # (128, Ns)
    out = _mm(wm5_ref[0], h) + bm5_ref[0]                 # (2, Ns), no BN/act
    o_ref[0] = out.astype(o_ref.dtype)
    # softmax over the 2 channels, class-1 probability == sigmoid(x1 - x0)
    ms_ref[0] = jax.nn.sigmoid(out[1:2, :] - out[0:1, :]).astype(ms_ref.dtype)


def fused_mask(emb2, score_raw, params, B):
    """cos_simi * softmax(score) + full mask_nn stack for BOTH sides in one call."""
    twoB, E, N = emb2.shape
    weights = [params[k] for k in ("wm1", "bm1", "wm2", "bm2", "wm3", "bm3",
                                   "wm4", "bm4", "wm5", "bm5")]
    w_specs = [pl.BlockSpec((1,) + w.shape[1:], lambda s, i: (s, 0, 0))
               for w in weights]
    qry = pl.BlockSpec((1, E, N), lambda s, i: (s * B + i, 0, 0))
    key = pl.BlockSpec((1, E, N), lambda s, i: ((1 - s) * B + i, 0, 0))
    ksc = pl.BlockSpec((1, 1, N), lambda s, i: ((1 - s) * B + i, 0, 0))
    return pl.pallas_call(
        _mask_kernel,
        out_shape=(jax.ShapeDtypeStruct((twoB, 2, N), jnp.float32),
                   jax.ShapeDtypeStruct((twoB, 1, N), jnp.float32)),
        grid=(2, B),
        in_specs=[qry, key, ksc] + w_specs,
        out_specs=(pl.BlockSpec((1, 2, N), lambda s, i: (s * B + i, 0, 0)),
                   pl.BlockSpec((1, 1, N), lambda s, i: (s * B + i, 0, 0))),
        compiler_params=pltpu.CompilerParams(
            dimension_semantics=("parallel", "parallel")),
    )(emb2, emb2, score_raw, *weights)


# ----------------------------------------------------------------------------
# Parameters (deterministic, synthetic; arrays ONLY — jit-friendly pytree).
# Per-side weights stacked along a leading axis of 2 (index 0 = src, 1 = tgt).
# ----------------------------------------------------------------------------
def init_params(key, emb_dims=32, n_points=128):
    e1 = emb_dims // 2
    kit = iter(jax.random.split(key, 32))

    def dense2(cout, cin, fold_bn=True):
        kw, kb = jax.random.split(next(kit))
        w = jax.random.normal(kw, (2, cout, cin), jnp.float32) / jnp.sqrt(cin)
        b = 0.01 * jax.random.normal(kb, (2, cout, 1), jnp.float32)
        if fold_bn:                      # eval-mode BN (mean=0, var=1) folded in
            w = w * BN_SCALE
            b = b * BN_SCALE
        # weights stored in bf16 (MXU operand dtype); biases stay f32
        return w.astype(jnp.bfloat16), b

    params = {}
    # TODO(synk): DGCNN (kNN graph conv) source was not provided; replaced by a
    # pointwise Conv1d(3 -> emb_dims/2) + LeakyReLU stand-in embedding (shared).
    kw, kb = jax.random.split(next(kit))
    params["emb1_w"] = (jax.random.normal(kw, (e1, 3), jnp.float32)
                        / jnp.sqrt(3.0) * BN_SCALE).astype(jnp.bfloat16)
    params["emb1_b"] = 0.01 * jax.random.normal(kb, (e1, 1), jnp.float32) * BN_SCALE

    params["w1"], params["b1"] = dense2(2 * e1, 4 * e1)          # emb_nn2 layer 1
    params["w2"], params["b2"] = dense2(emb_dims, 2 * e1)        # emb_nn2 layer 2
    params["ws1"], params["bs1"] = dense2(512, emb_dims)         # score_nn
    params["ws2"], params["bs2"] = dense2(128, 512)
    params["ws3"], params["bs3"] = dense2(128, 128)
    w4, b4 = dense2(1, 128, fold_bn=False)                       # score_nn last (sigmoid)
    params["ws4t"] = jnp.transpose(w4, (0, 2, 1))                # stored (2, Cin, 1)
    params["bs4"] = b4                                           # (2, 1, 1)
    params["wm1"], params["bm1"] = dense2(1024, n_points)        # mask_nn
    params["wm2"], params["bm2"] = dense2(512, 1024)
    params["wm3"], params["bm3"] = dense2(128, 512)
    params["wm4"], params["bm4"] = dense2(128, 128)
    params["wm5"], params["bm5"] = dense2(2, 128, fold_bn=False) # mask_nn last (no BN)
    return params


# ----------------------------------------------------------------------------
# OverlapNet forward
# ----------------------------------------------------------------------------
def overlapnet_forward(params, src, tgt, k_top):
    B = src.shape[0]

    # src & tgt concatenated along batch; per-side selection happens via
    # BlockSpec index_maps inside the fused kernels (no activation stacking).
    points = jnp.concatenate([src, tgt], axis=0)                 # (2B, 3, N)

    # fused: emb_nn1 + feature_interaction + emb_nn2 + score_nn (both sides)
    emb2, score_raw = fused_branch(points, params, B)            # (2B,E,N),(2B,1,N)

    # fused: score-weighted cos-simi (pre-transposed) + mask_nn + class-1 score
    mask_all, mask_score = fused_mask(emb2, score_raw, params, B)

    mask_src, mask_tgt = mask_all[:B], mask_all[B:]
    mask_src_score = mask_score[:B, 0, :]
    mask_tgt_score = mask_score[B:, 0, :]

    # TODO(synk): top-k + scatter has no clean Pallas TPU equivalent; kept in plain JAX.
    _, idx_s = jax.lax.top_k(mask_src_score, k_top)
    _, idx_t = jax.lax.top_k(mask_tgt_score, k_top)
    rows = jnp.arange(B)[:, None]
    mask_src_idx = jnp.zeros_like(mask_src_score).at[rows, idx_s].set(1.0)
    mask_tgt_idx = jnp.zeros_like(mask_tgt_score).at[rows, idx_t].set(1.0)

    return mask_src, mask_tgt, mask_src_idx, mask_tgt_idx


# ----------------------------------------------------------------------------
# Main
# ----------------------------------------------------------------------------
if __name__ == "__main__":
    B = 2            # batch
    N = 128          # src/tgt subsampled points (716 in the original)
    EMB = 32         # n_emb_dims (1024 in the original)
    K_TOP = 100      # top-k (700 in the original)

    key = jax.random.PRNGKey(0)
    k_src, k_tgt, k_par = jax.random.split(key, 3)
    src = jax.random.normal(k_src, (B, 3, N), jnp.float32)
    tgt = jax.random.normal(k_tgt, (B, 3, N), jnp.float32)

    params = init_params(k_par, emb_dims=EMB, n_points=N)   # arrays only (jit-safe)

    fwd = jax.jit(functools.partial(overlapnet_forward, k_top=K_TOP))
    mask_src, mask_tgt, mask_src_idx, mask_tgt_idx = fwd(params, src, tgt)
    jax.block_until_ready((mask_src, mask_tgt, mask_src_idx, mask_tgt_idx))

    assert mask_src.shape == (B, 2, N)
    assert mask_tgt.shape == (B, 2, N)
    assert mask_src_idx.shape == (B, N)
    assert mask_tgt_idx.shape == (B, N)
    assert bool(jnp.all(jnp.isfinite(mask_src)))
    assert bool(jnp.all(jnp.isfinite(mask_tgt)))
    assert int(mask_src_idx.sum()) == B * K_TOP
    assert int(mask_tgt_idx.sum()) == B * K_TOP
    print("KERNEL_OK")
</pallas_src>

<mosaic_0001>
module attributes {stable_mosaic.version = 11 : i64} {
  func.func @_branch_kernel(%arg0: i32, %arg1: i32, %arg2: memref<1x3x128xf32, #tpu.memory_space<vmem>>, %arg3: memref<1x3x128xf32, #tpu.memory_space<vmem>>, %arg4: memref<16x3xbf16, #tpu.memory_space<vmem>>, %arg5: memref<16x1xf32, #tpu.memory_space<vmem>>, %arg6: memref<1x32x64xbf16, #tpu.memory_space<vmem>>, %arg7: memref<1x32x1xf32, #tpu.memory_space<vmem>>, %arg8: memref<1x32x32xbf16, #tpu.memory_space<vmem>>, %arg9: memref<1x32x1xf32, #tpu.memory_space<vmem>>, %arg10: memref<1x512x32xbf16, #tpu.memory_space<vmem>>, %arg11: memref<1x512x1xf32, #tpu.memory_space<vmem>>, %arg12: memref<1x128x512xbf16, #tpu.memory_space<vmem>>, %arg13: memref<1x128x1xf32, #tpu.memory_space<vmem>>, %arg14: memref<1x128x128xbf16, #tpu.memory_space<vmem>>, %arg15: memref<1x128x1xf32, #tpu.memory_space<vmem>>, %arg16: memref<1x128x1xbf16, #tpu.memory_space<vmem>>, %arg17: memref<1x1x1xf32, #tpu.memory_space<vmem>>, %arg18: memref<1x32x128xf32, #tpu.memory_space<vmem>>, %arg19: memref<1x1x128xf32, #tpu.memory_space<vmem>>) attributes {dimension_semantics = [#tpu.dimension_semantics<parallel>, #tpu.dimension_semantics<parallel>], iteration_bounds = array<i64: 2, 2>, scalar_prefetch = 0 : i64, scratch_operands = 0 : i64, tpu.core_type = #tpu.core_type<tc>, window_params = [{transform_indices = @transform_0, window_bounds = array<i64: 1, 3, 128>}, {transform_indices = @transform_1, window_bounds = array<i64: 1, 3, 128>}, {pipeline_mode = #tpu.pipeline_mode<synchronous>, transform_indices = @transform_2, window_bounds = array<i64: 16, 3>}, {pipeline_mode = #tpu.pipeline_mode<synchronous>, transform_indices = @transform_3, window_bounds = array<i64: 16, 1>}, {transform_indices = @transform_4, window_bounds = array<i64: 1, 32, 64>}, {transform_indices = @transform_5, window_bounds = array<i64: 1, 32, 1>}, {transform_indices = @transform_6, window_bounds = array<i64: 1, 32, 32>}, {transform_indices = @transform_7, window_bounds = array<i64: 1, 32, 1>}, {transform_indices = @transform_8, window_bounds = array<i64: 1, 512, 32>}, {transform_indices = @transform_9, window_bounds = array<i64: 1, 512, 1>}, {transform_indices = @transform_10, window_bounds = array<i64: 1, 128, 512>}, {transform_indices = @transform_11, window_bounds = array<i64: 1, 128, 1>}, {transform_indices = @transform_12, window_bounds = array<i64: 1, 128, 128>}, {transform_indices = @transform_13, window_bounds = array<i64: 1, 128, 1>}, {transform_indices = @transform_14, window_bounds = array<i64: 1, 128, 1>}, {transform_indices = @transform_15, window_bounds = array<i64: 1, 1, 1>}, {transform_indices = @transform_16, window_bounds = array<i64: 1, 32, 128>}, {transform_indices = @transform_17, window_bounds = array<i64: 1, 1, 128>}]} {
    %c0 = arith.constant 0 : index
    %c0_0 = arith.constant 0 : index
    %0 = vector.load %arg4[%c0, %c0_0] : memref<16x3xbf16, #tpu.memory_space<vmem>>, vector<16x3xbf16>
    %1 = arith.extf %0 : vector<16x3xbf16> to vector<16x3xf32>
    %c0_1 = arith.constant 0 : index
    %c0_2 = arith.constant 0 : index
    %2 = vector.load %arg5[%c0_1, %c0_2] : memref<16x1xf32, #tpu.memory_space<vmem>>, vector<16x1xf32>
    %c0_3 = arith.constant 0 : index
    %c0_4 = arith.constant 0 : index
    %c0_5 = arith.constant 0 : index
    %3 = vector.load %arg2[%c0_3, %c0_4, %c0_5] : memref<1x3x128xf32, #tpu.memory_space<vmem>>, vector<1x3x128xf32>
    %4 = vector.shape_cast %3 : vector<1x3x128xf32> to vector<3x128xf32>
    %5 = vector.extract_strided_slice %1 {offsets = [0, 0], sizes = [16, 1], strides = [1, 1]} : vector<16x3xf32> to vector<16x1xf32>
    %6 = vector.extract_strided_slice %4 {offsets = [0, 0], sizes = [1, 128], strides = [1, 1]} : vector<3x128xf32> to vector<1x128xf32>
    %7 = vector.broadcast %5 : vector<16x1xf32> to vector<16x128xf32>
    %8 = vector.broadcast %6 : vector<1x128xf32> to vector<16x128xf32>
    %9 = arith.mulf %7, %8 : vector<16x128xf32>
    %10 = vector.extract_strided_slice %1 {offsets = [0, 1], sizes = [16, 1], strides = [1, 1]} : vector<16x3xf32> to vector<16x1xf32>
    %11 = vector.extract_strided_slice %4 {offsets = [1, 0], sizes = [1, 128], strides = [1, 1]} : vector<3x128xf32> to vector<1x128xf32>
    %12 = vector.broadcast %10 : vector<16x1xf32> to vector<16x128xf32>
    %13 = vector.broadcast %11 : vector<1x128xf32> to vector<16x128xf32>
    %14 = arith.mulf %12, %13 : vector<16x128xf32>
    %15 = arith.addf %9, %14 : vector<16x128xf32>
    %16 = vector.extract_strided_slice %1 {offsets = [0, 2], sizes = [16, 1], strides = [1, 1]} : vector<16x3xf32> to vector<16x1xf32>
    %17 = vector.extract_strided_slice %4 {offsets = [2, 0], sizes = [1, 128], strides = [1, 1]} : vector<3x128xf32> to vector<1x128xf32>
    %18 = vector.broadcast %16 : vector<16x1xf32> to vector<16x128xf32>
    %19 = vector.broadcast %17 : vector<1x128xf32> to vector<16x128xf32>
    %20 = arith.mulf %18, %19 : vector<16x128xf32>
    %21 = arith.addf %15, %20 : vector<16x128xf32>
    %22 = vector.broadcast %2 : vector<16x1xf32> to vector<16x128xf32>
    %23 = arith.addf %21, %22 : vector<16x128xf32>
    %cst = arith.constant 0.00999999977 : f32
    %24 = vector.broadcast %cst : f32 to vector<16x128xf32>
    %25 = arith.mulf %24, %23 : vector<16x128xf32>
    %26 = arith.maximumf %23, %25 : vector<16x128xf32>
    %c0_6 = arith.constant 0 : index
    %c0_7 = arith.constant 0 : index
    %c0_8 = arith.constant 0 : index
    %27 = vector.load %arg3[%c0_6, %c0_7, %c0_8] : memref<1x3x128xf32, #tpu.memory_space<vmem>>, vector<1x3x128xf32>
    %28 = vector.shape_cast %27 : vector<1x3x128xf32> to vector<3x128xf32>
    %29 = vector.extract_strided_slice %1 {offsets = [0, 0], sizes = [16, 1], strides = [1, 1]} : vector<16x3xf32> to vector<16x1xf32>
    %30 = vector.extract_strided_slice %28 {offsets = [0, 0], sizes = [1, 128], strides = [1, 1]} : vector<3x128xf32> to vector<1x128xf32>
    %31 = vector.broadcast %29 : vector<16x1xf32> to vector<16x128xf32>
    %32 = vector.broadcast %30 : vector<1x128xf32> to vector<16x128xf32>
    %33 = arith.mulf %31, %32 : vector<16x128xf32>
    %34 = vector.extract_strided_slice %1 {offsets = [0, 1], sizes = [16, 1], strides = [1, 1]} : vector<16x3xf32> to vector<16x1xf32>
    %35 = vector.extract_strided_slice %28 {offsets = [1, 0], sizes = [1, 128], strides = [1, 1]} : vector<3x128xf32> to vector<1x128xf32>
    %36 = vector.broadcast %34 : vector<16x1xf32> to vector<16x128xf32>
    %37 = vector.broadcast %35 : vector<1x128xf32> to vector<16x128xf32>
    %38 = arith.mulf %36, %37 : vector<16x128xf32>
    %39 = arith.addf %33, %38 : vector<16x128xf32>
    %40 = vector.extract_strided_slice %1 {offsets = [0, 2], sizes = [16, 1], strides = [1, 1]} : vector<16x3xf32> to vector<16x1xf32>
    %41 = vector.extract_strided_slice %28 {offsets = [2, 0], sizes = [1, 128], strides = [1, 1]} : vector<3x128xf32> to vector<1x128xf32>
    %42 = vector.broadcast %40 : vector<16x1xf32> to vector<16x128xf32>
    %43 = vector.broadcast %41 : vector<1x128xf32> to vector<16x128xf32>
    %44 = arith.mulf %42, %43 : vector<16x128xf32>
    %45 = arith.addf %39, %44 : vector<16x128xf32>
    %46 = vector.broadcast %2 : vector<16x1xf32> to vector<16x128xf32>
    %47 = arith.addf %45, %46 : vector<16x128xf32>
    %cst_9 = arith.constant 0.00999999977 : f32
    %48 = vector.broadcast %cst_9 : f32 to vector<16x128xf32>
    %49 = arith.mulf %48, %47 : vector<16x128xf32>
    %50 = arith.maximumf %47, %49 : vector<16x128xf32>
    %51 = arith.mulf %26, %26 : vector<16x128xf32>
    %cst_10 = arith.constant dense<0.000000e+00> : vector<128xf32>
    %52 = vector.multi_reduction <add>, %51, %cst_10 [0] : vector<16x128xf32> to vector<128xf32>
    %53 = vector.shape_cast %52 : vector<128xf32> to vector<1x128xf32>
    %cst_11 = arith.constant 1.000000e-24 : f32
    %54 = vector.broadcast %cst_11 : f32 to vector<1x128xf32>
    %55 = arith.maximumf %53, %54 : vector<1x128xf32>
    %56 = math.rsqrt %55 : vector<1x128xf32>
    %57 = vector.broadcast %56 : vector<1x128xf32> to vector<16x128xf32>
    %58 = arith.mulf %26, %57 : vector<16x128xf32>
    %59 = arith.mulf %50, %50 : vector<16x128xf32>
    %cst_12 = arith.constant dense<0.000000e+00> : vector<128xf32>
    %60 = vector.multi_reduction <add>, %59, %cst_12 [0] : vector<16x128xf32> to vector<128xf32>
    %61 = vector.shape_cast %60 : vector<128xf32> to vector<1x128xf32>
    %cst_13 = arith.constant 1.000000e-24 : f32
    %62 = vector.broadcast %cst_13 : f32 to vector<1x128xf32>
    %63 = arith.maximumf %61, %62 : vector<1x128xf32>
    %64 = math.rsqrt %63 : vector<1x128xf32>
    %65 = vector.broadcast %64 : vector<1x128xf32> to vector<16x128xf32>
    %66 = arith.mulf %50, %65 : vector<16x128xf32>
    %67 = arith.truncf %58 : vector<16x128xf32> to vector<16x128xbf16>
    %68 = arith.truncf %66 : vector<16x128xf32> to vector<16x128xbf16>
    %cst_14 = arith.constant dense<0.000000e+00> : vector<128x128xf32>
    %69 = tpu.matmul %67, %68, %cst_14 {dimension_numbers = #tpu.dot_dimension_numbers<[0], [0], [1], [1], [0, 1, 1, 1], [], []>} : vector<16x128xbf16>, vector<16x128xbf16>, vector<128x128xf32> -> vector<128x128xf32>
    %cst_15 = arith.constant dense<0xFF800000> : vector<128xf32>
    %70 = vector.multi_reduction <maximumf>, %69, %cst_15 [1] : vector<128x128xf32> to vector<128xf32>
    %71 = vector.shape_cast %70 : vector<128xf32> to vector<128x1xf32>
    %72 = vector.broadcast %71 : vector<128x1xf32> to vector<128x128xf32>
    %73 = arith.subf %69, %72 : vector<128x128xf32>
    %74 = math.exp %73 : vector<128x128xf32>
    %cst_16 = arith.constant dense<0.000000e+00> : vector<128xf32>
    %75 = vector.multi_reduction <add>, %74, %cst_16 [1] : vector<128x128xf32> to vector<128xf32>
    %76 = vector.shape_cast %75 : vector<128xf32> to vector<128x1xf32>
    %77 = tpu.reciprocal %76 {approx = true} : vector<128x1xf32> -> vector<128x1xf32>
    %78 = vector.broadcast %77 : vector<128x1xf32> to vector<128x128xf32>
    %79 = arith.mulf %74, %78 : vector<128x128xf32>
    %80 = arith.truncf %50 : vector<16x128xf32> to vector<16x128xbf16>
    %81 = arith.truncf %79 : vector<128x128xf32> to vector<128x128xbf16>
    %cst_17 = arith.constant dense<0.000000e+00> : vector<16x128xf32>
    %82 = tpu.matmul %80, %81, %cst_17 {dimension_numbers = #tpu.dot_dimension_numbers<[1], [1], [0], [0], [0, 0, 1, 0], [], []>} : vector<16x128xbf16>, vector<128x128xbf16>, vector<16x128xf32> -> vector<16x128xf32>
    %cst_18 = arith.constant dense<0xFF800000> : vector<16xf32>
    %83 = vector.multi_reduction <maximumf>, %26, %cst_18 [1] : vector<16x128xf32> to vector<16xf32>
    %84 = vector.shape_cast %83 : vector<16xf32> to vector<16x1xf32>
    %c0_19 = arith.constant 0 : index
    %c0_20 = arith.constant 0 : index
    %c0_21 = arith.constant 0 : index
    %85 = vector.load %arg6[%c0_19, %c0_20, %c0_21] : memref<1x32x64xbf16, #tpu.memory_space<vmem>>, vector<1x32x64xbf16>
    %86 = vector.shape_cast %85 : vector<1x32x64xbf16> to vector<32x64xbf16>
    %87 = vector.extract_strided_slice %86 {offsets = [0, 0], sizes = [32, 16], strides = [1, 1]} : vector<32x64xbf16> to vector<32x16xbf16>
    %88 = vector.extract_strided_slice %86 {offsets = [0, 16], sizes = [32, 16], strides = [1, 1]} : vector<32x64xbf16> to vector<32x16xbf16>
    %89 = vector.extract_strided_slice %86 {offsets = [0, 32], sizes = [32, 16], strides = [1, 1]} : vector<32x64xbf16> to vector<32x16xbf16>
    %90 = vector.extract_strided_slice %86 {offsets = [0, 48], sizes = [32, 16], strides = [1, 1]} : vector<32x64xbf16> to vector<32x16xbf16>
    %91 = arith.truncf %26 : vector<16x128xf32> to vector<16x128xbf16>
    %cst_22 = arith.constant dense<0.000000e+00> : vector<32x128xf32>
    %92 = tpu.matmul %87, %91, %cst_22 {dimension_numbers = #tpu.dot_dimension_numbers<[1], [0], [0], [1], [0, 0, 1, 1], [], []>} : vector<32x16xbf16>, vector<16x128xbf16>, vector<32x128xf32> -> vector<32x128xf32>
    %93 = arith.addf %88, %90 : vector<32x16xbf16>
    %94 = arith.truncf %82 : vector<16x128xf32> to vector<16x128xbf16>
    %cst_23 = arith.constant dense<0.000000e+00> : vector<32x128xf32>
    %95 = tpu.matmul %93, %94, %cst_23 {dimension_numbers = #tpu.dot_dimension_numbers<[1], [0], [0], [1], [0, 0, 1, 1], [], []>} : vector<32x16xbf16>, vector<16x128xbf16>, vector<32x128xf32> -> vector<32x128xf32>
    %96 = arith.addf %92, %95 : vector<32x128xf32>
    %97 = arith.subf %89, %90 : vector<32x16xbf16>
    %98 = arith.truncf %84 : vector<16x1xf32> to vector<16x1xbf16>
    %cst_24 = arith.constant dense<0.000000e+00> : vector<32x1xf32>
    %99 = tpu.matmul %97, %98, %cst_24 {dimension_numbers = #tpu.dot_dimension_numbers<[1], [0], [0], [1], [0, 0, 1, 1], [], []>} : vector<32x16xbf16>, vector<16x1xbf16>, vector<32x1xf32> -> vector<32x1xf32>
    %100 = vector.broadcast %99 : vector<32x1xf32> to vector<32x128xf32>
    %101 = arith.addf %96, %100 : vector<32x128xf32>
    %c0_25 = arith.constant 0 : index
    %c0_26 = arith.constant 0 : index
    %c0_27 = arith.constant 0 : index
    %102 = vector.load %arg7[%c0_25, %c0_26, %c0_27] : memref<1x32x1xf32, #tpu.memory_space<vmem>>, vector<1x32x1xf32>
    %103 = vector.shape_cast %102 : vector<1x32x1xf32> to vector<32x1xf32>
    %104 = vector.broadcast %103 : vector<32x1xf32> to vector<32x128xf32>
    %105 = arith.addf %101, %104 : vector<32x128xf32>
    %cst_28 = arith.constant 0.00999999977 : f32
    %106 = vector.broadcast %cst_28 : f32 to vector<32x128xf32>
    %107 = arith.mulf %106, %105 : vector<32x128xf32>
    %108 = arith.maximumf %105, %107 : vector<32x128xf32>
    %c0_29 = arith.constant 0 : index
    %c0_30 = arith.constant 0 : index
    %c0_31 = arith.constant 0 : index
    %109 = vector.load %arg8[%c0_29, %c0_30, %c0_31] : memref<1x32x32xbf16, #tpu.memory_space<vmem>>, vector<1x32x32xbf16>
    %110 = vector.shape_cast %109 : vector<1x32x32xbf16> to vector<32x32xbf16>
    %111 = arith.truncf %108 : vector<32x128xf32> to vector<32x128xbf16>
    %cst_32 = arith.constant dense<0.000000e+00> : vector<32x128xf32>
    %112 = tpu.matmul %110, %111, %cst_32 {dimension_numbers = #tpu.dot_dimension_numbers<[1], [0], [0], [1], [0, 0, 1, 1], [], []>} : vector<32x32xbf16>, vector<32x128xbf16>, vector<32x128xf32> -> vector<32x128xf32>
    %c0_33 = arith.constant 0 : index
    %c0_34 = arith.constant 0 : index
    %c0_35 = arith.constant 0 : index
    %113 = vector.load %arg9[%c0_33, %c0_34, %c0_35] : memref<1x32x1xf32, #tpu.memory_space<vmem>>, vector<1x32x1xf32>
    %114 = vector.shape_cast %113 : vector<1x32x1xf32> to vector<32x1xf32>
    %115 = vector.broadcast %114 : vector<32x1xf32> to vector<32x128xf32>
    %116 = arith.addf %112, %115 : vector<32x128xf32>
    %cst_36 = arith.constant 0.00999999977 : f32
    %117 = vector.broadcast %cst_36 : f32 to vector<32x128xf32>
    %118 = arith.mulf %117, %116 : vector<32x128xf32>
    %119 = arith.maximumf %116, %118 : vector<32x128xf32>
    %c0_37 = arith.constant 0 : index
    %c0_38 = arith.constant 0 : index
    %c0_39 = arith.constant 0 : index
    %120 = vector.load %arg18[%c0_37, %c0_38, %c0_39] : memref<1x32x128xf32, #tpu.memory_space<vmem>>, vector<1x32x128xf32>
    %121 = vector.shape_cast %120 : vector<1x32x128xf32> to vector<32x128xf32>
    %122 = vector.shape_cast %119 : vector<32x128xf32> to vector<1x32x128xf32>
    tpu.vector_store %arg18[%c0_37, %c0_38, %c0_39], %122 {strides = array<i32>} : memref<1x32x128xf32, #tpu.memory_space<vmem>>, vector<1x32x128xf32>,
    %c0_40 = arith.constant 0 : index
    %c0_41 = arith.constant 0 : index
    %c0_42 = arith.constant 0 : index
    %123 = vector.load %arg10[%c0_40, %c0_41, %c0_42] : memref<1x512x32xbf16, #tpu.memory_space<vmem>>, vector<1x512x32xbf16>
    %124 = vector.shape_cast %123 : vector<1x512x32xbf16> to vector<512x32xbf16>
    %125 = arith.truncf %119 : vector<32x128xf32> to vector<32x128xbf16>
    %cst_43 = arith.constant dense<0.000000e+00> : vector<512x128xf32>
    %126 = tpu.matmul %124, %125, %cst_43 {dimension_numbers = #tpu.dot_dimension_numbers<[1], [0], [0], [1], [0, 0, 1, 1], [], []>} : vector<512x32xbf16>, vector<32x128xbf16>, vector<512x128xf32> -> vector<512x128xf32>
    %c0_44 = arith.constant 0 : index
    %c0_45 = arith.constant 0 : index
    %c0_46 = arith.constant 0 : index
    %127 = vector.load %arg11[%c0_44, %c0_45, %c0_46] : memref<1x512x1xf32, #tpu.memory_space<vmem>>, vector<1x512x1xf32>
    %128 = vector.shape_cast %127 : vector<1x512x1xf32> to vector<512x1xf32>
    %129 = vector.broadcast %128 : vector<512x1xf32> to vector<512x128xf32>
    %130 = arith.addf %126, %129 : vector<512x128xf32>
    %cst_47 = arith.constant 0.00999999977 : f32
    %131 = vector.broadcast %cst_47 : f32 to vector<512x128xf32>
    %132 = arith.mulf %131, %130 : vector<512x128xf32>
    %133 = arith.maximumf %130, %132 : vector<512x128xf32>
    %c0_48 = arith.constant 0 : index
    %c0_49 = arith.constant 0 : index
    %c0_50 = arith.constant 0 : index
    %134 = vector.load %arg12[%c0_48, %c0_49, %c0_50] : memref<1x128x512xbf16, #tpu.memory_space<vmem>>, vector<1x128x512xbf16>
    %135 = vector.shape_cast %134 : vector<1x128x512xbf16> to vector<128x512xbf16>
    %136 = arith.truncf %133 : vector<512x128xf32> to vector<512x128xbf16>
    %cst_51 = arith.constant dense<0.000000e+00> : vector<128x128xf32>
    %137 = tpu.matmul %135, %136, %cst_51 {dimension_numbers = #tpu.dot_dimension_numbers<[1], [0], [0], [1], [0, 0, 1, 1], [], []>} : vector<128x512xbf16>, vector<512x128xbf16>, vector<128x128xf32> -> vector<128x128xf32>
    %c0_52 = arith.constant 0 : index
    %c0_53 = arith.constant 0 : index
    %c0_54 = arith.constant 0 : index
    %138 = vector.load %arg13[%c0_52, %c0_53, %c0_54] : memref<1x128x1xf32, #tpu.memory_space<vmem>>, vector<1x128x1xf32>
    %139 = vector.shape_cast %138 : vector<1x128x1xf32> to vector<128x1xf32>
    %140 = vector.broadcast %139 : vector<128x1xf32> to vector<128x128xf32>
    %141 = arith.addf %137, %140 : vector<128x128xf32>
    %cst_55 = arith.constant 0.00999999977 : f32
    %142 = vector.broadcast %cst_55 : f32 to vector<128x128xf32>
    %143 = arith.mulf %142, %141 : vector<128x128xf32>
    %144 = arith.maximumf %141, %143 : vector<128x128xf32>
    %c0_56 = arith.constant 0 : index
    %c0_57 = arith.constant 0 : index
    %c0_58 = arith.constant 0 : index
    %145 = vector.load %arg14[%c0_56, %c0_57, %c0_58] : memref<1x128x128xbf16, #tpu.memory_space<vmem>>, vector<1x128x128xbf16>
    %146 = vector.shape_cast %145 : vector<1x128x128xbf16> to vector<128x128xbf16>
    %147 = arith.truncf %144 : vector<128x128xf32> to vector<128x128xbf16>
    %cst_59 = arith.constant dense<0.000000e+00> : vector<128x128xf32>
    %148 = tpu.matmul %146, %147, %cst_59 {dimension_numbers = #tpu.dot_dimension_numbers<[1], [0], [0], [1], [0, 0, 1, 1], [], []>} : vector<128x128xbf16>, vector<128x128xbf16>, vector<128x128xf32> -> vector<128x128xf32>
    %c0_60 = arith.constant 0 : index
    %c0_61 = arith.constant 0 : index
    %c0_62 = arith.constant 0 : index
    %149 = vector.load %arg15[%c0_60, %c0_61, %c0_62] : memref<1x128x1xf32, #tpu.memory_space<vmem>>, vector<1x128x1xf32>
    %150 = vector.shape_cast %149 : vector<1x128x1xf32> to vector<128x1xf32>
    %151 = vector.broadcast %150 : vector<128x1xf32> to vector<128x128xf32>
    %152 = arith.addf %148, %151 : vector<128x128xf32>
    %cst_63 = arith.constant 0.00999999977 : f32
    %153 = vector.broadcast %cst_63 : f32 to vector<128x128xf32>
    %154 = arith.mulf %153, %152 : vector<128x128xf32>
    %155 = arith.maximumf %152, %154 : vector<128x128xf32>
    %c0_64 = arith.constant 0 : index
    %c0_65 = arith.constant 0 : index
    %c0_66 = arith.constant 0 : index
    %156 = vector.load %arg16[%c0_64, %c0_65, %c0_66] : memref<1x128x1xbf16, #tpu.memory_space<vmem>>, vector<1x128x1xbf16>
    %157 = vector.shape_cast %156 : vector<1x128x1xbf16> to vector<128x1xbf16>
    %158 = arith.extf %157 : vector<128x1xbf16> to vector<128x1xf32>
    %159 = vector.broadcast %158 : vector<128x1xf32> to vector<128x128xf32>
    %160 = arith.mulf %159, %155 : vector<128x128xf32>
    %cst_67 = arith.constant dense<0.000000e+00> : vector<128xf32>
    %161 = vector.multi_reduction <add>, %160, %cst_67 [0] : vector<128x128xf32> to vector<128xf32>
    %162 = vector.shape_cast %161 : vector<128xf32> to vector<1x128xf32>
    %c0_68 = arith.constant 0 : index
    %c0_69 = arith.constant 0 : index
    %c0_70 = arith.constant 0 : index
    %163 = vector.load %arg17[%c0_68, %c0_69, %c0_70] : memref<1x1x1xf32, #tpu.memory_space<vmem>>, vector<1x1x1xf32>
    %164 = vector.shape_cast %163 : vector<1x1x1xf32> to vector<1x1xf32>
    %165 = vector.broadcast %164 : vector<1x1xf32> to vector<1x128xf32>
    %166 = arith.addf %162, %165 : vector<1x128xf32>
    %167 = arith.negf %166 : vector<1x128xf32>
    %168 = math.exp %167 : vector<1x128xf32>
    %cst_71 = arith.constant 1.000000e+00 : f32
    %169 = vector.broadcast %cst_71 : f32 to vector<1x128xf32>
    %170 = arith.addf %169, %168 : vector<1x128xf32>
    %171 = arith.divf %169, %170 : vector<1x128xf32>
    %c0_72 = arith.constant 0 : index
    %c0_73 = arith.constant 0 : index
    %c0_74 = arith.constant 0 : index
    %172 = vector.load %arg19[%c0_72, %c0_73, %c0_74] : memref<1x1x128xf32, #tpu.memory_space<vmem>>, vector<1x1x128xf32>
    %173 = vector.shape_cast %172 : vector<1x1x128xf32> to vector<1x128xf32>
    %174 = vector.shape_cast %171 : vector<1x128xf32> to vector<1x1x128xf32>
    tpu.vector_store %arg19[%c0_72, %c0_73, %c0_74], %174 {strides = array<i32>} : memref<1x1x128xf32, #tpu.memory_space<vmem>>, vector<1x1x128xf32>,
    return
  }
  func.func @transform_0(%arg0: i32, %arg1: i32) -> (i32, i32, i32) {
    %c2_i32 = arith.constant 2 : i32
    %0 = arith.muli %arg0, %c2_i32 : i32
    %1 = arith.addi %0, %arg1 : i32
    %c0_i32 = arith.constant 0 : i32
    %c0_i32_0 = arith.constant 0 : i32
    %c0_i32_1 = arith.constant 0 : i32
    return %1, %c0_i32, %c0_i32_0 : i32, i32, i32
  }
  func.func @transform_1(%arg0: i32, %arg1: i32) -> (i32, i32, i32) {
    %c1_i32 = arith.constant 1 : i32
    %0 = arith.subi %c1_i32, %arg0 : i32
    %c2_i32 = arith.constant 2 : i32
    %1 = arith.muli %0, %c2_i32 : i32
    %2 = arith.addi %1, %arg1 : i32
    %c0_i32 = arith.constant 0 : i32
    %c0_i32_0 = arith.constant 0 : i32
    %c0_i32_1 = arith.constant 0 : i32
    return %2, %c0_i32, %c0_i32_0 : i32, i32, i32
  }
  func.func @transform_2(%arg0: i32, %arg1: i32) -> (i32, i32) {
    %c0_i32 = arith.constant 0 : i32
    %c0_i32_0 = arith.constant 0 : i32
    %c0_i32_1 = arith.constant 0 : i32
    return %c0_i32, %c0_i32_0 : i32, i32
  }
  func.func @transform_3(%arg0: i32, %arg1: i32) -> (i32, i32) {
    %c0_i32 = arith.constant 0 : i32
    %c0_i32_0 = arith.constant 0 : i32
    %c0_i32_1 = arith.constant 0 : i32
    return %c0_i32, %c0_i32_0 : i32, i32
  }
  func.func @transform_4(%arg0: i32, %arg1: i32) -> (i32, i32, i32) {
    %c0_i32 = arith.constant 0 : i32
    %c0_i32_0 = arith.constant 0 : i32
    %c0_i32_1 = arith.constant 0 : i32
    return %arg0, %c0_i32, %c0_i32_0 : i32, i32, i32
  }
  func.func @transform_5(%arg0: i32, %arg1: i32) -> (i32, i32, i32) {
    %c0_i32 = arith.constant 0 : i32
    %c0_i32_0 = arith.constant 0 : i32
    %c0_i32_1 = arith.constant 0 : i32
    return %arg0, %c0_i32, %c0_i32_0 : i32, i32, i32
  }
  func.func @transform_6(%arg0: i32, %arg1: i32) -> (i32, i32, i32) {
    %c0_i32 = arith.constant 0 : i32
    %c0_i32_0 = arith.constant 0 : i32
    %c0_i32_1 = arith.constant 0 : i32
    return %arg0, %c0_i32, %c0_i32_0 : i32, i32, i32
  }
  func.func @transform_7(%arg0: i32, %arg1: i32) -> (i32, i32, i32) {
    %c0_i32 = arith.constant 0 : i32
    %c0_i32_0 = arith.constant 0 : i32
    %c0_i32_1 = arith.constant 0 : i32
    return %arg0, %c0_i32, %c0_i32_0 : i32, i32, i32
  }
  func.func @transform_8(%arg0: i32, %arg1: i32) -> (i32, i32, i32) {
    %c0_i32 = arith.constant 0 : i32
    %c0_i32_0 = arith.constant 0 : i32
    %c0_i32_1 = arith.constant 0 : i32
    return %arg0, %c0_i32, %c0_i32_0 : i32, i32, i32
  }
  func.func @transform_9(%arg0: i32, %arg1: i32) -> (i32, i32, i32) {
    %c0_i32 = arith.constant 0 : i32
    %c0_i32_0 = arith.constant 0 : i32
    %c0_i32_1 = arith.constant 0 : i32
    return %arg0, %c0_i32, %c0_i32_0 : i32, i32, i32
  }
  func.func @transform_10(%arg0: i32, %arg1: i32) -> (i32, i32, i32) {
    %c0_i32 = arith.constant 0 : i32
    %c0_i32_0 = arith.constant 0 : i32
    %c0_i32_1 = arith.constant 0 : i32
    return %arg0, %c0_i32, %c0_i32_0 : i32, i32, i32
  }
  func.func @transform_11(%arg0: i32, %arg1: i32) -> (i32, i32, i32) {
    %c0_i32 = arith.constant 0 : i32
    %c0_i32_0 = arith.constant 0 : i32
    %c0_i32_1 = arith.constant 0 : i32
    return %arg0, %c0_i32, %c0_i32_0 : i32, i32, i32
  }
  func.func @transform_12(%arg0: i32, %arg1: i32) -> (i32, i32, i32) {
    %c0_i32 = arith.constant 0 : i32
    %c0_i32_0 = arith.constant 0 : i32
    %c0_i32_1 = arith.constant 0 : i32
    return %arg0, %c0_i32, %c0_i32_0 : i32, i32, i32
  }
  func.func @transform_13(%arg0: i32, %arg1: i32) -> (i32, i32, i32) {
    %c0_i32 = arith.constant 0 : i32
    %c0_i32_0 = arith.constant 0 : i32
    %c0_i32_1 = arith.constant 0 : i32
    return %arg0, %c0_i32, %c0_i32_0 : i32, i32, i32
  }
  func.func @transform_14(%arg0: i32, %arg1: i32) -> (i32, i32, i32) {
    %c0_i32 = arith.constant 0 : i32
    %c0_i32_0 = arith.constant 0 : i32
    %c0_i32_1 = arith.constant 0 : i32
    return %arg0, %c0_i32, %c0_i32_0 : i32, i32, i32
  }
  func.func @transform_15(%arg0: i32, %arg1: i32) -> (i32, i32, i32) {
    %c0_i32 = arith.constant 0 : i32
    %c0_i32_0 = arith.constant 0 : i32
    %c0_i32_1 = arith.constant 0 : i32
    return %arg0, %c0_i32, %c0_i32_0 : i32, i32, i32
  }
  func.func @transform_16(%arg0: i32, %arg1: i32) -> (i32, i32, i32) {
    %c2_i32 = arith.constant 2 : i32
    %0 = arith.muli %arg0, %c2_i32 : i32
    %1 = arith.addi %0, %arg1 : i32
    %c0_i32 = arith.constant 0 : i32
    %c0_i32_0 = arith.constant 0 : i32
    %c0_i32_1 = arith.constant 0 : i32
    return %1, %c0_i32, %c0_i32_0 : i32, i32, i32
  }
  func.func @transform_17(%arg0: i32, %arg1: i32) -> (i32, i32, i32) {
    %c2_i32 = arith.constant 2 : i32
    %0 = arith.muli %arg0, %c2_i32 : i32
    %1 = arith.addi %0, %arg1 : i32
    %c0_i32 = arith.constant 0 : i32
    %c0_i32_0 = arith.constant 0 : i32
    %c0_i32_1 = arith.constant 0 : i32
    return %1, %c0_i32, %c0_i32_0 : i32, i32, i32
  }
}

module attributes {stable_mosaic.version = 11 : i64} {
  func.func @_mask_kernel(%arg0: i32, %arg1: i32, %arg2: memref<1x32x128xf32, #tpu.memory_space<vmem>>, %arg3: memref<1x32x128xf32, #tpu.memory_space<vmem>>, %arg4: memref<1x1x128xf32, #tpu.memory_space<vmem>>, %arg5: memref<1x1024x128xbf16, #tpu.memory_space<vmem>>, %arg6: memref<1x1024x1xf32, #tpu.memory_space<vmem>>, %arg7: memref<1x512x1024xbf16, #tpu.memory_space<vmem>>, %arg8: memref<1x512x1xf32, #tpu.memory_space<vmem>>, %arg9: memref<1x128x512xbf16, #tpu.memory_space<vmem>>, %arg10: memref<1x128x1xf32, #tpu.memory_space<vmem>>, %arg11: memref<1x128x128xbf16, #tpu.memory_space<vmem>>, %arg12: memref<1x128x1xf32, #tpu.memory_space<vmem>>, %arg13: memref<1x2x128xbf16, #tpu.memory_space<vmem>>, %arg14: memref<1x2x1xf32, #tpu.memory_space<vmem>>, %arg15: memref<1x2x128xf32, #tpu.memory_space<vmem>>, %arg16: memref<1x1x128xf32, #tpu.memory_space<vmem>>) attributes {dimension_semantics = [#tpu.dimension_semantics<parallel>, #tpu.dimension_semantics<parallel>], iteration_bounds = array<i64: 2, 2>, scalar_prefetch = 0 : i64, scratch_operands = 0 : i64, tpu.core_type = #tpu.core_type<tc>, window_params = [{transform_indices = @transform_0, window_bounds = array<i64: 1, 32, 128>}, {transform_indices = @transform_1, window_bounds = array<i64: 1, 32, 128>}, {transform_indices = @transform_2, window_bounds = array<i64: 1, 1, 128>}, {transform_indices = @transform_3, window_bounds = array<i64: 1, 1024, 128>}, {transform_indices = @transform_4, window_bounds = array<i64: 1, 1024, 1>}, {transform_indices = @transform_5, window_bounds = array<i64: 1, 512, 1024>}, {transform_indices = @transform_6, window_bounds = array<i64: 1, 512, 1>}, {transform_indices = @transform_7, window_bounds = array<i64: 1, 128, 512>}, {transform_indices = @transform_8, window_bounds = array<i64: 1, 128, 1>}, {transform_indices = @transform_9, window_bounds = array<i64: 1, 128, 128>}, {transform_indices = @transform_10, window_bounds = array<i64: 1, 128, 1>}, {transform_indices = @transform_11, window_bounds = array<i64: 1, 2, 128>}, {transform_indices = @transform_12, window_bounds = array<i64: 1, 2, 1>}, {transform_indices = @transform_13, window_bounds = array<i64: 1, 2, 128>}, {transform_indices = @transform_14, window_bounds = array<i64: 1, 1, 128>}]} {
    %c0 = arith.constant 0 : index
    %c0_0 = arith.constant 0 : index
    %c0_1 = arith.constant 0 : index
    %0 = vector.load %arg2[%c0, %c0_0, %c0_1] : memref<1x32x128xf32, #tpu.memory_space<vmem>>, vector<1x32x128xf32>
    %1 = vector.shape_cast %0 : vector<1x32x128xf32> to vector<32x128xf32>
    %c0_2 = arith.constant 0 : index
    %c0_3 = arith.constant 0 : index
    %c0_4 = arith.constant 0 : index
    %2 = vector.load %arg3[%c0_2, %c0_3, %c0_4] : memref<1x32x128xf32, #tpu.memory_space<vmem>>, vector<1x32x128xf32>
    %3 = vector.shape_cast %2 : vector<1x32x128xf32> to vector<32x128xf32>
    %c0_5 = arith.constant 0 : index
    %c0_6 = arith.constant 0 : index
    %c0_7 = arith.constant 0 : index
    %4 = vector.load %arg4[%c0_5, %c0_6, %c0_7] : memref<1x1x128xf32, #tpu.memory_space<vmem>>, vector<1x1x128xf32>
    %5 = vector.shape_cast %4 : vector<1x1x128xf32> to vector<1x128xf32>
    %6 = arith.mulf %1, %1 : vector<32x128xf32>
    %cst = arith.constant dense<0.000000e+00> : vector<128xf32>
    %7 = vector.multi_reduction <add>, %6, %cst [0] : vector<32x128xf32> to vector<128xf32>
    %8 = vector.shape_cast %7 : vector<128xf32> to vector<1x128xf32>
    %cst_8 = arith.constant 1.000000e-24 : f32
    %9 = vector.broadcast %cst_8 : f32 to vector<1x128xf32>
    %10 = arith.maximumf %8, %9 : vector<1x128xf32>
    %11 = math.rsqrt %10 : vector<1x128xf32>
    %12 = vector.broadcast %11 : vector<1x128xf32> to vector<32x128xf32>
    %13 = arith.mulf %1, %12 : vector<32x128xf32>
    %14 = arith.mulf %3, %3 : vector<32x128xf32>
    %cst_9 = arith.constant dense<0.000000e+00> : vector<128xf32>
    %15 = vector.multi_reduction <add>, %14, %cst_9 [0] : vector<32x128xf32> to vector<128xf32>
    %16 = vector.shape_cast %15 : vector<128xf32> to vector<1x128xf32>
    %cst_10 = arith.constant 1.000000e-24 : f32
    %17 = vector.broadcast %cst_10 : f32 to vector<1x128xf32>
    %18 = arith.maximumf %16, %17 : vector<1x128xf32>
    %19 = math.rsqrt %18 : vector<1x128xf32>
    %20 = vector.broadcast %19 : vector<1x128xf32> to vector<32x128xf32>
    %21 = arith.mulf %3, %20 : vector<32x128xf32>
    %22 = arith.truncf %21 : vector<32x128xf32> to vector<32x128xbf16>
    %23 = arith.truncf %13 : vector<32x128xf32> to vector<32x128xbf16>
    %cst_11 = arith.constant dense<0.000000e+00> : vector<128x128xf32>
    %24 = tpu.matmul %22, %23, %cst_11 {dimension_numbers = #tpu.dot_dimension_numbers<[0], [0], [1], [1], [0, 1, 1, 1], [], []>} : vector<32x128xbf16>, vector<32x128xbf16>, vector<128x128xf32> -> vector<128x128xf32>
    %cst_12 = arith.constant dense<0xFF800000> : vector<1xf32>
    %25 = vector.multi_reduction <maximumf>, %5, %cst_12 [1] : vector<1x128xf32> to vector<1xf32>
    %26 = vector.shape_cast %25 : vector<1xf32> to vector<1x1xf32>
    %27 = vector.broadcast %26 : vector<1x1xf32> to vector<1x128xf32>
    %28 = arith.subf %5, %27 : vector<1x128xf32>
    %29 = math.exp %28 : vector<1x128xf32>
    %cst_13 = arith.constant dense<0.000000e+00> : vector<1xf32>
    %30 = vector.multi_reduction <add>, %29, %cst_13 [1] : vector<1x128xf32> to vector<1xf32>
    %31 = vector.shape_cast %30 : vector<1xf32> to vector<1x1xf32>
    %32 = tpu.reciprocal %31 {approx = true} : vector<1x1xf32> -> vector<1x1xf32>
    %33 = vector.broadcast %32 : vector<1x1xf32> to vector<1x128xf32>
    %34 = arith.mulf %29, %33 : vector<1x128xf32>
    %c0_14 = arith.constant 0 : index
    %c0_15 = arith.constant 0 : index
    %c0_16 = arith.constant 0 : index
    %35 = vector.load %arg5[%c0_14, %c0_15, %c0_16] : memref<1x1024x128xbf16, #tpu.memory_space<vmem>>, vector<1x1024x128xbf16>
    %36 = vector.shape_cast %35 : vector<1x1024x128xbf16> to vector<1024x128xbf16>
    %37 = arith.extf %36 : vector<1024x128xbf16> to vector<1024x128xf32>
    %38 = vector.broadcast %34 : vector<1x128xf32> to vector<1024x128xf32>
    %39 = arith.mulf %37, %38 : vector<1024x128xf32>
    %40 = arith.truncf %39 : vector<1024x128xf32> to vector<1024x128xbf16>
    %41 = arith.truncf %24 : vector<128x128xf32> to vector<128x128xbf16>
    %cst_17 = arith.constant dense<0.000000e+00> : vector<1024x128xf32>
    %42 = tpu.matmul %40, %41, %cst_17 {dimension_numbers = #tpu.dot_dimension_numbers<[1], [0], [0], [1], [0, 0, 1, 1], [], []>} : vector<1024x128xbf16>, vector<128x128xbf16>, vector<1024x128xf32> -> vector<1024x128xf32>
    %c0_18 = arith.constant 0 : index
    %c0_19 = arith.constant 0 : index
    %c0_20 = arith.constant 0 : index
    %43 = vector.load %arg6[%c0_18, %c0_19, %c0_20] : memref<1x1024x1xf32, #tpu.memory_space<vmem>>, vector<1x1024x1xf32>
    %44 = vector.shape_cast %43 : vector<1x1024x1xf32> to vector<1024x1xf32>
    %45 = vector.broadcast %44 : vector<1024x1xf32> to vector<1024x128xf32>
    %46 = arith.addf %42, %45 : vector<1024x128xf32>
    %cst_21 = arith.constant 0.00999999977 : f32
    %47 = vector.broadcast %cst_21 : f32 to vector<1024x128xf32>
    %48 = arith.mulf %47, %46 : vector<1024x128xf32>
    %49 = arith.maximumf %46, %48 : vector<1024x128xf32>
    %c0_22 = arith.constant 0 : index
    %c0_23 = arith.constant 0 : index
    %c0_24 = arith.constant 0 : index
    %50 = vector.load %arg7[%c0_22, %c0_23, %c0_24] : memref<1x512x1024xbf16, #tpu.memory_space<vmem>>, vector<1x512x1024xbf16>
    %51 = vector.shape_cast %50 : vector<1x512x1024xbf16> to vector<512x1024xbf16>
    %52 = arith.truncf %49 : vector<1024x128xf32> to vector<1024x128xbf16>
    %cst_25 = arith.constant dense<0.000000e+00> : vector<512x128xf32>
    %53 = tpu.matmul %51, %52, %cst_25 {dimension_numbers = #tpu.dot_dimension_numbers<[1], [0], [0], [1], [0, 0, 1, 1], [], []>} : vector<512x1024xbf16>, vector<1024x128xbf16>, vector<512x128xf32> -> vector<512x128xf32>
    %c0_26 = arith.constant 0 : index
    %c0_27 = arith.constant 0 : index
    %c0_28 = arith.constant 0 : index
    %54 = vector.load %arg8[%c0_26, %c0_27, %c0_28] : memref<1x512x1xf32, #tpu.memory_space<vmem>>, vector<1x512x1xf32>
    %55 = vector.shape_cast %54 : vector<1x512x1xf32> to vector<512x1xf32>
    %56 = vector.broadcast %55 : vector<512x1xf32> to vector<512x128xf32>
    %57 = arith.addf %53, %56 : vector<512x128xf32>
    %cst_29 = arith.constant 0.00999999977 : f32
    %58 = vector.broadcast %cst_29 : f32 to vector<512x128xf32>
    %59 = arith.mulf %58, %57 : vector<512x128xf32>
    %60 = arith.maximumf %57, %59 : vector<512x128xf32>
    %c0_30 = arith.constant 0 : index
    %c0_31 = arith.constant 0 : index
    %c0_32 = arith.constant 0 : index
    %61 = vector.load %arg9[%c0_30, %c0_31, %c0_32] : memref<1x128x512xbf16, #tpu.memory_space<vmem>>, vector<1x128x512xbf16>
    %62 = vector.shape_cast %61 : vector<1x128x512xbf16> to vector<128x512xbf16>
    %63 = arith.truncf %60 : vector<512x128xf32> to vector<512x128xbf16>
    %cst_33 = arith.constant dense<0.000000e+00> : vector<128x128xf32>
    %64 = tpu.matmul %62, %63, %cst_33 {dimension_numbers = #tpu.dot_dimension_numbers<[1], [0], [0], [1], [0, 0, 1, 1], [], []>} : vector<128x512xbf16>, vector<512x128xbf16>, vector<128x128xf32> -> vector<128x128xf32>
    %c0_34 = arith.constant 0 : index
    %c0_35 = arith.constant 0 : index
    %c0_36 = arith.constant 0 : index
    %65 = vector.load %arg10[%c0_34, %c0_35, %c0_36] : memref<1x128x1xf32, #tpu.memory_space<vmem>>, vector<1x128x1xf32>
    %66 = vector.shape_cast %65 : vector<1x128x1xf32> to vector<128x1xf32>
    %67 = vector.broadcast %66 : vector<128x1xf32> to vector<128x128xf32>
    %68 = arith.addf %64, %67 : vector<128x128xf32>
    %cst_37 = arith.constant 0.00999999977 : f32
    %69 = vector.broadcast %cst_37 : f32 to vector<128x128xf32>
    %70 = arith.mulf %69, %68 : vector<128x128xf32>
    %71 = arith.maximumf %68, %70 : vector<128x128xf32>
    %c0_38 = arith.constant 0 : index
    %c0_39 = arith.constant 0 : index
    %c0_40 = arith.constant 0 : index
    %72 = vector.load %arg11[%c0_38, %c0_39, %c0_40] : memref<1x128x128xbf16, #tpu.memory_space<vmem>>, vector<1x128x128xbf16>
    %73 = vector.shape_cast %72 : vector<1x128x128xbf16> to vector<128x128xbf16>
    %74 = arith.truncf %71 : vector<128x128xf32> to vector<128x128xbf16>
    %cst_41 = arith.constant dense<0.000000e+00> : vector<128x128xf32>
    %75 = tpu.matmul %73, %74, %cst_41 {dimension_numbers = #tpu.dot_dimension_numbers<[1], [0], [0], [1], [0, 0, 1, 1], [], []>} : vector<128x128xbf16>, vector<128x128xbf16>, vector<128x128xf32> -> vector<128x128xf32>
    %c0_42 = arith.constant 0 : index
    %c0_43 = arith.constant 0 : index
    %c0_44 = arith.constant 0 : index
    %76 = vector.load %arg12[%c0_42, %c0_43, %c0_44] : memref<1x128x1xf32, #tpu.memory_space<vmem>>, vector<1x128x1xf32>
    %77 = vector.shape_cast %76 : vector<1x128x1xf32> to vector<128x1xf32>
    %78 = vector.broadcast %77 : vector<128x1xf32> to vector<128x128xf32>
    %79 = arith.addf %75, %78 : vector<128x128xf32>
    %cst_45 = arith.constant 0.00999999977 : f32
    %80 = vector.broadcast %cst_45 : f32 to vector<128x128xf32>
    %81 = arith.mulf %80, %79 : vector<128x128xf32>
    %82 = arith.maximumf %79, %81 : vector<128x128xf32>
    %c0_46 = arith.constant 0 : index
    %c0_47 = arith.constant 0 : index
    %c0_48 = arith.constant 0 : index
    %83 = vector.load %arg13[%c0_46, %c0_47, %c0_48] : memref<1x2x128xbf16, #tpu.memory_space<vmem>>, vector<1x2x128xbf16>
    %84 = vector.shape_cast %83 : vector<1x2x128xbf16> to vector<2x128xbf16>
    %85 = arith.truncf %82 : vector<128x128xf32> to vector<128x128xbf16>
    %cst_49 = arith.constant dense<0.000000e+00> : vector<2x128xf32>
    %86 = tpu.matmul %84, %85, %cst_49 {dimension_numbers = #tpu.dot_dimension_numbers<[1], [0], [0], [1], [0, 0, 1, 1], [], []>} : vector<2x128xbf16>, vector<128x128xbf16>, vector<2x128xf32> -> vector<2x128xf32>
    %c0_50 = arith.constant 0 : index
    %c0_51 = arith.constant 0 : index
    %c0_52 = arith.constant 0 : index
    %87 = vector.load %arg14[%c0_50, %c0_51, %c0_52] : memref<1x2x1xf32, #tpu.memory_space<vmem>>, vector<1x2x1xf32>
    %88 = vector.shape_cast %87 : vector<1x2x1xf32> to vector<2x1xf32>
    %89 = vector.broadcast %88 : vector<2x1xf32> to vector<2x128xf32>
    %90 = arith.addf %86, %89 : vector<2x128xf32>
    %c0_53 = arith.constant 0 : index
    %c0_54 = arith.constant 0 : index
    %c0_55 = arith.constant 0 : index
    %91 = vector.load %arg15[%c0_53, %c0_54, %c0_55] : memref<1x2x128xf32, #tpu.memory_space<vmem>>, vector<1x2x128xf32>
    %92 = vector.shape_cast %91 : vector<1x2x128xf32> to vector<2x128xf32>
    %93 = vector.shape_cast %90 : vector<2x128xf32> to vector<1x2x128xf32>
    tpu.vector_store %arg15[%c0_53, %c0_54, %c0_55], %93 {strides = array<i32>} : memref<1x2x128xf32, #tpu.memory_space<vmem>>, vector<1x2x128xf32>,
    %94 = vector.extract_strided_slice %90 {offsets = [1, 0], sizes = [1, 128], strides = [1, 1]} : vector<2x128xf32> to vector<1x128xf32>
    %95 = vector.extract_strided_slice %90 {offsets = [0, 0], sizes = [1, 128], strides = [1, 1]} : vector<2x128xf32> to vector<1x128xf32>
    %96 = arith.subf %94, %95 : vector<1x128xf32>
    %97 = arith.negf %96 : vector<1x128xf32>
    %98 = math.exp %97 : vector<1x128xf32>
    %cst_56 = arith.constant 1.000000e+00 : f32
    %99 = vector.broadcast %cst_56 : f32 to vector<1x128xf32>
    %100 = arith.addf %99, %98 : vector<1x128xf32>
    %101 = arith.divf %99, %100 : vector<1x128xf32>
    %c0_57 = arith.constant 0 : index
    %c0_58 = arith.constant 0 : index
    %c0_59 = arith.constant 0 : index
    %102 = vector.load %arg16[%c0_57, %c0_58, %c0_59] : memref<1x1x128xf32, #tpu.memory_space<vmem>>, vector<1x1x128xf32>
    %103 = vector.shape_cast %102 : vector<1x1x128xf32> to vector<1x128xf32>
    %104 = vector.shape_cast %101 : vector<1x128xf32> to vector<1x1x128xf32>
    tpu.vector_store %arg16[%c0_57, %c0_58, %c0_59], %104 {strides = array<i32>} : memref<1x1x128xf32, #tpu.memory_space<vmem>>, vector<1x1x128xf32>,
    return
  }
  func.func @transform_0(%arg0: i32, %arg1: i32) -> (i32, i32, i32) {
    %c2_i32 = arith.constant 2 : i32
    %0 = arith.muli %arg0, %c2_i32 : i32
    %1 = arith.addi %0, %arg1 : i32
    %c0_i32 = arith.constant 0 : i32
    %c0_i32_0 = arith.constant 0 : i32
    %c0_i32_1 = arith.constant 0 : i32
    return %1, %c0_i32, %c0_i32_0 : i32, i32, i32
  }
  func.func @transform_1(%arg0: i32, %arg1: i32) -> (i32, i32, i32) {
    %c1_i32 = arith.constant 1 : i32
    %0 = arith.subi %c1_i32, %arg0 : i32
    %c2_i32 = arith.constant 2 : i32
    %1 = arith.muli %0, %c2_i32 : i32
    %2 = arith.addi %1, %arg1 : i32
    %c0_i32 = arith.constant 0 : i32
    %c0_i32_0 = arith.constant 0 : i32
    %c0_i32_1 = arith.constant 0 : i32
    return %2, %c0_i32, %c0_i32_0 : i32, i32, i32
  }
  func.func @transform_2(%arg0: i32, %arg1: i32) -> (i32, i32, i32) {
    %c1_i32 = arith.constant 1 : i32
    %0 = arith.subi %c1_i32, %arg0 : i32
    %c2_i32 = arith.constant 2 : i32
    %1 = arith.muli %0, %c2_i32 : i32
    %2 = arith.addi %1, %arg1 : i32
    %c0_i32 = arith.constant 0 : i32
    %c0_i32_0 = arith.constant 0 : i32
    %c0_i32_1 = arith.constant 0 : i32
    return %2, %c0_i32, %c0_i32_0 : i32, i32, i32
  }
  func.func @transform_3(%arg0: i32, %arg1: i32) -> (i32, i32, i32) {
    %c0_i32 = arith.constant 0 : i32
    %c0_i32_0 = arith.constant 0 : i32
    %c0_i32_1 = arith.constant 0 : i32
    return %arg0, %c0_i32, %c0_i32_0 : i32, i32, i32
  }
  func.func @transform_4(%arg0: i32, %arg1: i32) -> (i32, i32, i32) {
    %c0_i32 = arith.constant 0 : i32
    %c0_i32_0 = arith.constant 0 : i32
    %c0_i32_1 = arith.constant 0 : i32
    return %arg0, %c0_i32, %c0_i32_0 : i32, i32, i32
  }
  func.func @transform_5(%arg0: i32, %arg1: i32) -> (i32, i32, i32) {
    %c0_i32 = arith.constant 0 : i32
    %c0_i32_0 = arith.constant 0 : i32
    %c0_i32_1 = arith.constant 0 : i32
    return %arg0, %c0_i32, %c0_i32_0 : i32, i32, i32
  }
  func.func @transform_6(%arg0: i32, %arg1: i32) -> (i32, i32, i32) {
    %c0_i32 = arith.constant 0 : i32
    %c0_i32_0 = arith.constant 0 : i32
    %c0_i32_1 = arith.constant 0 : i32
    return %arg0, %c0_i32, %c0_i32_0 : i32, i32, i32
  }
  func.func @transform_7(%arg0: i32, %arg1: i32) -> (i32, i32, i32) {
    %c0_i32 = arith.constant 0 : i32
    %c0_i32_0 = arith.constant 0 : i32
    %c0_i32_1 = arith.constant 0 : i32
    return %arg0, %c0_i32, %c0_i32_0 : i32, i32, i32
  }
  func.func @transform_8(%arg0: i32, %arg1: i32) -> (i32, i32, i32) {
    %c0_i32 = arith.constant 0 : i32
    %c0_i32_0 = arith.constant 0 : i32
    %c0_i32_1 = arith.constant 0 : i32
    return %arg0, %c0_i32, %c0_i32_0 : i32, i32, i32
  }
  func.func @transform_9(%arg0: i32, %arg1: i32) -> (i32, i32, i32) {
    %c0_i32 = arith.constant 0 : i32
    %c0_i32_0 = arith.constant 0 : i32
    %c0_i32_1 = arith.constant 0 : i32
    return %arg0, %c0_i32, %c0_i32_0 : i32, i32, i32
  }
  func.func @transform_10(%arg0: i32, %arg1: i32) -> (i32, i32, i32) {
    %c0_i32 = arith.constant 0 : i32
    %c0_i32_0 = arith.constant 0 : i32
    %c0_i32_1 = arith.constant 0 : i32
    return %arg0, %c0_i32, %c0_i32_0 : i32, i32, i32
  }
  func.func @transform_11(%arg0: i32, %arg1: i32) -> (i32, i32, i32) {
    %c0_i32 = arith.constant 0 : i32
    %c0_i32_0 = arith.constant 0 : i32
    %c0_i32_1 = arith.constant 0 : i32
    return %arg0, %c0_i32, %c0_i32_0 : i32, i32, i32
  }
  func.func @transform_12(%arg0: i32, %arg1: i32) -> (i32, i32, i32) {
    %c0_i32 = arith.constant 0 : i32
    %c0_i32_0 = arith.constant 0 : i32
    %c0_i32_1 = arith.constant 0 : i32
    return %arg0, %c0_i32, %c0_i32_0 : i32, i32, i32
  }
  func.func @transform_13(%arg0: i32, %arg1: i32) -> (i32, i32, i32) {
    %c2_i32 = arith.constant 2 : i32
    %0 = arith.muli %arg0, %c2_i32 : i32
    %1 = arith.addi %0, %arg1 : i32
    %c0_i32 = arith.constant 0 : i32
    %c0_i32_0 = arith.constant 0 : i32
    %c0_i32_1 = arith.constant 0 : i32
    return %1, %c0_i32, %c0_i32_0 : i32, i32, i32
  }
  func.func @transform_14(%arg0: i32, %arg1: i32) -> (i32, i32, i32) {
    %c2_i32 = arith.constant 2 : i32
    %0 = arith.muli %arg0, %c2_i32 : i32
    %1 = arith.addi %0, %arg1 : i32
    %c0_i32 = arith.constant 0 : i32
    %c0_i32_0 = arith.constant 0 : i32
    %c0_i32_1 = arith.constant 0 : i32
    return %1, %c0_i32, %c0_i32_0 : i32, i32, i32
  }
}

</mosaic_0001>

<bundles_post_ra>
// kernel: overlapnet_forward.2
= control target key start
LH: loop header
LB: loop body
LE: loop exit
PB: predicated region body
PF: predicated region fallthrough
CT: control target
= control target key end

     0   :  { %s6524_s0 = inlined_call_operand.vmem [shape: f32[4,3,128], index: 0, kind: input, shape index: {}, may-alias: {0,1}]   ;;  %s6525_s1 = inlined_call_operand.vmem [shape: f32[4,3,128], index: 1, kind: input, shape index: {}, may-alias: {0,1}]   ;;  %s6526_s2 = inlined_call_operand.vmem [shape: bf16[16,3], index: 2, kind: input, shape index: {}]   ;;  %s6527_s3 = inlined_call_operand.vmem [shape: f32[16,1], index: 3, kind: input, shape index: {}]   ;;  %s6528_s4 = inlined_call_operand.hbm [shape: bf16[2,32,64], index: 4, kind: input, shape index: {}]   ;;  %s6529_s5 = inlined_call_operand.vmem [shape: f32[2,32,1], index: 5, kind: input, shape index: {}]   ;;  %s6530_s6 = inlined_call_operand.hbm [shape: bf16[2,32,32], index: 6, kind: input, shape index: {}]   ;;  %s6531_s7 = inlined_call_operand.vmem [shape: f32[2,32,1], index: 7, kind: input, shape index: {}]   ;;  %s6532_s8 = inlined_call_operand.vmem [shape: bf16[2,512,32], index: 8, kind: input, shape index: {}]   ;;  %s6533_s9 = inlined_call_operand.vmem [shape: f32[2,512,1], index: 9, kind: input, shape index: {}]   ;;  %s6534_s10 = inlined_call_operand.hbm [shape: bf16[2,128,512], index: 10, kind: input, shape index: {}]   ;;  %s6535_s11 = inlined_call_operand.vmem [shape: f32[2,128,1], index: 11, kind: input, shape index: {}]   ;;  %s6536_s12 = inlined_call_operand.hbm [shape: bf16[2,128,128], index: 12, kind: input, shape index: {}]   ;;  %s6537_s13 = inlined_call_operand.vmem [shape: f32[2,128,1], index: 13, kind: input, shape index: {}]   ;;  %s6538_s14 = inlined_call_operand.vmem [shape: bf16[2,128,1], index: 14, kind: input, shape index: {}]   ;;  %s6539_s15 = inlined_call_operand.vmem [shape: f32[2,1,1], index: 15, kind: input, shape index: {}]   ;;  %s6540_s16 = inlined_call_operand.vmem [shape: f32[4,32,128], index: 16, kind: output, shape index: {0}]   ;;  %s6541_s17 = inlined_call_operand.vmem [shape: f32[4,1,128], index: 17, kind: output, shape index: {1}]  }
   0x1   :  { %6553 = sst [smem:[#allocation17_spill]] %s6524_s0 }
   0x2   :  { %6554 = sst [smem:[#allocation18_spill]] %s6525_s1 }
   0x3   :  { %6555 = sst [smem:[#allocation19_spill]] %s6528_s4 }
   0x4   :  { %6556 = sst [smem:[#allocation20_spill]] %s6530_s6 }
   0x5   :  { %6557 = sst [smem:[#allocation21_spill]] %s6531_s7 }
   0x6   :  { %6558 = sst [smem:[#allocation22_spill]] %s6533_s9 }
   0x7   :  { %6559 = sst [smem:[#allocation23_spill]] %s6534_s10 }
   0x8   :  { %6560 = sst [smem:[#allocation24_spill]] %s6535_s11 }
   0x9   :  { %6561 = sst [smem:[#allocation25_spill]] %s6537_s13 }
   0xa   :  { %6562 = sst [smem:[#allocation26_spill]] %s6538_s14 }
   0xb   :  { %6563 = sst [smem:[#allocation27_spill]] %s6539_s15 }
   0xc   :  { %6564 = sst [smem:[#allocation28_spill]] %s6540_s16 }
   0xd   :  { %6565 = sst [smem:[#allocation29_spill]] %s6541_s17 }
   0xe   :  { %23 = vsyncpa [#allocation3], 0 }
   0xf   :  { %25 = vsyncpa [#allocation3 + $0x1], 0 }
  0x10   :  { %26 = vsyncpa [#allocation5], 0 }
  0x11   :  { %28 = vsyncpa [#allocation5 + $0x1], 0 }
  0x12   :  { %29 = vsyncpa [#allocation8], 0 }
  0x13   :  { %31 = vsyncpa [#allocation8 + $0x1], 0  ;;  %s5483_s24 = smov 0   ;;  %s5485_s25 = smov 0  }
  0x14   :  { %s5487_s26 = smov 0   ;;  %s5489_s27 = smov 0  }
  0x15   :  { %s5491_s28 = smov 0   ;;  %s5493_s29 = smov 0  }
  0x16   :  { %s5495_s0 = smov 0   ;;  %s5497_s30 = smov 0  }
  0x17 LB: > { %6566 = sst [smem:[#allocation12_spill]] %s5356_s26  ;;  %s6542_s18 = sadd.s32 4294967295, %s5376_s30   ;;  %s5376_s30 = sphi %s5497_s30, %s37_s30   ;;  %s5372_s0 = sphi %s5495_s0, %s6604_s0   ;;  %s5368_s29 = sphi %s5493_s29, %s6599_s29   ;;  %s5364_s28 = sphi %s5491_s28, %s6603_s28   ;;  %s5360_s27 = sphi %s5489_s27, %s6598_s27   ;;  %s5356_s26 = sphi %s5487_s26, %s6597_s26   ;;  %s5352_s25 = sphi %s5485_s25, %s6602_s25   ;;  %s5348_s24 = sphi %s5483_s24, %s6601_s24  }
  0x18   : > { %6567 = sst [smem:[#allocation13_spill]] %s5368_s29  ;;  %s46_s19 = sadd.s32 1, %s5368_s29 }
  0x19   : > { %p47_p0 = scmp.ge.s32.totalorder %s46_s19, 2  ;;  %s49_s1 = sadd.s32 1, %s5372_s0 }
  0x1a   : > { %s160_s20 = sadd.s32 1, %s5356_s26  ;;  %p167_p1 = scmp.ne.s32.totalorder %s5356_s26, %s5352_s25 }
  0x1b   : > { %s6606_s19 = smov (%p47_p0, %s46_s19), 0  ;;  %s6608_s1 = smov (!%p47_p0, %s49_s1), %s5372_s0 }
  0x1c   : > { %6568 = sst [smem:[#allocation14_spill]] %s6606_s19  ;;  %p168_p2 = scmp.eq.s32.totalorder %s5376_s30, 0 }
  0x1d   : > { %p173_p3 = scmp.ne.s32.totalorder %s5352_s25, %s5348_s24  ;;  %p51_p4 = scmp.ge.s32.totalorder %s6608_s1, 2 }
  0x1e   : > { %p174_p5 = scmp.eq.s32.totalorder %s6542_s18, 0  ;;  %p169_p6 = por %p168_p2, %p167_p1 }
  0x1f   : > { %s6610_s1 = smov (%p51_p4, %s6608_s1), 0  ;;  %p4891_p8 = scmp.lt.s32.totalorder %s5376_s30, 4 }
  0x20   : > { %6569 = sst [smem:[#allocation15_spill]] %s6610_s1  ;;  %p5536_p7 = por %p174_p5, %p173_p3 }
  0x21   : > { %s157_s22 = ssub.s32 %s5372_s0, %s6610_s1  ;;  %s5544_s23 = sand.u32 1, %s5356_s26  }
  0x22   : > { %s6570_s21 = scalar_select %p5536_p7, 1, 0 }
  0x23   : > { %p158_p9 = scmp.eq.s32.totalorder %s157_s22, 0  ;;  %s6545_s24 = sshll.u32 %s5544_s23, 4 }
  0x24   : > { %s6546_s19 = sshll.u32 %s5372_s0, 8  ;;  %p5548_p10 = pnand %p4891_p8, %p169_p6 }
  0x25   : > { %s5553_s29 = scalar_select %p158_p9, %s5356_s26, %s160_s20  }
  0x26   : > { %s602_s17 = sand.u32 1, %s5376_s30   ;;  %s6573_s6 = sld [smem:[#allocation20_spill]] }
  0x27   : > { %6572 = sst [smem:[#allocation16_spill]] %s5553_s29  ;;  %s606_s22 = scalar_lea.vmem [#allocation4], %s6545_s24 }
  0x28   : > { %s613_s14 = sshll.u32 %s606_s22, 4  ;;  %s5568_s13 = scalar_lea.sflag [#allocation5], %s602_s17  ;;  %s5565_s14 = int_to_ptr.vmem [resolvable:$true] %s613_s14 }
  0x29   : > { %p5574_p13 = pneg %p5548_p10 }
  0x2c   : > { %s5561_s1 = scalar_lea.hbm %s6573_s6, %s6546_s19  ;;  %s5187_s22 = scalar_lea.hbm %s6573_s6, 512 }
  0x2d   : > { %s5182_s20 = scalar_lea.hbm %s5561_s1, 256  ;;  %p5188_p2 = scmp.lt.u32.totalorder %s5561_s1, %s6573_s6 }
  0x2e   : > { %p5183_p12 = scmp.ne.s32.totalorder %s5561_s1, %s5182_s20  ;;  %p5189_p3 = scmp.lt.u32.totalorder %s5187_s22, %s5182_s20 }
  0x2f   : > { %p5191_p5 = scmp.lt.u32.totalorder %s5182_s20, %s5561_s1 }
  0x30   : > { %p5185_p0 = pnand %p5574_p13, %p5183_p12  ;;  %p5190_p4 = por %p5189_p3, %p5188_p2 }
  0x32   : > { %p5186_p1 = pneg %p5185_p0  ;;  %p5192_p6 = por %p5191_p5, %p5190_p4 }
  0x34   : > { %p5193_p8 = pnand %p5192_p6, %p5186_p1 }
  0x36   : > { %5196 = shalt.err (!%p5193_p8)
}
  0x37   : > { %s5197_s17 = scalar_lea.vmem %s5565_s14, 256  ;;  %s5378_s15 = smov [#allocation4]  }
  0x38   : > { %p5198_p9 = scmp.ne.s32.totalorder %s5565_s14, %s5197_s17  ;;  %s5202_s16 = sshll.u32 %s5378_s15, 4  ;;  %s5203_s16 = int_to_ptr.vmem [resolvable:$false] %s5202_s16 }
  0x39   : > { %s5204_s19 = scalar_lea.vmem %s5203_s16, 512  ;;  %p5205_p11 = scmp.lt.s32.totalorder %s5565_s14, %s5203_s16 }
  0x3a   : > { %p5200_p12 = pnand %p5198_p9, %p5574_p13  ;;  %p5206_p7 = scmp.lt.s32.totalorder %s5204_s19, %s5197_s17 }
  0x3c   : > { %p5201_p0 = pneg %p5200_p12  ;;  %p5207_p2 = por %p5206_p7, %p5205_p11 }
  0x3e   : > { %p5208_p3 = pnand %p5207_p2, %p5201_p0 }
  0x40   : > { %5211 = shalt.err (!%p5208_p3)
}
  0x41   : > { %s6549_s24 = smov 64   ;;  %s6551_s20 = smov 4  }
  0x42   : > { %4884 = dma.hbm_to_vmem [thread:$0]  (!%p5548_p10), %s5561_s1, 256, %s5565_s14, %s5568_s13, %s6549_s24, %s6549_s24, %s6551_s20  }
  0x43   : > { %p717_p7 = scmp.lt.s32.totalorder %s5376_s30, 5  ;;  %p6575_p11 = scmp.ge.s32.totalorder %s5376_s30, 1 }
  0x44   : > { %s6577_s17 = sshll.u32 %s5372_s0, 8  ;;  %s6578_s4 = sld [smem:[#allocation19_spill]] }
  0x45   : > { %p5604_p1 = pnand %p6575_p11, %p717_p7  ;;  %s6579_s6 = sshll.u32 %s5544_s23, 4 }
  0x46   : > { %s577_s26 = scalar_lea.vmem [#allocation2], %s6579_s6  ;;  %s4274_s14 = sshll.u32 %s5544_s23, 8 }
  0x47   : > { %s6576_s22 = scalar_select %p5604_p1, 1, 0 }
  0x48   : > { %s584_s11 = sshll.u32 %s577_s26, 4  ;;  %s574_s1 = scalar_lea.sflag [#allocation3], %s5544_s23  ;;  %s5617_s11 = int_to_ptr.vmem [resolvable:$true] %s584_s11 }
  0x4a   : > { %s5613_s19 = scalar_lea.hbm %s6578_s4, %s6577_s17  ;;  %s5217_s17 = scalar_lea.hbm %s6578_s4, 512 }
  0x4b   : > { %s5212_s24 = scalar_lea.hbm %s5613_s19, 256  ;;  %p5218_p8 = scmp.lt.u32.totalorder %s5613_s19, %s6578_s4 }
  0x4c   : > { %p5213_p4 = scmp.ne.s32.totalorder %s5613_s19, %s5212_s24  ;;  %p5219_p9 = scmp.lt.u32.totalorder %s5217_s17, %s5212_s24 }
  0x4d   : > { %p5221_p0 = scmp.lt.u32.totalorder %s5212_s24, %s5613_s19 }
  0x4e   : > { %p5215_p5 = pnand %p5213_p4, %p5574_p13  ;;  %p5220_p12 = por %p5219_p9, %p5218_p8 }
  0x50   : > { %p5216_p6 = pneg %p5215_p5  ;;  %p5222_p2 = por %p5221_p0, %p5220_p12 }
  0x52   : > { %p5223_p3 = pnand %p5222_p2, %p5216_p6 }
  0x54   : > { %5226 = shalt.err (!%p5223_p3)
}
  0x55   : > { %s5227_s6 = scalar_lea.vmem %s5617_s11, 256  ;;  %s5381_s26 = smov [#allocation2]  }
  0x56   : > { %p5228_p7 = scmp.ne.s32.totalorder %s5617_s11, %s5227_s6  ;;  %s5232_s20 = sshll.u32 %s5381_s26, 4  ;;  %s5233_s20 = int_to_ptr.vmem [resolvable:$false] %s5232_s20 }
  0x57   : > { %s5234_s9 = scalar_lea.vmem %s5233_s20, 512  ;;  %p5235_p5 = scmp.lt.s32.totalorder %s5617_s11, %s5233_s20 }
  0x58   : > { %p5230_p11 = pnand %p5228_p7, %p5574_p13  ;;  %p5236_p1 = scmp.lt.s32.totalorder %s5234_s9, %s5227_s6 }
  0x5a   : > { %p5231_p4 = pneg %p5230_p11  ;;  %p5237_p8 = por %p5236_p1, %p5235_p5 }
  0x5c   : > { %p5238_p9 = pnand %p5237_p8, %p5231_p4 }
  0x5e   : > { %5241 = shalt.err (!%p5238_p9)
}
  0x5f   : > { %s6580_s24 = smov 4   ;;  %s6581_s15 = smov 64  }
  0x60   : > { %4881 = dma.hbm_to_vmem [thread:$0]  (!%p5548_p10), %s5613_s19, 256, %s5617_s11, %s574_s1, %s6581_s15, %s6581_s15, %s6580_s24  }
  0x61   : > { %s4440_s17 = sshll.u32 %s5372_s0, 12  ;;  %s6582_s10 = sld [smem:[#allocation23_spill]] }
  0x62   : > { %s651_s20 = scalar_lea.vmem [#allocation6], %s4274_s14 }
  0x63   : > { %s658_s9 = sshll.u32 %s651_s20, 4  ;;  %s5655_s9 = int_to_ptr.vmem [resolvable:$true] %s658_s9 }
  0x67   : > { %s5651_s6 = scalar_lea.hbm %s6582_s10, %s4440_s17  ;;  %s5247_s1 = scalar_lea.hbm %s6582_s10, 8192 }
  0x68   : > { %s5242_s4 = scalar_lea.hbm %s5651_s6, 4096  ;;  %p5248_p0 = scmp.lt.u32.totalorder %s5651_s6, %s6582_s10 }
  0x69   : > { %p5243_p1 = scmp.ne.s32.totalorder %s5651_s6, %s5242_s4  ;;  %p5249_p2 = scmp.lt.u32.totalorder %s5247_s1, %s5242_s4 }
  0x6a   : > { %p5251_p7 = scmp.lt.u32.totalorder %s5242_s4, %s5651_s6 }
  0x6b   : > { %p5245_p6 = pnand %p5243_p1, %p5574_p13  ;;  %p5250_p3 = por %p5249_p2, %p5248_p0 }
  0x6d   : > { %p5246_p12 = pneg %p5245_p6  ;;  %p5252_p11 = por %p5251_p7, %p5250_p3 }
  0x6f   : > { %p5253_p4 = pnand %p5252_p11, %p5246_p12 }
  0x71   : > { %5256 = shalt.err (!%p5253_p4)
}
  0x72   : > { %s5257_s14 = scalar_lea.vmem %s5655_s9, 4096  ;;  %s5382_s26 = smov [#allocation6]  }
  0x73   : > { %p5258_p5 = scmp.ne.s32.totalorder %s5655_s9, %s5257_s14  ;;  %s5262_s20 = sshll.u32 %s5382_s26, 4  ;;  %s5263_s20 = int_to_ptr.vmem [resolvable:$false] %s5262_s20 }
  0x74   : > { %s5264_s11 = scalar_lea.vmem %s5263_s20, 8192  ;;  %p5265_p1 = scmp.lt.s32.totalorder %s5655_s9, %s5263_s20 }
  0x75   : > { %p5260_p8 = pnand %p5258_p5, %p5574_p13  ;;  %p5266_p6 = scmp.lt.s32.totalorder %s5264_s11, %s5257_s14 }
  0x77   : > { %p5261_p9 = pneg %p5260_p8  ;;  %p5267_p0 = por %p5266_p6, %p5265_p1 }
  0x79   : > { %p5268_p2 = pnand %p5267_p0, %p5261_p9 }
  0x7b   : > { %5271 = shalt.err (!%p5268_p2)
}
  0x7c   : > { %s5383_s4 = smov 256   ;;  %s5384_s19 = smov 16  }
  0x7d   : > { %4887 = dma.hbm_to_vmem [thread:$0]  (!%p5548_p10), %s5651_s6, 4096, %s5655_s9, %s5568_s13, %s5383_s4, %s5383_s4, %s5384_s19  }
  0x7e   : > { %s4277_s1 = sshll.u32 %s5544_s23, 6  ;;  %s4441_s17 = sshll.u32 %s5372_s0, 10 }
  0x7f   : > { %s5684_s14 = scalar_lea.hbm %s6536_s12, %s4441_s17  ;;  %s680_s20 = scalar_lea.vmem [#allocation7], %s4277_s1 }
  0x80   : > { %s687_s11 = sshll.u32 %s680_s20, 4  ;;  %s677_s10 = scalar_lea.sflag [#allocation8], %s5544_s23  ;;  %s5686_s11 = int_to_ptr.vmem [resolvable:$true] %s687_s11 }
  0x81   : > { %s5272_s7 = scalar_lea.hbm %s5684_s14, 1024  ;;  %s5277_s9 = scalar_lea.hbm %s6536_s12, 2048 }
  0x82   : > { %p5273_p12 = scmp.ne.s32.totalorder %s5684_s14, %s5272_s7  ;;  %p5278_p11 = scmp.lt.u32.totalorder %s5684_s14, %s6536_s12 }
  0x83   : > { %p5279_p4 = scmp.lt.u32.totalorder %s5277_s9, %s5272_s7  ;;  %p5281_p8 = scmp.lt.u32.totalorder %s5272_s7, %s5684_s14 }
  0x84   : > { %p5275_p3 = pnand %p5273_p12, %p5574_p13 }
  0x85   : > { %p5280_p5 = por %p5279_p4, %p5278_p11 }
  0x86   : > { %p5276_p7 = pneg %p5275_p3 }
  0x87   : > { %p5282_p9 = por %p5281_p8, %p5280_p5 }
  0x89   : > { %p5283_p1 = pnand %p5282_p9, %p5276_p7 }
  0x8b   : > { %5286 = shalt.err (!%p5283_p1)
}
  0x8c   : > { %s5287_s1 = scalar_lea.vmem %s5686_s11, 1024  ;;  %s5385_s17 = smov [#allocation7]  }
  0x8d   : > { %p5288_p6 = scmp.ne.s32.totalorder %s5686_s11, %s5287_s1  ;;  %s5292_s16 = sshll.u32 %s5385_s17, 4  ;;  %s5293_s16 = int_to_ptr.vmem [resolvable:$false] %s5292_s16 }
  0x8e   : > { %s5294_s26 = scalar_lea.vmem %s5293_s16, 2048  ;;  %p5295_p12 = scmp.lt.s32.totalorder %s5686_s11, %s5293_s16 }
  0x8f   : > { %p5290_p0 = pnand %p5288_p6, %p5574_p13  ;;  %p5296_p3 = scmp.lt.s32.totalorder %s5294_s26, %s5287_s1 }
  0x91   : > { %p5291_p2 = pneg %p5290_p0  ;;  %p5297_p11 = por %p5296_p3, %p5295_p12 }
  0x93   : > { %p5298_p4 = pnand %p5297_p11, %p5291_p2 }
  0x95   : > { %5301 = shalt.err (!%p5298_p4)
}
  0x96   : > { %4890 = dma.hbm_to_vmem [thread:$0]  (!%p5548_p10), %s5684_s14, 1024, %s5686_s11, %s677_s10, %s6581_s15, %s6581_s15, %s6580_s24  }
  0x97   : > { %p6583_p13 = scmp.ne.s32.totalorder %s6576_s22, 0 }
  0x98   : > { %s723_s7 = sand.u32 (!%p6583_p13), 1, %s5352_s25   ;;  %p6584_p7 = scmp.ne.s32.totalorder (!%p6583_p13), %s6570_s21, 0 }
  0x99   : > { %721 = sbr.rel (%p6583_p13) target bundleno = 2817 (0xb01), region = 84  ;;  %s4281_s29 = sshll.u32 (!%p6583_p13), %s723_s7, 4 }
  0x9a   : > { %s724_s20 = scalar_lea.sflag (!%p6583_p13), [#allocation3], %s723_s7  ;;  %s5718_s13 = scalar_lea.vmem (!%p6583_p13), [#allocation2], %s4281_s29 }
  0xa0   : > { %5335 = dma.done.wait (%p6584_p7), %s724_s20, 256  }
  0xa1   : > { %5337 = vsyncadd (%p6584_p7), %s724_s20, 4294967040  ;;  %s6585_s18 = sadd.s32 4294967295, %s5376_s30   ;;  %s5726_s24 = scalar_lea.vmem [#allocation4], %s4281_s29 }
  0xa2   : > { %s732_s23 = sand.u32 1, %s6585_s18  }
  0xa3   : > { %s733_s10 = scalar_lea.sflag [#allocation5], %s732_s23 }
  0xa4   : > { %5339 = dma.done.wait (%p6584_p7), %s733_s10, 4352  }
  0xa5   : > { %5341 = vsyncadd (%p6584_p7), %s733_s10, 4294962944  ;;  %s4283_s22 = sshll.u32 %s723_s7, 8  ;;  %s4284_s15 = sshll.u32 %s723_s7, 6 }
  0xa6   : > { %s5732_s14 = scalar_lea.vmem [#allocation6], %s4283_s22  ;;  %s751_s11 = scalar_lea.sflag [#allocation8], %s723_s7 }
  0xa7   : > { %s5734_s6 = scalar_lea.vmem [#allocation7], %s4284_s15 }
  0xa8   : > { %5343 = dma.done.wait (%p6584_p7), %s751_s11, 1024  }
  0xa9   : > { %5345 = vsyncadd (%p6584_p7), %s751_s11, 4294966272  ;;  %v5386_v0 = vmov 0   ;;  %v4451_v1 = vld [vmem:[%s6526_s2] sm:$0xff]   ;;  %v5387_v6 = vmov 2   ;;  %v956_v7 = vld [vmem:[%s6527_s3 + $0x8] sm:$0xff]  ;;  %v5388_v8 = vmov 1   ;;  %v968_v9 = vlaneseq }
  0xaa   : > { %4967 = vset.pattern.permute.xlu0 %v5386_v0  ;;  %4979 = vset.pattern.permute.xlu1 %v5386_v0  ;;  %v955_v2 = vld [vmem:[%s6527_s3] sm:$0xff]  ;;  %v4452_v3 = vunpack.c.l.bf16 %v4451_v1  ;;  %v4453_v4 = vunpack.c.h.bf16 %v4451_v1  ;;  %s886_s16 = ssub.s32 1, %s5364_s28  ;;  %s4285_s26 = sshll.u32 %s5364_s28, 1  ;;  %vm1095_vm0 = vcmask 130048   ;;  %vm5392_vm1 = vmmov 0  }
  0xab   : > { %1008 = vperm.xlu1 %4979, %v955_v2   ;;  %s4287_s7 = sshll.u32 %s886_s16, 1  ;;  %s879_s29 = sadd.s32 %s5360_s27, %s4285_s26  ;;  %v969_v10 = vshrl.u32 %v968_v9, 7  ;;  %vm1757_vm2 = vcmask 261120  }
  0xac   : > { %v4968_v5 = vpack.i.bf16 %v4453_v4, %v4452_v3  ;;  %s888_s20 = sadd.s32 %s5360_s27, %s4287_s7  ;;  %p880_p10 = scmp.lt.s32.totalorder %s879_s29, 3 }
  0xad   : > { %p889_p5 = scmp.lt.s32.totalorder %s888_s20, 3  ;;  %s6586_s15 = sld [smem:[#allocation17_spill]]  ;;  %v5765_v12 = vsub.s32 0, %v969_v10  ;;  %v1000_v15 = vsub.s32 2, %v969_v10  ;;  %v984_v17 = vsub.s32 1, %v969_v10 }
  0xae   : > { %4969 = vperm.xlu0 %4967, %v4968_v5   ;;  %s6612_s29 = smov (!%p880_p10, %s879_s29), 3  ;;  %s6587_s19 = sld [smem:[#allocation18_spill]] }
  0xaf   : > { %4980 = vset.pattern.permute.xlu1 %v5387_v6  ;;  %s6614_s20 = smov (!%p889_p5, %s888_s20), 3  ;;  %s4286_s18 = sshll.u32 %s6612_s29, 2 }
  0xb0   : > { %4982 = vperm.xlu1 %4980, %v4968_v5   ;;  %s4288_s23 = sshll.u32 %s6614_s20, 2  ;;  %s5390_s27 = smov 96  }
  0xb1   : > { %s5391_s21 = smov 112   ;;  %p896_p8 = scmp.lt.s32.totalorder %s5364_s28, 1 }
  0xb2   : > { %4973 = vset.pattern.permute.xlu0 %v5388_v8  ;;  %s6590_s16 = sld [smem:[#allocation24_spill]] }
  0xb3   : > { %4975 = vperm.xlu0 %4973, %v4968_v5   ;;  %s883_s11 = scalar_lea.vmem %s6586_s15, %s4286_s18  ;;  %s6616_s28 = smov (!%p896_p8, %s5364_s28), 1 }
  0xb4   : > { %4986 = vset.pattern.permute.xlu1 %v5386_v0  ;;  %s892_s1 = scalar_lea.vmem %s6587_s19, %s4288_s23  ;;  %v957_v13 = vld [vmem:[%s883_s11] sm:$0x7]  ;;  %s4442_s7 = sshll.u32 %s6616_s28, 5 }
  0xb5   : > { %1013 = vperm.xlu1 %4986, %v956_v7   ;;  %v1022_v14 = vld [vmem:[%s892_s1] sm:$0x7]  ;;  %v971_v18 = vrot.slane %v957_v13, %v5765_v12  ;;  %v1001_v23 = vrot.slane %v957_v13, %v1000_v15  ;;  %v985_v27 = vrot.slane %v957_v13, %v984_v17  ;;  %s5956_s23 = scalar_lea.vmem %s6529_s5, %s4442_s7  ;;  %s6588_s15 = sld [smem:[#allocation21_spill]] }
  0xb6   : > { %v1026_v19 = vrot.slane %v1022_v14, %v5765_v12  ;;  %v1040_v24 = vrot.slane %v1022_v14, %v1000_v15  ;;  %v1032_v28 = vrot.slane %v1022_v14, %v984_v17  ;;  %s4445_s9 = sshll.u32 %s6616_s28, 9  ;;  %s6589_s1 = sld [smem:[#allocation22_spill]] }
  0xbb   : > { %s905_s11 = scalar_lea.vmem %s6588_s15, %s4442_s7 }
 0x12a   : > { %v1009_v11 = vpop.permute.xlu1 %1008 }
 0x12d   : > { %v4970_v16 = vpop.permute.xlu0 %4969 }
 0x12e   : > { %v4972_v20 = vunpack.i.h.bf16 %v4970_v16  ;;  %v4971_v22 = vunpack.i.l.bf16 %v4970_v16 }
 0x12f   : > { %v4983_v21 = vpop.permute.xlu1 %4982 }
 0x130   : > { %v4985_v25 = vunpack.i.h.bf16 %v4983_v21  ;;  %v4984_v26 = vunpack.i.l.bf16 %v4983_v21  ;;  %v973_v29 = vmul.f32 %v4972_v20, %v971_v18  ;;  %v1028_v30 = vmul.f32 %v4972_v20, %v1026_v19 }
 0x131   : > { %v972_v32 = vmul.f32 %v4971_v22, %v971_v18  ;;  %v1027_v33 = vmul.f32 %v4971_v22, %v1026_v19 }
 0x132   : > { %v4976_v31 = vpop.permute.xlu0 %4975  ;;  %v1003_v36 = vmul.f32 %v4985_v25, %v1001_v23  ;;  %v1042_v37 = vmul.f32 %v4985_v25, %v1040_v24  ;;  %v1002_v38 = vmul.f32 %v4984_v26, %v1001_v23  ;;  %v1041_v39 = vmul.f32 %v4984_v26, %v1040_v24 }
 0x133   : > { %v4978_v34 = vunpack.i.h.bf16 %v4976_v31  ;;  %v4977_v35 = vunpack.i.l.bf16 %v4976_v31 }
 0x134   : > { %v1014_v48 = vpop.permute.xlu1 %1013 }
 0x135   : > { %v987_v40 = vmul.f32 %v4978_v34, %v985_v27  ;;  %v1034_v41 = vmul.f32 %v4978_v34, %v1032_v28  ;;  %v986_v42 = vmul.f32 %v4977_v35, %v985_v27  ;;  %v1033_v43 = vmul.f32 %v4977_v35, %v1032_v28 }
 0x137   : > { %v988_v44 = vadd.f32 %v986_v42, %v972_v32  ;;  %v1035_v45 = vadd.f32 %v1033_v43, %v1027_v33  ;;  %v989_v46 = vadd.f32 %v987_v40, %v973_v29  ;;  %v1036_v47 = vadd.f32 %v1034_v41, %v1028_v30 }
 0x139   : > { %v1004_v49 = vadd.f32 %v1002_v38, %v988_v44  ;;  %v1043_v50 = vadd.f32 %v1041_v39, %v1035_v45  ;;  %v1005_v51 = vadd.f32 %v1003_v36, %v989_v46  ;;  %v1044_v52 = vadd.f32 %v1042_v37, %v1036_v47 }
 0x13b   : > { %v1016_v53 = vadd.f32 %v1009_v11, %v1004_v49  ;;  %v1045_v54 = vadd.f32 %v1043_v50, %v1009_v11  ;;  %v1017_v55 = vadd.f32 %v1014_v48, %v1005_v51  ;;  %v1046_v56 = vadd.f32 %v1044_v52, %v1014_v48 }
 0x13d   : > { %v1018_v57 = vmul.f32 0.01, %v1016_v53  ;;  %v1019_v58 = vmul.f32 0.01, %v1017_v55  ;;  %v1048_v59 = vmul.f32 0.01, %v1046_v56 }
 0x13e   : > { %v1047_v60 = vmul.f32 0.01, %v1045_v54 }
 0x13f   : > { %v5769_v61 = vmax.f32 %v1016_v53, %v1018_v57  ;;  %v5771_v62 = vmax.f32 %v1017_v55, %v1019_v58  ;;  %v5773_v63 = vmax.f32 %v1046_v56, %v1048_v59 }
 0x140   : > { %v5775_v1 = vmax.f32 %v1045_v54, %v1047_v60 }
 0x141   : > { %v1051_v2 = vmul.f32 %v5769_v61, %v5769_v61  ;;  %v1052_v3 = vmul.f32 %v5771_v62, %v5771_v62  ;;  %v1065_v4 = vmul.f32 %v5773_v63, %v5773_v63 }
 0x142   : > { %v1064_v5 = vmul.f32 %v5775_v1, %v5775_v1  ;;  %v1361_v6 = vpack.c.bf16 %v5773_v63, %v5775_v1 }
 0x143   : > { %v1053_v7 = vadd.f32 %v1052_v3, %v1051_v2 }
 0x144   : > { %v1066_v8 = vadd.f32 %v1065_v4, %v1064_v5 }
 0x145   : > { %v1054_v9 = vrot.slane %v1053_v7, 4 }
 0x146   : > { %v1067_v10 = vrot.slane %v1066_v8, 4 }
 0x147   : > { %v1055_v11 = vadd.f32 %v1054_v9, %v1053_v7 }
 0x148   : > { %v1068_v13 = vadd.f32 %v1067_v10, %v1066_v8 }
 0x149   : > { %v1056_v14 = vrot.slane %v1055_v11, 2 }
 0x14a   : > { %v1069_v15 = vrot.slane %v1068_v13, 2 }
 0x14b   : > { %v1057_v16 = vadd.f32 %v1056_v14, %v1055_v11 }
 0x14c   : > { %v1070_v17 = vadd.f32 %v1069_v15, %v1068_v13 }
 0x14d   : > { %v1058_v18 = vrot.slane %v1057_v16, 1 }
 0x14e   : > { %v1071_v19 = vrot.slane %v1070_v17, 1 }
 0x14f   : > { %v1059_v20 = vadd.f32 %v1058_v18, %v1057_v16 }
 0x150   : > { %v1072_v21 = vadd.f32 %v1071_v19, %v1070_v17 }
 0x151   : > { %v1060_v22 = vmax.f32 %v1059_v20, 1e-24 }
 0x152   : > { %v1073_v23 = vmax.f32 %v1072_v21, 1e-24 }
 0x153   : > { %5110 = vrsqrt.f32 %v1060_v22 }
 0x154   : > { %5112 = vrsqrt.f32 %v1073_v23 }
 0x15d   : > { %v5111_v24 = vpop.eup %5110 }
 0x15e   : > { %v5113_v25 = vpop.eup %5112  ;;  %v1062_v26 = vmul.f32 %v5111_v24, %v5769_v61  ;;  %v1063_v27 = vmul.f32 %v5111_v24, %v5771_v62 }
 0x15f   : > { %v1075_v28 = vmul.f32 %v5113_v25, %v5775_v1  ;;  %v1076_v29 = vmul.f32 %v5113_v25, %v5773_v63  ;;  %v1419_v63 = vpack.c.bf16 %v5771_v62, %v5769_v61 }
 0x160   : > { %v1077_v30 = vpack.c.bf16 %v1063_v27, %v1062_v26 }
 0x161   : > { %v1078_v31 = vpack.c.bf16 %v1076_v29, %v1075_v28 }
 0x162   : > { %1079 = vxpose.xlu0.c.b16.start.end [1/1] (short) %v1077_v30, 128 }
 0x163   : > { %4702 = vmatprep.subr.bf16.mxu0 %v1078_v31 }
 0x164   : > { %4703 = vmatpush3.bf16.msra.mxu0 %v1078_v31 }
 0x16b   : > { %4987 = vset.pattern.permute.xlu0 %v5386_v0 }
 0x1c8   : > { %v1087_v32 = vpop.trf.xlu0 }
 0x1c9   : > { %4704 = vmatprep.mubr.msk.bf16.mxu0 %vm1095_vm0, %v1087_v32 }
 0x1cc   : > { %v1088_v33 = vpop.trf.xlu0 }
 0x1cd   : > { %4705 = vmatmul.mubr.msk.bf16.vlgmr.msra.gmra.mrb[0].mxu0 %vm1095_vm0, %v1088_v33 }
 0x1d0   : > { %v1089_v34 = vpop.trf.xlu0 }
 0x1d1   : > { %4708 = vmatprep.mubr.msk.bf16.mxu0 %vm1095_vm0, %v1089_v34 }
 0x1d4   : > { %v1090_v35 = vpop.trf.xlu0 }
 0x1d5   : > { %4709 = vmatmul.mubr.msk.bf16.gmra.mrb[4].mxu0 %vm1095_vm0, %v1090_v35 }
 0x1d8   : > { %v1091_v36 = vpop.trf.xlu0 }
 0x1d9   : > { %4712 = vmatprep.mubr.msk.bf16.mxu0 %vm1095_vm0, %v1091_v36 }
 0x1dc   : > { %v1092_v37 = vpop.trf.xlu0 }
 0x1dd   : > { %4713 = vmatmul.mubr.msk.bf16.gmra.mrb[8].mxu0 %vm1095_vm0, %v1092_v37 }
 0x1e0   : > { %v1093_v0 = vpop.trf.xlu0 }
 0x1e1   : > { %4716 = vmatprep.mubr.msk.bf16.mxu0 %vm1095_vm0, %v1093_v0 }
 0x1e4   : > { %v1094_v38 = vpop.trf.xlu0 }
 0x1e5   : > { %4717 = vmatmul.mubr.msk.bf16.gmra.mrb[12].mxu0 %vm1095_vm0, %v1094_v38 }
 0x2a0   : > { %v4706_v39 = vpop.f32.mrb[0].mxu0 }
 0x2a1   : > { %v1154_v40 = vpop.f32.mrb[1].mxu0 }
 0x2a2   : > { %1217 = vmax.xlane.f32.xlu1 %v1154_v40  ;;  %v4707_v41 = vpop.f32.mrb[2].mxu0 }
 0x2a3   : > { %v1157_v42 = vpop.f32.mrb[3].mxu0 }
 0x2a4   : > { %1219 = vmax.xlane.f32.xlu0 %v1157_v42 }
 0x2a6   : > { %1221 = vmax.xlane.f32.xlu1 %v4706_v39 }
 0x2a8   : > { %v4710_v43 = vpop.f32.mrb[4].mxu0 }
 0x2a9   : > { %v1170_v44 = vpop.f32.mrb[5].mxu0 }
 0x2aa   : > { %1223 = vmax.xlane.f32.xlu1 %v4707_v41  ;;  %v4711_v45 = vpop.f32.mrb[6].mxu0 }
 0x2ab   : > { %v1173_v46 = vpop.f32.mrb[7].mxu0 }
 0x2ae   : > { %1225 = vmax.xlane.f32.xlu1 %v1170_v44 }
 0x2b0   : > { %v5800_v47 = vpop.f32.mrb[8].mxu0 }
 0x2b1   : > { %v5802_v48 = vpop.f32.mrb[9].mxu0 }
 0x2b2   : > { %1227 = vmax.xlane.f32.xlu1 %v1173_v46  ;;  %v5804_v49 = vpop.f32.mrb[10].mxu0 }
 0x2b3   : > { %1239 = vmax.xlane.f32.xlu0 %v5804_v49  ;;  %v5807_v50 = vpop.f32.mrb[11].mxu0 }
 0x2b6   : > { %1229 = vmax.xlane.f32.xlu1 %v4710_v43 }
 0x2b8   : > { %v5809_v51 = vpop.f32.mrb[12].mxu0 }
 0x2b9   : > { %v5811_v52 = vpop.f32.mrb[13].mxu0 }
 0x2ba   : > { %1231 = vmax.xlane.f32.xlu1 %v4711_v45  ;;  %v5813_v53 = vpop.f32.mrb[14].mxu0 }
 0x2bb   : > { %v5815_v54 = vpop.f32.mrb[15].mxu0 }
 0x2bc   : > { %1243 = vmax.xlane.f32.xlu0 %v5815_v54 }
 0x2be   : > { %1233 = vmax.xlane.f32.xlu1 %v5802_v48 }
 0x2c0   : > { %1247 = vmax.xlane.f32.xlu0 %v5813_v53 }
 0x2c2   : > { %1235 = vmax.xlane.f32.xlu1 %v5807_v50 }
 0x2c6   : > { %1237 = vmax.xlane.f32.xlu1 %v5800_v47 }
 0x2ca   : > { %1241 = vmax.xlane.f32.xlu1 %v5811_v52 }
 0x2ce   : > { %1245 = vmax.xlane.f32.xlu1 %v5809_v51 }
 0x32f   : > { %v1218_v55 = vpop.xlane.xlu1 %1217 }
 0x330   : > { %v1249_v56 = vsub.f32 %v1154_v40, %v1218_v55 }
 0x331   : > { %v1220_v57 = vpop.xlane.xlu0 %1219 }
 0x332   : > { %v1265_v58 = vmul.f32 1.442695, %v1249_v56  ;;  %v1250_v59 = vsub.f32 %v1157_v42, %v1220_v57  ;;  %v5389_v57 = vmov 0.0  }
 0x333   : > { %v1222_v60 = vpop.xlane.xlu1 %1221  ;;  %4720 = vmatprep.subr.bf16.mxu1 %v5389_v57  ;;  %4736 = vmatprep.mubr.msk.bf16.mxu1 %vm5392_vm1, %v5389_v57 }
 0x334   : > { %5114 = vpow2.f32 %v1265_v58  ;;  %v1267_v2 = vmul.f32 1.442695, %v1250_v59  ;;  %v1251_v3 = vsub.f32 %v4706_v39, %v1222_v60 }
 0x336   : > { %5116 = vpow2.f32 %v1267_v2  ;;  %v1269_v4 = vmul.f32 1.442695, %v1251_v3  ;;  %v5882_v3 = vld [vmem:[%s5718_s13] sm:$0xf] }
 0x337   : > { %v1224_v5 = vpop.xlane.xlu1 %1223 }
 0x338   : > { %5118 = vpow2.f32 %v1269_v4  ;;  %v1252_v7 = vsub.f32 %v4707_v41, %v1224_v5  ;;  %v5887_v4 = vld [vmem:[%s5718_s13 + $0x8] sm:$0xf]  ;;  %v5892_v5 = vld [vmem:[%s5718_s13 + $0x4] sm:$0xf] }
 0x339   : > { %v4319_v1 = vcombine.low %v5882_v3, %v5892_v5 }
 0x33a   : > { %v1271_v8 = vmul.f32 1.442695, %v1252_v7  ;;  %v5895_v7 = vld [vmem:[%s5718_s13 + $0xc] sm:$0xf]  ;;  %s4444_s13 = sshll.u32 %s6616_s28, 8 }
 0x33b   : > { %v1226_v9 = vpop.xlane.xlu1 %1225  ;;  %s5917_s26 = scalar_lea.vmem %s6532_s8, %s4444_s13 }
 0x33c   : > { %5120 = vpow2.f32 %v1271_v8  ;;  %v1253_v10 = vsub.f32 %v1170_v44, %v1226_v9 }
 0x33e   : > { %v5824_v11 = vpop.eup %5114  ;;  %v1273_v13 = vmul.f32 1.442695, %v1253_v10 }
 0x33f   : > { %v1228_v14 = vpop.xlane.xlu1 %1227  ;;  %1297 = vadd.xlane.f32.xlu1 %v5824_v11 }
 0x340   : > { %v5827_v15 = vpop.eup %5116  ;;  %5122 = vpow2.f32 %v1273_v13  ;;  %v1254_v16 = vsub.f32 %v1173_v46, %v1228_v14  ;;  %v1240_v26 = vpop.xlane.xlu0 %1239 }
 0x341   : > { %1299 = vadd.xlane.f32.xlu0 %v5827_v15  ;;  %v1260_v33 = vsub.f32 %v5804_v49, %v1240_v26 }
 0x342   : > { %v5830_v17 = vpop.eup %5118  ;;  %v1275_v18 = vmul.f32 1.442695, %v1254_v16 }
 0x343   : > { %v1230_v19 = vpop.xlane.xlu1 %1229  ;;  %1301 = vadd.xlane.f32.xlu1 %v5830_v17  ;;  %v1287_v0 = vmul.f32 1.442695, %v1260_v33 }
 0x344   : > { %5124 = vpow2.f32 %v1275_v18  ;;  %v1255_v20 = vsub.f32 %v4710_v43, %v1230_v19 }
 0x346   : > { %v5833_v21 = vpop.eup %5120  ;;  %v1277_v22 = vmul.f32 1.442695, %v1255_v20 }
 0x347   : > { %v1232_v23 = vpop.xlane.xlu1 %1231  ;;  %1303 = vadd.xlane.f32.xlu0 %v5833_v21 }
 0x348   : > { %5126 = vpow2.f32 %v1277_v22  ;;  %v1256_v24 = vsub.f32 %v4711_v45, %v1232_v23 }
 0x349   : > { %v1244_v31 = vpop.xlane.xlu0 %1243 }
 0x34a   : > { %v5836_v25 = vpop.eup %5122  ;;  %v1279_v27 = vmul.f32 1.442695, %v1256_v24  ;;  %v1262_v38 = vsub.f32 %v5815_v54, %v1244_v31 }
 0x34b   : > { %v1234_v28 = vpop.xlane.xlu1 %1233  ;;  %1305 = vadd.xlane.f32.xlu1 %v5836_v25 }
 0x34c   : > { %5128 = vpow2.f32 %v1279_v27  ;;  %v1257_v29 = vsub.f32 %v5802_v48, %v1234_v28  ;;  %v1291_v44 = vmul.f32 1.442695, %v1262_v38 }
 0x34d   : > { %v1248_v40 = vpop.xlane.xlu0 %1247 }
 0x34e   : > { %v5840_v30 = vpop.eup %5124  ;;  %v1281_v32 = vmul.f32 1.442695, %v1257_v29  ;;  %v1264_v45 = vsub.f32 %v5813_v53, %v1248_v40 }
 0x34f   : > { %v1236_v34 = vpop.xlane.xlu1 %1235  ;;  %1307 = vadd.xlane.f32.xlu0 %v5840_v30 }
 0x350   : > { %5130 = vpow2.f32 %v1281_v32  ;;  %v1258_v35 = vsub.f32 %v5807_v50, %v1236_v34  ;;  %v1295_v54 = vmul.f32 1.442695, %v1264_v45 }
 0x352   : > { %v5845_v36 = vpop.eup %5126  ;;  %v1283_v37 = vmul.f32 1.442695, %v1258_v35 }
 0x353   : > { %v1238_v39 = vpop.xlane.xlu1 %1237  ;;  %1309 = vadd.xlane.f32.xlu1 %v5845_v36 }
 0x354   : > { %5132 = vpow2.f32 %v1283_v37  ;;  %v1259_v41 = vsub.f32 %v5800_v47, %v1238_v39 }
 0x355   : > { %5134 = vpow2.f32 %v1287_v0 }
 0x356   : > { %v5850_v42 = vpop.eup %5128  ;;  %v1285_v43 = vmul.f32 1.442695, %v1259_v41 }
 0x357   : > { %v1242_v46 = vpop.xlane.xlu1 %1241  ;;  %1311 = vadd.xlane.f32.xlu0 %v5850_v42 }
 0x358   : > { %5136 = vpow2.f32 %v1285_v43  ;;  %v1261_v48 = vsub.f32 %v5811_v52, %v1242_v46 }
 0x359   : > { %5138 = vpow2.f32 %v1291_v44 }
 0x35a   : > { %v5855_v49 = vpop.eup %5130  ;;  %v1289_v50 = vmul.f32 1.442695, %v1261_v48 }
 0x35b   : > { %1313 = vadd.xlane.f32.xlu1 %v5855_v49  ;;  %v1246_v47 = vpop.xlane.xlu1 %1245 }
 0x35c   : > { %5140 = vpow2.f32 %v1289_v50  ;;  %v1263_v55 = vsub.f32 %v5809_v51, %v1246_v47 }
 0x35d   : > { %5142 = vpow2.f32 %v1295_v54 }
 0x35e   : > { %v5859_v56 = vpop.eup %5132  ;;  %v1293_v53 = vmul.f32 1.442695, %v1263_v55 }
 0x35f   : > { %1315 = vadd.xlane.f32.xlu0 %v5859_v56  ;;  %v5863_v52 = vpop.eup %5134 }
 0x360   : > { %5144 = vpow2.f32 %v1293_v53 }
 0x362   : > { %v5865_v58 = vpop.eup %5136 }
 0x363   : > { %1317 = vadd.xlane.f32.xlu1 %v5865_v58  ;;  %1319 = vadd.xlane.f32.xlu0 %v5863_v52  ;;  %v5869_v51 = vpop.eup %5138 }
 0x366   : > { %v5871_v59 = vpop.eup %5140 }
 0x367   : > { %1321 = vadd.xlane.f32.xlu1 %v5871_v59  ;;  %1323 = vadd.xlane.f32.xlu0 %v5869_v51  ;;  %v5875_v60 = vpop.eup %5142 }
 0x36a   : > { %v5877_v2 = vpop.eup %5144 }
 0x36b   : > { %1325 = vadd.xlane.f32.xlu1 %v5877_v2  ;;  %1327 = vadd.xlane.f32.xlu0 %v5875_v60 }
 0x37c   : > { %1424 = vrot.lane.b32.xlu1 %v5882_v3, %s5390_s27 }
 0x380   : > { %1428 = vrot.lane.b32.xlu1 %v5887_v4, %s5390_s27 }
 0x381   : > { %1426 = vrot.lane.b32.xlu0 %v5892_v5, %s5390_s27 }
 0x384   : > { %1430 = vrot.lane.b32.xlu1 %v5895_v7, %s5390_s27 }
 0x385   : > { %1571 = vrot.lane.b32.xlu0 %v5882_v3, %s5391_s21 }
 0x388   : > { %1573 = vrot.lane.b32.xlu1 %v5892_v5, %s5391_s21 }
 0x389   : > { %1575 = vrot.lane.b32.xlu0 %v5887_v4, %s5391_s21 }
 0x38c   : > { %1577 = vrot.lane.b32.xlu1 %v5895_v7, %s5391_s21 }
 0x3b0   : > { %1411 = vmax.xlane.f32.xlu1 %v5769_v61 }
 0x3cc   : > { %v1298_v8 = vpop.xlane.xlu1 %1297 }
 0x3cd   : > { %5146 = vrcp.f32 %v1298_v8 }
 0x3ce   : > { %v1300_v9 = vpop.xlane.xlu0 %1299 }
 0x3cf   : > { %5148 = vrcp.f32 %v1300_v9 }
 0x3d0   : > { %v1302_v10 = vpop.xlane.xlu1 %1301 }
 0x3d1   : > { %5150 = vrcp.f32 %v1302_v10 }
 0x3d4   : > { %v1304_v13 = vpop.xlane.xlu0 %1303 }
 0x3d5   : > { %5152 = vrcp.f32 %v1304_v13 }
 0x3d7   : > { %v5147_v14 = vpop.eup %5146 }
 0x3d8   : > { %v1306_v18 = vpop.xlane.xlu1 %1305  ;;  %v1345_v19 = vmul.f32 %v5147_v14, %v5824_v11 }
 0x3d9   : > { %v5149_v16 = vpop.eup %5148  ;;  %5154 = vrcp.f32 %v1306_v18 }
 0x3da   : > { %v1346_v20 = vmul.f32 %v5149_v16, %v5827_v15 }
 0x3db   : > { %v5151_v24 = vpop.eup %5150 }
 0x3dc   : > { %v1308_v22 = vpop.xlane.xlu0 %1307  ;;  %v1362_v23 = vpack.c.bf16 %v1346_v20, %v1345_v19  ;;  %v1347_v29 = vmul.f32 %v5151_v24, %v5830_v17 }
 0x3dd   : > { %5156 = vrcp.f32 %v1308_v22 }
 0x3de   : > { %4721 = vmatpush3.bf16.xpose.msra.mxu1 %v1362_v23 }
 0x3df   : > { %v5153_v26 = vpop.eup %5152  ;;  %4722 = vmatprep.subr.bf16.mxu1 %v5389_v57 }
 0x3e0   : > { %v1348_v27 = vmul.f32 %v5153_v26, %v5833_v21  ;;  %v1310_v28 = vpop.xlane.xlu1 %1309 }
 0x3e1   : > { %5158 = vrcp.f32 %v1310_v28 }
 0x3e2   : > { %v1363_v32 = vpack.c.bf16 %v1348_v27, %v1347_v29 }
 0x3e3   : > { %v5155_v11 = vpop.eup %5154 }
 0x3e4   : > { %v1312_v31 = vpop.xlane.xlu0 %1311  ;;  %v1349_v35 = vmul.f32 %v5155_v11, %v5836_v25 }
 0x3e5   : > { %5160 = vrcp.f32 %v1312_v31 }
 0x3e6   : > { %4723 = vmatpush3.bf16.xpose.msra.mxu1 %v1363_v32 }
 0x3e7   : > { %v5157_v15 = vpop.eup %5156  ;;  %4724 = vmatprep.subr.bf16.mxu1 %v5389_v57 }
 0x3e8   : > { %v1350_v33 = vmul.f32 %v5157_v15, %v5840_v30  ;;  %v1314_v34 = vpop.xlane.xlu1 %1313 }
 0x3e9   : > { %5162 = vrcp.f32 %v1314_v34  ;;  %v1681_v34 = vld [vmem:[%s5956_s23] sm:$0xff] }
 0x3ea   : > { %v1364_v21 = vpack.c.bf16 %v1350_v33, %v1349_v35 }
 0x3eb   : > { %v5159_v0 = vpop.eup %5158 }
 0x3ec   : > { %v1316_v37 = vpop.xlane.xlu0 %1315  ;;  %v1351_v41 = vmul.f32 %v5159_v0, %v5845_v36 }
 0x3ed   : > { %5164 = vrcp.f32 %v1316_v37 }
 0x3ee   : > { %4725 = vmatpush3.bf16.xpose.msra.mxu1 %v1364_v21 }
 0x3ef   : > { %v5161_v17 = vpop.eup %5160  ;;  %4726 = vmatprep.subr.bf16.mxu1 %v5389_v57 }
 0x3f0   : > { %v1318_v38 = vpop.xlane.xlu1 %1317  ;;  %v1320_v39 = vpop.xlane.xlu0 %1319  ;;  %v1352_v40 = vmul.f32 %v5161_v17, %v5850_v42 }
 0x3f1   : > { %5166 = vrcp.f32 %v1318_v38 }
 0x3f2   : > { %5168 = vrcp.f32 %v1320_v39  ;;  %v1365_v25 = vpack.c.bf16 %v1352_v40, %v1351_v41 }
 0x3f3   : > { %v5163_v44 = vpop.eup %5162 }
 0x3f4   : > { %v1322_v30 = vpop.xlane.xlu1 %1321  ;;  %v1324_v43 = vpop.xlane.xlu0 %1323  ;;  %v1353_v54 = vmul.f32 %v5163_v44, %v5855_v49 }
 0x3f5   : > { %5170 = vrcp.f32 %v1322_v30 }
 0x3f6   : > { %4727 = vmatpush3.bf16.xpose.msra.mxu1 %v1365_v25  ;;  %5172 = vrcp.f32 %v1324_v43  ;;  %v4320_v43 = vcombine.low %v5887_v4, %v5895_v7 }
 0x3f7   : > { %v5165_v45 = vpop.eup %5164  ;;  %4728 = vmatprep.subr.bf16.mxu1 %v5389_v57 }
 0x3f8   : > { %v1326_v46 = vpop.xlane.xlu1 %1325  ;;  %v1328_v48 = vpop.xlane.xlu0 %1327  ;;  %v1354_v50 = vmul.f32 %v5165_v45, %v5859_v56 }
 0x3f9   : > { %5174 = vrcp.f32 %v1326_v46 }
 0x3fa   : > { %v1366_v55 = vpack.c.bf16 %v1354_v50, %v1353_v54  ;;  %5176 = vrcp.f32 %v1328_v48  ;;  %v1684_v50 = vld [vmem:[%s5956_s23 + $0x18] sm:$0xff]  ;;  %v1683_v54 = vld [vmem:[%s5956_s23 + $0x10] sm:$0xff] }
 0x3fb   : > { %v5167_v42 = vpop.eup %5166 }
 0x3fc   : > { %v1425_v47 = vpop.permute.xlu1 %1424  ;;  %v1427_v36 = vpop.permute.xlu0 %1426  ;;  %v1355_v56 = vmul.f32 %v5167_v42, %v5865_v58  ;;  %v1724_v42 = vld [vmem:[%s905_s11 + $0x8] sm:$0xff] }
 0x3fd   : > { %v5169_v53 = vpop.eup %5168  ;;  %v1436_v8 = vadd.bf16 %v1425_v47, %v5882_v3  ;;  %v1437_v9 = vadd.bf16 %v1427_v36, %v5892_v5  ;;  %v1723_v47 = vld [vmem:[%s905_s11] sm:$0xff]  ;;  %v1726_v36 = vld [vmem:[%s905_s11 + $0x18] sm:$0xff] }
 0x3fe   : > { %4729 = vmatpush3.bf16.xpose.msra.mxu1 %v1366_v55  ;;  %v1356_v14 = vmul.f32 %v5169_v53, %v5863_v52  ;;  %v1725_v55 = vld [vmem:[%s905_s11 + $0x10] sm:$0xff]  ;;  %s6592_s11 = sld [smem:[#allocation26_spill]] }
 0x3ff   : > { %v4315_v10 = vcombine.low %v1436_v8, %v1437_v9  ;;  %4730 = vmatprep.subr.bf16.mxu1 %v5389_v57  ;;  %v5171_v16 = vpop.eup %5170  ;;  %v5020_v9 = vld [vmem:[%s5726_s24] sm:$0xff]  }
 0x400   : > { %v1429_v13 = vpop.permute.xlu1 %1428  ;;  %v1572_v49 = vpop.permute.xlu0 %1571  ;;  %v1367_v19 = vpack.c.bf16 %v1356_v14, %v1355_v56  ;;  %v1357_v52 = vmul.f32 %v5171_v16, %v5871_v59 }
 0x401   : > { %1451 = vrot.lane.b32.xlu0 %v4315_v10, %s5391_s21  ;;  %v5173_v20 = vpop.eup %5172  ;;  %v1583_v22 = vsub.bf16 %v5882_v3, %v1572_v49 }
 0x402   : > { %v1358_v58 = vmul.f32 %v5173_v20, %v5869_v51 }
 0x403   : > { %v5175_v29 = vpop.eup %5174 }
 0x404   : > { %v1431_v18 = vpop.permute.xlu1 %1430  ;;  %v1576_v24 = vpop.permute.xlu0 %1575  ;;  %v1368_v32 = vpack.c.bf16 %v1358_v58, %v1357_v52  ;;  %v1359_v51 = vmul.f32 %v5175_v29, %v5877_v2 }
 0x405   : > { %v1585_v28 = vsub.bf16 %v5887_v4, %v1576_v24  ;;  %v5177_v11 = vpop.eup %5176  ;;  %v1439_v37 = vadd.bf16 %v1431_v18, %v5895_v7 }
 0x406   : > { %4731 = vmatpush3.bf16.xpose.msra.mxu1 %v1367_v19  ;;  %v1360_v59 = vmul.f32 %v5177_v11, %v5875_v60 }
 0x407   : > { %4732 = vmatprep.subr.bf16.mxu1 %v5389_v57 }
 0x408   : > { %v1574_v23 = vpop.permute.xlu1 %1573  ;;  %v1369_v35 = vpack.c.bf16 %v1360_v59, %v1359_v51 }
 0x409   : > { %v1584_v26 = vsub.bf16 %v5892_v5, %v1574_v23 }
 0x40b   : > { %v4323_v27 = vcombine.low %v1583_v22, %v1584_v26 }
 0x40c   : > { %v1578_v31 = vpop.permute.xlu1 %1577 }
 0x40d   : > { %v1586_v15 = vsub.bf16 %v5895_v7, %v1578_v31  ;;  %1598 = vrot.lane.b32.xlu1 %v4323_v27, %s5390_s27 }
 0x40e   : > { %4733 = vmatpush3.bf16.xpose.msra.mxu1 %v1368_v32 }
 0x40f   : > { %v4324_v33 = vcombine.low %v1585_v28, %v1586_v15  ;;  %4734 = vmatprep.subr.bf16.mxu1 %v5389_v57  ;;  %v1438_v57 = vadd.bf16 %v1429_v13, %v5887_v4 }
 0x411   : > { %1600 = vrot.lane.b32.xlu1 %v4324_v33, %s5390_s27  ;;  %v4316_v21 = vcombine.low %v1438_v57, %v1439_v37  ;;  %s6001_s27 = scalar_lea.vmem %s6589_s1, %s4445_s9  ;;  %s6593_s1 = sld [smem:[#allocation27_spill]] }
 0x412   : > { %v1908_v53 = vld [vmem:[%s6001_s27 + $0x88] sm:$0xff]  ;;  %v1907_v8 = vld [vmem:[%s6001_s27 + $0x80] sm:$0xff]  ;;  %v1910_v56 = vld [vmem:[%s6001_s27 + $0x98] sm:$0xff] }
 0x413   : > { %v1892_v10 = vld [vmem:[%s6001_s27 + $0x8] sm:$0xff]  ;;  %v1891_v13 = vld [vmem:[%s6001_s27] sm:$0xff]  ;;  %v1909_v14 = vld [vmem:[%s6001_s27 + $0x90] sm:$0xff] }
 0x414   : > { %v1894_v49 = vld [vmem:[%s6001_s27 + $0x18] sm:$0xff]  ;;  %v1893_v16 = vld [vmem:[%s6001_s27 + $0x10] sm:$0xff]  ;;  %v1912_v18 = vld [vmem:[%s6001_s27 + $0xa8] sm:$0xff] }
 0x415   : > { %1687 = vperm.xlu1 %4986, %v1681_v34   ;;  %v1911_v19 = vld [vmem:[%s6001_s27 + $0xa0] sm:$0xff]  ;;  %v1896_v20 = vld [vmem:[%s6001_s27 + $0x28] sm:$0xff]  ;;  %v1914_v23 = vld [vmem:[%s6001_s27 + $0xb8] sm:$0xff] }
 0x416   : > { %4735 = vmatpush3.bf16.xpose.msra.mxu1 %v1369_v35  ;;  %v1895_v22 = vld [vmem:[%s6001_s27 + $0x20] sm:$0xff]  ;;  %v1913_v24 = vld [vmem:[%s6001_s27 + $0xb0] sm:$0xff]  ;;  %v1898_v52 = vld [vmem:[%s6001_s27 + $0x38] sm:$0xff] }
 0x417   : > { %v1897_v58 = vld [vmem:[%s6001_s27 + $0x30] sm:$0xff]  ;;  %v1916_v26 = vld [vmem:[%s6001_s27 + $0xc8] sm:$0xff]  ;;  %v1915_v27 = vld [vmem:[%s6001_s27 + $0xc0] sm:$0xff] }
 0x418   : > { %v1900_v28 = vld [vmem:[%s6001_s27 + $0x48] sm:$0xff]  ;;  %v1899_v29 = vld [vmem:[%s6001_s27 + $0x40] sm:$0xff]  ;;  %v1918_v31 = vld [vmem:[%s6001_s27 + $0xd8] sm:$0xff] }
 0x419   : > { %v1917_v32 = vld [vmem:[%s6001_s27 + $0xd0] sm:$0xff]  ;;  %v1902_v11 = vld [vmem:[%s6001_s27 + $0x58] sm:$0xff]  ;;  %v1920_v33 = vld [vmem:[%s6001_s27 + $0xe8] sm:$0xff] }
 0x41a   : > { %v1901_v15 = vld [vmem:[%s6001_s27 + $0x50] sm:$0xff]  ;;  %v1919_v51 = vld [vmem:[%s6001_s27 + $0xe0] sm:$0xff]  ;;  %v1904_v59 = vld [vmem:[%s6001_s27 + $0x68] sm:$0xff] }
 0x41b   : > { %v1903_v34 = vld [vmem:[%s6001_s27 + $0x60] sm:$0xff]  ;;  %v1922_v35 = vld [vmem:[%s6001_s27 + $0xf8] sm:$0xff]  ;;  %v1921_v57 = vld [vmem:[%s6001_s27 + $0xf0] sm:$0xff] }
 0x41c   : > { %v1906_v37 = vld [vmem:[%s6001_s27 + $0x78] sm:$0xff] }
 0x41d   : > { %4737 = vmatmul.mubr.bf16.vlgmr.msra.gmra.mrb[0].mxu1 %v1361_v6 }
 0x420   : > { %1413 = vmax.xlane.f32.xlu0 %v5771_v62  ;;  %v1682_v62 = vld [vmem:[%s5956_s23 + $0x8] sm:$0xff]  ;;  %s6591_s23 = sld [smem:[#allocation25_spill]] }
 0x436   : > { %1453 = vrot.lane.b32.xlu0 %v4316_v21, %s5391_s21  ;;  %v1905_v21 = vld [vmem:[%s6001_s27 + $0x70] sm:$0xff]  ;;  %s4446_s21 = sshll.u32 %s6616_s28, 7 }
 0x437   : > { %s6078_s7 = scalar_lea.vmem %s6590_s16, %s4446_s21  ;;  %s6104_s10 = scalar_lea.vmem %s6591_s23, %s4446_s21 }
 0x438   : > { %s4449_s21 = sshll.u32 %s6612_s29, 5 }
 0x43a   : > { %1692 = vperm.xlu0 %4987, %v1682_v62   ;;  %v1929_v62 = vld [vmem:[%s6001_s27 + $0x130] sm:$0xff] }
 0x43d   : > { %v1412_v6 = vpop.xlane.xlu1 %1411 }
 0x473   : > { %v1452_v60 = vpop.permute.xlu0 %1451 }
 0x474   : > { %4742 = vmatprep.mubr.msk.bf16.mxu0 %vm1095_vm0, %v1452_v60  ;;  %v1940_v60 = vld [vmem:[%s6001_s27 + $0x188] sm:$0xff] }
 0x47f   : > { %v1599_v25 = vpop.permute.xlu1 %1598 }
 0x483   : > { %v1601_v61 = vpop.permute.xlu1 %1600 }
 0x4ad   : > { %v1414_v40 = vpop.xlane.xlu0 %1413 }
 0x4ae   : > { %v1587_v30 = vpack.c.bf16 %v1414_v40, %v1412_v6  ;;  %v1926_v40 = vld [vmem:[%s6001_s27 + $0x118] sm:$0xff]  ;;  %v1943_v6 = vld [vmem:[%s6001_s27 + $0x1a0] sm:$0xff] }
 0x4b1   : > { %v1454_v41 = vpop.permute.xlu0 %1453 }
 0x4f0   : > { %v1404_v2 = vpop.f32.mrb[0].mxu1 }
 0x4f1   : > { %v4738_v0 = vpop.f32.mrb[1].mxu1 }
 0x4f2   : > { %v1407_v17 = vpop.f32.mrb[2].mxu1  ;;  %v1924_v0 = vld [vmem:[%s6001_s27 + $0x108] sm:$0xff] }
 0x4f3   : > { %v1440_v38 = vpack.c.bf16 %v1407_v17, %v1404_v2  ;;  %v4739_v39 = vpop.f32.mrb[3].mxu1  ;;  %v1939_v2 = vld [vmem:[%s6001_s27 + $0x180] sm:$0xff] }
 0x4f4   : > { %v1923_v17 = vld [vmem:[%s6001_s27 + $0x100] sm:$0xff]  ;;  %v1941_v39 = vld [vmem:[%s6001_s27 + $0x190] sm:$0xff] }
 0x4f5   : > { %4740 = vmatprep.subr.bf16.mxu0 %v1440_v38 }
 0x4f6   : > { %4741 = vmatpush3.bf16.msra.mxu0 %v1440_v38  ;;  %v1942_v38 = vld [vmem:[%s6001_s27 + $0x198] sm:$0xff] }
 0x4f7   : > { %4746 = vmatprep.subr.bf16.mxu0 %v1419_v63 }
 0x4f9   : > { %4743 = vmatmul.mubr.msk.bf16.vlgmr.msra.gmra.mrb[16].mxu0 %vm1095_vm0, %v1454_v41  ;;  %v1928_v41 = vld [vmem:[%s6001_s27 + $0x128] sm:$0xff] }
 0x4fa   : > { %4747 = vmatpush3.bf16.msra.mxu0 %v1419_v63  ;;  %4748 = vmatprep.mubr.msk.bf16.mxu0 %vm1095_vm0, %v4319_v1  ;;  %v1925_v63 = vld [vmem:[%s6001_s27 + $0x110] sm:$0xff]  ;;  %v1944_v1 = vld [vmem:[%s6001_s27 + $0x1a8] sm:$0xff] }
 0x4fb   : > { %4752 = vmatprep.subr.bf16.mxu0 %v1587_v30 }
 0x505   : > { %4749 = vmatmul.mubr.msk.bf16.vlgmr.msra.gmra.mrb[16].mxu0 %vm1095_vm0, %v4320_v43  ;;  %v1946_v43 = vld [vmem:[%s6001_s27 + $0x1b8] sm:$0xff] }
 0x506   : > { %4753 = vmatpush3.bf16.msra.mxu0 %v1587_v30  ;;  %4754 = vmatprep.mubr.msk.bf16.mxu0 %vm1095_vm0, %v1599_v25  ;;  %v1927_v30 = vld [vmem:[%s6001_s27 + $0x120] sm:$0xff]  ;;  %v1945_v25 = vld [vmem:[%s6001_s27 + $0x1b0] sm:$0xff] }
 0x50d   : > { %4755 = vmatmul.mubr.msk.bf16.vlgmr.msra.gmra.mrb[20].mxu0 %vm1095_vm0, %v1601_v61  ;;  %v1930_v61 = vld [vmem:[%s6001_s27 + $0x138] sm:$0xff] }
 0x50e   : > { %4762 = vmatprep.mubr.msk.bf16.mxu0 %vm1757_vm2, %v5020_v9 }
 0x5d8   : > { %v5982_v3 = vpop.f32.mrb[16].mxu0 }
 0x5d9   : > { %v5984_v5 = vpop.f32.mrb[17].mxu0 }
 0x5da   : > { %v5986_v44 = vpop.f32.mrb[18].mxu0 }
 0x5db   : > { %v5988_v4 = vpop.f32.mrb[19].mxu0 }
 0x5e0   : > { %v4756_v7 = vpop.f32.mrb[20].mxu0 }
 0x5e1   : > { %v1642_v45 = vpop.f32.mrb[21].mxu0 }
 0x5e2   : > { %1659 = vperm.xlu0 %4987, %v1642_v45   ;;  %v4757_v46 = vpop.f32.mrb[22].mxu0  ;;  %v1947_v45 = vld [vmem:[%s6001_s27 + $0x1c0] sm:$0xff] }
 0x5e3   : > { %v1645_v48 = vpop.f32.mrb[23].mxu0 }
 0x5e4   : > { %1664 = vperm.xlu1 %4986, %v1645_v48   ;;  %v1931_v48 = vld [vmem:[%s6001_s27 + $0x140] sm:$0xff] }
 0x5e6   : > { %1674 = vperm.xlu0 %4987, %v4757_v46   ;;  %v1932_v46 = vld [vmem:[%s6001_s27 + $0x148] sm:$0xff] }
 0x5e8   : > { %1669 = vperm.xlu1 %4986, %v4756_v7   ;;  %v1948_v7 = vld [vmem:[%s6001_s27 + $0x1c8] sm:$0xff] }
 0x5ea   : > { %1702 = vperm.xlu0 %4987, %v1684_v50   ;;  %v1693_v50 = vpop.permute.xlu0 %1692 }
 0x5ec   : > { %1697 = vperm.xlu1 %4986, %v1683_v54   ;;  %v1950_v54 = vld [vmem:[%s6001_s27 + $0x1d8] sm:$0xff] }
 0x5ee   : > { %1734 = vperm.xlu0 %4987, %v1724_v42   ;;  %v1949_v42 = vld [vmem:[%s6001_s27 + $0x1d0] sm:$0xff] }
 0x5f0   : > { %1729 = vperm.xlu1 %4986, %v1723_v47   ;;  %v1688_v47 = vpop.permute.xlu1 %1687 }
 0x5f2   : > { %1744 = vperm.xlu0 %4987, %v1726_v36   ;;  %v1934_v36 = vld [vmem:[%s6001_s27 + $0x158] sm:$0xff] }
 0x5f4   : > { %1739 = vperm.xlu1 %4986, %v1725_v55  }
 0x5f6   : > { %2042 = vperm.xlu0 %4987, %v1908_v53   ;;  %v1933_v53 = vld [vmem:[%s6001_s27 + $0x150] sm:$0xff] }
 0x5f8   : > { %2037 = vperm.xlu1 %4986, %v1907_v8  }
 0x5fa   : > { %1962 = vperm.xlu0 %4987, %v1892_v10   ;;  %v1952_v10 = vld [vmem:[%s6001_s27 + $0x1e8] sm:$0xff] }
 0x5fc   : > { %1957 = vperm.xlu1 %4986, %v1891_v13  }
 0x5fe   : > { %2052 = vperm.xlu0 %4987, %v1910_v56  }
 0x600   : > { %2047 = vperm.xlu1 %4986, %v1909_v14  }
 0x602   : > { %1972 = vperm.xlu0 %4987, %v1894_v49   ;;  %v1951_v49 = vld [vmem:[%s6001_s27 + $0x1e0] sm:$0xff] }
 0x604   : > { %1967 = vperm.xlu1 %4986, %v1893_v16  }
 0x606   : > { %2062 = vperm.xlu0 %4987, %v1912_v18  }
 0x608   : > { %2057 = vperm.xlu1 %4986, %v1911_v19  }
 0x60a   : > { %1982 = vperm.xlu0 %4987, %v1896_v20   ;;  %v1936_v20 = vld [vmem:[%s6001_s27 + $0x168] sm:$0xff] }
 0x60c   : > { %1977 = vperm.xlu1 %4986, %v1895_v22  }
 0x60e   : > { %2072 = vperm.xlu0 %4987, %v1914_v23  }
 0x610   : > { %2067 = vperm.xlu1 %4986, %v1913_v24   ;;  %v1935_v24 = vld [vmem:[%s6001_s27 + $0x160] sm:$0xff] }
 0x612   : > { %1992 = vperm.xlu0 %4987, %v1898_v52  }
 0x614   : > { %1987 = vperm.xlu1 %4986, %v1897_v58  }
 0x616   : > { %2082 = vperm.xlu0 %4987, %v1916_v26  }
 0x618   : > { %2077 = vperm.xlu1 %4986, %v1915_v27  }
 0x61a   : > { %2002 = vperm.xlu0 %4987, %v1900_v28   ;;  %v1954_v28 = vld [vmem:[%s6001_s27 + $0x1f8] sm:$0xff] }
 0x61c   : > { %1997 = vperm.xlu1 %4986, %v1899_v29  }
 0x61e   : > { %2092 = vperm.xlu0 %4987, %v1918_v31  }
 0x620   : > { %2087 = vperm.xlu1 %4986, %v1917_v32  }
 0x622   : > { %2012 = vperm.xlu0 %4987, %v1902_v11  }
 0x624   : > { %2007 = vperm.xlu1 %4986, %v1901_v15   ;;  %v1938_v15 = vld [vmem:[%s6001_s27 + $0x178] sm:$0xff] }
 0x626   : > { %2102 = vperm.xlu0 %4987, %v1920_v33  }
 0x628   : > { %2097 = vperm.xlu1 %4986, %v1919_v51   ;;  %v1937_v51 = vld [vmem:[%s6001_s27 + $0x170] sm:$0xff] }
 0x62a   : > { %2022 = vperm.xlu0 %4987, %v1904_v59  }
 0x62c   : > { %2017 = vperm.xlu1 %4986, %v1903_v34   ;;  %v3013_v34 = vld [vmem:[%s6078_s7 + $0x8] sm:$0xff] }
 0x62e   : > { %2112 = vperm.xlu0 %4987, %v1922_v35   ;;  %v5021_v35 = vld [vmem:[%s5726_s24 + $0x8] sm:$0xff]   ;;  %s4448_s24 = sshll.u32 %s6616_s28, 6 }
 0x62f   : > { %s6109_s9 = scalar_lea.vmem %s6592_s11, %s4448_s24 }
 0x630   : > { %2107 = vperm.xlu1 %4986, %v1921_v57   ;;  %v3012_v57 = vld [vmem:[%s6078_s7] sm:$0xff] }
 0x632   : > { %2032 = vperm.xlu0 %4987, %v1906_v37   ;;  %v3015_v37 = vld [vmem:[%s6078_s7 + $0x18] sm:$0xff] }
 0x634   : > { %2027 = vperm.xlu1 %4986, %v1905_v21   ;;  %v3014_v21 = vld [vmem:[%s6078_s7 + $0x10] sm:$0xff] }
 0x636   : > { %2202 = vperm.xlu0 %4987, %v1940_v60   ;;  %v3017_v60 = vld [vmem:[%s6078_s7 + $0x28] sm:$0xff] }
 0x638   : > { %2197 = vperm.xlu1 %4986, %v1939_v2   ;;  %v3016_v2 = vld [vmem:[%s6078_s7 + $0x20] sm:$0xff] }
 0x63a   : > { %2122 = vperm.xlu0 %4987, %v1924_v0   ;;  %v3019_v0 = vld [vmem:[%s6078_s7 + $0x38] sm:$0xff] }
 0x63c   : > { %2117 = vperm.xlu1 %4986, %v1923_v17   ;;  %v3018_v17 = vld [vmem:[%s6078_s7 + $0x30] sm:$0xff] }
 0x63e   : > { %2212 = vperm.xlu0 %4987, %v1942_v38   ;;  %v3021_v38 = vld [vmem:[%s6078_s7 + $0x48] sm:$0xff] }
 0x640   : > { %2207 = vperm.xlu1 %4986, %v1941_v39   ;;  %v3020_v39 = vld [vmem:[%s6078_s7 + $0x40] sm:$0xff] }
 0x642   : > { %2132 = vperm.xlu0 %4987, %v1926_v40   ;;  %v3023_v40 = vld [vmem:[%s6078_s7 + $0x58] sm:$0xff] }
 0x644   : > { %2127 = vperm.xlu1 %4986, %v1925_v63   ;;  %v3022_v63 = vld [vmem:[%s6078_s7 + $0x50] sm:$0xff] }
 0x646   : > { %2222 = vperm.xlu0 %4987, %v1944_v1   ;;  %v3025_v1 = vld [vmem:[%s6078_s7 + $0x68] sm:$0xff] }
 0x648   : > { %2217 = vperm.xlu1 %4986, %v1943_v6   ;;  %v3024_v6 = vld [vmem:[%s6078_s7 + $0x60] sm:$0xff] }
 0x64a   : > { %2142 = vperm.xlu0 %4987, %v1928_v41   ;;  %v3027_v41 = vld [vmem:[%s6078_s7 + $0x78] sm:$0xff] }
 0x64c   : > { %2137 = vperm.xlu1 %4986, %v1927_v30   ;;  %v3026_v30 = vld [vmem:[%s6078_s7 + $0x70] sm:$0xff] }
 0x64e   : > { %2232 = vperm.xlu0 %4987, %v1946_v43   ;;  %v3519_v43 = vld [vmem:[%s6104_s10 + $0x8] sm:$0xff] }
 0x650   : > { %2227 = vperm.xlu1 %4986, %v1945_v25   ;;  %v4455_v25 = vld [vmem:[%s6109_s9] sm:$0xff]  }
 0x652   : > { %2152 = vperm.xlu0 %4987, %v1930_v61   ;;  %v3518_v61 = vld [vmem:[%s6104_s10] sm:$0xff] }
 0x654   : > { %2147 = vperm.xlu1 %4986, %v1929_v62   ;;  %v4456_v62 = vunpack.c.l.bf16 %v4455_v25 }
 0x656   : > { %2242 = vperm.xlu0 %4987, %v1948_v7   ;;  %v4457_v7 = vunpack.c.h.bf16 %v4455_v25 }
 0x658   : > { %2237 = vperm.xlu1 %4986, %v1947_v45   ;;  %v3521_v45 = vld [vmem:[%s6104_s10 + $0x18] sm:$0xff] }
 0x65a   : > { %2162 = vperm.xlu0 %4987, %v1932_v46   ;;  %v4486_v46 = vld [vmem:[%s6109_s9 + $0x8] sm:$0xff]  }
 0x65c   : > { %2157 = vperm.xlu1 %4986, %v1931_v48   ;;  %v3520_v48 = vld [vmem:[%s6104_s10 + $0x10] sm:$0xff] }
 0x65e   : > { %2252 = vperm.xlu0 %4987, %v1950_v54   ;;  %v4460_v54 = vunpack.c.l.bf16 %v4486_v46 }
 0x660   : > { %2247 = vperm.xlu1 %4986, %v1949_v42   ;;  %v4461_v42 = vunpack.c.h.bf16 %v4486_v46 }
 0x661   : > { %v1660_v55 = vpop.permute.xlu0 %1659 }
 0x662   : > { %v1677_v8 = vadd.f32 %v1660_v55, %v5984_v5  ;;  %2172 = vperm.xlu0 %4987, %v1934_v36   ;;  %v4993_v36 = vpack.i.bf16 %v4461_v42, %v4460_v54  ;;  %v3523_v55 = vld [vmem:[%s6104_s10 + $0x28] sm:$0xff] }
 0x663   : > { %v1665_v9 = vpop.permute.xlu1 %1664 }
 0x664   : > { %v1705_v13 = vadd.f32 %v1688_v47, %v1677_v8  ;;  %v1678_v56 = vadd.f32 %v1665_v9, %v5988_v4  ;;  %2167 = vperm.xlu1 %4986, %v1933_v53   ;;  %v3522_v47 = vld [vmem:[%s6104_s10 + $0x20] sm:$0xff]  ;;  %v4487_v53 = vld [vmem:[%s6109_s9 + $0x10] sm:$0xff]   ;;  %v3525_v8 = vld [vmem:[%s6104_s10 + $0x38] sm:$0xff] }
 0x665   : > { %v1675_v14 = vpop.permute.xlu0 %1674  ;;  %v4488_v9 = vld [vmem:[%s6109_s9 + $0x18] sm:$0xff]  }
 0x666   : > { %v1709_v16 = vmul.f32 0.01, %v1705_v13  ;;  %v1706_v18 = vadd.f32 %v1693_v50, %v1678_v56  ;;  %2262 = vperm.xlu0 %4987, %v1952_v10   ;;  %v1680_v5 = vadd.f32 %v5986_v44, %v1675_v14  ;;  %v1953_v44 = vld [vmem:[%s6001_s27 + $0x1f0] sm:$0xff]  ;;  %v4988_v50 = vpack.i.bf16 %v4457_v7, %v4456_v62  ;;  %s933_s27 = scalar_lea.vmem %s6593_s1, %s6616_s28  ;;  %s6594_s28 = sld [smem:[#allocation28_spill]] }
 0x667   : > { %v1670_v19 = vpop.permute.xlu1 %1669  ;;  %v4464_v10 = vunpack.c.l.bf16 %v4487_v53  ;;  %v3524_v56 = vld [vmem:[%s6104_s10 + $0x30] sm:$0xff]  ;;  %v4468_v14 = vunpack.c.l.bf16 %v4488_v9 }
 0x668   : > { %v1710_v22 = vmul.f32 0.01, %v1706_v18  ;;  %2257 = vperm.xlu1 %4986, %v1951_v49   ;;  %v1713_v52 = vmax.f32 %v1705_v13, %v1709_v16  ;;  %v1679_v4 = vadd.f32 %v5982_v3, %v1670_v19  ;;  %v4465_v13 = vunpack.c.h.bf16 %v4487_v53  ;;  %v3526_v16 = vld [vmem:[%s6104_s10 + $0x40] sm:$0xff] }
 0x669   : > { %v1703_v23 = vpop.permute.xlu0 %1702  ;;  %v4469_v49 = vunpack.c.h.bf16 %v4488_v9  ;;  %v5023_v9 = vld [vmem:[%s5917_s26 + $0x8] sm:$0xff]  }
 0x66a   : > { %v1714_v58 = vmax.f32 %v1706_v18, %v1710_v22  ;;  %v1708_v26 = vadd.f32 %v1703_v23, %v1680_v5  ;;  %2182 = vperm.xlu0 %4987, %v1936_v20   ;;  %v4998_v20 = vpack.i.bf16 %v4465_v13, %v4464_v10  ;;  %v3527_v5 = vld [vmem:[%s6104_s10 + $0x48] sm:$0xff]  ;;  %v4489_v23 = vld [vmem:[%s6109_s9 + $0x20] sm:$0xff]   ;;  %v5024_v10 = vld [vmem:[%s5917_s26 + $0x10] sm:$0xff]  }
 0x66b   : > { %v1698_v27 = vpop.permute.xlu1 %1697  ;;  %v5003_v22 = vpack.i.bf16 %v4469_v49, %v4468_v14  ;;  %v5025_v13 = vld [vmem:[%s5917_s26 + $0x18] sm:$0xff]   ;;  %v5027_v14 = vld [vmem:[%s5917_s26 + $0x28] sm:$0xff]   ;;  %v5028_v49 = vld [vmem:[%s5917_s26 + $0x30] sm:$0xff]  }
 0x66c   : > { %v1712_v29 = vmul.f32 0.01, %v1708_v26  ;;  %v1707_v31 = vadd.f32 %v1698_v27, %v1679_v4  ;;  %2177 = vperm.xlu1 %4986, %v1935_v24   ;;  %v1721_v32 = vpack.c.bf16 %v1714_v58, %v1713_v52  ;;  %v3529_v58 = vld [vmem:[%s6104_s10 + $0x58] sm:$0xff]  ;;  %v4490_v4 = vld [vmem:[%s6109_s9 + $0x28] sm:$0xff]   ;;  %v4473_v27 = vunpack.c.h.bf16 %v4489_v23  ;;  %s940_s16 = scalar_lea.vmem %s6594_s28, %s4449_s21 }
 0x66d   : > { %v6125_v18 = vpop.permute.xlu0 %1734 }
 0x66e   : > { %v1711_v11 = vmul.f32 0.01, %v1707_v31  ;;  %2272 = vperm.xlu0 %4987, %v1954_v28   ;;  %4758 = vmatprep.subr.bf16.mxu0 %v1721_v32  ;;  %v1716_v3 = vmax.f32 %v1708_v26, %v1712_v29  ;;  %v4472_v26 = vunpack.c.l.bf16 %v4489_v23  ;;  %v3528_v28 = vld [vmem:[%s6104_s10 + $0x50] sm:$0xff]  ;;  %v4476_v29 = vunpack.c.l.bf16 %v4490_v4  ;;  %v5035_v23 = vld [vmem:[%s5917_s26 + $0x68] sm:$0xff]  }
 0x66f   : > { %4759 = vmatpush3.bf16.msra.mxu0 %v1721_v32  ;;  %v1730_v19 = vpop.permute.xlu1 %1729  ;;  %v3530_v32 = vld [vmem:[%s6104_s10 + $0x60] sm:$0xff] }
 0x670   : > { %v1715_v33 = vmax.f32 %v1707_v31, %v1711_v11  ;;  %2267 = vperm.xlu1 %4986, %v1953_v44   ;;  %v4477_v31 = vunpack.c.h.bf16 %v4490_v4  ;;  %v5039_v4 = vld [vmem:[%s5917_s26 + $0x88] sm:$0xff]  }
 0x671   : > { %v1745_v24 = vpop.permute.xlu0 %1744 }
 0x672   : > { %2192 = vperm.xlu0 %4987, %v1938_v15   ;;  %v1722_v59 = vpack.c.bf16 %v1716_v3, %v1715_v33  ;;  %v5008_v15 = vpack.i.bf16 %v4473_v27, %v4472_v26  ;;  %v5013_v3 = vpack.i.bf16 %v4477_v31, %v4476_v29  ;;  %v3531_v33 = vld [vmem:[%s6104_s10 + $0x68] sm:$0xff]  ;;  %v5040_v26 = vld [vmem:[%s5917_s26 + $0x90] sm:$0xff]   ;;  %v5041_v27 = vld [vmem:[%s5917_s26 + $0x98] sm:$0xff]  }
 0x673   : > { %v1740_v52 = vpop.permute.xlu1 %1739  ;;  %v5043_v29 = vld [vmem:[%s5917_s26 + $0xa8] sm:$0xff]   ;;  %v5044_v31 = vld [vmem:[%s5917_s26 + $0xb0] sm:$0xff]  }
 0x674   : > { %2187 = vperm.xlu1 %4986, %v1937_v51   ;;  %4760 = vmatprep.subr.bf16.mxu0 %v1722_v59 }
 0x675   : > { %4761 = vmatpush3.bf16.msra.mxu0 %v1722_v59  ;;  %v6133_v44 = vpop.permute.xlu0 %2042 }
 0x676   : > { %3035 = vperm.xlu0 %4987, %v3013_v34   ;;  %v3533_v34 = vld [vmem:[%s6104_s10 + $0x78] sm:$0xff] }
 0x677   : > { %v6135_v11 = vpop.permute.xlu1 %2037 }
 0x678   : > { %3030 = vperm.xlu1 %4986, %v3012_v57   ;;  %4763 = vmatmul.mubr.msk.bf16.vlgmr.msra.gmra.mrb[24].mxu0 %vm1757_vm2, %v5021_v35  ;;  %v4491_v35 = vld [vmem:[%s6109_s9 + $0x30] sm:$0xff]  }
 0x679   : > { %v6138_v51 = vpop.permute.xlu0 %1962  ;;  %v3532_v57 = vld [vmem:[%s6104_s10 + $0x70] sm:$0xff] }
 0x67a   : > { %3045 = vperm.xlu0 %4987, %v3015_v37   ;;  %v4481_v37 = vunpack.c.h.bf16 %v4491_v35 }
 0x67b   : > { %v6140_v59 = vpop.permute.xlu1 %1957 }
 0x67c   : > { %3040 = vperm.xlu1 %4986, %v3014_v21   ;;  %v4492_v21 = vld [vmem:[%s6109_s9 + $0x38] sm:$0xff]  }
 0x67e   : > { %3055 = vperm.xlu0 %4987, %v3017_v60   ;;  %v6146_v60 = vpop.permute.xlu0 %2052 }
 0x680   : > { %3050 = vperm.xlu1 %4986, %v3016_v2   ;;  %v6148_v2 = vpop.permute.xlu1 %2047 }
 0x682   : > { %3065 = vperm.xlu0 %4987, %v3019_v0   ;;  %v4480_v0 = vunpack.c.l.bf16 %v4491_v35  ;;  %v5050_v35 = vld [vmem:[%s5917_s26 + $0xe0] sm:$0xff]  }
 0x684   : > { %3060 = vperm.xlu1 %4986, %v3018_v17   ;;  %v4485_v17 = vunpack.c.h.bf16 %v4492_v21 }
 0x686   : > { %3075 = vperm.xlu0 %4987, %v3021_v38   ;;  %v4484_v38 = vunpack.c.l.bf16 %v4492_v21  ;;  %v5053_v21 = vld [vmem:[%s5917_s26 + $0xf8] sm:$0xff]  }
 0x688   : > { %3070 = vperm.xlu1 %4986, %v3020_v39   ;;  %v6150_v39 = vpop.permute.xlu0 %1972 }
 0x68a   : > { %3085 = vperm.xlu0 %4987, %v3023_v40   ;;  %v6152_v40 = vpop.permute.xlu1 %1967 }
 0x68c   : > { %3080 = vperm.xlu1 %4986, %v3022_v63   ;;  %v3940_v63 = vld [vmem:[%s933_s27] sm:$0x1] }
 0x68e   : > { %3095 = vperm.xlu0 %4987, %v3025_v1   ;;  %v6158_v1 = vpop.permute.xlu1 %2057 }
 0x690   : > { %3090 = vperm.xlu1 %4986, %v3024_v6   ;;  %v5022_v6 = vld [vmem:[%s5917_s26] sm:$0xff]  }
 0x691   : > { %4770 = vmatprep.mubr.msk.bf16.mxu0 %vm1757_vm2, %v5022_v6 }
 0x692   : > { %3105 = vperm.xlu0 %4987, %v3027_v41  }
 0x694   : > { %3100 = vperm.xlu1 %4986, %v3026_v30  }
 0x696   : > { %3541 = vperm.xlu0 %4987, %v3519_v43  }
 0x698   : > { %3536 = vperm.xlu1 %4986, %v3518_v61  }
 0x69a   : > { %3551 = vperm.xlu0 %4987, %v3521_v45  }
 0x69c   : > { %3546 = vperm.xlu1 %4986, %v3520_v48  }
 0x69e   : > { %4989 = vperm.xlu0 %4987, %v4988_v50  }
 0x6a0   : > { %3556 = vperm.xlu1 %4986, %v3522_v47  }
 0x6a2   : > { %4994 = vperm.xlu0 %4987, %v4993_v36  }
 0x6a4   : > { %3561 = vperm.xlu1 %4986, %v3523_v55  }
 0x6a6   : > { %3571 = vperm.xlu0 %4987, %v3525_v8  }
 0x6a8   : > { %3566 = vperm.xlu1 %4986, %v3524_v56   ;;  %v5026_v56 = vld [vmem:[%s5917_s26 + $0x20] sm:$0xff]  }
 0x6aa   : > { %3576 = vperm.xlu0 %4987, %v3526_v16   ;;  %v5029_v16 = vld [vmem:[%s5917_s26 + $0x38] sm:$0xff]  }
 0x6ac   : > { %4999 = vperm.xlu1 %4986, %v4998_v20   ;;  %v5032_v20 = vld [vmem:[%s5917_s26 + $0x50] sm:$0xff]  }
 0x6ae   : > { %5004 = vperm.xlu0 %4987, %v5003_v22   ;;  %v5033_v22 = vld [vmem:[%s5917_s26 + $0x58] sm:$0xff]  }
 0x6b0   : > { %3581 = vperm.xlu1 %4986, %v3527_v5   ;;  %v5034_v5 = vld [vmem:[%s5917_s26 + $0x60] sm:$0xff]  }
 0x6b2   : > { %3591 = vperm.xlu0 %4987, %v3529_v58   ;;  %v5038_v58 = vld [vmem:[%s5917_s26 + $0x80] sm:$0xff]  }
 0x6b4   : > { %3586 = vperm.xlu1 %4986, %v3528_v28   ;;  %v5042_v28 = vld [vmem:[%s5917_s26 + $0xa0] sm:$0xff]  }
 0x6b6   : > { %3596 = vperm.xlu0 %4987, %v3530_v32   ;;  %v5045_v32 = vld [vmem:[%s5917_s26 + $0xb8] sm:$0xff]  }
 0x6b8   : > { %5009 = vperm.xlu1 %4986, %v5008_v15   ;;  %v5046_v15 = vld [vmem:[%s5917_s26 + $0xc0] sm:$0xff]  }
 0x6ba   : > { %5014 = vperm.xlu0 %4987, %v5013_v3   ;;  %v5047_v3 = vld [vmem:[%s5917_s26 + $0xc8] sm:$0xff]  }
 0x6bc   : > { %3601 = vperm.xlu1 %4986, %v3531_v33   ;;  %v5048_v33 = vld [vmem:[%s5917_s26 + $0xd0] sm:$0xff]  }
 0x6be   : > { %3611 = vperm.xlu0 %4987, %v3533_v34   ;;  %v5049_v34 = vld [vmem:[%s5917_s26 + $0xd8] sm:$0xff]  }
 0x6c0   : > { %3606 = vperm.xlu1 %4986, %v3532_v57   ;;  %v5051_v57 = vld [vmem:[%s5917_s26 + $0xe8] sm:$0xff]  }
 0x6c2   : > { %3890 = vperm.xlu0 %4987, %v4481_v37   ;;  %v5052_v37 = vld [vmem:[%s5917_s26 + $0xf0] sm:$0xff]  }
 0x6c4   : > { %3885 = vperm.xlu1 %4986, %v4480_v0   ;;  %v6229_v0 = vpop.permute.xlu0 %2062 }
 0x6c6   : > { %3900 = vperm.xlu0 %4987, %v4485_v17   ;;  %v1978_v17 = vpop.permute.xlu1 %1977 }
 0x6c8   : > { %3895 = vperm.xlu1 %4986, %v4484_v38   ;;  %v1983_v38 = vpop.permute.xlu0 %1982 }
 0x6cc   : > { %3943 = vperm.xlu1 %4986, %v3940_v63   ;;  %v6231_v63 = vpop.permute.xlu1 %2067  ;;  %v6233_v6 = vpop.permute.xlu0 %2072 }
 0x74b   : > { %v4764_v41 = vpop.f32.mrb[24].mxu0 }
 0x74c   : > { %v1807_v30 = vadd.f32 %v4764_v41, %v1740_v52  ;;  %v1798_v43 = vpop.f32.mrb[25].mxu0  ;;  %v5037_v52 = vld [vmem:[%s5917_s26 + $0x78] sm:$0xff]   ;;  %v1988_v41 = vpop.permute.xlu1 %1987 }
 0x74d   : > { %v1799_v25 = vadd.f32 %v1798_v43, %v1730_v19  ;;  %v4765_v61 = vpop.f32.mrb[26].mxu0  ;;  %v5031_v19 = vld [vmem:[%s5917_s26 + $0x48] sm:$0xff]   ;;  %v5056_v43 = vld [vmem:[%s5732_s14 + $0x4] ss:$16 sps:$4 sm:$0xff]  }
 0x74e   : > { %v1815_v62 = vmul.f32 0.01, %v1807_v30  ;;  %v1810_v7 = vadd.f32 %v4765_v61, %v1745_v24  ;;  %v1801_v45 = vpop.f32.mrb[27].mxu0  ;;  %v5036_v24 = vld [vmem:[%s5917_s26 + $0x70] sm:$0xff]   ;;  %3300 = vmatprep.mubr.bf16.mxu1 %v5056_v43 }
 0x74f   : > { %v1813_v46 = vmul.f32 0.01, %v1799_v25  ;;  %v1802_v48 = vadd.f32 %v1801_v45, %v6125_v18  ;;  %v5030_v18 = vld [vmem:[%s5917_s26 + $0x40] sm:$0xff]   ;;  %s6595_s26 = sld [smem:[#allocation29_spill]] }
 0x750   : > { %v1819_v50 = vmax.f32 %v1807_v30, %v1815_v62  ;;  %v1816_v54 = vmul.f32 0.01, %v1810_v7  ;;  %v1993_v30 = vpop.permute.xlu0 %1992 }
 0x751   : > { %v1817_v42 = vmax.f32 %v1799_v25, %v1813_v46  ;;  %v1814_v47 = vmul.f32 0.01, %v1802_v48  ;;  %v6236_v25 = vpop.permute.xlu1 %2077 }
 0x752   : > { %1823 = vst [vmem:[%s940_s16 + $0x10] sm:$0xff] %v1819_v50  ;;  %v1820_v36 = vmax.f32 %v1810_v7, %v1816_v54 }
 0x753   : > { %1821 = vst [vmem:[%s940_s16] sm:$0xff] %v1817_v42  ;;  %v1818_v55 = vmax.f32 %v1802_v48, %v1814_v47 }
 0x754   : > { %1824 = vst [vmem:[%s940_s16 + $0x18] sm:$0xff] %v1820_v36  ;;  %v1890_v53 = vpack.c.bf16 %v1820_v36, %v1819_v50  ;;  %v6238_v61 = vpop.permute.xlu0 %2082 }
 0x755   : > { %1822 = vst [vmem:[%s940_s16 + $0x8] sm:$0xff] %v1818_v55  ;;  %v1889_v8 = vpack.c.bf16 %v1818_v55, %v1817_v42  ;;  %v1998_v62 = vpop.permute.xlu1 %1997  ;;  %s947_s7 = scalar_lea.vmem %s6595_s26, %s6612_s29 }
 0x757   : > { %4766 = vmatprep.subr.bf16.mxu0 %v1889_v8 }
 0x758   : > { %4767 = vmatpush3.bf16.msra.mxu0 %v1889_v8  ;;  %v6240_v7 = vpop.permute.xlu0 %2002 }
 0x759   : > { %4768 = vmatprep.subr.bf16.mxu0 %v1890_v53  ;;  %v6242_v45 = vpop.permute.xlu1 %2087 }
 0x75c   : > { %4769 = vmatpush3.bf16.msra.mxu0 %v1890_v53  ;;  %v6244_v46 = vpop.permute.xlu0 %2092 }
 0x75d   : > { %v2008_v48 = vpop.permute.xlu1 %2007 }
 0x75f   : > { %4771 = vmatmul.mubr.msk.bf16.vlgmr.msra.gmra.mrb[28].mxu0 %vm1757_vm2, %v5023_v9 }
 0x760   : > { %4774 = vmatprep.mubr.msk.bf16.mxu0 %vm1757_vm2, %v5024_v10  ;;  %v2013_v50 = vpop.permute.xlu0 %2012 }
 0x761   : > { %v6246_v54 = vpop.permute.xlu1 %2097 }
 0x764   : > { %v6248_v42 = vpop.permute.xlu0 %2102 }
 0x765   : > { %v6250_v47 = vpop.permute.xlu1 %2017 }
 0x767   : > { %4775 = vmatmul.mubr.msk.bf16.gmra.mrb[32].mxu0 %vm1757_vm2, %v5025_v13 }
 0x768   : > { %4778 = vmatprep.mubr.msk.bf16.mxu0 %vm1757_vm2, %v5026_v56  ;;  %v6252_v36 = vpop.permute.xlu0 %2022 }
 0x769   : > { %v6254_v55 = vpop.permute.xlu1 %2107 }
 0x76c   : > { %v6256_v53 = vpop.permute.xlu0 %2112 }
 0x76d   : > { %v6258_v8 = vpop.permute.xlu1 %2027 }
 0x76f   : > { %4779 = vmatmul.mubr.msk.bf16.gmra.mrb[36].mxu0 %vm1757_vm2, %v5027_v14 }
 0x770   : > { %4782 = vmatprep.mubr.msk.bf16.mxu0 %vm1757_vm2, %v5028_v49  ;;  %v6260_v9 = vpop.permute.xlu0 %2032 }
 0x771   : > { %v6262_v10 = vpop.permute.xlu1 %2197 }
 0x774   : > { %v6264_v13 = vpop.permute.xlu0 %2202 }
 0x777   : > { %4783 = vmatmul.mubr.msk.bf16.gmra.mrb[40].mxu0 %vm1757_vm2, %v5029_v16 }
 0x778   : > { %4786 = vmatprep.mubr.msk.bf16.mxu0 %vm1757_vm2, %v5030_v18 }
 0x77f   : > { %4787 = vmatmul.mubr.msk.bf16.gmra.mrb[44].mxu0 %vm1757_vm2, %v5031_v19 }
 0x780   : > { %4790 = vmatprep.mubr.msk.bf16.mxu0 %vm1757_vm2, %v5032_v20 }
 0x787   : > { %4791 = vmatmul.mubr.msk.bf16.gmra.mrb[48].mxu0 %vm1757_vm2, %v5033_v22 }
 0x788   : > { %4794 = vmatprep.mubr.msk.bf16.mxu0 %vm1757_vm2, %v5034_v5  ;;  %v6269_v5 = vpop.permute.xlu1 %2117 }
 0x78f   : > { %4795 = vmatmul.mubr.msk.bf16.gmra.mrb[52].mxu0 %vm1757_vm2, %v5035_v23 }
 0x790   : > { %4798 = vmatprep.mubr.msk.bf16.mxu0 %vm1757_vm2, %v5036_v24 }
 0x797   : > { %4799 = vmatmul.mubr.msk.bf16.gmra.mrb[56].mxu0 %vm1757_vm2, %v5037_v52 }
 0x798   : > { %4802 = vmatprep.mubr.msk.bf16.mxu0 %vm1757_vm2, %v5038_v58  ;;  %v6272_v58 = vpop.permute.xlu0 %2122 }
 0x79f   : > { %4803 = vmatmul.mubr.msk.bf16.gmra.mrb[60].mxu0 %vm1757_vm2, %v5039_v4 }
 0x7a0   : > { %4806 = vmatprep.mubr.msk.bf16.mxu0 %vm1757_vm2, %v5040_v26 }
 0x7a7   : > { %4807 = vmatmul.mubr.msk.bf16.gmra.mrb[64].mxu0 %vm1757_vm2, %v5041_v27 }
 0x7a8   : > { %4810 = vmatprep.mubr.msk.bf16.mxu0 %vm1757_vm2, %v5042_v28 }
 0x7af   : > { %4811 = vmatmul.mubr.msk.bf16.gmra.mrb[68].mxu0 %vm1757_vm2, %v5043_v29 }
 0x7b0   : > { %4814 = vmatprep.mubr.msk.bf16.mxu0 %vm1757_vm2, %v5044_v31 }
 0x7b7   : > { %4815 = vmatmul.mubr.msk.bf16.gmra.mrb[72].mxu0 %vm1757_vm2, %v5045_v32 }
 0x7b8   : > { %4818 = vmatprep.mubr.msk.bf16.mxu0 %vm1757_vm2, %v5046_v15 }
 0x7bf   : > { %4819 = vmatmul.mubr.msk.bf16.gmra.mrb[76].mxu0 %vm1757_vm2, %v5047_v3 }
 0x7c0   : > { %4822 = vmatprep.mubr.msk.bf16.mxu0 %vm1757_vm2, %v5048_v33 }
 0x7c7   : > { %4823 = vmatmul.mubr.msk.bf16.gmra.mrb[80].mxu0 %vm1757_vm2, %v5049_v34 }
 0x7c8   : > { %4826 = vmatprep.mubr.msk.bf16.mxu0 %vm1757_vm2, %v5050_v35 }
 0x7cf   : > { %4827 = vmatmul.mubr.msk.bf16.gmra.mrb[84].mxu0 %vm1757_vm2, %v5051_v57  ;;  %v6280_v57 = vpop.permute.xlu0 %2212 }
 0x7d0   : > { %4830 = vmatprep.mubr.msk.bf16.mxu0 %vm1757_vm2, %v5052_v37 }
 0x7d7   : > { %4831 = vmatmul.mubr.msk.bf16.gmra.mrb[88].mxu0 %vm1757_vm2, %v5053_v21 }
 0x832   : > { %v4772_v56 = vpop.f32.mrb[28].mxu0 }
 0x833   : > { %v2574_v14 = vadd.f32 %v4772_v56, %v6152_v40  ;;  %v2565_v49 = vpop.f32.mrb[29].mxu0 }
 0x834   : > { %v2566_v16 = vadd.f32 %v2565_v49, %v6140_v59  ;;  %v4773_v18 = vpop.f32.mrb[30].mxu0 }
 0x835   : > { %v2822_v19 = vmul.f32 0.01, %v2574_v14  ;;  %v2577_v20 = vadd.f32 %v4773_v18, %v6150_v39  ;;  %v2568_v22 = vpop.f32.mrb[31].mxu0  ;;  %v6276_v39 = vpop.permute.xlu1 %2207 }
 0x836   : > { %v2820_v23 = vmul.f32 0.01, %v2566_v16  ;;  %v2569_v24 = vadd.f32 %v2568_v22, %v6138_v51 }
 0x837   : > { %v2823_v52 = vmul.f32 0.01, %v2577_v20  ;;  %v2886_v26 = vmax.f32 %v2574_v14, %v2822_v19 }
 0x838   : > { %v2821_v4 = vmul.f32 0.01, %v2569_v24  ;;  %v2884_v40 = vmax.f32 %v2566_v16, %v2820_v23  ;;  %v6286_v23 = vpop.permute.xlu0 %2132 }
 0x839   : > { %v2887_v27 = vmax.f32 %v2577_v20, %v2823_v52  ;;  %v6282_v16 = vpop.permute.xlu1 %2127 }
 0x83a   : > { %v2885_v28 = vmax.f32 %v2569_v24, %v2821_v4  ;;  %v4776_v29 = vpop.f32.mrb[32].mxu0 }
 0x83b   : > { %v6274_v59 = vpack.c.bf16 %v2887_v27, %v2886_v26  ;;  %v2590_v31 = vadd.f32 %v4776_v29, %v1988_v41  ;;  %v2581_v32 = vpop.f32.mrb[33].mxu0 }
 0x83c   : > { %v6278_v15 = vpack.c.bf16 %v2885_v28, %v2884_v40  ;;  %v2582_v3 = vadd.f32 %v2581_v32, %v1978_v17  ;;  %v4777_v33 = vpop.f32.mrb[34].mxu0 }
 0x83d   : > { %v2826_v51 = vmul.f32 0.01, %v2590_v31  ;;  %v2593_v34 = vadd.f32 %v4777_v33, %v1993_v30  ;;  %v2584_v35 = vpop.f32.mrb[35].mxu0  ;;  %v6291_v29 = vpop.permute.xlu1 %2217 }
 0x83e   : > { %v2824_v37 = vmul.f32 0.01, %v2582_v3  ;;  %v2585_v21 = vadd.f32 %v2584_v35, %v1983_v38 }
 0x83f   : > { %v2827_v43 = vmul.f32 0.01, %v2593_v34  ;;  %v2890_v14 = vmax.f32 %v2590_v31, %v2826_v51 }
 0x840   : > { %v2825_v56 = vmul.f32 0.01, %v2585_v21  ;;  %v2888_v41 = vmax.f32 %v2582_v3, %v2824_v37 }
 0x841   : > { %v2891_v49 = vmax.f32 %v2593_v34, %v2827_v43 }
 0x842   : > { %v2889_v18 = vmax.f32 %v2585_v21, %v2825_v56  ;;  %v4780_v19 = vpop.f32.mrb[36].mxu0 }
 0x843   : > { %v6284_v20 = vpack.c.bf16 %v2891_v49, %v2890_v14  ;;  %v2606_v17 = vadd.f32 %v4780_v19, %v2008_v48  ;;  %v2597_v22 = vpop.f32.mrb[37].mxu0  ;;  %v6293_v48 = vpop.permute.xlu0 %2222 }
 0x844   : > { %v6288_v30 = vpack.c.bf16 %v2889_v18, %v2888_v41  ;;  %v2598_v24 = vadd.f32 %v2597_v22, %v1998_v62  ;;  %v4781_v52 = vpop.f32.mrb[38].mxu0  ;;  %v6302_v49 = vpop.permute.xlu1 %2137 }
 0x845   : > { %v2830_v38 = vmul.f32 0.01, %v2606_v17  ;;  %v2609_v4 = vadd.f32 %v4781_v52, %v2013_v50  ;;  %v2600_v26 = vpop.f32.mrb[39].mxu0 }
 0x846   : > { %v2828_v27 = vmul.f32 0.01, %v2598_v24  ;;  %v2601_v40 = vadd.f32 %v2600_v26, %v6240_v7 }
 0x847   : > { %v2831_v28 = vmul.f32 0.01, %v2609_v4  ;;  %v2894_v32 = vmax.f32 %v2606_v17, %v2830_v38  ;;  %v6305_v17 = vpop.permute.xlu0 %2142 }
 0x848   : > { %v2829_v31 = vmul.f32 0.01, %v2601_v40  ;;  %v2892_v33 = vmax.f32 %v2598_v24, %v2828_v27  ;;  %v6310_v27 = vpop.permute.xlu1 %2227 }
 0x849   : > { %v2895_v3 = vmax.f32 %v2609_v4, %v2831_v28 }
 0x84a   : > { %v2893_v51 = vmax.f32 %v2601_v40, %v2829_v31  ;;  %v4784_v34 = vpop.f32.mrb[40].mxu0 }
 0x84b   : > { %v6295_v35 = vpack.c.bf16 %v2895_v3, %v2894_v32  ;;  %v2622_v62 = vadd.f32 %v4784_v34, %v6258_v8  ;;  %v2613_v50 = vpop.f32.mrb[41].mxu0 }
 0x84c   : > { %v6298_v37 = vpack.c.bf16 %v2893_v51, %v2892_v33  ;;  %v2614_v7 = vadd.f32 %v2613_v50, %v6250_v47  ;;  %v4785_v21 = vpop.f32.mrb[42].mxu0  ;;  %v6316_v33 = vpop.permute.xlu0 %2232 }
 0x84d   : > { %v2834_v43 = vmul.f32 0.01, %v2622_v62  ;;  %v2625_v56 = vadd.f32 %v4785_v21, %v6260_v9  ;;  %v2616_v14 = vpop.f32.mrb[43].mxu0  ;;  %v6319_v21 = vpop.permute.xlu1 %2147 }
 0x84e   : > { %v2832_v41 = vmul.f32 0.01, %v2614_v7  ;;  %v2617_v18 = vadd.f32 %v2616_v14, %v6252_v36 }
 0x84f   : > { %v2835_v19 = vmul.f32 0.01, %v2625_v56  ;;  %v2898_v8 = vmax.f32 %v2622_v62, %v2834_v43 }
 0x850   : > { %v2833_v22 = vmul.f32 0.01, %v2617_v18  ;;  %v2896_v52 = vmax.f32 %v2614_v7, %v2832_v41 }
 0x851   : > { %v2899_v24 = vmax.f32 %v2625_v56, %v2835_v19 }
 0x852   : > { %v2897_v38 = vmax.f32 %v2617_v18, %v2833_v22  ;;  %v4788_v4 = vpop.f32.mrb[44].mxu0 }
 0x853   : > { %v6307_v47 = vpack.c.bf16 %v2899_v24, %v2898_v8  ;;  %v2638_v26 = vadd.f32 %v4788_v4, %v6148_v2  ;;  %v2629_v9 = vpop.f32.mrb[45].mxu0 }
 0x854   : > { %v6312_v40 = vpack.c.bf16 %v2897_v38, %v2896_v52  ;;  %v2630_v36 = vadd.f32 %v2629_v9, %v6135_v11  ;;  %v4789_v28 = vpop.f32.mrb[46].mxu0 }
 0x855   : > { %v2838_v31 = vmul.f32 0.01, %v2638_v26  ;;  %v2641_v32 = vadd.f32 %v4789_v28, %v6146_v60  ;;  %v2632_v3 = vpop.f32.mrb[47].mxu0  ;;  %v6322_v60 = vpop.permute.xlu0 %2152 }
 0x856   : > { %v2836_v51 = vmul.f32 0.01, %v2630_v36  ;;  %v2633_v34 = vadd.f32 %v2632_v3, %v6133_v44 }
 0x857   : > { %v2839_v62 = vmul.f32 0.01, %v2641_v32  ;;  %v2902_v2 = vmax.f32 %v2638_v26, %v2838_v31 }
 0x858   : > { %v2837_v50 = vmul.f32 0.01, %v2633_v34  ;;  %v2900_v43 = vmax.f32 %v2630_v36, %v2836_v51 }
 0x859   : > { %v2903_v7 = vmax.f32 %v2641_v32, %v2839_v62 }
 0x85a   : > { %v2901_v56 = vmax.f32 %v2633_v34, %v2837_v50  ;;  %v4792_v14 = vpop.f32.mrb[48].mxu0 }
 0x85b   : > { %v2654_v11 = vadd.f32 %v4792_v14, %v6231_v63  ;;  %v2645_v41 = vpop.f32.mrb[49].mxu0  ;;  %v2989_v18 = vpack.c.bf16 %v2903_v7, %v2902_v2  ;;  %v6328_v63 = vpop.permute.xlu1 %2237 }
 0x85c   : > { %v2646_v19 = vadd.f32 %v2645_v41, %v6158_v1  ;;  %v4793_v22 = vpop.f32.mrb[50].mxu0  ;;  %v2988_v8 = vpack.c.bf16 %v2901_v56, %v2900_v43  ;;  %v6330_v1 = vpop.permute.xlu0 %2242 }
 0x85d   : > { %v2842_v44 = vmul.f32 0.01, %v2654_v11  ;;  %v2657_v24 = vadd.f32 %v4793_v22, %v6233_v6  ;;  %v2648_v52 = vpop.f32.mrb[51].mxu0 }
 0x85e   : > { %v2840_v38 = vmul.f32 0.01, %v2646_v19  ;;  %v2649_v4 = vadd.f32 %v2648_v52, %v6229_v0  ;;  %4558 = vmatprep.subr.bf16.mxu1 %v2988_v8 }
 0x85f   : > { %v2843_v26 = vmul.f32 0.01, %v2657_v24  ;;  %4559 = vmatpush3.bf16.msra.mxu1 %v6278_v15  ;;  %v2906_v36 = vmax.f32 %v2654_v11, %v2842_v44  ;;  %v6336_v43 = vpop.permute.xlu1 %2157 }
 0x860   : > { %v2841_v9 = vmul.f32 0.01, %v2649_v4  ;;  %4560 = vmatprep.subr.bf16.mxu1 %v2989_v18  ;;  %v2904_v31 = vmax.f32 %v2646_v19, %v2840_v38 }
 0x861   : > { %v2907_v28 = vmax.f32 %v2657_v24, %v2843_v26 }
 0x862   : > { %v2905_v32 = vmax.f32 %v2649_v4, %v2841_v9  ;;  %v4796_v3 = vpop.f32.mrb[52].mxu0 }
 0x863   : > { %v2670_v6 = vadd.f32 %v4796_v3, %v6242_v45  ;;  %v2661_v51 = vpop.f32.mrb[53].mxu0  ;;  %4561 = vmatpush3.bf16.msra.mxu1 %v6274_v59  ;;  %v2991_v0 = vpack.c.bf16 %v2907_v28, %v2906_v36  ;;  %v6340_v45 = vpop.permute.xlu0 %2162 }
 0x864   : > { %v2662_v34 = vadd.f32 %v2661_v51, %v6236_v25  ;;  %v4797_v15 = vpop.f32.mrb[54].mxu0  ;;  %v2990_v62 = vpack.c.bf16 %v2905_v32, %v2904_v31 }
 0x865   : > { %v2846_v50 = vmul.f32 0.01, %v2670_v6  ;;  %v2673_v2 = vadd.f32 %v4797_v15, %v6244_v46  ;;  %v2664_v7 = vpop.f32.mrb[55].mxu0 }
 0x866   : > { %v2844_v56 = vmul.f32 0.01, %v2662_v34  ;;  %v2665_v14 = vadd.f32 %v2664_v7, %v6238_v61  ;;  %4562 = vmatprep.subr.bf16.mxu1 %v2990_v62  ;;  %v6344_v61 = vpop.permute.xlu1 %2247 }
 0x867   : > { %v2847_v11 = vmul.f32 0.01, %v2673_v2  ;;  %4563 = vmatpush3.bf16.msra.mxu1 %v6288_v30  ;;  %v2910_v25 = vmax.f32 %v2670_v6, %v2846_v50  ;;  %v6348_v9 = vpop.permute.xlu0 %2252 }
 0x868   : > { %v2845_v59 = vmul.f32 0.01, %v2665_v14  ;;  %4564 = vmatprep.subr.bf16.mxu1 %v2991_v0  ;;  %v2908_v18 = vmax.f32 %v2662_v34, %v2844_v56 }
 0x869   : > { %v2911_v41 = vmax.f32 %v2673_v2, %v2847_v11 }
 0x86a   : > { %v2909_v19 = vmax.f32 %v2665_v14, %v2845_v59  ;;  %v4800_v22 = vpop.f32.mrb[56].mxu0 }
 0x86b   : > { %v2686_v46 = vadd.f32 %v4800_v22, %v6254_v55  ;;  %v2677_v8 = vpop.f32.mrb[57].mxu0  ;;  %4565 = vmatpush3.bf16.msra.mxu1 %v6284_v20  ;;  %v2993_v44 = vpack.c.bf16 %v2911_v41, %v2910_v25  ;;  %v2173_v15 = vpop.permute.xlu0 %2172 }
 0x86c   : > { %v2678_v24 = vadd.f32 %v2677_v8, %v6246_v54  ;;  %v4801_v30 = vpop.f32.mrb[58].mxu0  ;;  %v2992_v52 = vpack.c.bf16 %v2909_v19, %v2908_v18  ;;  %v2168_v54 = vpop.permute.xlu1 %2167  ;;  %v5054_v19 = vld [vmem:[%s5732_s14] ss:$16 sps:$4 sm:$0xff]  }
 0x86d   : > { %v2850_v38 = vmul.f32 0.01, %v2686_v46  ;;  %v2689_v4 = vadd.f32 %v4801_v30, %v6256_v53  ;;  %v2680_v26 = vpop.f32.mrb[59].mxu0 }
 0x86e   : > { %v2848_v36 = vmul.f32 0.01, %v2678_v24  ;;  %v2681_v28 = vadd.f32 %v2680_v26, %v6248_v42  ;;  %4566 = vmatprep.subr.bf16.mxu1 %v2992_v52 }
 0x86f   : > { %v2851_v55 = vmul.f32 0.01, %v2689_v4  ;;  %4567 = vmatpush3.bf16.msra.mxu1 %v6298_v37  ;;  %v2914_v31 = vmax.f32 %v2686_v46, %v2850_v38  ;;  %v6360_v25 = vpop.permute.xlu0 %2262 }
 0x870   : > { %v2849_v20 = vmul.f32 0.01, %v2681_v28  ;;  %4568 = vmatprep.subr.bf16.mxu1 %v2993_v44  ;;  %v2912_v3 = vmax.f32 %v2678_v24, %v2848_v36 }
 0x871   : > { %v2915_v32 = vmax.f32 %v2689_v4, %v2851_v55 }
 0x872   : > { %v2913_v6 = vmax.f32 %v2681_v28, %v2849_v20  ;;  %v4804_v51 = vpop.f32.mrb[60].mxu0 }
 0x873   : > { %v2702_v53 = vadd.f32 %v4804_v51, %v6282_v16  ;;  %v2693_v0 = vpop.f32.mrb[61].mxu0  ;;  %4569 = vmatpush3.bf16.msra.mxu1 %v6295_v35  ;;  %v2995_v34 = vpack.c.bf16 %v2915_v32, %v2914_v31  ;;  %v6358_v16 = vpop.permute.xlu1 %2257 }
 0x874   : > { %v2694_v42 = vadd.f32 %v2693_v0, %v6269_v5  ;;  %v4805_v62 = vpop.f32.mrb[62].mxu0  ;;  %v2994_v50 = vpack.c.bf16 %v2913_v6, %v2912_v3  ;;  %v5059_v3 = vld [vmem:[%s5732_s14 + $0x20] ss:$16 sps:$4 sm:$0xff]  }
 0x875   : > { %v2854_v37 = vmul.f32 0.01, %v2702_v53  ;;  %v2705_v2 = vadd.f32 %v4805_v62, %v6286_v23  ;;  %v2696_v7 = vpop.f32.mrb[63].mxu0 }
 0x876   : > { %v2852_v56 = vmul.f32 0.01, %v2694_v42  ;;  %v2697_v14 = vadd.f32 %v2696_v7, %v6272_v58  ;;  %4570 = vmatprep.subr.bf16.mxu1 %v2994_v50 }
 0x877   : > { %v2855_v11 = vmul.f32 0.01, %v2705_v2  ;;  %4571 = vmatpush3.bf16.msra.mxu1 %v6312_v40  ;;  %v2918_v5 = vmax.f32 %v2702_v53, %v2854_v37  ;;  %v5057_v40 = vld [vmem:[%s5732_s14 + $0x24] ss:$16 sps:$4 sm:$0xff]   ;;  %v2178_v4 = vpop.permute.xlu1 %2177 }
 0x878   : > { %v2853_v35 = vmul.f32 0.01, %v2697_v14  ;;  %4572 = vmatprep.subr.bf16.mxu1 %v2995_v34  ;;  %v2916_v41 = vmax.f32 %v2694_v42, %v2852_v56  ;;  %v5060_v53 = vld [vmem:[%s5732_s14 + $0x44] ss:$16 sps:$4 sm:$0xff]  }
 0x879   : > { %v2919_v59 = vmax.f32 %v2705_v2, %v2855_v11 }
 0x87a   : > { %v2917_v23 = vmax.f32 %v2697_v14, %v2853_v35  ;;  %v4808_v18 = vpop.f32.mrb[64].mxu0 }
 0x87b   : > { %v6363_v22 = vpack.c.bf16 %v2919_v59, %v2918_v5  ;;  %v2718_v58 = vadd.f32 %v4808_v18, %v6319_v21  ;;  %v2709_v46 = vpop.f32.mrb[65].mxu0  ;;  %4573 = vmatpush3.bf16.msra.mxu1 %v6307_v47  ;;  %v2183_v47 = vpop.permute.xlu0 %2182 }
 0x87c   : > { %v6368_v8 = vpack.c.bf16 %v2917_v23, %v2916_v41  ;;  %v2710_v44 = vadd.f32 %v2709_v46, %v6302_v49  ;;  %v4809_v24 = vpop.f32.mrb[66].mxu0  ;;  %v6377_v0 = vpop.permute.xlu1 %2267  ;;  %v5062_v23 = vld [vmem:[%s5732_s14 + $0x40] ss:$16 sps:$4 sm:$0xff]  }
 0x87d   : > { %v2858_v30 = vmul.f32 0.01, %v2718_v58  ;;  %v2721_v52 = vadd.f32 %v4809_v24, %v6322_v60  ;;  %v2712_v38 = vpop.f32.mrb[67].mxu0 }
 0x87e   : > { %v2856_v26 = vmul.f32 0.01, %v2710_v44  ;;  %v2713_v36 = vadd.f32 %v2712_v38, %v6305_v17  ;;  %3301 = vmatmul.mubr.bf16.vlgmr.msra.gmra.mrb[4].mxu1 %v5054_v19 }
 0x87f   : > { %v2859_v21 = vmul.f32 0.01, %v2721_v52  ;;  %3308 = vmatprep.mubr.bf16.mxu1 %v5057_v40  ;;  %v2922_v55 = vmax.f32 %v2718_v58, %v2858_v30  ;;  %v6382_v2 = vpop.permute.xlu0 %2272  ;;  %v5063_v58 = vld [vmem:[%s5732_s14 + $0x64] ss:$16 sps:$4 sm:$0xff]  }
 0x880   : > { %v2857_v28 = vmul.f32 0.01, %v2713_v36  ;;  %v2920_v31 = vmax.f32 %v2710_v44, %v2856_v26  ;;  %v2188_v5 = vpop.permute.xlu1 %2187 }
 0x881   : > { %v2923_v20 = vmax.f32 %v2721_v52, %v2859_v21 }
 0x882   : > { %v2921_v49 = vmax.f32 %v2713_v36, %v2857_v28  ;;  %v4812_v32 = vpop.f32.mrb[68].mxu0 }
 0x883   : > { %v6374_v6 = vpack.c.bf16 %v2923_v20, %v2922_v55  ;;  %v2734_v60 = vadd.f32 %v4812_v32, %v2168_v54  ;;  %v2725_v51 = vpop.f32.mrb[69].mxu0  ;;  %v2193_v46 = vpop.permute.xlu0 %2192  ;;  %v5065_v32 = vld [vmem:[%s5732_s14 + $0x60] ss:$16 sps:$4 sm:$0xff]  }
 0x884   : > { %v6379_v34 = vpack.c.bf16 %v2921_v49, %v2920_v31  ;;  %v2726_v17 = vadd.f32 %v2725_v51, %v6336_v43  ;;  %v4813_v42 = vpop.f32.mrb[70].mxu0  ;;  %v5066_v51 = vld [vmem:[%s5732_s14 + $0x84] ss:$16 sps:$4 sm:$0xff]  }
 0x885   : > { %v2862_v62 = vmul.f32 0.01, %v2734_v60  ;;  %v2737_v50 = vadd.f32 %v4813_v42, %v2173_v15  ;;  %v2728_v37 = vpop.f32.mrb[71].mxu0 }
 0x886   : > { %v2860_v7 = vmul.f32 0.01, %v2726_v17  ;;  %v2729_v56 = vadd.f32 %v2728_v37, %v6340_v45  ;;  %3309 = vmatmul.mubr.bf16.gmra.mrb[8].mxu1 %v5059_v3 }
 0x887   : > { %v2863_v54 = vmul.f32 0.01, %v2737_v50  ;;  %3316 = vmatprep.mubr.bf16.mxu1 %v5060_v53  ;;  %v2926_v11 = vmax.f32 %v2734_v60, %v2862_v62 }
 0x888   : > { %v2861_v14 = vmul.f32 0.01, %v2729_v56  ;;  %v2924_v59 = vmax.f32 %v2726_v17, %v2860_v7 }
 0x889   : > { %v2927_v35 = vmax.f32 %v2737_v50, %v2863_v54 }
 0x88a   : > { %v2925_v43 = vmax.f32 %v2729_v56, %v2861_v14  ;;  %v4816_v41 = vpop.f32.mrb[72].mxu0 }
 0x88b   : > { %v6386_v18 = vpack.c.bf16 %v2927_v35, %v2926_v11  ;;  %v2750_v15 = vadd.f32 %v4816_v41, %v2188_v5  ;;  %v2741_v19 = vpop.f32.mrb[73].mxu0 }
 0x88c   : > { %v6389_v40 = vpack.c.bf16 %v2925_v43, %v2924_v59  ;;  %v2742_v45 = vadd.f32 %v2741_v19, %v2178_v4  ;;  %v4817_v44 = vpop.f32.mrb[74].mxu0 }
 0x88d   : > { %v2866_v24 = vmul.f32 0.01, %v2750_v15  ;;  %v2753_v30 = vadd.f32 %v4817_v44, %v2193_v46  ;;  %v2744_v52 = vpop.f32.mrb[75].mxu0 }
 0x88e   : > { %v2864_v38 = vmul.f32 0.01, %v2742_v45  ;;  %v2745_v26 = vadd.f32 %v2744_v52, %v2183_v47  ;;  %3317 = vmatmul.mubr.bf16.gmra.mrb[12].mxu1 %v5062_v23 }
 0x88f   : > { %v2867_v36 = vmul.f32 0.01, %v2753_v30  ;;  %3324 = vmatprep.mubr.bf16.mxu1 %v5063_v58  ;;  %v2930_v28 = vmax.f32 %v2750_v15, %v2866_v24 }
 0x890   : > { %v2865_v21 = vmul.f32 0.01, %v2745_v26  ;;  %v2928_v20 = vmax.f32 %v2742_v45, %v2864_v38 }
 0x891   : > { %v2931_v55 = vmax.f32 %v2753_v30, %v2867_v36 }
 0x892   : > { %v2929_v31 = vmax.f32 %v2745_v26, %v2865_v21  ;;  %v4820_v49 = vpop.f32.mrb[76].mxu0 }
 0x893   : > { %v6392_v3 = vpack.c.bf16 %v2931_v55, %v2930_v28  ;;  %v2766_v4 = vadd.f32 %v4820_v49, %v6276_v39  ;;  %v2757_v60 = vpop.f32.mrb[77].mxu0  ;;  %v5072_v28 = vld [vmem:[%s5732_s14 + $0xc4] ss:$16 sps:$4 sm:$0xff]  }
 0x894   : > { %v6396_v53 = vpack.c.bf16 %v2929_v31, %v2928_v20  ;;  %v2758_v47 = vadd.f32 %v2757_v60, %v6262_v10  ;;  %v4821_v17 = vpop.f32.mrb[78].mxu0  ;;  %v5068_v10 = vld [vmem:[%s5732_s14 + $0x80] ss:$16 sps:$4 sm:$0xff]  }
 0x895   : > { %v2870_v42 = vmul.f32 0.01, %v2766_v4  ;;  %v2769_v62 = vadd.f32 %v4821_v17, %v6280_v57  ;;  %v2760_v50 = vpop.f32.mrb[79].mxu0  ;;  %v5069_v57 = vld [vmem:[%s5732_s14 + $0xa4] ss:$16 sps:$4 sm:$0xff]  }
 0x896   : > { %v2868_v37 = vmul.f32 0.01, %v2758_v47  ;;  %v2761_v7 = vadd.f32 %v2760_v50, %v6264_v13  ;;  %3325 = vmatmul.mubr.bf16.gmra.mrb[16].mxu1 %v5065_v32 }
 0x897   : > { %v2871_v56 = vmul.f32 0.01, %v2769_v62  ;;  %3332 = vmatprep.mubr.bf16.mxu1 %v5066_v51  ;;  %v2934_v54 = vmax.f32 %v2766_v4, %v2870_v42 }
 0x898   : > { %v2869_v39 = vmul.f32 0.01, %v2761_v7  ;;  %v2932_v11 = vmax.f32 %v2758_v47, %v2868_v37  ;;  %v5075_v37 = vld [vmem:[%s5732_s14 + $0xe4] ss:$16 sps:$4 sm:$0xff]  }
 0x899   : > { %v2935_v14 = vmax.f32 %v2769_v62, %v2871_v56 }
 0x89a   : > { %v2933_v35 = vmax.f32 %v2761_v7, %v2869_v39  ;;  %v4824_v5 = vpop.f32.mrb[80].mxu0 }
 0x89b   : > { %v2782_v59 = vadd.f32 %v4824_v5, %v6310_v27  ;;  %v2773_v43 = vpop.f32.mrb[81].mxu0  ;;  %v3005_v41 = vpack.c.bf16 %v2935_v14, %v2934_v54 }
 0x89c   : > { %v2774_v23 = vadd.f32 %v2773_v43, %v6291_v29  ;;  %v4825_v15 = vpop.f32.mrb[82].mxu0  ;;  %v3004_v19 = vpack.c.bf16 %v2933_v35, %v2932_v11  ;;  %v5080_v43 = vld [vmem:[%s5732_s14 + $0xc] ss:$16 sps:$4 sm:$0xff]  }
 0x89d   : > { %v2874_v13 = vmul.f32 0.01, %v2782_v59  ;;  %v2785_v58 = vadd.f32 %v4825_v15, %v6316_v33  ;;  %v2776_v46 = vpop.f32.mrb[83].mxu0  ;;  %v5071_v33 = vld [vmem:[%s5732_s14 + $0xa0] ss:$16 sps:$4 sm:$0xff]  }
 0x89e   : > { %v2872_v45 = vmul.f32 0.01, %v2774_v23  ;;  %v2777_v44 = vadd.f32 %v2776_v46, %v6293_v48  ;;  %3333 = vmatmul.mubr.bf16.gmra.mrb[20].mxu1 %v5068_v10  ;;  %4622 = vmatprep.subr.bf16.mxu1 %v3004_v19  ;;  %v5086_v15 = vld [vmem:[%s5732_s14 + $0x48] ss:$16 sps:$4 sm:$0xff]  }
 0x89f   : > { %v2875_v24 = vmul.f32 0.01, %v2785_v58  ;;  %4623 = vmatpush3.bf16.msra.mxu1 %v6368_v8  ;;  %3340 = vmatprep.mubr.bf16.mxu1 %v5069_v57  ;;  %v2938_v29 = vmax.f32 %v2782_v59, %v2874_v13  ;;  %v5081_v57 = vld [vmem:[%s5732_s14 + $0x2c] ss:$16 sps:$4 sm:$0xff]   ;;  %v5089_v19 = vld [vmem:[%s5732_s14 + $0x68] ss:$16 sps:$4 sm:$0xff]  }
 0x8a0   : > { %v2873_v27 = vmul.f32 0.01, %v2777_v44  ;;  %4624 = vmatprep.subr.bf16.mxu1 %v3005_v41  ;;  %v2936_v52 = vmax.f32 %v2774_v23, %v2872_v45  ;;  %v5084_v23 = vld [vmem:[%s5732_s14 + $0x4c] ss:$16 sps:$4 sm:$0xff]   ;;  %v5092_v13 = vld [vmem:[%s5732_s14 + $0x88] ss:$16 sps:$4 sm:$0xff]  }
 0x8a1   : > { %v2939_v30 = vmax.f32 %v2785_v58, %v2875_v24  ;;  %v5093_v58 = vld [vmem:[%s5732_s14 + $0xac] ss:$16 sps:$4 sm:$0xff]   ;;  %v5095_v46 = vld [vmem:[%s5732_s14 + $0xa8] ss:$16 sps:$4 sm:$0xff]  }
 0x8a2   : > { %v2937_v38 = vmax.f32 %v2777_v44, %v2873_v27  ;;  %v4828_v26 = vpop.f32.mrb[84].mxu0  ;;  %v5096_v45 = vld [vmem:[%s5732_s14 + $0xcc] ss:$16 sps:$4 sm:$0xff]   ;;  %v5098_v44 = vld [vmem:[%s5732_s14 + $0xc8] ss:$16 sps:$4 sm:$0xff]  }
 0x8a3   : > { %v2798_v36 = vadd.f32 %v4828_v26, %v6344_v61  ;;  %v2789_v21 = vpop.f32.mrb[85].mxu0  ;;  %4625 = vmatpush3.bf16.msra.mxu1 %v6363_v22  ;;  %v3007_v48 = vpack.c.bf16 %v2939_v30, %v2938_v29  ;;  %v5099_v24 = vld [vmem:[%s5732_s14 + $0xec] ss:$16 sps:$4 sm:$0xff]   ;;  %v5101_v27 = vld [vmem:[%s5732_s14 + $0xe8] ss:$16 sps:$4 sm:$0xff]  }
 0x8a4   : > { %v2790_v55 = vadd.f32 %v2789_v21, %v6328_v63  ;;  %v4829_v20 = vpop.f32.mrb[86].mxu0  ;;  %v3006_v8 = vpack.c.bf16 %v2937_v38, %v2936_v52 }
 0x8a5   : > { %v2878_v31 = vmul.f32 0.01, %v2798_v36  ;;  %v2801_v49 = vadd.f32 %v4829_v20, %v6348_v9  ;;  %v2792_v32 = vpop.f32.mrb[87].mxu0  ;;  %v5074_v9 = vld [vmem:[%s5732_s14 + $0xc0] ss:$16 sps:$4 sm:$0xff]  }
 0x8a6   : > { %v2876_v4 = vmul.f32 0.01, %v2790_v55  ;;  %v2793_v60 = vadd.f32 %v2792_v32, %v6330_v1  ;;  %3341 = vmatmul.mubr.bf16.gmra.mrb[24].mxu1 %v5071_v33  ;;  %4626 = vmatprep.subr.bf16.mxu1 %v3006_v8 }
 0x8a7   : > { %v2879_v61 = vmul.f32 0.01, %v2801_v49  ;;  %4627 = vmatpush3.bf16.msra.mxu1 %v6379_v34  ;;  %3348 = vmatprep.mubr.bf16.mxu1 %v5072_v28  ;;  %v2942_v63 = vmax.f32 %v2798_v36, %v2878_v31  ;;  %v5102_v36 = vld [vmem:[%s5734_s6] sm:$0xff]  }
 0x8a8   : > { %v2877_v22 = vmul.f32 0.01, %v2793_v60  ;;  %4628 = vmatprep.subr.bf16.mxu1 %v3007_v48  ;;  %v2940_v47 = vmax.f32 %v2790_v55, %v2876_v4  ;;  %4850 = vmatprep.mubr.bf16.mxu0 %v5102_v36 }
 0x8a9   : > { %v2943_v51 = vmax.f32 %v2801_v49, %v2879_v61 }
 0x8aa   : > { %v2941_v17 = vmax.f32 %v2793_v60, %v2877_v22  ;;  %v4832_v42 = vpop.f32.mrb[88].mxu0 }
 0x8ab   : > { %v2814_v62 = vadd.f32 %v4832_v42, %v6377_v0  ;;  %v2805_v50 = vpop.f32.mrb[89].mxu0  ;;  %4629 = vmatpush3.bf16.msra.mxu1 %v6374_v6  ;;  %v3009_v1 = vpack.c.bf16 %v2943_v51, %v2942_v63 }
 0x8ac   : > { %v2806_v7 = vadd.f32 %v2805_v50, %v6358_v16  ;;  %v4833_v56 = vpop.f32.mrb[90].mxu0  ;;  %v3008_v34 = vpack.c.bf16 %v2941_v17, %v2940_v47 }
 0x8ad   : > { %v2882_v39 = vmul.f32 0.01, %v2814_v62  ;;  %v2817_v54 = vadd.f32 %v4833_v56, %v6382_v2  ;;  %v2808_v14 = vpop.f32.mrb[91].mxu0  ;;  %v5077_v2 = vld [vmem:[%s5732_s14 + $0xe0] ss:$16 sps:$4 sm:$0xff]  }
 0x8ae   : > { %v2880_v11 = vmul.f32 0.01, %v2806_v7  ;;  %v2809_v35 = vadd.f32 %v2808_v14, %v6360_v25  ;;  %3349 = vmatmul.mubr.bf16.gmra.mrb[28].mxu1 %v5074_v9  ;;  %4630 = vmatprep.subr.bf16.mxu1 %v3008_v34 }
 0x8af   : > { %v2883_v0 = vmul.f32 0.01, %v2817_v54  ;;  %4631 = vmatpush3.bf16.msra.mxu1 %v6389_v40  ;;  %3356 = vmatprep.mubr.bf16.mxu1 %v5075_v37  ;;  %v2946_v16 = vmax.f32 %v2814_v62, %v2882_v39  ;;  %v5078_v40 = vld [vmem:[%s5732_s14 + $0x8] ss:$16 sps:$4 sm:$0xff]  }
 0x8b0   : > { %v2881_v6 = vmul.f32 0.01, %v2809_v35  ;;  %4632 = vmatprep.subr.bf16.mxu1 %v3009_v1  ;;  %v2944_v10 = vmax.f32 %v2806_v7, %v2880_v11 }
 0x8b1   : > { %v2947_v5 = vmax.f32 %v2817_v54, %v2883_v0 }
 0x8b2   : > { %v2945_v59 = vmax.f32 %v2809_v35, %v2881_v6 }
 0x8b3   : > { %4633 = vmatpush3.bf16.msra.mxu1 %v6386_v18  ;;  %v3011_v25 = vpack.c.bf16 %v2947_v5, %v2946_v16  ;;  %v5083_v18 = vld [vmem:[%s5732_s14 + $0x28] ss:$16 sps:$4 sm:$0xff]  }
 0x8b4   : > { %v3010_v41 = vpack.c.bf16 %v2945_v59, %v2944_v10 }
 0x8b6   : > { %3357 = vmatmul.mubr.bf16.gmra.mrb[32].mxu1 %v5077_v2  ;;  %4634 = vmatprep.subr.bf16.mxu1 %v3010_v41 }
 0x8b7   : > { %4635 = vmatpush3.bf16.msra.mxu1 %v6396_v53  ;;  %3397 = vmatprep.mubr.bf16.mxu1 %v5080_v43  ;;  %v5087_v53 = vld [vmem:[%s5732_s14 + $0x6c] ss:$16 sps:$4 sm:$0xff]  }
 0x8b8   : > { %4636 = vmatprep.subr.bf16.mxu1 %v3011_v25 }
 0x8bb   : > { %4637 = vmatpush3.bf16.msra.mxu1 %v6392_v3  ;;  %v5090_v3 = vld [vmem:[%s5732_s14 + $0x8c] ss:$16 sps:$4 sm:$0xff]  }
 0x8be   : > { %3398 = vmatmul.mubr.bf16.vlgmr.msra.gmra.mrb[36].mxu1 %v5078_v40 }
 0x8bf   : > { %3405 = vmatprep.mubr.bf16.mxu1 %v5081_v57 }
 0x8c6   : > { %3406 = vmatmul.mubr.bf16.gmra.mrb[40].mxu1 %v5083_v18  ;;  %v3031_v18 = vpop.permute.xlu1 %3030 }
 0x8c7   : > { %3413 = vmatprep.mubr.bf16.mxu1 %v5084_v23 }
 0x8ce   : > { %3414 = vmatmul.mubr.bf16.gmra.mrb[44].mxu1 %v5086_v15 }
 0x8cf   : > { %3421 = vmatprep.mubr.bf16.mxu1 %v5087_v53 }
 0x8d6   : > { %3422 = vmatmul.mubr.bf16.gmra.mrb[48].mxu1 %v5089_v19 }
 0x8d7   : > { %3429 = vmatprep.mubr.bf16.mxu1 %v5090_v3  ;;  %v3036_v3 = vpop.permute.xlu0 %3035 }
 0x8de   : > { %3430 = vmatmul.mubr.bf16.gmra.mrb[52].mxu1 %v5092_v13 }
 0x8df   : > { %3437 = vmatprep.mubr.bf16.mxu1 %v5093_v58 }
 0x8e6   : > { %3438 = vmatmul.mubr.bf16.gmra.mrb[56].mxu1 %v5095_v46 }
 0x8e7   : > { %3445 = vmatprep.mubr.bf16.mxu1 %v5096_v45 }
 0x8ee   : > { %3446 = vmatmul.mubr.bf16.gmra.mrb[60].mxu1 %v5098_v44 }
 0x8ef   : > { %3453 = vmatprep.mubr.bf16.mxu1 %v5099_v24 }
 0x8f6   : > { %3454 = vmatmul.mubr.bf16.gmra.mrb[64].mxu1 %v5101_v27 }
 0x951   : > { %v4574_v29 = vpop.f32.mrb[4].mxu1 }
 0x952   : > { %v4575_v30 = vpop.f32.mrb[5].mxu1 }
 0x953   : > { %v4576_v52 = vadd.f32 %v4575_v30, %v4574_v29  ;;  %v4577_v38 = vpop.f32.mrb[6].mxu1  ;;  %v3041_v30 = vpop.permute.xlu1 %3040 }
 0x954   : > { %v4578_v26 = vpop.f32.mrb[7].mxu1 }
 0x955   : > { %v4579_v33 = vadd.f32 %v4578_v26, %v4577_v38  ;;  %v3303_v15 = vadd.f32 %v4576_v52, %v3031_v18 }
 0x957   : > { %v3306_v58 = vadd.f32 %v4579_v33, %v3036_v3 }
 0x959   : > { %v4580_v21 = vpop.f32.mrb[8].mxu1 }
 0x95a   : > { %v4581_v48 = vpop.f32.mrb[9].mxu1 }
 0x95b   : > { %v4582_v28 = vadd.f32 %v4581_v48, %v4580_v21  ;;  %v4583_v55 = vpop.f32.mrb[10].mxu1 }
 0x95c   : > { %v4584_v20 = vpop.f32.mrb[11].mxu1 }
 0x95d   : > { %v4585_v8 = vadd.f32 %v4584_v20, %v4583_v55  ;;  %v3311_v26 = vadd.f32 %v4582_v28, %v3041_v30  ;;  %v3046_v20 = vpop.permute.xlu0 %3045 }
 0x961   : > { %v4586_v31 = vpop.f32.mrb[12].mxu1 }
 0x962   : > { %v4587_v49 = vpop.f32.mrb[13].mxu1 }
 0x963   : > { %v6445_v32 = vadd.f32 %v4587_v49, %v4586_v31  ;;  %v4589_v4 = vpop.f32.mrb[14].mxu1  ;;  %v3314_v31 = vadd.f32 %v4585_v8, %v3046_v20 }
 0x964   : > { %v4590_v60 = vpop.f32.mrb[15].mxu1 }
 0x965   : > { %v6447_v61 = vadd.f32 %v4590_v60, %v4589_v4 }
 0x969   : > { %v4592_v22 = vpop.f32.mrb[16].mxu1 }
 0x96a   : > { %v4593_v63 = vpop.f32.mrb[17].mxu1 }
 0x96b   : > { %v6449_v51 = vadd.f32 %v4593_v63, %v4592_v22  ;;  %v4595_v47 = vpop.f32.mrb[18].mxu1 }
 0x96c   : > { %v4596_v17 = vpop.f32.mrb[19].mxu1 }
 0x96d   : > { %v6451_v42 = vadd.f32 %v4596_v17, %v4595_v47  ;;  %v3051_v17 = vpop.permute.xlu1 %3050 }
 0x96e   : > { %v3319_v28 = vadd.f32 %v6445_v32, %v3051_v17 }
 0x971   : > { %v4598_v9 = vpop.f32.mrb[20].mxu1 }
 0x972   : > { %v4599_v62 = vpop.f32.mrb[21].mxu1 }
 0x973   : > { %v6453_v50 = vadd.f32 %v4599_v62, %v4598_v9  ;;  %v4601_v1 = vpop.f32.mrb[22].mxu1 }
 0x974   : > { %v4602_v37 = vpop.f32.mrb[23].mxu1 }
 0x975   : > { %v6455_v7 = vadd.f32 %v4602_v37, %v4601_v1 }
 0x979   : > { %v4604_v56 = vpop.f32.mrb[24].mxu1 }
 0x97a   : > { %v4605_v34 = vpop.f32.mrb[25].mxu1 }
 0x97b   : > { %v6457_v39 = vadd.f32 %v4605_v34, %v4604_v56  ;;  %v4607_v54 = vpop.f32.mrb[26].mxu1  ;;  %v3056_v34 = vpop.permute.xlu0 %3055 }
 0x97c   : > { %v4608_v14 = vpop.f32.mrb[27].mxu1  ;;  %v3322_v8 = vadd.f32 %v6447_v61, %v3056_v34 }
 0x97d   : > { %v6459_v11 = vadd.f32 %v4608_v14, %v4607_v54 }
 0x981   : > { %v4610_v35 = vpop.f32.mrb[28].mxu1 }
 0x982   : > { %v4611_v0 = vpop.f32.mrb[29].mxu1 }
 0x983   : > { %v6461_v6 = vadd.f32 %v4611_v0, %v4610_v35  ;;  %v4613_v16 = vpop.f32.mrb[30].mxu1 }
 0x984   : > { %v4614_v5 = vpop.f32.mrb[31].mxu1 }
 0x985   : > { %v6463_v10 = vadd.f32 %v4614_v5, %v4613_v16 }
 0x989   : > { %v4616_v59 = vpop.f32.mrb[32].mxu1 }
 0x98a   : > { %v4617_v2 = vpop.f32.mrb[33].mxu1 }
 0x98b   : > { %v6465_v25 = vadd.f32 %v4617_v2, %v4616_v59  ;;  %v4619_v43 = vpop.f32.mrb[34].mxu1 }
 0x98c   : > { %v4620_v41 = vpop.f32.mrb[35].mxu1 }
 0x98d   : > { %v6467_v40 = vadd.f32 %v4620_v41, %v4619_v43  ;;  %v3061_v43 = vpop.permute.xlu1 %3060 }
 0x98e   : > { %v3327_v32 = vadd.f32 %v6449_v51, %v3061_v43 }
 0x991   : > { %v4638_v57 = vpop.f32.mrb[36].mxu1 }
 0x992   : > { %v4639_v23 = vpop.f32.mrb[37].mxu1 }
 0x993   : > { %v4640_v53 = vadd.f32 %v4639_v23, %v4638_v57  ;;  %v4641_v19 = vpop.f32.mrb[38].mxu1 }
 0x994   : > { %v4642_v13 = vpop.f32.mrb[39].mxu1 }
 0x995   : > { %v3400_v46 = vadd.f32 %v4640_v53, %v3303_v15  ;;  %v4643_v45 = vadd.f32 %v4642_v13, %v4641_v19  ;;  %v3066_v53 = vpop.permute.xlu0 %3065 }
 0x996   : > { %v3330_v61 = vadd.f32 %v6451_v42, %v3066_v53 }
 0x997   : > { %v3462_v44 = vmul.f32 0.01, %v3400_v46  ;;  %v3403_v24 = vadd.f32 %v4643_v45, %v3306_v58 }
 0x999   : > { %v3463_v27 = vmul.f32 0.01, %v3403_v24  ;;  %v4644_v29 = vpop.f32.mrb[40].mxu1  ;;  %v3478_v36 = vmax.f32 %v3400_v46, %v3462_v44 }
 0x99a   : > { %v4645_v38 = vpop.f32.mrb[41].mxu1 }
 0x99b   : > { %v3479_v21 = vmax.f32 %v3403_v24, %v3463_v27  ;;  %v4646_v48 = vadd.f32 %v4645_v38, %v4644_v29  ;;  %v4647_v55 = vpop.f32.mrb[42].mxu1  ;;  %v3071_v27 = vpop.permute.xlu1 %3070 }
 0x99c   : > { %v4648_v52 = vpop.f32.mrb[43].mxu1  ;;  %v3335_v51 = vadd.f32 %v6453_v50, %v3071_v27 }
 0x99d   : > { %v3408_v49 = vadd.f32 %v4646_v48, %v3311_v26  ;;  %v4649_v4 = vadd.f32 %v4648_v52, %v4647_v55  ;;  %v3510_v60 = vpack.c.bf16 %v3479_v21, %v3478_v36  ;;  %v3076_v21 = vpop.permute.xlu0 %3075 }
 0x99e   : > { %v3338_v42 = vadd.f32 %v6455_v7, %v3076_v21 }
 0x99f   : > { %v3464_v33 = vmul.f32 0.01, %v3408_v49  ;;  %v3411_v22 = vadd.f32 %v4649_v4, %v3314_v31  ;;  %4834 = vmatprep.subr.bf16.mxu0 %v3510_v60 }
 0x9a0   : > { %4835 = vmatpush3.bf16.msra.mxu0 %v3510_v60 }
 0x9a1   : > { %v3465_v63 = vmul.f32 0.01, %v3411_v22  ;;  %v4650_v47 = vpop.f32.mrb[44].mxu1  ;;  %v3480_v62 = vmax.f32 %v3408_v49, %v3464_v33  ;;  %v3081_v33 = vpop.permute.xlu1 %3080 }
 0x9a2   : > { %v4651_v9 = vpop.f32.mrb[45].mxu1  ;;  %v3343_v50 = vadd.f32 %v6457_v39, %v3081_v33 }
 0x9a3   : > { %v3481_v1 = vmax.f32 %v3411_v22, %v3465_v63  ;;  %v4652_v37 = vadd.f32 %v4651_v9, %v4650_v47  ;;  %v4653_v56 = vpop.f32.mrb[46].mxu1 }
 0x9a4   : > { %v4654_v54 = vpop.f32.mrb[47].mxu1 }
 0x9a5   : > { %v3416_v14 = vadd.f32 %v4652_v37, %v3319_v28  ;;  %v4655_v35 = vadd.f32 %v4654_v54, %v4653_v56  ;;  %v3511_v0 = vpack.c.bf16 %v3481_v1, %v3480_v62  ;;  %v3086_v28 = vpop.permute.xlu0 %3085 }
 0x9a6   : > { %v3346_v7 = vadd.f32 %v6459_v11, %v3086_v28 }
 0x9a7   : > { %v3466_v16 = vmul.f32 0.01, %v3416_v14  ;;  %v3419_v5 = vadd.f32 %v4655_v35, %v3322_v8  ;;  %4836 = vmatprep.subr.bf16.mxu0 %v3511_v0  ;;  %v3091_v35 = vpop.permute.xlu1 %3090 }
 0x9a8   : > { %4837 = vmatpush3.bf16.msra.mxu0 %v3511_v0  ;;  %v3351_v39 = vadd.f32 %v6461_v6, %v3091_v35 }
 0x9a9   : > { %v3467_v59 = vmul.f32 0.01, %v3419_v5  ;;  %v4656_v2 = vpop.f32.mrb[48].mxu1  ;;  %v3482_v57 = vmax.f32 %v3416_v14, %v3466_v16  ;;  %v3096_v43 = vpop.permute.xlu0 %3095 }
 0x9aa   : > { %v4657_v41 = vpop.f32.mrb[49].mxu1  ;;  %v3354_v11 = vadd.f32 %v6463_v10, %v3096_v43 }
 0x9ab   : > { %v3483_v18 = vmax.f32 %v3419_v5, %v3467_v59  ;;  %v4658_v23 = vadd.f32 %v4657_v41, %v4656_v2  ;;  %v4659_v15 = vpop.f32.mrb[50].mxu1 }
 0x9ac   : > { %v4660_v19 = vpop.f32.mrb[51].mxu1 }
 0x9ad   : > { %v3424_v3 = vadd.f32 %v4658_v23, %v3327_v32  ;;  %v4661_v13 = vadd.f32 %v4660_v19, %v4659_v15  ;;  %v3512_v58 = vpack.c.bf16 %v3483_v18, %v3482_v57 }
 0x9af   : > { %v3468_v46 = vmul.f32 0.01, %v3424_v3  ;;  %v3427_v45 = vadd.f32 %v4661_v13, %v3330_v61  ;;  %4838 = vmatprep.subr.bf16.mxu0 %v3512_v58  ;;  %v3101_v61 = vpop.permute.xlu1 %3100 }
 0x9b0   : > { %4839 = vmatpush3.bf16.msra.mxu0 %v3512_v58  ;;  %v3359_v6 = vadd.f32 %v6465_v25, %v3101_v61 }
 0x9b1   : > { %v3469_v44 = vmul.f32 0.01, %v3427_v45  ;;  %v4662_v24 = vpop.f32.mrb[52].mxu1  ;;  %v3484_v30 = vmax.f32 %v3424_v3, %v3468_v46 }
 0x9b2   : > { %v4663_v29 = vpop.f32.mrb[53].mxu1 }
 0x9b3   : > { %v3485_v38 = vmax.f32 %v3427_v45, %v3469_v44  ;;  %v4664_v26 = vadd.f32 %v4663_v29, %v4662_v24  ;;  %v4665_v36 = vpop.f32.mrb[54].mxu1  ;;  %v3106_v44 = vpop.permute.xlu0 %3105 }
 0x9b4   : > { %v4666_v48 = vpop.f32.mrb[55].mxu1  ;;  %v3362_v24 = vadd.f32 %v6467_v40, %v3106_v44  ;;  %v5104_v40 = vld [vmem:[%s5734_s6 + $0x10] sm:$0xff]  }
 0x9b5   : > { %v3432_v55 = vadd.f32 %v4664_v26, %v3335_v51  ;;  %v4667_v20 = vadd.f32 %v4666_v48, %v4665_v36  ;;  %v3513_v52 = vpack.c.bf16 %v3485_v38, %v3484_v30  ;;  %v5103_v48 = vld [vmem:[%s5734_s6 + $0x8] sm:$0xff]  }
 0x9b7   : > { %v3470_v31 = vmul.f32 0.01, %v3432_v55  ;;  %v3435_v49 = vadd.f32 %v4667_v20, %v3338_v42  ;;  %4840 = vmatprep.subr.bf16.mxu0 %v3513_v52  ;;  %v5105_v42 = vld [vmem:[%s5734_s6 + $0x18] sm:$0xff]   ;;  %v5107_v20 = vld [vmem:[%s5734_s6 + $0x28] sm:$0xff]  }
 0x9b8   : > { %4841 = vmatpush3.bf16.msra.mxu0 %v3513_v52  ;;  %v5108_v52 = vld [vmem:[%s5734_s6 + $0x30] sm:$0xff]  }
 0x9b9   : > { %v3471_v4 = vmul.f32 0.01, %v3435_v49  ;;  %v4668_v60 = vpop.f32.mrb[56].mxu1  ;;  %v3486_v63 = vmax.f32 %v3432_v55, %v3470_v31  ;;  %v5106_v55 = vld [vmem:[%s5734_s6 + $0x20] sm:$0xff]   ;;  %v5109_v31 = vld [vmem:[%s5734_s6 + $0x38] sm:$0xff]  }
 0x9ba   : > { %v4669_v22 = vpop.f32.mrb[57].mxu1 }
 0x9bb   : > { %v3487_v47 = vmax.f32 %v3435_v49, %v3471_v4  ;;  %v4670_v17 = vadd.f32 %v4669_v22, %v4668_v60  ;;  %v4671_v9 = vpop.f32.mrb[58].mxu1  ;;  %v3537_v49 = vpop.permute.xlu1 %3536 }
 0x9bc   : > { %v4672_v62 = vpop.f32.mrb[59].mxu1  ;;  %v3542_v4 = vpop.permute.xlu0 %3541 }
 0x9bd   : > { %v3440_v1 = vadd.f32 %v4670_v17, %v3343_v50  ;;  %v4673_v37 = vadd.f32 %v4672_v62, %v4671_v9  ;;  %v3514_v56 = vpack.c.bf16 %v3487_v47, %v3486_v63 }
 0x9bf   : > { %v3472_v34 = vmul.f32 0.01, %v3440_v1  ;;  %v3443_v54 = vadd.f32 %v4673_v37, %v3346_v7  ;;  %4842 = vmatprep.subr.bf16.mxu0 %v3514_v56  ;;  %v3547_v60 = vpop.permute.xlu1 %3546 }
 0x9c0   : > { %4843 = vmatpush3.bf16.msra.mxu0 %v3514_v56  ;;  %v3552_v33 = vpop.permute.xlu0 %3551 }
 0x9c1   : > { %v3473_v8 = vmul.f32 0.01, %v3443_v54  ;;  %v4674_v14 = vpop.f32.mrb[60].mxu1  ;;  %v3488_v16 = vmax.f32 %v3440_v1, %v3472_v34 }
 0x9c2   : > { %v4675_v0 = vpop.f32.mrb[61].mxu1 }
 0x9c3   : > { %v3489_v5 = vmax.f32 %v3443_v54, %v3473_v8  ;;  %v4676_v59 = vadd.f32 %v4675_v0, %v4674_v14  ;;  %v4677_v2 = vpop.f32.mrb[62].mxu1  ;;  %v3557_v22 = vpop.permute.xlu1 %3556 }
 0x9c4   : > { %v4678_v41 = vpop.f32.mrb[63].mxu1  ;;  %v4990_v50 = vpop.permute.xlu0 %4989 }
 0x9c5   : > { %v3448_v32 = vadd.f32 %v4676_v59, %v3351_v39  ;;  %v4679_v57 = vadd.f32 %v4678_v41, %v4677_v2  ;;  %v3515_v18 = vpack.c.bf16 %v3489_v5, %v3488_v16 }
 0x9c7   : > { %v3474_v23 = vmul.f32 0.01, %v3448_v32  ;;  %v3451_v15 = vadd.f32 %v4679_v57, %v3354_v11  ;;  %4844 = vmatprep.subr.bf16.mxu0 %v3515_v18  ;;  %v3562_v63 = vpop.permute.xlu1 %3561  ;;  %v4991_v57 = vunpack.i.l.bf16 %v4990_v50 }
 0x9c8   : > { %4845 = vmatpush3.bf16.msra.mxu0 %v3515_v18  ;;  %v4995_v47 = vpop.permute.xlu0 %4994 }
 0x9c9   : > { %v3475_v53 = vmul.f32 0.01, %v3451_v15  ;;  %v4680_v19 = vpop.f32.mrb[64].mxu1  ;;  %v3490_v13 = vmax.f32 %v3448_v32, %v3474_v23  ;;  %v4992_v32 = vunpack.i.h.bf16 %v4990_v50 }
 0x9ca   : > { %v4681_v3 = vpop.f32.mrb[65].mxu1 }
 0x9cb   : > { %v3491_v58 = vmax.f32 %v3451_v15, %v3475_v53  ;;  %v4682_v46 = vadd.f32 %v4681_v3, %v4680_v19  ;;  %v4683_v45 = vpop.f32.mrb[66].mxu1  ;;  %v3567_v17 = vpop.permute.xlu1 %3566  ;;  %v4996_v15 = vunpack.i.l.bf16 %v4995_v47 }
 0x9cc   : > { %v4684_v10 = vpop.f32.mrb[67].mxu1  ;;  %v3572_v9 = vpop.permute.xlu0 %3571 }
 0x9cd   : > { %v3456_v27 = vadd.f32 %v4682_v46, %v3359_v6  ;;  %v4685_v29 = vadd.f32 %v4684_v10, %v4683_v45  ;;  %v3516_v51 = vpack.c.bf16 %v3491_v58, %v3490_v13  ;;  %v4997_v46 = vunpack.i.h.bf16 %v4995_v47 }
 0x9cf   : > { %v3476_v30 = vmul.f32 0.01, %v3456_v27  ;;  %v3459_v38 = vadd.f32 %v4685_v29, %v3362_v24  ;;  %4846 = vmatprep.subr.bf16.mxu0 %v3516_v51  ;;  %v5000_v28 = vpop.permute.xlu1 %4999 }
 0x9d0   : > { %4847 = vmatpush3.bf16.msra.mxu0 %v3516_v51  ;;  %v3577_v62 = vpop.permute.xlu0 %3576 }
 0x9d1   : > { %v3477_v25 = vmul.f32 0.01, %v3459_v38  ;;  %v3492_v26 = vmax.f32 %v3456_v27, %v3476_v30 }
 0x9d3   : > { %v3493_v36 = vmax.f32 %v3459_v38, %v3477_v25  ;;  %v6488_v7 = vpop.permute.xlu1 %3581  ;;  %v5001_v38 = vunpack.i.l.bf16 %v5000_v28 }
 0x9d4   : > { %v6490_v37 = vpop.permute.xlu0 %5004 }
 0x9d5   : > { %v3517_v21 = vpack.c.bf16 %v3493_v36, %v3492_v26 }
 0x9d7   : > { %4848 = vmatprep.subr.bf16.mxu0 %v3517_v21  ;;  %v3587_v5 = vpop.permute.xlu1 %3586 }
 0x9d8   : > { %4849 = vmatpush3.bf16.msra.mxu0 %v3517_v21  ;;  %v3592_v41 = vpop.permute.xlu0 %3591 }
 0x9db   : > { %4851 = vmatmul.mubr.bf16.vlgmr.msra.gmra.mrb[92].mxu0 %v5103_v48  ;;  %v5010_v45 = vpop.permute.xlu1 %5009 }
 0x9dc   : > { %4854 = vmatprep.mubr.bf16.mxu0 %v5104_v40  ;;  %v3597_v25 = vpop.permute.xlu0 %3596 }
 0x9e3   : > { %4855 = vmatmul.mubr.bf16.gmra.mrb[96].mxu0 %v5105_v42  ;;  %v5002_v42 = vunpack.i.h.bf16 %v5000_v28 }
 0x9e4   : > { %4858 = vmatprep.mubr.bf16.mxu0 %v5106_v55 }
 0x9eb   : > { %4859 = vmatmul.mubr.bf16.gmra.mrb[100].mxu0 %v5107_v20 }
 0x9ec   : > { %4862 = vmatprep.mubr.bf16.mxu0 %v5108_v52 }
 0x9f3   : > { %4863 = vmatmul.mubr.bf16.gmra.mrb[104].mxu0 %v5109_v31 }
 0xaae   : > { %v4852_v1 = vpop.f32.mrb[92].mxu0 }
 0xaaf   : > { %v3705_v56 = vadd.f32 %v4852_v1, %v3547_v60  ;;  %v3696_v34 = vpop.f32.mrb[93].mxu0  ;;  %v3602_v60 = vpop.permute.xlu1 %3601  ;;  %v5007_v1 = vunpack.i.h.bf16 %v6490_v37 }
 0xab0   : > { %v3697_v54 = vadd.f32 %v3696_v34, %v3537_v49  ;;  %v4853_v8 = vpop.f32.mrb[94].mxu0 }
 0xab1   : > { %v3761_v14 = vmul.f32 0.01, %v3705_v56  ;;  %v3708_v35 = vadd.f32 %v4853_v8, %v3552_v33  ;;  %v3699_v0 = vpop.f32.mrb[95].mxu0 }
 0xab2   : > { %v3759_v39 = vmul.f32 0.01, %v3697_v54  ;;  %v3700_v16 = vadd.f32 %v3699_v0, %v3542_v4  ;;  %v5006_v4 = vunpack.i.l.bf16 %v6490_v37 }
 0xab3   : > { %v3762_v59 = vmul.f32 0.01, %v3708_v35  ;;  %v3777_v11 = vmax.f32 %v3705_v56, %v3761_v14  ;;  %v5015_v56 = vpop.permute.xlu0 %5014 }
 0xab4   : > { %v3775_v2 = vmax.f32 %v3697_v54, %v3759_v39  ;;  %v3760_v43 = vmul.f32 0.01, %v3700_v16  ;;  %v5011_v39 = vunpack.i.l.bf16 %v5010_v45 }
 0xab5   : > { %v3778_v53 = vmax.f32 %v3708_v35, %v3762_v59  ;;  %v3905_v44 = vmul.f32 %v4996_v15, %v3777_v11  ;;  %v3607_v11 = vpop.permute.xlu1 %3606 }
 0xab6   : > { %v3776_v18 = vmax.f32 %v3700_v16, %v3760_v43  ;;  %v4856_v23 = vpop.f32.mrb[96].mxu0  ;;  %v3903_v3 = vmul.f32 %v4991_v57, %v3775_v2 }
 0xab7   : > { %v3721_v19 = vadd.f32 %v4856_v23, %v3567_v17  ;;  %v3712_v61 = vpop.f32.mrb[97].mxu0  ;;  %v3906_v26 = vmul.f32 %v4997_v46, %v3778_v53  ;;  %v3612_v15 = vpop.permute.xlu0 %3611 }
 0xab8   : > { %v3904_v6 = vmul.f32 %v4992_v32, %v3776_v18  ;;  %v3713_v13 = vadd.f32 %v3712_v61, %v3557_v22  ;;  %v4857_v58 = vpop.f32.mrb[98].mxu0  ;;  %v5012_v32 = vunpack.i.h.bf16 %v5010_v45 }
 0xab9   : > { %v3724_v10 = vadd.f32 %v4857_v58, %v3572_v9  ;;  %v3715_v24 = vpop.f32.mrb[99].mxu0  ;;  %v3765_v29 = vmul.f32 0.01, %v3721_v19  ;;  %v5017_v58 = vunpack.i.h.bf16 %v5015_v56 }
 0xaba   : > { %v3919_v27 = vadd.f32 %v3904_v6, %v3903_v3  ;;  %v3763_v51 = vmul.f32 0.01, %v3713_v13  ;;  %v3716_v30 = vadd.f32 %v3715_v24, %v3562_v63 }
 0xabb   : > { %v3766_v48 = vmul.f32 0.01, %v3724_v10  ;;  %v3781_v55 = vmax.f32 %v3721_v19, %v3765_v29 }
 0xabc   : > { %v3920_v36 = vadd.f32 %v3919_v27, %v3905_v44  ;;  %v3779_v21 = vmax.f32 %v3713_v13, %v3763_v51  ;;  %v3764_v40 = vmul.f32 0.01, %v3716_v30  ;;  %v3886_v51 = vpop.permute.xlu1 %3885 }
 0xabd   : > { %v3782_v63 = vmax.f32 %v3724_v10, %v3766_v48  ;;  %v3909_v8 = vmul.f32 %v5006_v4, %v3781_v55  ;;  %v3891_v48 = vpop.permute.xlu0 %3890 }
 0xabe   : > { %v3907_v20 = vmul.f32 %v5001_v38, %v3779_v21  ;;  %v3921_v52 = vadd.f32 %v3920_v36, %v3906_v26  ;;  %v3780_v31 = vmax.f32 %v3716_v30, %v3764_v40  ;;  %v4860_v49 = vpop.f32.mrb[100].mxu0 }
 0xabf   : > { %v3737_v33 = vadd.f32 %v4860_v49, %v3587_v5  ;;  %v3728_v22 = vpop.f32.mrb[101].mxu0  ;;  %v3910_v5 = vmul.f32 %v5007_v1, %v3782_v63 }
 0xac0   : > { %v3922_v50 = vadd.f32 %v3921_v52, %v3907_v20  ;;  %v3908_v47 = vmul.f32 %v5002_v42, %v3780_v31  ;;  %v3729_v17 = vadd.f32 %v3728_v22, %v3577_v62  ;;  %v4861_v9 = vpop.f32.mrb[102].mxu0  ;;  %v3896_v49 = vpop.permute.xlu1 %3895 }
 0xac1   : > { %v3769_v34 = vmul.f32 0.01, %v3737_v33  ;;  %v3740_v28 = vadd.f32 %v4861_v9, %v3592_v41  ;;  %v3731_v54 = vpop.f32.mrb[103].mxu0  ;;  %v5016_v41 = vunpack.i.l.bf16 %v5015_v56  ;;  %v3901_v22 = vpop.permute.xlu0 %3900 }
 0xac2   : > { %v3923_v14 = vadd.f32 %v3922_v50, %v3908_v47  ;;  %v3767_v35 = vmul.f32 0.01, %v3729_v17  ;;  %v3732_v0 = vadd.f32 %v3731_v54, %v6488_v7 }
 0xac3   : > { %v3770_v16 = vmul.f32 0.01, %v3740_v28  ;;  %v3785_v62 = vmax.f32 %v3737_v33, %v3769_v34 }
 0xac4   : > { %v3924_v59 = vadd.f32 %v3923_v14, %v3909_v8  ;;  %v3783_v2 = vmax.f32 %v3729_v17, %v3767_v35  ;;  %v3768_v43 = vmul.f32 0.01, %v3732_v0  ;;  %v3944_v56 = vpop.permute.xlu1 %3943 }
 0xac5   : > { %v3786_v53 = vmax.f32 %v3740_v28, %v3770_v16  ;;  %v3913_v46 = vmul.f32 %v5016_v41, %v3785_v62  ;;  %v3949_v28 = vrot.slane %v3944_v56, %v5765_v12 }
 0xac6   : > { %v3911_v57 = vmul.f32 %v5011_v39, %v3783_v2  ;;  %v3925_v37 = vadd.f32 %v3924_v59, %v3910_v5  ;;  %v3784_v18 = vmax.f32 %v3732_v0, %v3768_v43  ;;  %v4864_v23 = vpop.f32.mrb[104].mxu0 }
 0xac7   : > { %v3753_v19 = vadd.f32 %v4864_v23, %v3607_v11  ;;  %v3744_v61 = vpop.f32.mrb[105].mxu0  ;;  %v3914_v30 = vmul.f32 %v5017_v58, %v3786_v53 }
 0xac8   : > { %v3926_v3 = vadd.f32 %v3925_v37, %v3911_v57  ;;  %v3912_v7 = vmul.f32 %v5012_v32, %v3784_v18  ;;  %v3745_v6 = vadd.f32 %v3744_v61, %v3597_v25  ;;  %v4865_v13 = vpop.f32.mrb[106].mxu0 }
 0xac9   : > { %v3756_v44 = vadd.f32 %v4865_v13, %v3612_v15  ;;  %v3747_v10 = vpop.f32.mrb[107].mxu0  ;;  %v3773_v27 = vmul.f32 0.01, %v3753_v19 }
 0xaca   : > { %v3927_v24 = vadd.f32 %v3926_v3, %v3912_v7  ;;  %v3771_v45 = vmul.f32 0.01, %v3745_v6  ;;  %v3748_v29 = vadd.f32 %v3747_v10, %v3602_v60 }
 0xacb   : > { %v3774_v36 = vmul.f32 0.01, %v3756_v44  ;;  %v3789_v40 = vmax.f32 %v3753_v19, %v3773_v27 }
 0xacc   : > { %v3928_v38 = vadd.f32 %v3927_v24, %v3913_v46  ;;  %v3787_v26 = vmax.f32 %v3745_v6, %v3771_v45  ;;  %v3772_v21 = vmul.f32 0.01, %v3748_v29 }
 0xacd   : > { %v3790_v52 = vmax.f32 %v3756_v44, %v3774_v36  ;;  %v3917_v4 = vmul.f32 %v3896_v49, %v3789_v40 }
 0xace   : > { %v3915_v42 = vmul.f32 %v3886_v51, %v3787_v26  ;;  %v3929_v55 = vadd.f32 %v3928_v38, %v3914_v30  ;;  %v3788_v25 = vmax.f32 %v3748_v29, %v3772_v21 }
 0xacf   : > { %v3918_v50 = vmul.f32 %v3901_v22, %v3790_v52 }
 0xad0   : > { %v3930_v20 = vadd.f32 %v3929_v55, %v3915_v42  ;;  %v3916_v31 = vmul.f32 %v3891_v48, %v3788_v25 }
 0xad2   : > { %v3931_v33 = vadd.f32 %v3930_v20, %v3916_v31 }
 0xad4   : > { %v3932_v60 = vadd.f32 %v3931_v33, %v3917_v4 }
 0xad6   : > { %v3933_v63 = vadd.f32 %v3932_v60, %v3918_v50 }
 0xad8   : > { %v3934_v47 = vrot.slane %v3933_v63, 4 }
 0xada   : > { %v3935_v17 = vadd.f32 %v3934_v47, %v3933_v63 }
 0xadc   : > { %v3936_v9 = vrot.slane %v3935_v17, 2 }
 0xade   : > { %v3937_v1 = vadd.f32 %v3936_v9, %v3935_v17 }
 0xae0   : > { %v3938_v34 = vrot.slane %v3937_v1, 1 }
 0xae2   : > { %v3939_v54 = vadd.f32 %v3938_v34, %v3937_v1 }
 0xae4   : > { %v3950_v8 = vadd.f32 %v3949_v28, %v3939_v54 }
 0xae6   : > { %v4435_v14 = vmul.f32 -1.442695, %v3950_v8 }
 0xae8   : > { %5178 = vpow2.f32 %v4435_v14 }
 0xaf2   : > { %v5179_v35 = vpop.eup %5178 }
 0xaf3   : > { %v3954_v0 = vadd.f32 1.0, %v5179_v35 }
 0xaf5   : > { %5180 = vrcp.f32 %v3954_v0 }
 0xaff   : > { %v5181_v39 = vpop.eup %5180 }
 0xb00   : > { %3957 = vst [vmem:[%s947_s7] sm:$0x1] %v5181_v39 }
 0xb01 PF: > { %s37_s30 = sadd.s32 1, %s5376_s30   ;;  %s6596_s20 = sld [smem:[#allocation12_spill]] }
 0xb02   : > { %p34_p9 = scmp.ge.s32.totalorder %s37_s30, 6   ;;  %s6597_s26 = sld [smem:[#allocation16_spill]] }
 0xb03   : > { %s6598_s27 = sld [smem:[#allocation13_spill]]  ;;  %s6599_s29 = sld [smem:[#allocation14_spill]] }
 0xb04   : > { %s6600_s18 = sld [smem:[#allocation15_spill]]  ;;  %s6601_s24 = smov %s5352_s25 }
 0xb05   : > { %s6603_s28 = smov %s5372_s0  ;;  %36 = sbr.rel (!%p34_p9) target bundleno = 23 (0x17), region = 203 }
 0xb07   : > { %s6602_s25 = smov %s6596_s20 }
 0xb0a   : > { %s6604_s0 = smov %s6600_s18 }
 0xb0c   :  { %4003 = vsyncpa [#allocation3], 1 }
 0xb0d   :  { %4005 = vsyncpa [#allocation3 + $0x1], 1 }
 0xb0e   :  { %4006 = vsyncpa [#allocation5], 1 }
 0xb0f   :  { %4008 = vsyncpa [#allocation5 + $0x1], 1 }
 0xb10   :  { %4009 = vsyncpa [#allocation8], 1 }
 0xb11   :  { %4011 = vsyncpa [#allocation8 + $0x1], 1 }

// kernel: overlapnet_forward.3
= control target key start
LH: loop header
LB: loop body
LE: loop exit
PB: predicated region body
PF: predicated region fallthrough
CT: control target
= control target key end

     0   :  { %s9215_s29 = smov 0   ;;  %s9217_s30 = smov 0   ;;  %s12080_s0 = inlined_call_operand.vmem [shape: f32[4,32,128], index: 0, kind: input, shape index: {}, may-alias: {0,1}]   ;;  %s12081_s1 = inlined_call_operand.vmem [shape: f32[4,32,128], index: 1, kind: input, shape index: {}, may-alias: {0,1}]   ;;  %s12082_s2 = inlined_call_operand.vmem [shape: f32[4,1,128], index: 2, kind: input, shape index: {}]   ;;  %s12083_s3 = inlined_call_operand.vmem [shape: bf16[2,1024,128], index: 3, kind: input, shape index: {}]   ;;  %s12084_s4 = inlined_call_operand.vmem [shape: f32[2,1024,1], index: 4, kind: input, shape index: {}]   ;;  %s12085_s5 = inlined_call_operand.vmem [shape: bf16[2,512,1024], index: 5, kind: input, shape index: {}]   ;;  %s12086_s6 = inlined_call_operand.vmem [shape: f32[2,512,1], index: 6, kind: input, shape index: {}]   ;;  %s12087_s7 = inlined_call_operand.vmem [shape: bf16[2,128,512], index: 7, kind: input, shape index: {}]   ;;  %s12088_s8 = inlined_call_operand.vmem [shape: f32[2,128,1], index: 8, kind: input, shape index: {}]   ;;  %s12089_s9 = inlined_call_operand.vmem [shape: bf16[2,128,128], index: 9, kind: input, shape index: {}]   ;;  %s12090_s10 = inlined_call_operand.vmem [shape: f32[2,128,1], index: 10, kind: input, shape index: {}]   ;;  %s12091_s11 = inlined_call_operand.vmem [shape: bf16[2,2,128], index: 11, kind: input, shape index: {}]   ;;  %s12092_s12 = inlined_call_operand.vmem [shape: f32[2,2,1], index: 12, kind: input, shape index: {}]   ;;  %s12093_s13 = inlined_call_operand.vmem [shape: f32[4,2,128], index: 13, kind: output, shape index: {0}]   ;;  %s12094_s14 = inlined_call_operand.vmem [shape: f32[4,1,128], index: 14, kind: output, shape index: {1}]  }
   0x1   :  { %s9219_s15 = smov 0   ;;  %s9221_s16 = smov 0  }
   0x2   :  { %s9223_s17 = smov 0  }
   0x3 LB: > { %s34_s18 = sadd.s32 1, %s9127_s15  ;;  %s37_s19 = sadd.s32 1, %s9131_s16  ;;  %s9135_s17 = sphi %s9223_s17, %s25_s17   ;;  %s9131_s16 = sphi %s9221_s16, %s12845_s16   ;;  %s9127_s15 = sphi %s9219_s15, %s12844_s15   ;;  %s9123_s30 = sphi %s9217_s30, %s12843_s30   ;;  %s9119_s29 = sphi %s9215_s29, %s12842_s29  }
   0x4   : > { %p35_p0 = scmp.ge.s32.totalorder %s34_s18, 2  ;;  %p7453_p1 = scmp.ge.s32.totalorder %s9135_s17, 1 }
   0x5   : > { %p582_p2 = scmp.lt.s32.totalorder %s9135_s17, 5 }
   0x6   : > { %s12847_s18 = smov (%p35_p0, %s34_s18), 0  ;;  %s12849_s19 = smov (!%p35_p0, %s37_s19), %s9131_s16 }
   0x7   : > { %12205 = sst [smem:[#allocation2_spill]] %s12847_s18  ;;  %p583_p3 = pnand %p7453_p1, %p582_p2 }
   0x8   : > { %p39_p4 = scmp.ge.s32.totalorder %s12849_s19, 2 }
   0x9   : > { %586 = sbr.rel (%p583_p3) target bundleno = 2492 (0x9bc), region = 72 }
   0xa   : > { %s12851_s19 = smov (%p39_p4, %s12849_s19), 0 }
   0xb   : > { %12206 = sst [smem:[#allocation3_spill]] %s12851_s19 }
  0x10   : > { %s706_s20 = ssub.s32 1, %s9123_s30  ;;  %s7454_s22 = sshll.u32 %s9123_s30, 1  ;;  %v12095_v0 = vmov 0   ;;  %vm978_vm0 = vcmask 1040384   ;;  %vm856_vm1 = vcmask 261120   ;;  %vm9139_vm2 = vmmov 0  }
  0x11   : > { %s7457_s21 = sshll.u32 %s706_s20, 1  ;;  %9028 = vset.pattern.permute.xlu1 %v12095_v0  ;;  %s698_s24 = sadd.s32 %s9119_s29, %s7454_s22 }
  0x12   : > { %s708_s23 = sadd.s32 %s9119_s29, %s7457_s21  ;;  %p699_p6 = scmp.lt.s32.totalorder %s698_s24, 3 }
  0x13   : > { %p709_p5 = scmp.lt.s32.totalorder %s708_s23, 3  ;;  %p726_p7 = scmp.lt.s32.totalorder %s9123_s30, 1 }
  0x14   : > { %s12855_s24 = smov (!%p699_p6, %s698_s24), 3 }
  0x15   : > { %s12853_s23 = smov (!%p709_p5, %s708_s23), 3  ;;  %s7788_s29 = sshll.u32 %s12855_s24, 5 }
  0x16   : > { %s722_s27 = scalar_lea.vmem %s12082_s2, %s12853_s23  ;;  %s7789_s28 = sshll.u32 %s12853_s23, 5 }
  0x17   : > { %v9253_v1 = vld [vmem:[%s722_s27] sm:$0x1]  ;;  %s713_s20 = scalar_lea.vmem %s12081_s1, %s7789_s28  ;;  %s703_s19 = scalar_lea.vmem %s12080_s0, %s7788_s29 }
  0x18   : > { %v979_v2 = vsel %vm978_vm0, %v9253_v1, -inf  ;;  %v795_v3 = vld [vmem:[%s713_s20 + $0x10] sm:$0xff]  ;;  %v793_v4 = vld [vmem:[%s713_s20] sm:$0xff]  ;;  %v796_v5 = vld [vmem:[%s713_s20 + $0x18] sm:$0xff]  ;;  %s12857_s30 = smov (!%p726_p7, %s9123_s30), 1  ;;  %s785_s18 = scalar_lea.vmem %s12094_s14, %s12855_s24 }
  0x19   : > { %980 = vmax.xlane.f32.xlu1 %v979_v2  ;;  %v794_v6 = vld [vmem:[%s713_s20 + $0x8] sm:$0xff]  ;;  %v817_v7 = vmul.f32 %v793_v4, %v793_v4  ;;  %v819_v9 = vmul.f32 %v795_v3, %v795_v3  ;;  %v820_v10 = vmul.f32 %v796_v5, %v796_v5  ;;  %v789_v12 = vld [vmem:[%s703_s19] sm:$0xff]  ;;  %v791_v14 = vld [vmem:[%s703_s19 + $0x10] sm:$0xff]  ;;  %s7791_s22 = sshll.u32 %s12857_s30, 10  ;;  %s7790_s27 = sshll.u32 %s12857_s30, 9 }
  0x1a   : > { %v818_v8 = vmul.f32 %v794_v6, %v794_v6  ;;  %v790_v13 = vld [vmem:[%s703_s19 + $0x8] sm:$0xff]  ;;  %v792_v16 = vld [vmem:[%s703_s19 + $0x18] sm:$0xff]  ;;  %v798_v17 = vmul.f32 %v789_v12, %v789_v12  ;;  %v800_v19 = vmul.f32 %v791_v14, %v791_v14  ;;  %s9276_s26 = scalar_lea.vmem %s12084_s4, %s7791_s22  ;;  %s9414_s29 = scalar_lea.vmem %s12083_s3, %s7790_s27 }
  0x1b   : > { %v799_v18 = vmul.f32 %v790_v13, %v790_v13  ;;  %v801_v21 = vmul.f32 %v792_v16, %v792_v16  ;;  %v1484_v53 = vld [vmem:[%s9276_s26 + $0x100] sm:$0xff]  ;;  %v1490_v54 = vld [vmem:[%s9276_s26 + $0x130] sm:$0xff]  ;;  %s9842_s19 = scalar_lea.vmem %s12086_s6, %s7790_s27  ;;  %s7795_s22 = sshll.u32 %s12857_s30, 7 }
  0x1c   : > { %v821_v11 = vadd.f32 %v818_v8, %v817_v7  ;;  %v1492_v55 = vld [vmem:[%s9276_s26 + $0x140] sm:$0xff]  ;;  %v1494_v56 = vld [vmem:[%s9276_s26 + $0x150] sm:$0xff]  ;;  %s10845_s20 = scalar_lea.vmem %s12090_s10, %s7795_s22  ;;  %s7794_s27 = sshll.u32 %s12857_s30, 8 }
  0x1d   : > { %v802_v22 = vadd.f32 %v799_v18, %v798_v17  ;;  %v1496_v57 = vld [vmem:[%s9276_s26 + $0x160] sm:$0xff]  ;;  %v1498_v58 = vld [vmem:[%s9276_s26 + $0x170] sm:$0xff]  ;;  %s7796_s21 = sshll.u32 %s12857_s30, 6 }
  0x1e   : > { %v822_v15 = vadd.f32 %v821_v11, %v819_v9  ;;  %v1500_v59 = vld [vmem:[%s9276_s26 + $0x180] sm:$0xff]  ;;  %v1502_v60 = vld [vmem:[%s9276_s26 + $0x190] sm:$0xff] }
  0x1f   : > { %v803_v24 = vadd.f32 %v802_v22, %v800_v19  ;;  %v1504_v61 = vld [vmem:[%s9276_s26 + $0x1a0] sm:$0xff]  ;;  %v1506_v62 = vld [vmem:[%s9276_s26 + $0x1b0] sm:$0xff] }
  0x20   : > { %v823_v20 = vadd.f32 %v822_v15, %v820_v10  ;;  %v1508_v63 = vld [vmem:[%s9276_s26 + $0x1c0] sm:$0xff]  ;;  %v1510_v2 = vld [vmem:[%s9276_s26 + $0x1d0] sm:$0xff] }
  0x21   : > { %v804_v26 = vadd.f32 %v803_v24, %v801_v21  ;;  %v1520_v7 = vld [vmem:[%s9276_s26 + $0x220] sm:$0xff]  ;;  %v1522_v9 = vld [vmem:[%s9276_s26 + $0x230] sm:$0xff] }
  0x22   : > { %v824_v23 = vrot.slane %v823_v20, 4  ;;  %v1528_v18 = vld [vmem:[%s9276_s26 + $0x260] sm:$0xff] }
  0x23   : > { %v805_v28 = vrot.slane %v804_v26, 4 }
  0x24   : > { %v825_v25 = vadd.f32 %v824_v23, %v823_v20  ;;  %v1530_v20 = vld [vmem:[%s9276_s26 + $0x270] sm:$0xff]  ;;  %v1532_v23 = vld [vmem:[%s9276_s26 + $0x280] sm:$0xff] }
  0x25   : > { %v806_v30 = vadd.f32 %v805_v28, %v804_v26  ;;  %v1485_v28 = vld [vmem:[%s9276_s26 + $0x108] sm:$0xff] }
  0x26   : > { %v826_v27 = vrot.slane %v825_v25, 2 }
  0x27   : > { %v807_v32 = vrot.slane %v806_v30, 2 }
  0x28   : > { %v827_v29 = vadd.f32 %v826_v27, %v825_v25  ;;  %v1534_v25 = vld [vmem:[%s9276_s26 + $0x290] sm:$0xff]  ;;  %v1536_v27 = vld [vmem:[%s9276_s26 + $0x2a0] sm:$0xff] }
  0x29   : > { %v808_v34 = vadd.f32 %v807_v32, %v806_v30  ;;  %v1486_v30 = vld [vmem:[%s9276_s26 + $0x110] sm:$0xff]  ;;  %v1487_v32 = vld [vmem:[%s9276_s26 + $0x118] sm:$0xff] }
  0x2a   : > { %v828_v31 = vrot.slane %v827_v29, 1 }
  0x2b   : > { %v809_v36 = vrot.slane %v808_v34, 1 }
  0x2c   : > { %v829_v33 = vadd.f32 %v828_v31, %v827_v29  ;;  %v1538_v29 = vld [vmem:[%s9276_s26 + $0x2b0] sm:$0xff]  ;;  %v1540_v31 = vld [vmem:[%s9276_s26 + $0x2c0] sm:$0xff] }
  0x2d   : > { %v810_v37 = vadd.f32 %v809_v36, %v808_v34  ;;  %v1488_v34 = vld [vmem:[%s9276_s26 + $0x120] sm:$0xff]  ;;  %v1489_v36 = vld [vmem:[%s9276_s26 + $0x128] sm:$0xff] }
  0x2e   : > { %v830_v35 = vmax.f32 %v829_v33, 1e-24  ;;  %v1542_v33 = vld [vmem:[%s9276_s26 + $0x2d0] sm:$0xff] }
  0x2f   : > { %v811_v38 = vmax.f32 %v810_v37, 1e-24  ;;  %v1546_v37 = vld [vmem:[%s9276_s26 + $0x2f0] sm:$0xff] }
  0x30   : > { %9085 = vrsqrt.f32 %v830_v35  ;;  %v1544_v35 = vld [vmem:[%s9276_s26 + $0x2e0] sm:$0xff] }
  0x31   : > { %9087 = vrsqrt.f32 %v811_v38  ;;  %v1491_v38 = vld [vmem:[%s9276_s26 + $0x138] sm:$0xff] }
  0x3a   : > { %v9086_v39 = vpop.eup %9085 }
  0x3b   : > { %v832_v40 = vmul.f32 %v9086_v39, %v793_v4  ;;  %v833_v41 = vmul.f32 %v9086_v39, %v794_v6  ;;  %v834_v42 = vmul.f32 %v9086_v39, %v795_v3  ;;  %v835_v43 = vmul.f32 %v9086_v39, %v796_v5  ;;  %v9088_v45 = vpop.eup %9087  ;;  %v1512_v3 = vld [vmem:[%s9276_s26 + $0x1e0] sm:$0xff]  ;;  %v1514_v4 = vld [vmem:[%s9276_s26 + $0x1f0] sm:$0xff] }
  0x3c   : > { %v813_v47 = vmul.f32 %v9088_v45, %v789_v12  ;;  %v814_v48 = vmul.f32 %v9088_v45, %v790_v13  ;;  %v815_v49 = vmul.f32 %v9088_v45, %v791_v14  ;;  %v816_v50 = vmul.f32 %v9088_v45, %v792_v16  ;;  %v1516_v5 = vld [vmem:[%s9276_s26 + $0x200] sm:$0xff]  ;;  %v1518_v6 = vld [vmem:[%s9276_s26 + $0x210] sm:$0xff]  ;;  %v1497_v45 = vld [vmem:[%s9276_s26 + $0x168] sm:$0xff] }
  0x3d   : > { %v836_v44 = vpack.c.bf16 %v833_v41, %v832_v40  ;;  %v837_v46 = vpack.c.bf16 %v835_v43, %v834_v42  ;;  %v1524_v14 = vld [vmem:[%s9276_s26 + $0x240] sm:$0xff]  ;;  %v1526_v16 = vld [vmem:[%s9276_s26 + $0x250] sm:$0xff]  ;;  %v1493_v40 = vld [vmem:[%s9276_s26 + $0x148] sm:$0xff] }
  0x3e   : > { %v838_v51 = vpack.c.bf16 %v814_v48, %v813_v47  ;;  %v839_v52 = vpack.c.bf16 %v816_v50, %v815_v49  ;;  %v1452_v39 = vld [vmem:[%s9276_s26] sm:$0xff]  ;;  %v1454_v41 = vld [vmem:[%s9276_s26 + $0x10] sm:$0xff]  ;;  %v1495_v42 = vld [vmem:[%s9276_s26 + $0x158] sm:$0xff] }
  0x3f   : > { %840 = vxpose.xlu0.c.b16.start [1/2] (short) %v836_v44, 128  ;;  %v1456_v43 = vld [vmem:[%s9276_s26 + $0x20] sm:$0xff]  ;;  %v1499_v48 = vld [vmem:[%s9276_s26 + $0x178] sm:$0xff] }
  0x40   : > { %8352 = vmatprep.subr.bf16.mxu0 %v838_v51  ;;  %v1460_v49 = vld [vmem:[%s9276_s26 + $0x40] sm:$0xff] }
  0x41   : > { %8353 = vmatpush3.bf16.msra.mxu0 %v838_v51  ;;  %v1501_v51 = vld [vmem:[%s9276_s26 + $0x188] sm:$0xff] }
  0x42   : > { %8354 = vmatprep.subr.bf16.mxu0 %v839_v52 }
  0x43   : > { %841 = vxpose.xlu0.c.b16.end [2/2] (short) %v837_v46, 128  ;;  %v1458_v46 = vld [vmem:[%s9276_s26 + $0x30] sm:$0xff] }
  0x45   : > { %8355 = vmatpush3.bf16.msra.mxu0 %v839_v52  ;;  %v1462_v52 = vld [vmem:[%s9276_s26 + $0x50] sm:$0xff] }
  0x46   : > { %5294 = vmatprep.subr.bf16.mxu0 %v12095_v0 }
  0x4c   : > { %9027 = vset.pattern.permute.xlu0 %v12095_v0  ;;  %v9685_v0 = vld [vmem:[%s9414_s29 + $0x188] sm:$0xff]  }
  0x4d   : > { %12239 = vst [vmem:[#allocation36_spill] sm:$0xff] %v9685_v0  ;;  %v1455_v0 = vld [vmem:[%s9276_s26 + $0x18] sm:$0xff] }
  0x64   : > { %1742 = vperm.xlu0 %9027, %v1484_v53  }
  0x68   : > { %1772 = vperm.xlu0 %9027, %v1490_v54   ;;  %v1503_v54 = vld [vmem:[%s9276_s26 + $0x198] sm:$0xff] }
  0x6c   : > { %1782 = vperm.xlu0 %9027, %v1492_v55   ;;  %v1464_v55 = vld [vmem:[%s9276_s26 + $0x60] sm:$0xff] }
  0x70   : > { %1792 = vperm.xlu0 %9027, %v1494_v56  }
  0x74   : > { %1802 = vperm.xlu0 %9027, %v1496_v57   ;;  %v1505_v57 = vld [vmem:[%s9276_s26 + $0x1a8] sm:$0xff] }
  0x78   : > { %1812 = vperm.xlu0 %9027, %v1498_v58   ;;  %v1466_v58 = vld [vmem:[%s9276_s26 + $0x70] sm:$0xff] }
  0x7c   : > { %1822 = vperm.xlu0 %9027, %v1500_v59  }
  0x80   : > { %1832 = vperm.xlu0 %9027, %v1502_v60   ;;  %v1507_v60 = vld [vmem:[%s9276_s26 + $0x1b8] sm:$0xff] }
  0x84   : > { %1842 = vperm.xlu0 %9027, %v1504_v61   ;;  %v1468_v61 = vld [vmem:[%s9276_s26 + $0x80] sm:$0xff] }
  0x88   : > { %1852 = vperm.xlu0 %9027, %v1506_v62  }
  0x8c   : > { %1862 = vperm.xlu0 %9027, %v1508_v63   ;;  %v1509_v63 = vld [vmem:[%s9276_s26 + $0x1c8] sm:$0xff] }
  0x90   : > { %1872 = vperm.xlu0 %9027, %v1510_v2   ;;  %v1470_v2 = vld [vmem:[%s9276_s26 + $0x90] sm:$0xff] }
  0x94   : > { %1882 = vperm.xlu0 %9027, %v1512_v3  }
  0x98   : > { %1892 = vperm.xlu0 %9027, %v1514_v4   ;;  %v1511_v4 = vld [vmem:[%s9276_s26 + $0x1d8] sm:$0xff] }
  0x9c   : > { %1902 = vperm.xlu0 %9027, %v1516_v5   ;;  %v1472_v5 = vld [vmem:[%s9276_s26 + $0xa0] sm:$0xff] }
  0xa0   : > { %1912 = vperm.xlu0 %9027, %v1518_v6  }
  0xa4   : > { %1922 = vperm.xlu0 %9027, %v1520_v7   ;;  %v1513_v7 = vld [vmem:[%s9276_s26 + $0x1e8] sm:$0xff] }
  0xa5   : > { %v848_v8 = vpop.trf.xlu0 }
  0xa6   : > { %8356 = vmatprep.mubr.msk.bf16.mxu0 %vm856_vm1, %v848_v8  ;;  %v981_v10 = vpop.xlane.xlu1 %980  ;;  %v1474_v8 = vld [vmem:[%s9276_s26 + $0xb0] sm:$0xff] }
  0xa7   : > { %v982_v11 = vsub.f32 %v9253_v1, %v981_v10  ;;  %v1515_v10 = vld [vmem:[%s9276_s26 + $0x1f8] sm:$0xff] }
  0xa8   : > { %1932 = vperm.xlu0 %9027, %v1522_v9  }
  0xa9   : > { %v983_v12 = vmul.f32 1.442695, %v982_v11  ;;  %v849_v13 = vpop.trf.xlu0  ;;  %v1476_v11 = vld [vmem:[%s9276_s26 + $0xc0] sm:$0xff] }
  0xaa   : > { %8357 = vmatmul.mubr.msk.bf16.vlgmr.msra.gmra.mrb[0].mxu0 %vm856_vm1, %v849_v13  ;;  %v1517_v13 = vld [vmem:[%s9276_s26 + $0x208] sm:$0xff] }
  0xab   : > { %9089 = vpow2.f32 %v983_v12 }
  0xac   : > { %1942 = vperm.xlu0 %9027, %v1524_v14   ;;  %v1478_v14 = vld [vmem:[%s9276_s26 + $0xd0] sm:$0xff] }
  0xad   : > { %v850_v15 = vpop.trf.xlu0 }
  0xae   : > { %8360 = vmatprep.mubr.msk.bf16.mxu0 %vm856_vm1, %v850_v15 }
  0xb0   : > { %1952 = vperm.xlu0 %9027, %v1526_v16   ;;  %v1519_v16 = vld [vmem:[%s9276_s26 + $0x218] sm:$0xff] }
  0xb1   : > { %v851_v17 = vpop.trf.xlu0 }
  0xb2   : > { %8361 = vmatmul.mubr.msk.bf16.gmra.mrb[4].mxu0 %vm856_vm1, %v851_v17  ;;  %v1480_v17 = vld [vmem:[%s9276_s26 + $0xe0] sm:$0xff] }
  0xb4   : > { %1962 = vperm.xlu0 %9027, %v1528_v18  }
  0xb5   : > { %v9304_v1 = vpop.eup %9089  ;;  %v852_v19 = vpop.trf.xlu0 }
  0xb6   : > { %8364 = vmatprep.mubr.msk.bf16.mxu0 %vm856_vm1, %v852_v19  ;;  %v985_v21 = vsel %vm978_vm0, %v9304_v1, 0.0  ;;  %v1521_v19 = vld [vmem:[%s9276_s26 + $0x228] sm:$0xff] }
  0xb7   : > { %986 = vadd.xlane.f32.xlu1 %v985_v21 }
  0xb8   : > { %1972 = vperm.xlu0 %9027, %v1530_v20   ;;  %v1482_v20 = vld [vmem:[%s9276_s26 + $0xf0] sm:$0xff] }
  0xb9   : > { %v853_v22 = vpop.trf.xlu0 }
  0xba   : > { %8365 = vmatmul.mubr.msk.bf16.gmra.mrb[8].mxu0 %vm856_vm1, %v853_v22  ;;  %v1523_v22 = vld [vmem:[%s9276_s26 + $0x238] sm:$0xff] }
  0xbc   : > { %1982 = vperm.xlu0 %9027, %v1532_v23   ;;  %v1548_v23 = vld [vmem:[%s9276_s26 + $0x300] sm:$0xff] }
  0xbd   : > { %v854_v24 = vpop.trf.xlu0 }
  0xbe   : > { %8368 = vmatprep.mubr.msk.bf16.mxu0 %vm856_vm1, %v854_v24 }
  0xc0   : > { %1992 = vperm.xlu0 %9027, %v1534_v25   ;;  %v1525_v25 = vld [vmem:[%s9276_s26 + $0x248] sm:$0xff] }
  0xc1   : > { %v855_v26 = vpop.trf.xlu0 }
  0xc2   : > { %8369 = vmatmul.mubr.msk.bf16.gmra.mrb[12].mxu0 %vm856_vm1, %v855_v26  ;;  %v1550_v26 = vld [vmem:[%s9276_s26 + $0x310] sm:$0xff] }
  0xc4   : > { %2002 = vperm.xlu0 %9027, %v1536_v27  }
  0xc8   : > { %1747 = vperm.xlu1 %9028, %v1485_v28   ;;  %2012 = vperm.xlu0 %9027, %v1538_v29   ;;  %v1527_v28 = vld [vmem:[%s9276_s26 + $0x258] sm:$0xff]  ;;  %v1552_v29 = vld [vmem:[%s9276_s26 + $0x320] sm:$0xff] }
  0xcc   : > { %1752 = vperm.xlu1 %9028, %v1486_v30   ;;  %2022 = vperm.xlu0 %9027, %v1540_v31   ;;  %v1529_v31 = vld [vmem:[%s9276_s26 + $0x268] sm:$0xff] }
  0xd0   : > { %1757 = vperm.xlu1 %9028, %v1487_v32   ;;  %2032 = vperm.xlu0 %9027, %v1542_v33   ;;  %v1554_v32 = vld [vmem:[%s9276_s26 + $0x330] sm:$0xff] }
  0xd4   : > { %1762 = vperm.xlu1 %9028, %v1488_v34   ;;  %2042 = vperm.xlu0 %9027, %v1544_v35   ;;  %v1531_v34 = vld [vmem:[%s9276_s26 + $0x278] sm:$0xff]  ;;  %v1556_v35 = vld [vmem:[%s9276_s26 + $0x340] sm:$0xff] }
  0xd8   : > { %1767 = vperm.xlu1 %9028, %v1489_v36   ;;  %2052 = vperm.xlu0 %9027, %v1546_v37   ;;  %v1247_v36 = vlaneseq }
  0xdc   : > { %1777 = vperm.xlu1 %9028, %v1491_v38   ;;  %1582 = vperm.xlu0 %9027, %v1452_v39   ;;  %v1533_v38 = vld [vmem:[%s9276_s26 + $0x288] sm:$0xff]  ;;  %v1558_v39 = vld [vmem:[%s9276_s26 + $0x350] sm:$0xff] }
  0xe0   : > { %1787 = vperm.xlu1 %9028, %v1493_v40   ;;  %1592 = vperm.xlu0 %9027, %v1454_v41   ;;  %v9416_v40 = vshrl.u32 %v1247_v36, 7  ;;  %v9489_v36 = vld [vmem:[%s9414_s29 + $0x70] sm:$0xff]  }
  0xe3   : > { %v9332_v44 = vpop.permute.xlu0 %1742 }
  0xe4   : > { %12207 = vst [vmem:[#allocation4_spill] sm:$0xff] %v9332_v44  ;;  %1797 = vperm.xlu1 %9028, %v1495_v42   ;;  %1602 = vperm.xlu0 %9027, %v1456_v43   ;;  %v1535_v42 = vld [vmem:[%s9276_s26 + $0x298] sm:$0xff]  ;;  %v9422_v43 = vld [vmem:[%s9414_s29] sm:$0xff]  }
  0xe7   : > { %v9336_v47 = vpop.permute.xlu0 %1772 }
  0xe8   : > { %12208 = vst [vmem:[#allocation5_spill] sm:$0xff] %v9336_v47  ;;  %1807 = vperm.xlu1 %9028, %v1497_v45   ;;  %1612 = vperm.xlu0 %9027, %v1458_v46   ;;  %v1560_v45 = vld [vmem:[%s9276_s26 + $0x360] sm:$0xff]  ;;  %v9426_v46 = vld [vmem:[%s9414_s29 + $0x8] sm:$0xff]   ;;  %v9695_v47 = vld [vmem:[%s9414_s29 + $0x198] sm:$0xff]  }
  0xe9   : > { %12241 = vst [vmem:[#allocation38_spill] sm:$0xff] %v9695_v47  ;;  %v9757_v47 = vld [vmem:[%s9414_s29 + $0x1e8] sm:$0xff]  }
  0xea   : > { %12250 = vst [vmem:[#allocation47_spill] sm:$0xff] %v9757_v47 }
  0xeb   : > { %v9340_v50 = vpop.permute.xlu0 %1782 }
  0xec   : > { %12209 = vst [vmem:[#allocation6_spill] sm:$0xff] %v9340_v50  ;;  %1817 = vperm.xlu1 %9028, %v1499_v48   ;;  %1622 = vperm.xlu0 %9027, %v1460_v49   ;;  %v9429_v48 = vld [vmem:[%s9414_s29 + $0x10] sm:$0xff]   ;;  %v9432_v49 = vld [vmem:[%s9414_s29 + $0x18] sm:$0xff]  }
  0xed   : > { %v9760_v50 = vld [vmem:[%s9414_s29 + $0x1f0] sm:$0xff]  }
  0xee   : > { %12251 = vst [vmem:[#allocation48_spill] sm:$0xff] %v9760_v50  ;;  %v1578_v50 = vld [vmem:[%s9276_s26 + $0x3f0] sm:$0xff] }
  0xef   : > { %v9344_v53 = vpop.permute.xlu0 %1792 }
  0xf0   : > { %12210 = vst [vmem:[#allocation7_spill] sm:$0xff] %v9344_v53  ;;  %1827 = vperm.xlu1 %9028, %v1501_v51   ;;  %1632 = vperm.xlu0 %9027, %v1462_v52   ;;  %v9435_v51 = vld [vmem:[%s9414_s29 + $0x20] sm:$0xff]   ;;  %v1543_v52 = vld [vmem:[%s9276_s26 + $0x2d8] sm:$0xff] }
  0xf1   : > { %v9704_v53 = vld [vmem:[%s9414_s29 + $0x1a0] sm:$0xff]  }
  0xf2   : > { %12243 = vst [vmem:[#allocation40_spill] sm:$0xff] %v9704_v53  ;;  %v9771_v53 = vld [vmem:[%s9414_s29 + $0x1f8] sm:$0xff]  }
  0xf3   : > { %v9348_v56 = vpop.permute.xlu0 %1802 }
  0xf4   : > { %12211 = vst [vmem:[#allocation8_spill] sm:$0xff] %v9348_v56  ;;  %1837 = vperm.xlu1 %9028, %v1503_v54   ;;  %1642 = vperm.xlu0 %9027, %v1464_v55   ;;  %v9599_v55 = vld [vmem:[%s9414_s29 + $0x110] sm:$0xff]   ;;  %v9707_v56 = vld [vmem:[%s9414_s29 + $0x1a8] sm:$0xff]  }
  0xf5   : > { %12244 = vst [vmem:[#allocation41_spill] sm:$0xff] %v9707_v56 }
  0xf7   : > { %v9352_v59 = vpop.permute.xlu0 %1812 }
  0xf8   : > { %12212 = vst [vmem:[#allocation9_spill] sm:$0xff] %v9352_v59  ;;  %1847 = vperm.xlu1 %9028, %v1505_v57   ;;  %1652 = vperm.xlu0 %9027, %v1466_v58   ;;  %v9442_v57 = vld [vmem:[%s9414_s29 + $0x28] sm:$0xff]   ;;  %v9445_v58 = vld [vmem:[%s9414_s29 + $0x30] sm:$0xff]  }
  0xf9   : > { %v9692_v59 = vld [vmem:[%s9414_s29 + $0x190] sm:$0xff]  }
  0xfa   : > { %12240 = vst [vmem:[#allocation37_spill] sm:$0xff] %v9692_v59  ;;  %v12253_v59 = vsub.s32 0, %v9416_v40 }
  0xfb   : > { %v9356_v62 = vpop.permute.xlu0 %1822 }
  0xfc   : > { %12213 = vst [vmem:[#allocation10_spill] sm:$0xff] %v9356_v62  ;;  %1857 = vperm.xlu1 %9028, %v1507_v60   ;;  %1662 = vperm.xlu0 %9027, %v1468_v61   ;;  %v1537_v60 = vld [vmem:[%s9276_s26 + $0x2a8] sm:$0xff]  ;;  %v9585_v61 = vld [vmem:[%s9414_s29 + $0xf8] sm:$0xff]   ;;  %v9728_v62 = vld [vmem:[%s9414_s29 + $0x1c0] sm:$0xff]  }
  0xfd   : > { %12248 = vst [vmem:[#allocation45_spill] sm:$0xff] %v9728_v62 }
  0xff   : > { %v9360_v3 = vpop.permute.xlu0 %1832 }
 0x100   : > { %12214 = vst [vmem:[#allocation11_spill] sm:$0xff] %v9360_v3  ;;  %1867 = vperm.xlu1 %9028, %v1509_v63   ;;  %1672 = vperm.xlu0 %9027, %v1470_v2   ;;  %v9574_v63 = vld [vmem:[%s9414_s29 + $0xe8] sm:$0xff]   ;;  %v9588_v2 = vld [vmem:[%s9414_s29 + $0x100] sm:$0xff]   ;;  %v9674_v3 = vld [vmem:[%s9414_s29 + $0x178] sm:$0xff]  }
 0x101   : > { %12237 = vst [vmem:[#allocation34_spill] sm:$0xff] %v9674_v3  ;;  %v9720_v3 = vld [vmem:[%s9414_s29 + $0x1b8] sm:$0xff]  }
 0x102   : > { %12247 = vst [vmem:[#allocation44_spill] sm:$0xff] %v9720_v3 }
 0x103   : > { %v9364_v6 = vpop.permute.xlu0 %1842 }
 0x104   : > { %12215 = vst [vmem:[#allocation12_spill] sm:$0xff] %v9364_v6  ;;  %1877 = vperm.xlu1 %9028, %v1511_v4   ;;  %1682 = vperm.xlu0 %9027, %v1472_v5   ;;  %v9453_v5 = vld [vmem:[%s9414_s29 + $0x38] sm:$0xff]   ;;  %v9577_v4 = vld [vmem:[%s9414_s29 + $0xf0] sm:$0xff]  }
 0x105   : > { %v9671_v6 = vld [vmem:[%s9414_s29 + $0x170] sm:$0xff]  }
 0x106   : > { %12236 = vst [vmem:[#allocation33_spill] sm:$0xff] %v9671_v6  ;;  %v9738_v6 = vld [vmem:[%s9414_s29 + $0x1d0] sm:$0xff]  }
 0x107   : > { %v9368_v9 = vpop.permute.xlu0 %1852 }
 0x108   : > { %12216 = vst [vmem:[#allocation13_spill] sm:$0xff] %v9368_v9  ;;  %1887 = vperm.xlu1 %9028, %v1513_v7   ;;  %1692 = vperm.xlu0 %9027, %v1474_v8   ;;  %v9456_v7 = vld [vmem:[%s9414_s29 + $0x40] sm:$0xff]   ;;  %v1562_v8 = vld [vmem:[%s9276_s26 + $0x370] sm:$0xff] }
 0x10b   : > { %v9372_v12 = vpop.permute.xlu0 %1862 }
 0x10c   : > { %12217 = vst [vmem:[#allocation14_spill] sm:$0xff] %v9372_v12  ;;  %1897 = vperm.xlu1 %9028, %v1515_v10   ;;  %1702 = vperm.xlu0 %9027, %v1476_v11   ;;  %v1566_v10 = vld [vmem:[%s9276_s26 + $0x390] sm:$0xff]  ;;  %v9661_v12 = vld [vmem:[%s9414_s29 + $0x168] sm:$0xff]  }
 0x10d   : > { %12234 = vst [vmem:[#allocation31_spill] sm:$0xff] %v9661_v12 }
 0x10f   : > { %v9376_v15 = vpop.permute.xlu0 %1872 }
 0x110   : > { %12218 = vst [vmem:[#allocation15_spill] sm:$0xff] %v9376_v15  ;;  %1907 = vperm.xlu1 %9028, %v1517_v13   ;;  %1712 = vperm.xlu0 %9027, %v1478_v14   ;;  %v1541_v14 = vld [vmem:[%s9276_s26 + $0x2c8] sm:$0xff]  ;;  %v9649_v15 = vld [vmem:[%s9414_s29 + $0x158] sm:$0xff]  }
 0x111   : > { %v9552_v13 = vld [vmem:[%s9414_s29 + $0xc8] sm:$0xff]  }
 0x113   : > { %v9380_v18 = vpop.permute.xlu0 %1882 }
 0x114   : > { %12219 = vst [vmem:[#allocation16_spill] sm:$0xff] %v9380_v18  ;;  %1917 = vperm.xlu1 %9028, %v1519_v16   ;;  %1722 = vperm.xlu0 %9027, %v1480_v17   ;;  %v9464_v16 = vld [vmem:[%s9414_s29 + $0x48] sm:$0xff]   ;;  %v9467_v17 = vld [vmem:[%s9414_s29 + $0x50] sm:$0xff]  }
 0x115   : > { %v9646_v18 = vld [vmem:[%s9414_s29 + $0x150] sm:$0xff]  }
 0x117   : > { %v9384_v21 = vpop.permute.xlu0 %1892 }
 0x118   : > { %12220 = vst [vmem:[#allocation17_spill] sm:$0xff] %v9384_v21  ;;  %1927 = vperm.xlu1 %9028, %v1521_v19   ;;  %1732 = vperm.xlu0 %9027, %v1482_v20   ;;  %v9544_v20 = vld [vmem:[%s9414_s29 + $0xc0] sm:$0xff]   ;;  %v9555_v19 = vld [vmem:[%s9414_s29 + $0xd0] sm:$0xff]   ;;  %v9731_v21 = vld [vmem:[%s9414_s29 + $0x1c8] sm:$0xff]  }
 0x11b   : > { %v9388_v24 = vpop.permute.xlu0 %1902 }
 0x11c   : > { %12221 = vst [vmem:[#allocation18_spill] sm:$0xff] %v9388_v24  ;;  %1937 = vperm.xlu1 %9028, %v1523_v22   ;;  %2062 = vperm.xlu0 %9027, %v1548_v23   ;;  %v9530_v22 = vld [vmem:[%s9414_s29 + $0xa8] sm:$0xff]   ;;  %v9541_v23 = vld [vmem:[%s9414_s29 + $0xb8] sm:$0xff]  }
 0x11d   : > { %v1545_v24 = vld [vmem:[%s9276_s26 + $0x2e8] sm:$0xff] }
 0x11f   : > { %v9392_v27 = vpop.permute.xlu0 %1912 }
 0x120   : > { %12222 = vst [vmem:[#allocation19_spill] sm:$0xff] %v9392_v27  ;;  %1947 = vperm.xlu1 %9028, %v1525_v25   ;;  %2072 = vperm.xlu0 %9027, %v1550_v26   ;;  %v9474_v25 = vld [vmem:[%s9414_s29 + $0x58] sm:$0xff]   ;;  %v9477_v26 = vld [vmem:[%s9414_s29 + $0x60] sm:$0xff]  }
 0x121   : > { %v9629_v27 = vld [vmem:[%s9414_s29 + $0x138] sm:$0xff]  }
 0x123   : > { %v9396_v30 = vpop.permute.xlu0 %1922 }
 0x124   : > { %12223 = vst [vmem:[#allocation20_spill] sm:$0xff] %v9396_v30  ;;  %1957 = vperm.xlu1 %9028, %v1527_v28   ;;  %2082 = vperm.xlu0 %9027, %v1552_v29   ;;  %v9533_v29 = vld [vmem:[%s9414_s29 + $0xb0] sm:$0xff]   ;;  %v9606_v30 = vld [vmem:[%s9414_s29 + $0x118] sm:$0xff]  }
 0x127   : > { %v9400_v33 = vpop.permute.xlu0 %1932 }
 0x128   : > { %12224 = vst [vmem:[#allocation21_spill] sm:$0xff] %v9400_v33  ;;  %1967 = vperm.xlu1 %9028, %v1529_v31   ;;  %2092 = vperm.xlu0 %9027, %v1554_v32   ;;  %v9500_v32 = vld [vmem:[%s9414_s29 + $0x80] sm:$0xff]   ;;  %v9626_v33 = vld [vmem:[%s9414_s29 + $0x130] sm:$0xff]  }
 0x129   : > { %v1564_v31 = vld [vmem:[%s9276_s26 + $0x380] sm:$0xff] }
 0x12b   : > { %v9405_v37 = vpop.permute.xlu0 %1942 }
 0x12c   : > { %12225 = vst [vmem:[#allocation22_spill] sm:$0xff] %v9405_v37  ;;  %1977 = vperm.xlu1 %9028, %v1531_v34   ;;  %2102 = vperm.xlu0 %9027, %v1556_v35   ;;  %v9486_v35 = vld [vmem:[%s9414_s29 + $0x68] sm:$0xff]   ;;  %v9497_v34 = vld [vmem:[%s9414_s29 + $0x78] sm:$0xff]   ;;  %v9615_v37 = vld [vmem:[%s9414_s29 + $0x120] sm:$0xff]  }
 0x12f   : > { %v9418_v41 = vpop.permute.xlu0 %1952 }
 0x130   : > { %12226 = vst [vmem:[#allocation23_spill] sm:$0xff] %v9418_v41  ;;  %1987 = vperm.xlu1 %9028, %v1533_v38   ;;  %2112 = vperm.xlu0 %9027, %v1558_v39   ;;  %v1539_v38 = vld [vmem:[%s9276_s26 + $0x2b8] sm:$0xff]  ;;  %v9508_v39 = vld [vmem:[%s9414_s29 + $0x88] sm:$0xff]  }
 0x131   : > { %v9618_v41 = vld [vmem:[%s9414_s29 + $0x128] sm:$0xff]  }
 0x133   : > { %v9438_v54 = vpop.permute.xlu0 %1962 }
 0x134   : > { %12227 = vst [vmem:[#allocation24_spill] sm:$0xff] %v9438_v54  ;;  %1997 = vperm.xlu1 %9028, %v1535_v42   ;;  %2122 = vperm.xlu0 %9027, %v1560_v45   ;;  %v9511_v45 = vld [vmem:[%s9414_s29 + $0x90] sm:$0xff]   ;;  %v1568_v54 = vld [vmem:[%s9276_s26 + $0x3a0] sm:$0xff] }
 0x137   : > { %v9479_v28 = vpop.permute.xlu0 %1972 }
 0x138   : > { %12228 = vst [vmem:[#allocation25_spill] sm:$0xff] %v9479_v28  ;;  %2007 = vperm.xlu1 %9028, %v1537_v60   ;;  %2132 = vperm.xlu0 %9027, %v1562_v8   ;;  %v9518_v60 = vld [vmem:[%s9414_s29 + $0x98] sm:$0xff]   ;;  %v9521_v8 = vld [vmem:[%s9414_s29 + $0xa0] sm:$0xff]  }
 0x13b   : > { %v9523_v42 = vpop.permute.xlu0 %1982 }
 0x13c   : > { %12229 = vst [vmem:[#allocation26_spill] sm:$0xff] %v9523_v42  ;;  %2017 = vperm.xlu1 %9028, %v1539_v38   ;;  %2142 = vperm.xlu0 %9027, %v1564_v31   ;;  %v9562_v38 = vld [vmem:[%s9414_s29 + $0xd8] sm:$0xff]   ;;  %v9565_v31 = vld [vmem:[%s9414_s29 + $0xe0] sm:$0xff]   ;;  %v9596_v42 = vld [vmem:[%s9414_s29 + $0x108] sm:$0xff]  }
 0x13f   : > { %v9567_v11 = vpop.permute.xlu0 %1992 }
 0x140   : > { %12230 = vst [vmem:[#allocation27_spill] sm:$0xff] %v9567_v11  ;;  %2027 = vperm.xlu1 %9028, %v1541_v14   ;;  %2152 = vperm.xlu0 %9027, %v1566_v10   ;;  %v9639_v10 = vld [vmem:[%s9414_s29 + $0x148] sm:$0xff]   ;;  %v9682_v11 = vld [vmem:[%s9414_s29 + $0x180] sm:$0xff]  }
 0x141   : > { %12238 = vst [vmem:[#allocation35_spill] sm:$0xff] %v9682_v11  ;;  %v9748_v11 = vld [vmem:[%s9414_s29 + $0x1e0] sm:$0xff]  }
 0x143   : > { %v9608_v14 = vpop.permute.xlu0 %2002 }
 0x144   : > { %12231 = vst [vmem:[#allocation28_spill] sm:$0xff] %v9608_v14  ;;  %2037 = vperm.xlu1 %9028, %v1543_v52   ;;  %v987_v28 = vpop.xlane.xlu1 %986  ;;  %2162 = vperm.xlu0 %9027, %v1568_v54   ;;  %v1570_v52 = vld [vmem:[%s9276_s26 + $0x3b0] sm:$0xff]  ;;  %v9636_v14 = vld [vmem:[%s9414_s29 + $0x140] sm:$0xff]  }
 0x145   : > { %9091 = vrcp.f32 %v987_v28  ;;  %v9658_v28 = vld [vmem:[%s9414_s29 + $0x160] sm:$0xff]  }
 0x146   : > { %12233 = vst [vmem:[#allocation30_spill] sm:$0xff] %v9658_v28 }
 0x147   : > { %v9651_v54 = vpop.permute.xlu0 %2012 }
 0x148   : > { %12232 = vst [vmem:[#allocation29_spill] sm:$0xff] %v9651_v54  ;;  %2047 = vperm.xlu1 %9028, %v1545_v24   ;;  %v9663_v9 = vpop.permute.xlu1 %1747  ;;  %v1547_v54 = vld [vmem:[%s9276_s26 + $0x2f8] sm:$0xff]  ;;  %2172 = vperm.xlu0 %9027, %v1570_v52   ;;  %v1572_v24 = vld [vmem:[%s9276_s26 + $0x3c0] sm:$0xff] }
 0x149   : > { %12235 = vst [vmem:[#allocation32_spill] sm:$0xff] %v9663_v9  ;;  %v9717_v9 = vld [vmem:[%s9414_s29 + $0x1b0] sm:$0xff]  }
 0x14a   : > { %12246 = vst [vmem:[#allocation43_spill] sm:$0xff] %v9717_v9  ;;  %v1576_v9 = vld [vmem:[%s9276_s26 + $0x3e0] sm:$0xff] }
 0x14b   : > { %v9697_v52 = vpop.permute.xlu0 %2022 }
 0x14c   : > { %12242 = vst [vmem:[#allocation39_spill] sm:$0xff] %v9697_v52  ;;  %2057 = vperm.xlu1 %9028, %v1547_v54   ;;  %v9709_v44 = vpop.permute.xlu1 %1752  ;;  %v1453_v52 = vld [vmem:[%s9276_s26 + $0x8] sm:$0xff]  ;;  %2182 = vperm.xlu0 %9027, %v1572_v24   ;;  %v1574_v54 = vld [vmem:[%s9276_s26 + $0x3d0] sm:$0xff] }
 0x14d   : > { %12245 = vst [vmem:[#allocation42_spill] sm:$0xff] %v9709_v44  ;;  %v9741_v44 = vld [vmem:[%s9414_s29 + $0x1d8] sm:$0xff]   ;;  %s7477_s29 = sshll.u32 %s12857_s30, 1 }
 0x14f   : > { %v9092_v12 = vpop.eup %9091  ;;  %v9763_v3 = vpop.permute.xlu0 %2032 }
 0x150   : > { %v989_v28 = vmul.f32 %v9092_v12, %v9304_v1  ;;  %1587 = vperm.xlu1 %9028, %v1453_v52   ;;  %v9751_v56 = vpop.permute.xlu1 %1757  ;;  %2192 = vperm.xlu0 %9027, %v1574_v54   ;;  %12252 = vst [vmem:[#allocation49_spill] sm:$0xff] %v9763_v3  ;;  %v12256_v3 = vunpack.c.h.bf16 %v9422_v43  ;;  %v12257_v12 = vunpack.c.l.bf16 %v9426_v46  ;;  %v12258_v54 = vunpack.c.h.bf16 %v9426_v46 }
 0x151   : > { %12249 = vst [vmem:[#allocation46_spill] sm:$0xff] %v9751_v56  ;;  %v12263_v46 = vunpack.c.h.bf16 %v9432_v49 }
 0x152   : > { %v9775_v24 = vrot.slane %v989_v28, %v12253_v59  ;;  %v12255_v59 = vunpack.c.l.bf16 %v9422_v43 }
 0x154   : > { %1597 = vperm.xlu1 %9028, %v1455_v0   ;;  %v9784_v40 = vpop.permute.xlu1 %1762  ;;  %v1252_v28 = vmul.f32 %v12255_v59, %v9775_v24  ;;  %v1253_v62 = vmul.f32 %v12256_v3, %v9775_v24  ;;  %2202 = vperm.xlu0 %9027, %v1576_v9   ;;  %v9795_v1 = vmul.f32 %v12257_v12, %v9775_v24  ;;  %v1457_v0 = vld [vmem:[%s9276_s26 + $0x28] sm:$0xff]  ;;  %v12259_v59 = vunpack.c.l.bf16 %v9429_v48 }
 0x155   : > { %12254 = vst [vmem:[#allocation50_spill] sm:$0xff] %v9784_v40  ;;  %v9802_v56 = vmul.f32 %v12258_v54, %v9775_v24  ;;  %v12261_v3 = vunpack.c.h.bf16 %v9429_v48  ;;  %v12262_v12 = vunpack.c.l.bf16 %v9432_v49  ;;  %v9823_v54 = vmul.f32 %v12263_v46, %v9775_v24 }
 0x156   : > { %v9807_v43 = vmul.f32 %v12259_v59, %v9775_v24  ;;  %v1380_v40 = vpack.c.bf16 %v1253_v62, %v1252_v28  ;;  %v12264_v59 = vunpack.c.l.bf16 %v9435_v51  ;;  %v12266_v48 = vunpack.c.h.bf16 %v9435_v51 }
 0x157   : > { %v9812_v9 = vmul.f32 %v12261_v3, %v9775_v24  ;;  %v9817_v52 = vmul.f32 %v12262_v12, %v9775_v24  ;;  %v9835_v12 = vpop.permute.xlu0 %2042  ;;  %v12268_v28 = vunpack.c.l.bf16 %v9442_v57  ;;  %v12270_v46 = vunpack.c.h.bf16 %v9442_v57  ;;  %v1459_v57 = vld [vmem:[%s9276_s26 + $0x38] sm:$0xff] }
 0x158   : > { %12260 = vst [vmem:[#allocation51_spill] sm:$0xff] %v9807_v43  ;;  %v9828_v47 = vmul.f32 %v12264_v59, %v9775_v24  ;;  %v9833_v3 = vmul.f32 %v12266_v48, %v9775_v24  ;;  %12267 = vst [vmem:[#allocation53_spill] sm:$0xff] %v9835_v12  ;;  %1607 = vperm.xlu1 %9028, %v1457_v0   ;;  %8388 = vmatprep.mubr.bf16.mxu1 %v1380_v40  ;;  %v9858_v48 = vpop.permute.xlu1 %1767  ;;  %v12273_v12 = vunpack.c.l.bf16 %v9445_v58 }
 0x159   : > { %v9851_v51 = vmul.f32 %v12268_v28, %v9775_v24  ;;  %v9856_v59 = vmul.f32 %v12270_v46, %v9775_v24  ;;  %12272 = vst [vmem:[#allocation56_spill] sm:$0xff] %v9858_v48  ;;  %2212 = vperm.xlu0 %9027, %v1578_v50   ;;  %v12274_v0 = vunpack.c.h.bf16 %v9445_v58  ;;  %v12275_v49 = vunpack.c.l.bf16 %v9453_v5  ;;  %v3357_v50 = vld [vmem:[%s9842_s19 + $0x80] sm:$0xff] }
 0x15a   : > { %12265 = vst [vmem:[#allocation52_spill] sm:$0xff] %v9828_v47  ;;  %v9867_v28 = vmul.f32 %v12273_v12, %v9775_v24  ;;  %v12277_v12 = vunpack.c.h.bf16 %v9453_v5  ;;  %v12278_v40 = vunpack.c.l.bf16 %v9456_v7  ;;  %v12279_v58 = vunpack.c.h.bf16 %v9456_v7 }
 0x15b   : > { %12269 = vst [vmem:[#allocation54_spill] sm:$0xff] %v9851_v51  ;;  %12271 = vst [vmem:[#allocation55_spill] sm:$0xff] %v9856_v59  ;;  %v9876_v46 = vmul.f32 %v12274_v0, %v9775_v24  ;;  %v9881_v62 = vmul.f32 %v12275_v49, %v9775_v24  ;;  %v12280_v49 = vunpack.c.l.bf16 %v9464_v16  ;;  %v12282_v5 = vunpack.c.h.bf16 %v9464_v16 }
 0x15c   : > { %v9886_v48 = vmul.f32 %v12277_v12, %v9775_v24  ;;  %v9892_v43 = vmul.f32 %v12278_v40, %v9775_v24  ;;  %v9897_v0 = vmul.f32 %v12279_v58, %v9775_v24  ;;  %v12283_v7 = vunpack.c.l.bf16 %v9467_v17  ;;  %1617 = vperm.xlu1 %9028, %v1459_v57   ;;  %v9923_v16 = vpop.permute.xlu1 %1777  ;;  %v9940_v57 = vpop.permute.xlu0 %2052 }
 0x15d   : > { %12276 = vst [vmem:[#allocation57_spill] sm:$0xff] %v9881_v62  ;;  %v9902_v51 = vmul.f32 %v12280_v49, %v9775_v24  ;;  %v9907_v12 = vmul.f32 %v12282_v5, %v9775_v24  ;;  %v12285_v49 = vunpack.c.h.bf16 %v9467_v17  ;;  %12287 = vst [vmem:[#allocation61_spill] sm:$0xff] %v9923_v16  ;;  %v12288_v59 = vunpack.c.l.bf16 %v9474_v25  ;;  %3487 = vperm.xlu0 %9027, %v3357_v50   ;;  %v3341_v50 = vld [vmem:[%s9842_s19] sm:$0xff] }
 0x15e   : > { %v9916_v58 = vmul.f32 %v12283_v7, %v9775_v24  ;;  %v12290_v7 = vunpack.c.h.bf16 %v9474_v25  ;;  %12291 = vst [vmem:[#allocation63_spill] sm:$0xff] %v9940_v57  ;;  %v12292_v40 = vunpack.c.l.bf16 %v9477_v26  ;;  %v12296_v25 = vunpack.c.l.bf16 %v9486_v35 }
 0x15f   : > { %12281 = vst [vmem:[#allocation58_spill] sm:$0xff] %v9902_v51  ;;  %v9921_v47 = vmul.f32 %v12285_v49, %v9775_v24  ;;  %v9932_v62 = vmul.f32 %v12288_v59, %v9775_v24  ;;  %v1461_v49 = vld [vmem:[%s9276_s26 + $0x48] sm:$0xff]  ;;  %v12294_v59 = vunpack.c.h.bf16 %v9477_v26  ;;  %v12297_v57 = vunpack.c.h.bf16 %v9486_v35 }
 0x160   : > { %12284 = vst [vmem:[#allocation59_spill] sm:$0xff] %v9916_v58  ;;  %v9937_v17 = vmul.f32 %v12290_v7, %v9775_v24  ;;  %v9947_v16 = vmul.f32 %v12292_v40, %v9775_v24  ;;  %v9957_v7 = vmul.f32 %v12296_v25, %v9775_v24  ;;  %v12298_v26 = vunpack.c.l.bf16 %v9489_v36  ;;  %1627 = vperm.xlu1 %9028, %v1461_v49  }
 0x161   : > { %12286 = vst [vmem:[#allocation60_spill] sm:$0xff] %v9921_v47  ;;  %12289 = vst [vmem:[#allocation62_spill] sm:$0xff] %v9932_v62  ;;  %v9952_v51 = vmul.f32 %v12294_v59, %v9775_v24  ;;  %v9965_v40 = vmul.f32 %v12297_v57, %v9775_v24  ;;  %v12300_v58 = vunpack.c.h.bf16 %v9489_v36  ;;  %v12301_v5 = vunpack.c.l.bf16 %v9497_v34  ;;  %3407 = vperm.xlu0 %9027, %v3341_v50  }
 0x162   : > { %12293 = vst [vmem:[#allocation64_spill] sm:$0xff] %v9947_v16  ;;  %v9970_v59 = vmul.f32 %v12298_v26, %v9775_v24  ;;  %v12303_v57 = vunpack.c.h.bf16 %v9497_v34  ;;  %v12304_v26 = vunpack.c.l.bf16 %v9500_v32  ;;  %v12307_v16 = vunpack.c.h.bf16 %v9500_v32 }
 0x163   : > { %12295 = vst [vmem:[#allocation65_spill] sm:$0xff] %v9952_v51  ;;  %v9975_v25 = vmul.f32 %v12300_v58, %v9775_v24  ;;  %v9982_v35 = vmul.f32 %v12301_v5, %v9775_v24  ;;  %v9994_v58 = vpop.permute.xlu1 %1787  ;;  %v12310_v47 = vunpack.c.h.bf16 %v9508_v39  ;;  %v12311_v32 = vunpack.c.l.bf16 %v9511_v45 }
 0x164   : > { %12299 = vst [vmem:[#allocation66_spill] sm:$0xff] %v9970_v59  ;;  %v9987_v62 = vmul.f32 %v12303_v57, %v9775_v24  ;;  %v9992_v36 = vmul.f32 %v12304_v26, %v9775_v24  ;;  %12306 = vst [vmem:[#allocation69_spill] sm:$0xff] %v9994_v58  ;;  %v10003_v34 = vmul.f32 %v12307_v16, %v9775_v24  ;;  %v12309_v57 = vunpack.c.l.bf16 %v9508_v39  ;;  %v1463_v26 = vld [vmem:[%s9276_s26 + $0x58] sm:$0xff]  ;;  %v3359_v59 = vld [vmem:[%s9842_s19 + $0x90] sm:$0xff] }
 0x165   : > { %12302 = vst [vmem:[#allocation67_spill] sm:$0xff] %v9982_v35  ;;  %v10016_v58 = vmul.f32 %v12310_v47, %v9775_v24  ;;  %v10021_v16 = vmul.f32 %v12311_v32, %v9775_v24  ;;  %v12313_v5 = vunpack.c.h.bf16 %v9511_v45  ;;  %v12314_v39 = vunpack.c.l.bf16 %v9518_v60  ;;  %v10046_v35 = vpop.permute.xlu0 %1582  ;;  %1637 = vperm.xlu1 %9028, %v1463_v26   ;;  %v1465_v26 = vld [vmem:[%s9276_s26 + $0x68] sm:$0xff]  ;;  %3497 = vperm.xlu0 %9027, %v3359_v59   ;;  %v3343_v59 = vld [vmem:[%s9842_s19 + $0x10] sm:$0xff] }
 0x166   : > { %12305 = vst [vmem:[#allocation68_spill] sm:$0xff] %v9992_v36  ;;  %12308 = vst [vmem:[#allocation70_spill] sm:$0xff] %v10003_v34  ;;  %v10008_v51 = vmul.f32 %v12309_v57, %v9775_v24  ;;  %v12316_v49 = vunpack.c.h.bf16 %v9518_v60  ;;  %v12317_v45 = vunpack.c.l.bf16 %v9521_v8  ;;  %v12320_v36 = vunpack.c.h.bf16 %v9521_v8 }
 0x167   : > { %12312 = vst [vmem:[#allocation71_spill] sm:$0xff] %v10021_v16  ;;  %v10026_v57 = vmul.f32 %v12313_v5, %v9775_v24  ;;  %v10034_v47 = vmul.f32 %v12314_v39, %v9775_v24  ;;  %12319 = vst [vmem:[#allocation74_spill] sm:$0xff] %v10046_v35  ;;  %v12324_v35 = vunpack.c.h.bf16 %v9530_v22  ;;  %v12325_v8 = vunpack.c.l.bf16 %v9533_v29 }
 0x168   : > { %v10039_v32 = vmul.f32 %v12316_v49, %v9775_v24  ;;  %v10044_v5 = vmul.f32 %v12317_v45, %v9775_v24  ;;  %v10055_v60 = vmul.f32 %v12320_v36, %v9775_v24  ;;  %v12322_v49 = vunpack.c.l.bf16 %v9530_v22  ;;  %v10062_v45 = vpop.permute.xlu1 %1797 }
 0x169   : > { %12315 = vst [vmem:[#allocation72_spill] sm:$0xff] %v10034_v47  ;;  %12323 = vst [vmem:[#allocation76_spill] sm:$0xff] %v10062_v45  ;;  %v10069_v39 = vmul.f32 %v12324_v35, %v9775_v24  ;;  %v10074_v36 = vmul.f32 %v12325_v8, %v9775_v24  ;;  %v12328_v22 = vunpack.c.l.bf16 %v9541_v23  ;;  %v12330_v45 = vunpack.c.h.bf16 %v9541_v23  ;;  %1647 = vperm.xlu1 %9028, %v1465_v26   ;;  %v1467_v26 = vld [vmem:[%s9276_s26 + $0x78] sm:$0xff] }
 0x16a   : > { %12318 = vst [vmem:[#allocation73_spill] sm:$0xff] %v10044_v5  ;;  %12321 = vst [vmem:[#allocation75_spill] sm:$0xff] %v10055_v60  ;;  %v10060_v34 = vmul.f32 %v12322_v49, %v9775_v24  ;;  %v12327_v49 = vunpack.c.h.bf16 %v9533_v29  ;;  %v12331_v29 = vunpack.c.l.bf16 %v9544_v20  ;;  %v12335_v23 = vunpack.c.l.bf16 %v9552_v13  ;;  %3417 = vperm.xlu0 %9027, %v3343_v59  }
 0x16b   : > { %12326 = vst [vmem:[#allocation77_spill] sm:$0xff] %v10074_v36  ;;  %v10087_v35 = vmul.f32 %v12328_v22, %v9775_v24  ;;  %v10092_v8 = vmul.f32 %v12330_v45, %v9775_v24  ;;  %v12333_v22 = vunpack.c.h.bf16 %v9544_v20  ;;  %v12336_v47 = vunpack.c.h.bf16 %v9552_v13 }
 0x16c   : > { %v10079_v16 = vmul.f32 %v12327_v49, %v9775_v24  ;;  %v10097_v49 = vmul.f32 %v12331_v29, %v9775_v24  ;;  %v10112_v45 = vmul.f32 %v12335_v23, %v9775_v24  ;;  %v12337_v5 = vunpack.c.l.bf16 %v9555_v19  ;;  %v10131_v23 = vpop.permute.xlu1 %1807 }
 0x16d   : > { %12329 = vst [vmem:[#allocation78_spill] sm:$0xff] %v10087_v35  ;;  %v10107_v60 = vmul.f32 %v12333_v22, %v9775_v24  ;;  %v10119_v50 = vmul.f32 %v12336_v47, %v9775_v24  ;;  %v12339_v22 = vunpack.c.h.bf16 %v9555_v19  ;;  %12340 = vst [vmem:[#allocation82_spill] sm:$0xff] %v10131_v23  ;;  %v12341_v13 = vunpack.c.l.bf16 %v9562_v38  ;;  %v10151_v23 = vpop.permute.xlu0 %1592  ;;  %1657 = vperm.xlu1 %9028, %v1467_v26  }
 0x16e   : > { %12332 = vst [vmem:[#allocation79_spill] sm:$0xff] %v10097_v49  ;;  %v10124_v20 = vmul.f32 %v12337_v5, %v9775_v24  ;;  %v12343_v5 = vunpack.c.h.bf16 %v9562_v38  ;;  %v12344_v19 = vunpack.c.l.bf16 %v9565_v31  ;;  %12346 = vst [vmem:[#allocation85_spill] sm:$0xff] %v10151_v23  ;;  %v12347_v38 = vunpack.c.h.bf16 %v9565_v31 }
 0x16f   : > { %12334 = vst [vmem:[#allocation80_spill] sm:$0xff] %v10107_v60  ;;  %v10129_v36 = vmul.f32 %v12339_v22, %v9775_v24  ;;  %v10138_v47 = vmul.f32 %v12341_v13, %v9775_v24  ;;  %v12349_v49 = vunpack.c.l.bf16 %v9574_v63  ;;  %v3361_v60 = vld [vmem:[%s9842_s19 + $0xa0] sm:$0xff]  ;;  %v12350_v29 = vunpack.c.h.bf16 %v9574_v63 }
 0x170   : > { %12338 = vst [vmem:[#allocation81_spill] sm:$0xff] %v10124_v20  ;;  %v10143_v35 = vmul.f32 %v12343_v5, %v9775_v24  ;;  %v10148_v22 = vmul.f32 %v12344_v19, %v9775_v24  ;;  %v10160_v5 = vmul.f32 %v12347_v38, %v9775_v24  ;;  %v12351_v31 = vunpack.c.l.bf16 %v9577_v4  ;;  %3507 = vperm.xlu0 %9027, %v3361_v60  }
 0x171   : > { %12342 = vst [vmem:[#allocation83_spill] sm:$0xff] %v10138_v47  ;;  %v10165_v19 = vmul.f32 %v12349_v49, %v9775_v24  ;;  %v10173_v23 = vmul.f32 %v12350_v29, %v9775_v24  ;;  %v12353_v13 = vunpack.c.h.bf16 %v9577_v4  ;;  %v12354_v59 = vunpack.c.l.bf16 %v9585_v61 }
 0x172   : > { %12345 = vst [vmem:[#allocation84_spill] sm:$0xff] %v10148_v22  ;;  %12348 = vst [vmem:[#allocation86_spill] sm:$0xff] %v10160_v5  ;;  %v10178_v38 = vmul.f32 %v12351_v31, %v9775_v24  ;;  %v12356_v29 = vunpack.c.h.bf16 %v9585_v61  ;;  %v12357_v31 = vunpack.c.l.bf16 %v9588_v2  ;;  %v12360_v22 = vunpack.c.h.bf16 %v9588_v2 }
 0x173   : > { %v10183_v49 = vmul.f32 %v12353_v13, %v9775_v24  ;;  %v10190_v63 = vmul.f32 %v12354_v59, %v9775_v24  ;;  %v10202_v13 = vpop.permute.xlu1 %1817  ;;  %v12363_v20 = vunpack.c.h.bf16 %v9596_v42  ;;  %v12364_v2 = vunpack.c.l.bf16 %v9599_v55 }
 0x174   : > { %12352 = vst [vmem:[#allocation87_spill] sm:$0xff] %v10178_v38  ;;  %v10195_v47 = vmul.f32 %v12356_v29, %v9775_v24  ;;  %v10200_v4 = vmul.f32 %v12357_v31, %v9775_v24  ;;  %12359 = vst [vmem:[#allocation90_spill] sm:$0xff] %v10202_v13  ;;  %v10211_v61 = vmul.f32 %v12360_v22, %v9775_v24  ;;  %v12362_v29 = vunpack.c.l.bf16 %v9596_v42  ;;  %v1469_v31 = vld [vmem:[%s9276_s26 + $0x88] sm:$0xff]  ;;  %v3345_v38 = vld [vmem:[%s9842_s19 + $0x20] sm:$0xff] }
 0x175   : > { %12355 = vst [vmem:[#allocation88_spill] sm:$0xff] %v10190_v63  ;;  %v10224_v13 = vmul.f32 %v12363_v20, %v9775_v24  ;;  %v10229_v22 = vmul.f32 %v12364_v2, %v9775_v24  ;;  %v12366_v59 = vunpack.c.h.bf16 %v9599_v55  ;;  %v12367_v42 = vunpack.c.l.bf16 %v9606_v30  ;;  %v10254_v63 = vpop.permute.xlu0 %1602  ;;  %1667 = vperm.xlu1 %9028, %v1469_v31   ;;  %v1471_v31 = vld [vmem:[%s9276_s26 + $0x98] sm:$0xff]  ;;  %3427 = vperm.xlu0 %9027, %v3345_v38   ;;  %v3363_v38 = vld [vmem:[%s9842_s19 + $0xb0] sm:$0xff] }
 0x176   : > { %12358 = vst [vmem:[#allocation89_spill] sm:$0xff] %v10200_v4  ;;  %12361 = vst [vmem:[#allocation91_spill] sm:$0xff] %v10211_v61  ;;  %v10216_v5 = vmul.f32 %v12362_v29, %v9775_v24  ;;  %v12369_v26 = vunpack.c.h.bf16 %v9606_v30  ;;  %v12370_v55 = vunpack.c.l.bf16 %v9615_v37  ;;  %v12373_v4 = vunpack.c.h.bf16 %v9615_v37 }
 0x177   : > { %12365 = vst [vmem:[#allocation92_spill] sm:$0xff] %v10229_v22  ;;  %v10234_v29 = vmul.f32 %v12366_v59, %v9775_v24  ;;  %v10242_v20 = vmul.f32 %v12367_v42, %v9775_v24  ;;  %12372 = vst [vmem:[#allocation95_spill] sm:$0xff] %v10254_v63  ;;  %v12378_v63 = vunpack.c.h.bf16 %v9618_v41  ;;  %v12379_v37 = vunpack.c.l.bf16 %v9626_v33 }
 0x178   : > { %v10247_v2 = vmul.f32 %v12369_v26, %v9775_v24  ;;  %v10252_v59 = vmul.f32 %v12370_v55, %v9775_v24  ;;  %v10263_v30 = vmul.f32 %v12373_v4, %v9775_v24  ;;  %v12375_v26 = vunpack.c.l.bf16 %v9618_v41  ;;  %v10270_v55 = vpop.permute.xlu1 %1827 }
 0x179   : > { %12368 = vst [vmem:[#allocation93_spill] sm:$0xff] %v10242_v20  ;;  %12377 = vst [vmem:[#allocation98_spill] sm:$0xff] %v10270_v55  ;;  %v10277_v42 = vmul.f32 %v12378_v63, %v9775_v24  ;;  %v10282_v4 = vmul.f32 %v12379_v37, %v9775_v24  ;;  %v12383_v41 = vunpack.c.l.bf16 %v9629_v27  ;;  %v12385_v55 = vunpack.c.h.bf16 %v9629_v27  ;;  %1677 = vperm.xlu1 %9028, %v1471_v31   ;;  %v1473_v31 = vld [vmem:[%s9276_s26 + $0xa8] sm:$0xff] }
 0x17a   : > { %12371 = vst [vmem:[#allocation94_spill] sm:$0xff] %v10252_v59  ;;  %12374 = vst [vmem:[#allocation96_spill] sm:$0xff] %v10263_v30  ;;  %v10268_v61 = vmul.f32 %v12375_v26, %v9775_v24  ;;  %v12381_v26 = vunpack.c.h.bf16 %v9626_v33  ;;  %v12387_v33 = vunpack.c.l.bf16 %v9636_v14  ;;  %v12391_v27 = vunpack.c.l.bf16 %v9639_v10  ;;  %3517 = vperm.xlu0 %9027, %v3363_v38   ;;  %v12420_v38 = vld [vmem:[#allocation34_spill] sm:$0xff] }
 0x17b   : > { %12380 = vst [vmem:[#allocation99_spill] sm:$0xff] %v10282_v4  ;;  %v10295_v63 = vmul.f32 %v12383_v41, %v9775_v24  ;;  %v10300_v37 = vmul.f32 %v12385_v55, %v9775_v24  ;;  %v12389_v41 = vunpack.c.h.bf16 %v9636_v14  ;;  %v12393_v20 = vunpack.c.h.bf16 %v9639_v10 }
 0x17c   : > { %12376 = vst [vmem:[#allocation97_spill] sm:$0xff] %v10268_v61  ;;  %v10287_v22 = vmul.f32 %v12381_v26, %v9775_v24  ;;  %v10305_v26 = vmul.f32 %v12387_v33, %v9775_v24  ;;  %v10320_v55 = vmul.f32 %v12391_v27, %v9775_v24  ;;  %v12395_v59 = vunpack.c.l.bf16 %v9646_v18  ;;  %v10339_v27 = vpop.permute.xlu1 %1837 }
 0x17d   : > { %12384 = vst [vmem:[#allocation101_spill] sm:$0xff] %v10295_v63  ;;  %12386 = vst [vmem:[#allocation102_spill] sm:$0xff] %v10300_v37  ;;  %v10315_v30 = vmul.f32 %v12389_v41, %v9775_v24  ;;  %v10327_v60 = vmul.f32 %v12393_v20, %v9775_v24  ;;  %v12397_v41 = vunpack.c.h.bf16 %v9646_v18  ;;  %v12400_v10 = vunpack.c.l.bf16 %v9649_v15  ;;  %v12404_v18 = vld [vmem:[#allocation30_spill] sm:$0xff]  ;;  %1687 = vperm.xlu1 %9028, %v1473_v31  }
 0x17e   : > { %12382 = vst [vmem:[#allocation100_spill] sm:$0xff] %v10287_v22  ;;  %12388 = vst [vmem:[#allocation103_spill] sm:$0xff] %v10305_v26  ;;  %v10332_v14 = vmul.f32 %v12395_v59, %v9775_v24  ;;  %v12402_v59 = vunpack.c.h.bf16 %v9649_v15  ;;  %v12408_v15 = vunpack.c.h.bf16 %v12404_v18  ;;  %v12410_v26 = vld [vmem:[#allocation31_spill] sm:$0xff]  ;;  %v3347_v22 = vld [vmem:[%s9842_s19 + $0x30] sm:$0xff] }
 0x17f   : > { %12390 = vst [vmem:[#allocation104_spill] sm:$0xff] %v10315_v30  ;;  %12392 = vst [vmem:[#allocation105_spill] sm:$0xff] %v10320_v55  ;;  %v10337_v4 = vmul.f32 %v12397_v41, %v9775_v24  ;;  %v10346_v20 = vmul.f32 %v12400_v10, %v9775_v24  ;;  %v12405_v41 = vunpack.c.l.bf16 %v12404_v18  ;;  %v12411_v30 = vunpack.c.l.bf16 %v12410_v26  ;;  %v12415_v10 = vld [vmem:[#allocation33_spill] sm:$0xff]  ;;  %3437 = vperm.xlu0 %9027, %v3347_v22   ;;  %v12441_v31 = vld [vmem:[#allocation38_spill] sm:$0xff] }
 0x180   : > { %12394 = vst [vmem:[#allocation106_spill] sm:$0xff] %v10327_v60  ;;  %12396 = vst [vmem:[#allocation107_spill] sm:$0xff] %v10332_v14  ;;  %v10351_v63 = vmul.f32 %v12402_v59, %v9775_v24  ;;  %v10368_v59 = vmul.f32 %v12408_v15, %v9775_v24  ;;  %v12413_v33 = vunpack.c.h.bf16 %v12410_v26  ;;  %v12416_v18 = vunpack.c.l.bf16 %v12415_v10 }
 0x181   : > { %12398 = vst [vmem:[#allocation108_spill] sm:$0xff] %v10337_v4  ;;  %12399 = vst [vmem:[#allocation109_spill] sm:$0xff] %v10339_v27  ;;  %v10356_v37 = vmul.f32 %v12405_v41, %v9775_v24  ;;  %v10359_v27 = vpop.permute.xlu0 %1612  ;;  %v10373_v41 = vmul.f32 %v12411_v30, %v9775_v24  ;;  %v12418_v14 = vunpack.c.h.bf16 %v12415_v10  ;;  %v12471_v22 = vunpack.c.h.bf16 %v9731_v21 }
 0x182   : > { %12401 = vst [vmem:[#allocation110_spill] sm:$0xff] %v10346_v20  ;;  %12403 = vst [vmem:[#allocation111_spill] sm:$0xff] %v10351_v63  ;;  %v10386_v15 = vmul.f32 %v12416_v18, %v9775_v24  ;;  %v12421_v20 = vunpack.c.l.bf16 %v12420_v38  ;;  %v12425_v18 = vld [vmem:[#allocation35_spill] sm:$0xff] }
 0x183   : > { %12406 = vst [vmem:[#allocation30_spill] sm:$0xff] %v10356_v37  ;;  %12407 = vst [vmem:[#allocation112_spill] sm:$0xff] %v10359_v27  ;;  %v10381_v27 = vmul.f32 %v12413_v33, %v9775_v24  ;;  %v10391_v30 = vmul.f32 %v12418_v14, %v9775_v24  ;;  %v12423_v33 = vunpack.c.h.bf16 %v12420_v38  ;;  %v12426_v55 = vunpack.c.l.bf16 %v12425_v18  ;;  %v10410_v14 = vpop.permute.xlu1 %1847 }
 0x184   : > { %12409 = vst [vmem:[#allocation113_spill] sm:$0xff] %v10368_v59  ;;  %12412 = vst [vmem:[#allocation31_spill] sm:$0xff] %v10373_v41  ;;  %v10398_v26 = vmul.f32 %v12421_v20, %v9775_v24  ;;  %v12429_v37 = vunpack.c.h.bf16 %v12425_v18  ;;  %v12436_v20 = vld [vmem:[#allocation37_spill] sm:$0xff] }
 0x185   : > { %12414 = vst [vmem:[#allocation114_spill] sm:$0xff] %v10381_v27  ;;  %12417 = vst [vmem:[#allocation33_spill] sm:$0xff] %v10386_v15  ;;  %v10403_v63 = vmul.f32 %v12423_v33, %v9775_v24  ;;  %v10408_v10 = vmul.f32 %v12426_v55, %v9775_v24  ;;  %v12431_v33 = vld [vmem:[#allocation36_spill] sm:$0xff]  ;;  %v1475_v55 = vld [vmem:[%s9276_s26 + $0xb8] sm:$0xff]  ;;  %v12437_v18 = vunpack.c.l.bf16 %v12436_v20  ;;  %v12439_v15 = vunpack.c.h.bf16 %v12436_v20  ;;  %v10462_v41 = vpop.permute.xlu0 %1622 }
 0x186   : > { %12419 = vst [vmem:[#allocation115_spill] sm:$0xff] %v10391_v30  ;;  %12422 = vst [vmem:[#allocation34_spill] sm:$0xff] %v10398_v26  ;;  %v10419_v38 = vmul.f32 %v12429_v37, %v9775_v24  ;;  %v12432_v59 = vunpack.c.l.bf16 %v12431_v33  ;;  %v12434_v4 = vunpack.c.h.bf16 %v12431_v33  ;;  %v3365_v30 = vld [vmem:[%s9842_s19 + $0xc0] sm:$0xff]  ;;  %v12442_v26 = vunpack.c.l.bf16 %v12441_v31  ;;  %1697 = vperm.xlu1 %9028, %v1475_v55   ;;  %v8358_v55 = vpop.f32.mrb[0].mxu0 }
 0x187   : > { %12424 = vst [vmem:[#allocation116_spill] sm:$0xff] %v10403_v63  ;;  %12427 = vst [vmem:[#allocation35_spill] sm:$0xff] %v10408_v10  ;;  %v10437_v37 = vmul.f32 %v12437_v18, %v9775_v24  ;;  %v12444_v33 = vunpack.c.h.bf16 %v12441_v31  ;;  %v12446_v63 = vld [vmem:[#allocation40_spill] sm:$0xff]  ;;  %v12452_v31 = vld [vmem:[#allocation41_spill] sm:$0xff]  ;;  %3527 = vperm.xlu0 %9027, %v3365_v30  }
 0x188   : > { %12428 = vst [vmem:[#allocation117_spill] sm:$0xff] %v10410_v14  ;;  %12430 = vst [vmem:[#allocation118_spill] sm:$0xff] %v10419_v38  ;;  %v10424_v60 = vmul.f32 %v12432_v59, %v9775_v24  ;;  %v10432_v14 = vmul.f32 %v12434_v4, %v9775_v24  ;;  %v10442_v59 = vmul.f32 %v12439_v15, %v9775_v24  ;;  %v12447_v20 = vunpack.c.l.bf16 %v12446_v63  ;;  %v3349_v30 = vld [vmem:[%s9842_s19 + $0x40] sm:$0xff] }
 0x189   : > { %12438 = vst [vmem:[#allocation37_spill] sm:$0xff] %v10437_v37  ;;  %v10450_v4 = vmul.f32 %v12442_v26, %v9775_v24  ;;  %v10455_v18 = vmul.f32 %v12444_v33, %v9775_v24  ;;  %12449 = vst [vmem:[#allocation122_spill] sm:$0xff] %v10462_v41  ;;  %v12450_v26 = vunpack.c.h.bf16 %v12446_v63  ;;  %v12453_v33 = vunpack.c.l.bf16 %v12452_v31  ;;  %v12457_v63 = vld [vmem:[#allocation43_spill] sm:$0xff] }
 0x18a   : > { %12433 = vst [vmem:[#allocation36_spill] sm:$0xff] %v10424_v60  ;;  %12435 = vst [vmem:[#allocation119_spill] sm:$0xff] %v10432_v14  ;;  %v10460_v15 = vmul.f32 %v12447_v20, %v9775_v24  ;;  %v10478_v20 = vpop.permute.xlu1 %1857  ;;  %v12456_v10 = vunpack.c.h.bf16 %v12452_v31  ;;  %v12462_v31 = vld [vmem:[#allocation44_spill] sm:$0xff]  ;;  %v915_v14 = vpop.f32.mrb[1].mxu0 }
 0x18b   : > { %12440 = vst [vmem:[#allocation120_spill] sm:$0xff] %v10442_v59  ;;  %12443 = vst [vmem:[#allocation38_spill] sm:$0xff] %v10450_v4  ;;  %v10471_v38 = vmul.f32 %v12450_v26, %v9775_v24  ;;  %v10476_v27 = vmul.f32 %v12453_v33, %v9775_v24  ;;  %v12458_v26 = vunpack.c.l.bf16 %v12457_v63  ;;  %v12460_v33 = vunpack.c.h.bf16 %v12457_v63  ;;  %v12467_v63 = vld [vmem:[#allocation45_spill] sm:$0xff]  ;;  %3447 = vperm.xlu0 %9027, %v3349_v30   ;;  %v12483_v30 = vld [vmem:[#allocation47_spill] sm:$0xff] }
 0x18c   : > { %12445 = vst [vmem:[#allocation121_spill] sm:$0xff] %v10455_v18  ;;  %12448 = vst [vmem:[#allocation40_spill] sm:$0xff] %v10460_v15  ;;  %v10485_v41 = vmul.f32 %v12456_v10, %v9775_v24  ;;  %v12463_v10 = vunpack.c.l.bf16 %v12462_v31 }
 0x18d   : > { %12451 = vst [vmem:[#allocation123_spill] sm:$0xff] %v10471_v38  ;;  %12454 = vst [vmem:[#allocation41_spill] sm:$0xff] %v10476_v27  ;;  %v10490_v37 = vmul.f32 %v12458_v26, %v9775_v24  ;;  %v10495_v59 = vmul.f32 %v12460_v33, %v9775_v24  ;;  %v12465_v26 = vunpack.c.h.bf16 %v12462_v31  ;;  %v12468_v33 = vunpack.c.l.bf16 %v12467_v63 }
 0x18e   : > { %12455 = vst [vmem:[#allocation124_spill] sm:$0xff] %v10478_v20  ;;  %v1477_v20 = vld [vmem:[%s9276_s26 + $0xc8] sm:$0xff]  ;;  %v10503_v4 = vmul.f32 %v12463_v10, %v9775_v24  ;;  %v12469_v10 = vunpack.c.h.bf16 %v12467_v63  ;;  %v10535_v27 = vmul.f32 %v12471_v22, %v9775_v24  ;;  %v12472_v63 = vunpack.c.l.bf16 %v9738_v6  ;;  %v10547_v61 = vpop.permute.xlu1 %1867 }
 0x18f   : > { %12459 = vst [vmem:[#allocation43_spill] sm:$0xff] %v10490_v37  ;;  %12461 = vst [vmem:[#allocation125_spill] sm:$0xff] %v10495_v59  ;;  %v10508_v18 = vmul.f32 %v12465_v26, %v9775_v24  ;;  %v10513_v60 = vmul.f32 %v12468_v33, %v9775_v24  ;;  %v12470_v26 = vunpack.c.l.bf16 %v9731_v21  ;;  %v8359_v33 = vpop.f32.mrb[2].mxu0  ;;  %1707 = vperm.xlu1 %9028, %v1477_v20   ;;  %v12476_v22 = vunpack.c.l.bf16 %v9741_v44 }
 0x190   : > { %12464 = vst [vmem:[#allocation44_spill] sm:$0xff] %v10503_v4  ;;  %v10523_v31 = vmul.f32 %v12469_v10, %v9775_v24  ;;  %v10540_v15 = vmul.f32 %v12472_v63, %v9775_v24  ;;  %v12474_v10 = vunpack.c.h.bf16 %v9738_v6  ;;  %v1445_v37 = vpack.c.bf16 %v8359_v33, %v8358_v55  ;;  %v918_v59 = vpop.f32.mrb[3].mxu0  ;;  %12475 = vst [vmem:[#allocation127_spill] sm:$0xff] %v10547_v61  ;;  %v10562_v55 = vpop.permute.xlu0 %1632  ;;  %v3367_v61 = vld [vmem:[%s9842_s19 + $0xd0] sm:$0xff] }
 0x191   : > { %12466 = vst [vmem:[#allocation126_spill] sm:$0xff] %v10508_v18  ;;  %v10528_v38 = vmul.f32 %v12470_v26, %v9775_v24  ;;  %v10554_v4 = vmul.f32 %v12476_v22, %v9775_v24  ;;  %v12478_v63 = vunpack.c.h.bf16 %v9741_v44  ;;  %v1479_v18 = vld [vmem:[%s9276_s26 + $0xd8] sm:$0xff]  ;;  %12480 = vst [vmem:[#allocation130_spill] sm:$0xff] %v10562_v55  ;;  %v12481_v22 = vunpack.c.l.bf16 %v9748_v11  ;;  %v12488_v55 = vld [vmem:[#allocation48_spill] sm:$0xff]  ;;  %3537 = vperm.xlu0 %9027, %v3367_v61  }
 0x192   : > { %12473 = vst [vmem:[#allocation45_spill] sm:$0xff] %v10540_v15  ;;  %v10545_v26 = vmul.f32 %v12474_v10, %v9775_v24  ;;  %v1444_v10 = vpack.c.bf16 %v918_v59, %v915_v14  ;;  %v12482_v14 = vunpack.c.h.bf16 %v9748_v11  ;;  %v12486_v33 = vunpack.c.h.bf16 %v12483_v30  ;;  %v8362_v15 = vpop.f32.mrb[4].mxu0 }
 0x193   : > { %12477 = vst [vmem:[#allocation128_spill] sm:$0xff] %v10554_v4  ;;  %v10559_v6 = vmul.f32 %v12478_v63, %v9775_v24  ;;  %v10571_v21 = vmul.f32 %v12481_v22, %v9775_v24  ;;  %v12484_v63 = vunpack.c.l.bf16 %v12483_v30  ;;  %v12489_v44 = vunpack.c.l.bf16 %v12488_v55  ;;  %1717 = vperm.xlu1 %9028, %v1479_v18   ;;  %v931_v18 = vpop.f32.mrb[5].mxu0 }
 0x194   : > { %v10579_v59 = vmul.f32 %v12482_v14, %v9775_v24  ;;  %v10589_v22 = vmul.f32 %v12486_v33, %v9775_v24  ;;  %8372 = vmatprep.subr.bf16.mxu1 %v1444_v10  ;;  %v12490_v11 = vunpack.c.h.bf16 %v12488_v55  ;;  %v12493_v33 = vunpack.c.h.bf16 %v9771_v53 }
 0x195   : > { %12479 = vst [vmem:[#allocation129_spill] sm:$0xff] %v10559_v6  ;;  %v10584_v20 = vmul.f32 %v12484_v63, %v9775_v24  ;;  %v10594_v4 = vmul.f32 %v12489_v44, %v9775_v24  ;;  %v12491_v63 = vunpack.c.l.bf16 %v9771_v53  ;;  %8373 = vmatpush3.bf16.msra.mxu1 %v1444_v10  ;;  %v10611_v44 = vpop.permute.xlu1 %1877  ;;  %v3351_v10 = vld [vmem:[%s9842_s19 + $0x50] sm:$0xff]  ;;  %v3369_v53 = vld [vmem:[%s9842_s19 + $0xe0] sm:$0xff] }
 0x196   : > { %12487 = vst [vmem:[#allocation131_spill] sm:$0xff] %v10589_v22  ;;  %v10599_v14 = vmul.f32 %v12490_v11, %v9775_v24  ;;  %v10609_v30 = vmul.f32 %v12493_v33, %v9775_v24  ;;  %12495 = vst [vmem:[#allocation133_spill] sm:$0xff] %v10611_v44  ;;  %8374 = vmatprep.subr.bf16.mxu1 %v1445_v37  ;;  %v8363_v33 = vpop.f32.mrb[6].mxu0  ;;  %v10623_v44 = vpop.permute.xlu0 %1642  ;;  %v1483_v22 = vld [vmem:[%s9276_s26 + $0xf8] sm:$0xff]  ;;  %3457 = vperm.xlu0 %9027, %v3351_v10  }
 0x197   : > { %12485 = vst [vmem:[#allocation47_spill] sm:$0xff] %v10584_v20  ;;  %v10604_v6 = vmul.f32 %v12491_v63, %v9775_v24  ;;  %v1481_v63 = vld [vmem:[%s9276_s26 + $0xe8] sm:$0xff]  ;;  %v1447_v55 = vpack.c.bf16 %v8363_v33, %v8362_v15  ;;  %v934_v11 = vpop.f32.mrb[7].mxu0 }
 0x198   : > { %12494 = vst [vmem:[#allocation132_spill] sm:$0xff] %v10609_v30  ;;  %1727 = vperm.xlu1 %9028, %v1481_v63   ;;  %v1446_v61 = vpack.c.bf16 %v934_v11, %v931_v18  ;;  %v1549_v15 = vld [vmem:[%s9276_s26 + $0x308] sm:$0xff]  ;;  %v3353_v63 = vld [vmem:[%s9842_s19 + $0x60] sm:$0xff] }
 0x199   : > { %12492 = vst [vmem:[#allocation48_spill] sm:$0xff] %v10604_v6  ;;  %8375 = vmatpush3.bf16.msra.mxu1 %v1445_v37  ;;  %v10625_v20 = vpop.permute.xlu1 %1887  ;;  %v8366_v6 = vpop.f32.mrb[8].mxu0 }
 0x19a   : > { %12496 = vst [vmem:[#allocation134_spill] sm:$0xff] %v10625_v20  ;;  %8376 = vmatprep.subr.bf16.mxu1 %v1446_v61  ;;  %v10632_v33 = vpop.permute.xlu0 %1652  ;;  %3547 = vperm.xlu0 %9027, %v3369_v53   ;;  %v947_v37 = vpop.f32.mrb[9].mxu0 }
 0x19b   : > { %v8367_v20 = vpop.f32.mrb[10].mxu0 }
 0x19c   : > { %1737 = vperm.xlu1 %9028, %v1483_v22   ;;  %v1449_v11 = vpack.c.bf16 %v8367_v20, %v8366_v6  ;;  %v950_v18 = vpop.f32.mrb[11].mxu0  ;;  %v1553_v20 = vld [vmem:[%s9276_s26 + $0x328] sm:$0xff] }
 0x19d   : > { %8377 = vmatpush3.bf16.msra.mxu1 %v1446_v61  ;;  %v10629_v24 = vpop.permute.xlu1 %1897  ;;  %v1448_v10 = vpack.c.bf16 %v950_v18, %v947_v37  ;;  %v1551_v61 = vld [vmem:[%s9276_s26 + $0x318] sm:$0xff]  ;;  %v8370_v6 = vpop.f32.mrb[12].mxu0 }
 0x19e   : > { %12497 = vst [vmem:[#allocation135_spill] sm:$0xff] %v10629_v24  ;;  %8378 = vmatprep.subr.bf16.mxu1 %v1447_v55  ;;  %3467 = vperm.xlu0 %9027, %v3353_v63   ;;  %v3371_v24 = vld [vmem:[%s9842_s19 + $0xf0] sm:$0xff]  ;;  %v10639_v30 = vpop.permute.xlu0 %1662 }
 0x19f   : > { %12499 = vst [vmem:[#allocation137_spill] sm:$0xff] %v10639_v30  ;;  %v3389_v30 = vld [vmem:[%s9842_s19 + $0x180] sm:$0xff] }
 0x1a0   : > { %2067 = vperm.xlu1 %9028, %v1549_v15   ;;  %v3355_v15 = vld [vmem:[%s9842_s19 + $0x70] sm:$0xff] }
 0x1a1   : > { %8379 = vmatpush3.bf16.msra.mxu1 %v1447_v55  ;;  %v10635_v22 = vpop.permute.xlu1 %1907  ;;  %v963_v55 = vpop.f32.mrb[13].mxu0 }
 0x1a2   : > { %12498 = vst [vmem:[#allocation136_spill] sm:$0xff] %v10635_v22  ;;  %8380 = vmatprep.subr.bf16.mxu1 %v1448_v10  ;;  %3557 = vperm.xlu0 %9027, %v3371_v24   ;;  %v8371_v22 = vpop.f32.mrb[14].mxu0 }
 0x1a3   : > { %v1451_v37 = vpack.c.bf16 %v8371_v22, %v8370_v6  ;;  %v966_v63 = vpop.f32.mrb[15].mxu0  ;;  %v1557_v22 = vld [vmem:[%s9276_s26 + $0x348] sm:$0xff] }
 0x1a4   : > { %2077 = vperm.xlu1 %9028, %v1551_v61   ;;  %v1555_v61 = vld [vmem:[%s9276_s26 + $0x338] sm:$0xff] }
 0x1a5   : > { %8381 = vmatpush3.bf16.msra.mxu1 %v1448_v10  ;;  %v10641_v53 = vpop.permute.xlu1 %1917  ;;  %v1450_v10 = vpack.c.bf16 %v966_v63, %v963_v55  ;;  %v1559_v55 = vld [vmem:[%s9276_s26 + $0x358] sm:$0xff]  ;;  %v3391_v63 = vld [vmem:[%s9842_s19 + $0x190] sm:$0xff] }
 0x1a6   : > { %12500 = vst [vmem:[#allocation138_spill] sm:$0xff] %v10641_v53  ;;  %8382 = vmatprep.subr.bf16.mxu1 %v1449_v11  ;;  %v10648_v53 = vpop.permute.xlu0 %1672  ;;  %3477 = vperm.xlu0 %9027, %v3355_v15   ;;  %v12503_v15 = vmov 0  }
 0x1a8   : > { %2087 = vperm.xlu1 %9028, %v1553_v20  }
 0x1a9   : > { %8383 = vmatpush3.bf16.msra.mxu1 %v1449_v11  ;;  %v10645_v18 = vpop.permute.xlu1 %1927  ;;  %v3373_v11 = vld [vmem:[%s9842_s19 + $0x100] sm:$0xff] }
 0x1aa   : > { %12501 = vst [vmem:[#allocation139_spill] sm:$0xff] %v10645_v18  ;;  %8384 = vmatprep.subr.bf16.mxu1 %v1450_v10  ;;  %3647 = vperm.xlu0 %9027, %v3389_v30   ;;  %v10655_v6 = vpop.permute.xlu0 %1682  ;;  %v12505_v30 = vld [vmem:[#allocation51_spill] sm:$0xff] }
 0x1ac   : > { %2097 = vperm.xlu1 %9028, %v1555_v61   ;;  %v12506_v61 = vpack.c.bf16 %v9812_v9, %v12505_v30 }
 0x1ad   : > { %8385 = vmatpush3.bf16.msra.mxu1 %v1450_v10  ;;  %v10651_v24 = vpop.permute.xlu1 %1937  ;;  %v12504_v10 = vpack.c.bf16 %v9802_v56, %v9795_v1  ;;  %v1563_v56 = vld [vmem:[%s9276_s26 + $0x378] sm:$0xff]  ;;  %v3393_v1 = vld [vmem:[%s9842_s19 + $0x1a0] sm:$0xff] }
 0x1ae   : > { %8386 = vmatprep.subr.bf16.mxu1 %v1451_v37  ;;  %3567 = vperm.xlu0 %9027, %v3373_v11   ;;  %v3375_v11 = vld [vmem:[%s9842_s19 + $0x110] sm:$0xff] }
 0x1b0   : > { %2107 = vperm.xlu1 %9028, %v1557_v22   ;;  %v10670_v22 = vpop.permute.xlu0 %1692 }
 0x1b1   : > { %8387 = vmatpush3.bf16.msra.mxu1 %v1451_v37  ;;  %v10657_v20 = vpop.permute.xlu1 %1947 }
 0x1b2   : > { %12502 = vst [vmem:[#allocation140_spill] sm:$0xff] %v10657_v20  ;;  %5005 = vmatprep.subr.bf16.mxu1 %v12503_v15  ;;  %v1561_v20 = vld [vmem:[%s9276_s26 + $0x368] sm:$0xff]  ;;  %3657 = vperm.xlu0 %9027, %v3391_v63  }
 0x1b3   : > { %v1565_v63 = vld [vmem:[%s9276_s26 + $0x388] sm:$0xff] }
 0x1b4   : > { %8389 = vmatmul.mubr.bf16.vlgmr.msra.gmra.mrb[0].mxu1 %v12504_v10  ;;  %2117 = vperm.xlu1 %9028, %v1559_v55   ;;  %v10678_v9 = vpop.permute.xlu0 %1702  ;;  %v12508_v55 = vpack.c.bf16 %v9823_v54, %v9817_v52  ;;  %v12509_v10 = vld [vmem:[#allocation52_spill] sm:$0xff]  ;;  %v1567_v52 = vld [vmem:[%s9276_s26 + $0x398] sm:$0xff]  ;;  %v3395_v54 = vld [vmem:[%s9842_s19 + $0x1b0] sm:$0xff] }
 0x1b5   : > { %8392 = vmatprep.mubr.bf16.mxu1 %v12506_v61  ;;  %v10668_v37 = vpop.permute.xlu1 %1957  ;;  %v12510_v30 = vpack.c.bf16 %v9833_v3, %v12509_v10  ;;  %v3377_v61 = vld [vmem:[%s9842_s19 + $0x120] sm:$0xff]  ;;  %v12512_v3 = vld [vmem:[#allocation55_spill] sm:$0xff] }
 0x1b6   : > { %3577 = vperm.xlu0 %9027, %v3375_v11  }
 0x1b8   : > { %2127 = vperm.xlu1 %9028, %v1561_v20  }
 0x1b9   : > { %v10674_v18 = vpop.permute.xlu1 %1967 }
 0x1ba   : > { %12507 = vst [vmem:[#allocation51_spill] sm:$0xff] %v10674_v18  ;;  %3667 = vperm.xlu0 %9027, %v3393_v1   ;;  %v10692_v18 = vpop.permute.xlu0 %1712 }
 0x1bc   : > { %8393 = vmatmul.mubr.bf16.gmra.mrb[4].mxu1 %v12508_v55  ;;  %2137 = vperm.xlu1 %9028, %v1563_v56   ;;  %v12513_v55 = vld [vmem:[#allocation54_spill] sm:$0xff]  ;;  %v12515_v56 = vpack.c.bf16 %v9876_v46, %v9867_v28  ;;  %v12517_v28 = vld [vmem:[#allocation57_spill] sm:$0xff] }
 0x1bd   : > { %8396 = vmatprep.mubr.bf16.mxu1 %v12510_v30  ;;  %v10686_v20 = vpop.permute.xlu1 %1977  ;;  %v12514_v10 = vpack.c.bf16 %v12512_v3, %v12513_v55  ;;  %v1569_v30 = vld [vmem:[%s9276_s26 + $0x3a8] sm:$0xff]  ;;  %v1571_v3 = vld [vmem:[%s9276_s26 + $0x3b8] sm:$0xff]  ;;  %v3397_v55 = vld [vmem:[%s9842_s19 + $0x1c0] sm:$0xff]  ;;  %v12518_v46 = vpack.c.bf16 %v9886_v48, %v12517_v28 }
 0x1be   : > { %3587 = vperm.xlu0 %9027, %v3377_v61   ;;  %v1575_v48 = vld [vmem:[%s9276_s26 + $0x3d8] sm:$0xff]  ;;  %v3399_v28 = vld [vmem:[%s9842_s19 + $0x1d0] sm:$0xff] }
 0x1c0   : > { %2147 = vperm.xlu1 %9028, %v1565_v63   ;;  %v3379_v63 = vld [vmem:[%s9842_s19 + $0x130] sm:$0xff] }
 0x1c1   : > { %v10690_v11 = vpop.permute.xlu1 %1987 }
 0x1c2   : > { %12511 = vst [vmem:[#allocation52_spill] sm:$0xff] %v10690_v11  ;;  %3677 = vperm.xlu0 %9027, %v3395_v54   ;;  %v10706_v11 = vpop.permute.xlu0 %1722 }
 0x1c4   : > { %8397 = vmatmul.mubr.bf16.gmra.mrb[8].mxu1 %v12514_v10  ;;  %2157 = vperm.xlu1 %9028, %v1567_v52   ;;  %v12519_v52 = vpack.c.bf16 %v9897_v0, %v9892_v43  ;;  %v12522_v0 = vld [vmem:[#allocation58_spill] sm:$0xff] }
 0x1c5   : > { %8400 = vmatprep.mubr.bf16.mxu1 %v12515_v56  ;;  %v10702_v1 = vpop.permute.xlu1 %1997  ;;  %v1573_v56 = vld [vmem:[%s9276_s26 + $0x3c8] sm:$0xff] }
 0x1c6   : > { %3597 = vperm.xlu0 %9027, %v3379_v63   ;;  %v10720_v10 = vpop.permute.xlu0 %1732 }
 0x1c8   : > { %2167 = vperm.xlu1 %9028, %v1569_v30   ;;  %v3381_v30 = vld [vmem:[%s9842_s19 + $0x140] sm:$0xff] }
 0x1c9   : > { %v10708_v61 = vpop.permute.xlu1 %2007 }
 0x1ca   : > { %12516 = vst [vmem:[#allocation55_spill] sm:$0xff] %v10708_v61  ;;  %3687 = vperm.xlu0 %9027, %v3397_v55   ;;  %v10728_v43 = vpop.permute.xlu0 %2062  ;;  %v1577_v55 = vld [vmem:[%s9276_s26 + $0x3e8] sm:$0xff] }
 0x1cb   : > { %12521 = vst [vmem:[#allocation57_spill] sm:$0xff] %v10728_v43  ;;  %v1579_v43 = vld [vmem:[%s9276_s26 + $0x3f8] sm:$0xff]  ;;  %s10776_s26 = scalar_lea.vmem %s12088_s8, %s7795_s22  ;;  %s772_s22 = scalar_lea.vmem %s12092_s12, %s7477_s29 }
 0x1cc   : > { %8401 = vmatmul.mubr.bf16.gmra.mrb[12].mxu1 %v12518_v46  ;;  %2177 = vperm.xlu1 %9028, %v1571_v3   ;;  %v12523_v3 = vpack.c.bf16 %v9907_v12, %v12522_v0  ;;  %v12524_v46 = vld [vmem:[#allocation60_spill] sm:$0xff]  ;;  %v12528_v0 = vld [vmem:[#allocation62_spill] sm:$0xff]  ;;  %s11767_s29 = scalar_lea.vmem %s12087_s7, %s7794_s27  ;;  %s7479_s27 = sshll.u32 %s12855_s24, 1 }
 0x1cd   : > { %8404 = vmatprep.mubr.bf16.mxu1 %v12519_v52  ;;  %v10718_v54 = vpop.permute.xlu1 %2017  ;;  %v12525_v52 = vld [vmem:[#allocation59_spill] sm:$0xff]  ;;  %v3401_v12 = vld [vmem:[%s9842_s19 + $0x1e0] sm:$0xff] }
 0x1ce   : > { %3607 = vperm.xlu0 %9027, %v3381_v30   ;;  %v12526_v61 = vpack.c.bf16 %v12524_v46, %v12525_v52  ;;  %v3383_v30 = vld [vmem:[%s9842_s19 + $0x150] sm:$0xff]  ;;  %v3358_v52 = vld [vmem:[%s9842_s19 + $0x88] sm:$0xff] }
 0x1d0   : > { %2187 = vperm.xlu1 %9028, %v1573_v56  }
 0x1d1   : > { %v10724_v63 = vpop.permute.xlu1 %2027 }
 0x1d2   : > { %12520 = vst [vmem:[#allocation54_spill] sm:$0xff] %v10724_v63  ;;  %3697 = vperm.xlu0 %9027, %v3399_v28   ;;  %v10740_v63 = vpop.permute.xlu0 %2072  ;;  %v12532_v28 = vld [vmem:[#allocation64_spill] sm:$0xff] }
 0x1d3   : > { %12527 = vst [vmem:[#allocation58_spill] sm:$0xff] %v10740_v63 }
 0x1d4   : > { %8405 = vmatmul.mubr.bf16.gmra.mrb[16].mxu1 %v12523_v3  ;;  %2197 = vperm.xlu1 %9028, %v1575_v48   ;;  %v12529_v3 = vpack.c.bf16 %v9937_v17, %v12528_v0  ;;  %v12531_v48 = vld [vmem:[#allocation65_spill] sm:$0xff] }
 0x1d5   : > { %8408 = vmatprep.mubr.bf16.mxu1 %v12526_v61  ;;  %v10737_v56 = vpop.permute.xlu1 %2037  ;;  %v12533_v46 = vpack.c.bf16 %v12531_v48, %v12532_v28  ;;  %v3342_v17 = vld [vmem:[%s9842_s19 + $0x8] sm:$0xff]  ;;  %v12535_v48 = vpack.c.bf16 %v9965_v40, %v9957_v7  ;;  %v3344_v40 = vld [vmem:[%s9842_s19 + $0x18] sm:$0xff] }
 0x1d6   : > { %3617 = vperm.xlu0 %9027, %v3383_v30   ;;  %v10754_v30 = vpop.permute.xlu0 %2082 }
 0x1d7   : > { %12534 = vst [vmem:[#allocation59_spill] sm:$0xff] %v10754_v30  ;;  %v3362_v30 = vld [vmem:[%s9842_s19 + $0xa8] sm:$0xff] }
 0x1d8   : > { %2207 = vperm.xlu1 %9028, %v1577_v55   ;;  %v3385_v55 = vld [vmem:[%s9842_s19 + $0x160] sm:$0xff] }
 0x1d9   : > { %v10747_v61 = vpop.permute.xlu1 %2047 }
 0x1da   : > { %12530 = vst [vmem:[#allocation60_spill] sm:$0xff] %v10747_v61  ;;  %3707 = vperm.xlu0 %9027, %v3401_v12   ;;  %v10767_v12 = vpop.permute.xlu0 %2092 }
 0x1db   : > { %12538 = vst [vmem:[#allocation62_spill] sm:$0xff] %v10767_v12 }
 0x1dc   : > { %8409 = vmatmul.mubr.bf16.gmra.mrb[20].mxu1 %v12529_v3  ;;  %2217 = vperm.xlu1 %9028, %v1579_v43   ;;  %v3403_v3 = vld [vmem:[%s9842_s19 + $0x1f0] sm:$0xff] }
 0x1dd   : > { %8412 = vmatprep.mubr.bf16.mxu1 %v12533_v46  ;;  %v10757_v0 = vpop.permute.xlu1 %2057  ;;  %v12536_v43 = vld [vmem:[#allocation66_spill] sm:$0xff]  ;;  %v3360_v46 = vld [vmem:[%s9842_s19 + $0x98] sm:$0xff] }
 0x1de   : > { %3627 = vperm.xlu0 %9027, %v3385_v55   ;;  %v12537_v28 = vpack.c.bf16 %v9975_v25, %v12536_v43  ;;  %v6353_v25 = vld [vmem:[%s10776_s26] sm:$0xff]  ;;  %v10782_v55 = vpop.permute.xlu0 %2102 }
 0x1df   : > { %12539 = vst [vmem:[#allocation65_spill] sm:$0xff] %v10782_v55  ;;  %v12543_v43 = vld [vmem:[#allocation68_spill] sm:$0xff]  ;;  %v3346_v55 = vld [vmem:[%s9842_s19 + $0x28] sm:$0xff] }
 0x1e0   : > { %3492 = vperm.xlu1 %9028, %v3358_v52   ;;  %v3387_v52 = vld [vmem:[%s9842_s19 + $0x170] sm:$0xff] }
 0x1e1   : > { %v10778_v7 = vpop.permute.xlu1 %1587 }
 0x1e2   : > { %3717 = vperm.xlu0 %9027, %v3403_v3   ;;  %v10794_v12 = vpop.permute.xlu0 %2112 }
 0x1e3   : > { %12545 = vst [vmem:[#allocation64_spill] sm:$0xff] %v10794_v12  ;;  %v12628_v12 = vld [vmem:[#allocation33_spill] sm:$0xff] }
 0x1e4   : > { %8413 = vmatmul.mubr.bf16.gmra.mrb[24].mxu1 %v12535_v48  ;;  %3412 = vperm.xlu1 %9028, %v3342_v17   ;;  %v12540_v17 = vld [vmem:[#allocation67_spill] sm:$0xff]  ;;  %v12542_v48 = vld [vmem:[#allocation70_spill] sm:$0xff] }
 0x1e5   : > { %8416 = vmatprep.mubr.bf16.mxu1 %v12537_v28  ;;  %v12541_v3 = vpack.c.bf16 %v9987_v62, %v12540_v17  ;;  %v12544_v28 = vpack.c.bf16 %v12542_v48, %v12543_v43  ;;  %v6357_v62 = vld [vmem:[%s10776_s26 + $0x20] sm:$0xff]  ;;  %v12546_v17 = vpack.c.bf16 %v10016_v58, %v10008_v51  ;;  %v6359_v48 = vld [vmem:[%s10776_s26 + $0x30] sm:$0xff] }
 0x1e6   : > { %3637 = vperm.xlu0 %9027, %v3387_v52   ;;  %v6355_v52 = vld [vmem:[%s10776_s26 + $0x10] sm:$0xff]  ;;  %v10808_v43 = vpop.permute.xlu0 %2122  ;;  %v6361_v58 = vld [vmem:[%s10776_s26 + $0x40] sm:$0xff] }
 0x1e7   : > { %12549 = vst [vmem:[#allocation66_spill] sm:$0xff] %v10808_v43  ;;  %v3350_v43 = vld [vmem:[%s9842_s19 + $0x48] sm:$0xff] }
 0x1e8   : > { %3502 = vperm.xlu1 %9028, %v3360_v46   ;;  %v10791_v46 = vpop.permute.xlu1 %1597 }
 0x1ea   : > { %6371 = vperm.xlu0 %9027, %v6353_v25  }
 0x1ec   : > { %8417 = vmatmul.mubr.bf16.gmra.mrb[28].mxu1 %v12541_v3  ;;  %3422 = vperm.xlu1 %9028, %v3344_v40   ;;  %v10801_v3 = vpop.permute.xlu1 %1607  ;;  %v12547_v40 = vld [vmem:[#allocation71_spill] sm:$0xff] }
 0x1ed   : > { %8420 = vmatprep.mubr.bf16.mxu1 %v12544_v28  ;;  %v12548_v25 = vpack.c.bf16 %v10026_v57, %v12547_v40  ;;  %v3348_v28 = vld [vmem:[%s9842_s19 + $0x38] sm:$0xff] }
 0x1ee   : > { %6381 = vperm.xlu0 %9027, %v6355_v52   ;;  %v12550_v52 = vld [vmem:[#allocation72_spill] sm:$0xff] }
 0x1ef   : > { %v12551_v57 = vpack.c.bf16 %v10039_v32, %v12550_v52  ;;  %v6365_v32 = vld [vmem:[%s10776_s26 + $0x60] sm:$0xff] }
 0x1f0   : > { %3512 = vperm.xlu1 %9028, %v3362_v30   ;;  %v3364_v30 = vld [vmem:[%s9842_s19 + $0xb8] sm:$0xff]  ;;  %v10811_v51 = vpop.permute.xlu1 %1617 }
 0x1f2   : > { %6391 = vperm.xlu0 %9027, %v6357_v62   ;;  %v10820_v62 = vpop.permute.xlu0 %2132 }
 0x1f3   : > { %12555 = vst [vmem:[#allocation67_spill] sm:$0xff] %v10820_v62  ;;  %v12627_v62 = vld [vmem:[#allocation115_spill] sm:$0xff] }
 0x1f4   : > { %8421 = vmatmul.mubr.bf16.gmra.mrb[32].mxu1 %v12546_v17  ;;  %3432 = vperm.xlu1 %9028, %v3346_v55   ;;  %v12552_v17 = vld [vmem:[#allocation75_spill] sm:$0xff]  ;;  %v12553_v55 = vld [vmem:[#allocation73_spill] sm:$0xff] }
 0x1f5   : > { %8424 = vmatprep.mubr.bf16.mxu1 %v12548_v25  ;;  %v12554_v40 = vpack.c.bf16 %v12552_v17, %v12553_v55  ;;  %v3366_v25 = vld [vmem:[%s9842_s19 + $0xc8] sm:$0xff] }
 0x1f6   : > { %6401 = vperm.xlu0 %9027, %v6359_v48   ;;  %v10824_v48 = vpop.permute.xlu1 %1627  ;;  %v10828_v52 = vpop.permute.xlu0 %2142 }
 0x1f7   : > { %12556 = vst [vmem:[#allocation70_spill] sm:$0xff] %v10828_v52 }
 0x1f8   : > { %3522 = vperm.xlu1 %9028, %v3364_v30   ;;  %v6363_v30 = vld [vmem:[%s10776_s26 + $0x50] sm:$0xff] }
 0x1fa   : > { %6411 = vperm.xlu0 %9027, %v6361_v58   ;;  %v3368_v58 = vld [vmem:[%s9842_s19 + $0xd8] sm:$0xff]  ;;  %v10837_v55 = vpop.permute.xlu1 %1637 }
 0x1fc   : > { %8425 = vmatmul.mubr.bf16.gmra.mrb[36].mxu1 %v12551_v57  ;;  %3442 = vperm.xlu1 %9028, %v3348_v28   ;;  %v12557_v57 = vpack.c.bf16 %v10069_v39, %v10060_v34  ;;  %v12558_v28 = vld [vmem:[#allocation77_spill] sm:$0xff]  ;;  %v10847_v34 = vpop.permute.xlu0 %2152  ;;  %v6859_v39 = vld [vmem:[%s10845_s20] sm:$0xff] }
 0x1fd   : > { %8428 = vmatprep.mubr.bf16.mxu1 %v12554_v40  ;;  %v12559_v17 = vpack.c.bf16 %v10079_v16, %v12558_v28  ;;  %v6367_v40 = vld [vmem:[%s10776_s26 + $0x70] sm:$0xff]  ;;  %12560 = vst [vmem:[#allocation68_spill] sm:$0xff] %v10847_v34  ;;  %v3352_v16 = vld [vmem:[%s9842_s19 + $0x58] sm:$0xff] }
 0x1fe   : > { %6421 = vperm.xlu0 %9027, %v6363_v30   ;;  %v10854_v30 = vpop.permute.xlu1 %1647 }
 0x200   : > { %3532 = vperm.xlu1 %9028, %v3366_v25   ;;  %v10861_v52 = vpop.permute.xlu0 %2162 }
 0x201   : > { %12566 = vst [vmem:[#allocation71_spill] sm:$0xff] %v10861_v52  ;;  %v3374_v52 = vld [vmem:[%s9842_s19 + $0x108] sm:$0xff] }
 0x202   : > { %6431 = vperm.xlu0 %9027, %v6365_v32   ;;  %v12563_v32 = vld [vmem:[#allocation80_spill] sm:$0xff] }
 0x204   : > { %8429 = vmatmul.mubr.bf16.gmra.mrb[40].mxu1 %v12557_v57  ;;  %3452 = vperm.xlu1 %9028, %v3350_v43   ;;  %v12561_v43 = vld [vmem:[#allocation78_spill] sm:$0xff]  ;;  %v12564_v57 = vld [vmem:[#allocation79_spill] sm:$0xff] }
 0x205   : > { %8432 = vmatprep.mubr.bf16.mxu1 %v12559_v17  ;;  %v12562_v25 = vpack.c.bf16 %v10092_v8, %v12561_v43  ;;  %v12565_v28 = vpack.c.bf16 %v12563_v32, %v12564_v57  ;;  %v3370_v17 = vld [vmem:[%s9842_s19 + $0xe8] sm:$0xff]  ;;  %v10864_v8 = vpop.permute.xlu1 %1657  ;;  %v6863_v43 = vld [vmem:[%s10845_s20 + $0x20] sm:$0xff]  ;;  %v3372_v57 = vld [vmem:[%s9842_s19 + $0xf8] sm:$0xff] }
 0x206   : > { %6441 = vperm.xlu0 %9027, %v6367_v40   ;;  %v3354_v40 = vld [vmem:[%s9842_s19 + $0x68] sm:$0xff] }
 0x208   : > { %3542 = vperm.xlu1 %9028, %v3368_v58   ;;  %v6861_v58 = vld [vmem:[%s10845_s20 + $0x10] sm:$0xff] }
 0x20a   : > { %6877 = vperm.xlu0 %9027, %v6859_v39   ;;  %v10873_v39 = vpop.permute.xlu0 %2172 }
 0x20b   : > { %12570 = vst [vmem:[#allocation72_spill] sm:$0xff] %v10873_v39 }
 0x20c   : > { %8433 = vmatmul.mubr.bf16.gmra.mrb[44].mxu1 %v12562_v25  ;;  %3462 = vperm.xlu1 %9028, %v3352_v16   ;;  %v12567_v25 = vpack.c.bf16 %v10119_v50, %v10112_v45  ;;  %v12568_v16 = vld [vmem:[#allocation81_spill] sm:$0xff]  ;;  %v6867_v50 = vld [vmem:[%s10845_s20 + $0x40] sm:$0xff] }
 0x20d   : > { %8436 = vmatprep.mubr.bf16.mxu1 %v12565_v28  ;;  %v12569_v32 = vpack.c.bf16 %v10129_v36, %v12568_v16  ;;  %v6865_v28 = vld [vmem:[%s10845_s20 + $0x30] sm:$0xff]  ;;  %v12572_v36 = vld [vmem:[#allocation83_spill] sm:$0xff]  ;;  %v12575_v16 = vld [vmem:[#allocation84_spill] sm:$0xff] }
 0x20e   : > { %6887 = vperm.xlu0 %9027, %v6861_v58   ;;  %v3356_v58 = vld [vmem:[%s9842_s19 + $0x78] sm:$0xff]  ;;  %v10881_v45 = vpop.permute.xlu0 %2182 }
 0x20f   : > { %12571 = vst [vmem:[#allocation75_spill] sm:$0xff] %v10881_v45 }
 0x210   : > { %3552 = vperm.xlu1 %9028, %v3370_v17   ;;  %v10877_v17 = vpop.permute.xlu1 %1667 }
 0x212   : > { %6897 = vperm.xlu0 %9027, %v6863_v43   ;;  %v3390_v43 = vld [vmem:[%s9842_s19 + $0x188] sm:$0xff]  ;;  %v10893_v45 = vpop.permute.xlu0 %2192 }
 0x213   : > { %12577 = vst [vmem:[#allocation73_spill] sm:$0xff] %v10893_v45  ;;  %v12606_v45 = vld [vmem:[#allocation103_spill] sm:$0xff] }
 0x214   : > { %8437 = vmatmul.mubr.bf16.gmra.mrb[48].mxu1 %v12567_v25  ;;  %3472 = vperm.xlu1 %9028, %v3354_v40   ;;  %v12573_v25 = vpack.c.bf16 %v10143_v35, %v12572_v36  ;;  %v12574_v40 = vld [vmem:[#allocation86_spill] sm:$0xff]  ;;  %v6871_v35 = vld [vmem:[%s10845_s20 + $0x60] sm:$0xff]  ;;  %v12578_v36 = vpack.c.bf16 %v10173_v23, %v10165_v19  ;;  %v3376_v23 = vld [vmem:[%s9842_s19 + $0x118] sm:$0xff] }
 0x215   : > { %8440 = vmatprep.mubr.bf16.mxu1 %v12569_v32  ;;  %v12576_v32 = vpack.c.bf16 %v12574_v40, %v12575_v16  ;;  %v6873_v16 = vld [vmem:[%s10845_s20 + $0x70] sm:$0xff] }
 0x216   : > { %6907 = vperm.xlu0 %9027, %v6865_v28   ;;  %v6869_v28 = vld [vmem:[%s10845_s20 + $0x50] sm:$0xff] }
 0x218   : > { %3562 = vperm.xlu1 %9028, %v3372_v57   ;;  %v10890_v57 = vpop.permute.xlu1 %1677 }
 0x21a   : > { %6917 = vperm.xlu0 %9027, %v6867_v50   ;;  %v3392_v50 = vld [vmem:[%s9842_s19 + $0x198] sm:$0xff] }
 0x21c   : > { %8441 = vmatmul.mubr.bf16.gmra.mrb[52].mxu1 %v12573_v25  ;;  %3482 = vperm.xlu1 %9028, %v3356_v58   ;;  %v10900_v25 = vpop.permute.xlu1 %1687  ;;  %v12579_v58 = vld [vmem:[#allocation87_spill] sm:$0xff] }
 0x21d   : > { %8444 = vmatprep.mubr.bf16.mxu1 %v12576_v32  ;;  %v12580_v40 = vpack.c.bf16 %v10183_v49, %v12579_v58  ;;  %v10908_v32 = vpop.permute.xlu0 %2202  ;;  %v7141_v49 = vld [vmem:[%s772_s22] sm:$0x3] }
 0x21e   : > { %6927 = vperm.xlu0 %9027, %v6869_v28   ;;  %12581 = vst [vmem:[#allocation77_spill] sm:$0xff] %v10908_v32  ;;  %v12584_v28 = vld [vmem:[#allocation91_spill] sm:$0xff] }
 0x220   : > { %3652 = vperm.xlu1 %9028, %v3390_v43   ;;  %v10914_v19 = vpop.permute.xlu1 %1697 }
 0x221   : > { %v10922_v58 = vpop.permute.xlu0 %2212 }
 0x222   : > { %6937 = vperm.xlu0 %9027, %v6871_v35   ;;  %v12585_v35 = vld [vmem:[#allocation89_spill] sm:$0xff]  ;;  %12587 = vst [vmem:[#allocation78_spill] sm:$0xff] %v10922_v58  ;;  %v12605_v58 = vld [vmem:[#allocation104_spill] sm:$0xff] }
 0x224   : > { %8445 = vmatmul.mubr.bf16.gmra.mrb[56].mxu1 %v12578_v36  ;;  %3572 = vperm.xlu1 %9028, %v3374_v52   ;;  %v12582_v52 = vld [vmem:[#allocation88_spill] sm:$0xff]  ;;  %v12586_v36 = vpack.c.bf16 %v12584_v28, %v12585_v35  ;;  %v12591_v35 = vld [vmem:[#allocation93_spill] sm:$0xff] }
 0x225   : > { %8448 = vmatprep.mubr.bf16.mxu1 %v12580_v40  ;;  %v12583_v43 = vpack.c.bf16 %v10195_v47, %v12582_v52  ;;  %v3394_v40 = vld [vmem:[%s9842_s19 + $0x1a8] sm:$0xff]  ;;  %v12588_v47 = vpack.c.bf16 %v10224_v13, %v10216_v5  ;;  %v12589_v52 = vld [vmem:[#allocation92_spill] sm:$0xff]  ;;  %v12594_v13 = vld [vmem:[#allocation94_spill] sm:$0xff] }
 0x226   : > { %6947 = vperm.xlu0 %9027, %v6873_v16   ;;  %v3378_v16 = vld [vmem:[%s9842_s19 + $0x128] sm:$0xff]  ;;  %v12593_v5 = vld [vmem:[#allocation96_spill] sm:$0xff] }
 0x228   : > { %3662 = vperm.xlu1 %9028, %v3392_v50   ;;  %v10925_v50 = vpop.permute.xlu1 %1707 }
 0x22a   : > { %7144 = vperm.xlu0 %9027, %v7141_v49   ;;  %v3380_v49 = vld [vmem:[%s9842_s19 + $0x138] sm:$0xff] }
 0x22c   : > { %8449 = vmatmul.mubr.bf16.gmra.mrb[60].mxu1 %v12583_v43  ;;  %3582 = vperm.xlu1 %9028, %v3376_v23   ;;  %v12590_v43 = vpack.c.bf16 %v10234_v29, %v12589_v52  ;;  %v3396_v23 = vld [vmem:[%s9842_s19 + $0x1b8] sm:$0xff]  ;;  %v10935_v28 = vpop.permute.xlu1 %1717  ;;  %v3398_v29 = vld [vmem:[%s9842_s19 + $0x1c8] sm:$0xff] }
 0x22d   : > { %8452 = vmatprep.mubr.bf16.mxu1 %v12586_v36  ;;  %v12592_v36 = vpack.c.bf16 %v10247_v2, %v12591_v35  ;;  %v12598_v2 = vld [vmem:[#allocation100_spill] sm:$0xff]  ;;  %v12599_v35 = vld [vmem:[#allocation99_spill] sm:$0xff] }
 0x230   : > { %3672 = vperm.xlu1 %9028, %v3394_v40   ;;  %v10941_v40 = vpop.permute.xlu1 %1727 }
 0x234   : > { %8453 = vmatmul.mubr.bf16.gmra.mrb[64].mxu1 %v12588_v47  ;;  %3592 = vperm.xlu1 %9028, %v3378_v16   ;;  %v12595_v47 = vpack.c.bf16 %v12593_v5, %v12594_v13  ;;  %v3382_v16 = vld [vmem:[%s9842_s19 + $0x148] sm:$0xff]  ;;  %v10948_v52 = vpop.permute.xlu1 %1737  ;;  %v3400_v5 = vld [vmem:[%s9842_s19 + $0x1d8] sm:$0xff] }
 0x235   : > { %8456 = vmatprep.mubr.bf16.mxu1 %v12590_v43  ;;  %v12596_v43 = vld [vmem:[#allocation97_spill] sm:$0xff] }
 0x238   : > { %3682 = vperm.xlu1 %9028, %v3396_v23   ;;  %v12597_v23 = vpack.c.bf16 %v10277_v42, %v12596_v43  ;;  %v10957_v13 = vpop.permute.xlu1 %2067  ;;  %v12607_v42 = vpack.c.bf16 %v12605_v58, %v12606_v45  ;;  %v3402_v43 = vld [vmem:[%s9842_s19 + $0x1e8] sm:$0xff]  ;;  %v3404_v45 = vld [vmem:[%s9842_s19 + $0x1f8] sm:$0xff] }
 0x239   : > { %12601 = vst [vmem:[#allocation80_spill] sm:$0xff] %v10957_v13  ;;  %v3388_v58 = vld [vmem:[%s9842_s19 + $0x178] sm:$0xff] }
 0x23c   : > { %8457 = vmatmul.mubr.bf16.gmra.mrb[68].mxu1 %v12592_v36  ;;  %3602 = vperm.xlu1 %9028, %v3380_v49   ;;  %v12600_v36 = vpack.c.bf16 %v12598_v2, %v12599_v35  ;;  %v3384_v49 = vld [vmem:[%s9842_s19 + $0x158] sm:$0xff]  ;;  %v12609_v2 = vld [vmem:[#allocation106_spill] sm:$0xff]  ;;  %v12610_v35 = vld [vmem:[#allocation105_spill] sm:$0xff] }
 0x23d   : > { %8460 = vmatprep.mubr.bf16.mxu1 %v12595_v47  ;;  %v12602_v47 = vld [vmem:[#allocation102_spill] sm:$0xff] }
 0x240   : > { %3692 = vperm.xlu1 %9028, %v3398_v29   ;;  %v12603_v29 = vld [vmem:[#allocation101_spill] sm:$0xff] }
 0x241   : > { %v12604_v32 = vpack.c.bf16 %v12602_v47, %v12603_v29  ;;  %v12613_v47 = vld [vmem:[#allocation108_spill] sm:$0xff] }
 0x244   : > { %8461 = vmatmul.mubr.bf16.gmra.mrb[72].mxu1 %v12597_v23  ;;  %3612 = vperm.xlu1 %9028, %v3382_v16   ;;  %v10967_v23 = vpop.permute.xlu1 %2077  ;;  %v3386_v16 = vld [vmem:[%s9842_s19 + $0x168] sm:$0xff]  ;;  %s7792_s19 = sshll.u32 %s12857_s30, 11 }
 0x245   : > { %8464 = vmatprep.mubr.bf16.mxu1 %v12600_v36  ;;  %12608 = vst [vmem:[#allocation79_spill] sm:$0xff] %v10967_v23  ;;  %v12611_v36 = vpack.c.bf16 %v12609_v2, %v12610_v35  ;;  %v12620_v2 = vld [vmem:[#allocation113_spill] sm:$0xff]  ;;  %v12621_v35 = vld [vmem:[#allocation30_spill] sm:$0xff] }
 0x248   : > { %3702 = vperm.xlu1 %9028, %v3400_v5   ;;  %v10973_v5 = vpop.permute.xlu1 %2087 }
 0x249   : > { %12612 = vst [vmem:[#allocation81_spill] sm:$0xff] %v10973_v5 }
 0x24c   : > { %8465 = vmatmul.mubr.bf16.gmra.mrb[76].mxu1 %v12604_v32  ;;  %3622 = vperm.xlu1 %9028, %v3384_v49   ;;  %v12614_v32 = vld [vmem:[#allocation107_spill] sm:$0xff]  ;;  %v10980_v49 = vpop.permute.xlu1 %2097 }
 0x24d   : > { %8468 = vmatprep.mubr.bf16.mxu1 %v12607_v42  ;;  %v12615_v29 = vpack.c.bf16 %v12613_v47, %v12614_v32  ;;  %12616 = vst [vmem:[#allocation83_spill] sm:$0xff] %v10980_v49  ;;  %v12617_v42 = vld [vmem:[#allocation111_spill] sm:$0xff]  ;;  %v6354_v47 = vld [vmem:[%s10776_s26 + $0x8] sm:$0xff]  ;;  %v12663_v49 = vld [vmem:[#allocation44_spill] sm:$0xff] }
 0x250   : > { %3712 = vperm.xlu1 %9028, %v3402_v43   ;;  %v12618_v43 = vld [vmem:[#allocation110_spill] sm:$0xff]  ;;  %v10989_v32 = vpop.permute.xlu1 %2107 }
 0x251   : > { %v12619_v39 = vpack.c.bf16 %v12617_v42, %v12618_v43  ;;  %12623 = vst [vmem:[#allocation86_spill] sm:$0xff] %v10989_v32  ;;  %v12629_v42 = vpack.c.bf16 %v12627_v62, %v12628_v12  ;;  %v6362_v12 = vld [vmem:[%s10776_s26 + $0x48] sm:$0xff]  ;;  %v6364_v62 = vld [vmem:[%s10776_s26 + $0x58] sm:$0xff] }
 0x254   : > { %8469 = vmatmul.mubr.bf16.gmra.mrb[80].mxu1 %v12611_v36  ;;  %3632 = vperm.xlu1 %9028, %v3386_v16   ;;  %v12622_v36 = vpack.c.bf16 %v12620_v2, %v12621_v35  ;;  %v6356_v16 = vld [vmem:[%s10776_s26 + $0x18] sm:$0xff]  ;;  %v10999_v43 = vpop.permute.xlu1 %2117  ;;  %v12631_v2 = vld [vmem:[#allocation116_spill] sm:$0xff]  ;;  %v12632_v35 = vld [vmem:[#allocation34_spill] sm:$0xff] }
 0x255   : > { %8472 = vmatprep.mubr.bf16.mxu1 %v12615_v29  ;;  %v12624_v29 = vld [vmem:[#allocation114_spill] sm:$0xff]  ;;  %12630 = vst [vmem:[#allocation84_spill] sm:$0xff] %v10999_v43  ;;  %v12650_v43 = vld [vmem:[#allocation40_spill] sm:$0xff] }
 0x258   : > { %3722 = vperm.xlu1 %9028, %v3404_v45   ;;  %v12625_v45 = vld [vmem:[#allocation31_spill] sm:$0xff] }
 0x259   : > { %v12626_v34 = vpack.c.bf16 %v12624_v29, %v12625_v45  ;;  %v12635_v29 = vld [vmem:[#allocation118_spill] sm:$0xff] }
 0x25c   : > { %8473 = vmatmul.mubr.bf16.gmra.mrb[84].mxu1 %v12619_v39  ;;  %3642 = vperm.xlu1 %9028, %v3388_v58   ;;  %v6358_v39 = vld [vmem:[%s10776_s26 + $0x28] sm:$0xff]  ;;  %v6360_v58 = vld [vmem:[%s10776_s26 + $0x38] sm:$0xff] }
 0x25d   : > { %8476 = vmatprep.mubr.bf16.mxu1 %v12622_v36  ;;  %v12633_v36 = vpack.c.bf16 %v12631_v2, %v12632_v35  ;;  %v12642_v2 = vld [vmem:[#allocation120_spill] sm:$0xff]  ;;  %v12643_v35 = vld [vmem:[#allocation37_spill] sm:$0xff] }
 0x260   : > { %6376 = vperm.xlu1 %9028, %v6354_v47   ;;  %v11005_v47 = vpop.permute.xlu1 %2127 }
 0x261   : > { %12634 = vst [vmem:[#allocation87_spill] sm:$0xff] %v11005_v47 }
 0x264   : > { %8477 = vmatmul.mubr.bf16.gmra.mrb[88].mxu1 %v12626_v34  ;;  %6386 = vperm.xlu1 %9028, %v6356_v16   ;;  %v12636_v34 = vld [vmem:[#allocation35_spill] sm:$0xff]  ;;  %v11012_v16 = vpop.permute.xlu1 %2137 }
 0x265   : > { %8480 = vmatprep.mubr.bf16.mxu1 %v12629_v42  ;;  %v12637_v45 = vpack.c.bf16 %v12635_v29, %v12636_v34  ;;  %12638 = vst [vmem:[#allocation88_spill] sm:$0xff] %v11012_v16  ;;  %v12639_v42 = vld [vmem:[#allocation119_spill] sm:$0xff]  ;;  %v6366_v29 = vld [vmem:[%s10776_s26 + $0x68] sm:$0xff] }
 0x266   : > { %v12649_v16 = vld [vmem:[#allocation123_spill] sm:$0xff] }
 0x267   : > { %v12651_v5 = vpack.c.bf16 %v12649_v16, %v12650_v43  ;;  %v6864_v43 = vld [vmem:[%s10845_s20 + $0x28] sm:$0xff] }
 0x268   : > { %6396 = vperm.xlu1 %9028, %v6358_v39   ;;  %v12640_v39 = vld [vmem:[#allocation36_spill] sm:$0xff]  ;;  %v11021_v34 = vpop.permute.xlu1 %2147  ;;  %v12659_v16 = vld [vmem:[#allocation85_spill] sm:$0xff] }
 0x269   : > { %v12641_v32 = vpack.c.bf16 %v12639_v42, %v12640_v39  ;;  %12645 = vst [vmem:[#allocation91_spill] sm:$0xff] %v11021_v34  ;;  %v12653_v39 = vld [vmem:[#allocation41_spill] sm:$0xff] }
 0x26c   : > { %8481 = vmatmul.mubr.bf16.gmra.mrb[92].mxu1 %v12633_v36  ;;  %6406 = vperm.xlu1 %9028, %v6360_v58   ;;  %v12644_v36 = vpack.c.bf16 %v12642_v2, %v12643_v35  ;;  %v6368_v58 = vld [vmem:[%s10776_s26 + $0x78] sm:$0xff]  ;;  %v11031_v42 = vpop.permute.xlu1 %2157  ;;  %v12654_v2 = vpack.c.bf16 %v10485_v41, %v12653_v39  ;;  %s11072_s26 = scalar_lea.vmem %s12085_s5, %s7792_s19  ;;  %s12021_s19 = scalar_lea.vmem %s12089_s9, %s7796_s21 }
 0x26d   : > { %8484 = vmatprep.mubr.bf16.mxu1 %v12637_v45  ;;  %v12646_v45 = vld [vmem:[#allocation121_spill] sm:$0xff]  ;;  %12652 = vst [vmem:[#allocation89_spill] sm:$0xff] %v11031_v42 }
 0x270   : > { %6416 = vperm.xlu1 %9028, %v6362_v12   ;;  %v12647_v12 = vld [vmem:[#allocation38_spill] sm:$0xff]  ;;  %v11037_v35 = vpop.permute.xlu1 %2167 }
 0x271   : > { %v12648_v47 = vpack.c.bf16 %v12646_v45, %v12647_v12  ;;  %12655 = vst [vmem:[#allocation92_spill] sm:$0xff] %v11037_v35  ;;  %v12660_v12 = vld [vmem:[#allocation74_spill] sm:$0xff] }
 0x274   : > { %8485 = vmatmul.mubr.bf16.gmra.mrb[96].mxu1 %v12641_v32  ;;  %6426 = vperm.xlu1 %9028, %v6364_v62   ;;  %v6860_v32 = vld [vmem:[%s10845_s20 + $0x8] sm:$0xff]  ;;  %v6862_v62 = vld [vmem:[%s10845_s20 + $0x18] sm:$0xff]  ;;  %v11047_v35 = vpop.permute.xlu1 %2177 }
 0x275   : > { %8488 = vmatprep.mubr.bf16.mxu1 %v12644_v36  ;;  %v12656_v36 = vld [vmem:[#allocation125_spill] sm:$0xff]  ;;  %12661 = vst [vmem:[#allocation93_spill] sm:$0xff] %v11047_v35 }
 0x278   : > { %6436 = vperm.xlu1 %9028, %v6366_v29   ;;  %v12657_v29 = vld [vmem:[#allocation43_spill] sm:$0xff] }
 0x27c   : > { %8489 = vmatmul.mubr.bf16.gmra.mrb[100].mxu1 %v12648_v47  ;;  %6446 = vperm.xlu1 %9028, %v6368_v58   ;;  %v12658_v47 = vpack.c.bf16 %v12656_v36, %v12657_v29 }
 0x27d   : > { %8492 = vmatprep.mubr.bf16.mxu1 %v12651_v5 }
 0x280   : > { %6882 = vperm.xlu1 %9028, %v6860_v32  }
 0x284   : > { %8493 = vmatmul.mubr.bf16.gmra.mrb[104].mxu1 %v12654_v2  ;;  %6892 = vperm.xlu1 %9028, %v6862_v62   ;;  %v6866_v2 = vld [vmem:[%s10845_s20 + $0x38] sm:$0xff] }
 0x285   : > { %8496 = vmatprep.mubr.bf16.mxu1 %v12658_v47  ;;  %v12662_v47 = vld [vmem:[#allocation126_spill] sm:$0xff] }
 0x287   : > { %v8390_v5 = vpop.f32.mrb[0].mxu1 }
 0x288   : > { %v2263_v58 = vadd.f32 %v8390_v5, %v12659_v16  ;;  %v2254_v45 = vpop.f32.mrb[1].mxu1  ;;  %6902 = vperm.xlu1 %9028, %v6864_v43   ;;  %v12664_v5 = vpack.c.bf16 %v12662_v47, %v12663_v49  ;;  %v6868_v43 = vld [vmem:[%s10845_s20 + $0x48] sm:$0xff]  ;;  %v11058_v49 = vpop.permute.xlu1 %2187  ;;  %v12667_v47 = vld [vmem:[#allocation95_spill] sm:$0xff] }
 0x289   : > { %v2255_v32 = vadd.f32 %v2254_v45, %v12660_v12  ;;  %v8391_v34 = vpop.f32.mrb[2].mxu1  ;;  %v12665_v45 = vpack.c.bf16 %v10523_v31, %v10513_v60 }
 0x28a   : > { %v2767_v42 = vmul.f32 0.01, %v2263_v58  ;;  %v2266_v41 = vadd.f32 %v8391_v34, %v10791_v46  ;;  %v2257_v39 = vpop.f32.mrb[3].mxu1 }
 0x28b   : > { %v2765_v36 = vmul.f32 0.01, %v2255_v32  ;;  %v2258_v62 = vadd.f32 %v2257_v39, %v10778_v7  ;;  %v12666_v7 = vld [vmem:[#allocation112_spill] sm:$0xff] }
 0x28c   : > { %v2768_v29 = vmul.f32 0.01, %v2266_v41  ;;  %8497 = vmatmul.mubr.bf16.gmra.mrb[108].mxu1 %v12664_v5  ;;  %6912 = vperm.xlu1 %9028, %v6866_v2   ;;  %v2895_v46 = vmax.f32 %v2263_v58, %v2767_v42 }
 0x28d   : > { %v2766_v16 = vmul.f32 0.01, %v2258_v62  ;;  %8500 = vmatprep.mubr.bf16.mxu1 %v12665_v45  ;;  %v2893_v12 = vmax.f32 %v2255_v32, %v2765_v36  ;;  %v6870_v32 = vld [vmem:[%s10845_s20 + $0x58] sm:$0xff]  ;;  %v12668_v36 = vpack.c.bf16 %v10535_v27, %v10528_v38  ;;  %v11079_v27 = vld [vmem:[%s11072_s26 + $0x8] sm:$0xff]  ;;  %v11081_v38 = vpop.permute.xlu1 %2197 }
 0x28e   : > { %v2896_v34 = vmax.f32 %v2266_v41, %v2768_v29 }
 0x28f   : > { %v2894_v35 = vmax.f32 %v2258_v62, %v2766_v16  ;;  %v8394_v13 = vpop.f32.mrb[4].mxu1  ;;  %v6872_v62 = vld [vmem:[%s10845_s20 + $0x68] sm:$0xff] }
 0x290   : > { %v2279_v39 = vadd.f32 %v8394_v13, %v12666_v7  ;;  %v2270_v23 = vpop.f32.mrb[5].mxu1  ;;  %v3278_v63 = vpack.c.bf16 %v2896_v34, %v2895_v46  ;;  %6922 = vperm.xlu1 %9028, %v6868_v43   ;;  %v11084_v46 = vld [vmem:[%s11072_s26 + $0x28] sm:$0xff]  ;;  %v12671_v34 = vld [vmem:[#allocation130_spill] sm:$0xff] }
 0x291   : > { %v2271_v5 = vadd.f32 %v2270_v23, %v12667_v47  ;;  %v8395_v61 = vpop.f32.mrb[6].mxu1  ;;  %v3277_v60 = vpack.c.bf16 %v2894_v35, %v2893_v12  ;;  %v7491_v7 = vcombine.low %v11079_v27, %v11084_v46  ;;  %v12672_v47 = vld [vmem:[#allocation122_spill] sm:$0xff] }
 0x292   : > { %v2771_v31 = vmul.f32 0.01, %v2279_v39  ;;  %v2282_v42 = vadd.f32 %v8395_v61, %v10811_v51  ;;  %v2273_v58 = vpop.f32.mrb[7].mxu1  ;;  %v12669_v51 = vld [vmem:[#allocation45_spill] sm:$0xff] }
 0x293   : > { %v2769_v41 = vmul.f32 0.01, %v2271_v5  ;;  %v2274_v2 = vadd.f32 %v2273_v58, %v10801_v3  ;;  %5006 = vmatpush1.bf16.msra.mxu1 %v3277_v60  ;;  %v12670_v23 = vpack.c.bf16 %v10545_v26, %v12669_v51 }
 0x294   : > { %v2772_v13 = vmul.f32 0.01, %v2282_v42  ;;  %8501 = vmatmul.mubr.bf16.gmra.mrb[112].mxu1 %v12668_v36  ;;  %5007 = vmatprep.subr.bf16.mxu1 %v12503_v15  ;;  %v2899_v3 = vmax.f32 %v2279_v39, %v2771_v31  ;;  %v7492_v39 = vcombine.high %v11079_v27, %v11084_v46  ;;  %v12673_v36 = vld [vmem:[#allocation129_spill] sm:$0xff] }
 0x295   : > { %v2770_v61 = vmul.f32 0.01, %v2274_v2  ;;  %8504 = vmatprep.mubr.bf16.mxu1 %v12670_v23  ;;  %6932 = vperm.xlu1 %9028, %v6870_v32   ;;  %v2897_v29 = vmax.f32 %v2271_v5, %v2769_v41  ;;  %v6874_v32 = vld [vmem:[%s10845_s20 + $0x78] sm:$0xff]  ;;  %v11100_v23 = vpop.permute.xlu1 %2207 }
 0x296   : > { %v2900_v35 = vmax.f32 %v2282_v42, %v2772_v13  ;;  %5326 = vmatprep.mubr.bf16.mxu0 %v7492_v39 }
 0x297   : > { %v2898_v16 = vmax.f32 %v2274_v2, %v2770_v61  ;;  %v8398_v45 = vpop.f32.mrb[8].mxu1  ;;  %5008 = vmatpush1.bf16.msra.mxu1 %v3278_v63  ;;  %v12674_v61 = vld [vmem:[#allocation128_spill] sm:$0xff] }
 0x298   : > { %v2295_v43 = vadd.f32 %v8398_v45, %v12671_v34  ;;  %v2286_v12 = vpop.f32.mrb[9].mxu1  ;;  %5009 = vmatprep.subr.bf16.mxu1 %v12503_v15  ;;  %v3280_v26 = vpack.c.bf16 %v2900_v35, %v2899_v3  ;;  %v12675_v51 = vpack.c.bf16 %v12673_v36, %v12674_v61 }
 0x299   : > { %v2287_v5 = vadd.f32 %v2286_v12, %v12672_v47  ;;  %v8399_v60 = vpop.f32.mrb[10].mxu1  ;;  %6942 = vperm.xlu1 %9028, %v6872_v62   ;;  %v3279_v31 = vpack.c.bf16 %v2898_v16, %v2897_v29 }
 0x29a   : > { %v2775_v63 = vmul.f32 0.01, %v2295_v43  ;;  %v2298_v42 = vadd.f32 %v8399_v60, %v10837_v55  ;;  %v2289_v58 = vpop.f32.mrb[11].mxu1  ;;  %v12676_v55 = vpack.c.bf16 %v10579_v59, %v10571_v21 }
 0x29b   : > { %v2773_v41 = vmul.f32 0.01, %v2287_v5  ;;  %v2290_v2 = vadd.f32 %v2289_v58, %v10824_v48  ;;  %5010 = vmatpush1.bf16.msra.mxu1 %v3279_v31  ;;  %v12680_v58 = vpack.c.bf16 %v10599_v14, %v10594_v4 }
 0x29c   : > { %v2776_v13 = vmul.f32 0.01, %v2298_v42  ;;  %8505 = vmatmul.mubr.bf16.gmra.mrb[116].mxu1 %v12675_v51  ;;  %5011 = vmatprep.subr.bf16.mxu1 %v12503_v15  ;;  %v2903_v35 = vmax.f32 %v2295_v43, %v2775_v63  ;;  %v12678_v63 = vld [vmem:[#allocation47_spill] sm:$0xff] }
 0x29d   : > { %v2774_v3 = vmul.f32 0.01, %v2290_v2  ;;  %8508 = vmatprep.mubr.bf16.mxu1 %v12676_v55  ;;  %6952 = vperm.xlu1 %9028, %v6874_v32   ;;  %v2901_v29 = vmax.f32 %v2287_v5, %v2773_v41  ;;  %v12681_v55 = vld [vmem:[#allocation137_spill] sm:$0xff] }
 0x29e   : > { %v2904_v62 = vmax.f32 %v2298_v42, %v2776_v13 }
 0x29f   : > { %v2902_v48 = vmax.f32 %v2290_v2, %v2774_v3  ;;  %v8402_v16 = vpop.f32.mrb[12].mxu1  ;;  %5012 = vmatpush1.bf16.msra.mxu1 %v3280_v26  ;;  %v11121_v2 = vld [vmem:[%s11072_s26 + $0x20] sm:$0xff] }
 0x2a0   : > { %v2311_v45 = vadd.f32 %v8402_v16, %v10632_v33  ;;  %v2302_v34 = vpop.f32.mrb[13].mxu1  ;;  %5013 = vmatprep.subr.bf16.mxu1 %v12503_v15  ;;  %v3282_v12 = vpack.c.bf16 %v2904_v62, %v2903_v35  ;;  %v12677_v33 = vld [vmem:[#allocation131_spill] sm:$0xff] }
 0x2a1   : > { %v2303_v39 = vadd.f32 %v2302_v34, %v10623_v44  ;;  %v8403_v47 = vpop.f32.mrb[14].mxu1  ;;  %v3281_v21 = vpack.c.bf16 %v2902_v48, %v2901_v29  ;;  %v12679_v42 = vpack.c.bf16 %v12677_v33, %v12678_v63 }
 0x2a2   : > { %v2779_v59 = vmul.f32 0.01, %v2311_v45  ;;  %v2314_v43 = vadd.f32 %v8403_v47, %v10864_v8  ;;  %v2305_v60 = vpop.f32.mrb[15].mxu1  ;;  %v11118_v8 = vld [vmem:[%s11072_s26] sm:$0xff] }
 0x2a3   : > { %v2777_v5 = vmul.f32 0.01, %v2303_v39  ;;  %v2306_v31 = vadd.f32 %v2305_v60, %v10854_v30  ;;  %5014 = vmatpush1.bf16.msra.mxu1 %v3281_v21  ;;  %v7490_v62 = vcombine.high %v11118_v8, %v11121_v2 }
 0x2a4   : > { %v2780_v26 = vmul.f32 0.01, %v2314_v43  ;;  %8509 = vmatmul.mubr.bf16.gmra.mrb[120].mxu1 %v12679_v42  ;;  %5015 = vmatprep.subr.bf16.mxu1 %v12503_v15  ;;  %v2907_v32 = vmax.f32 %v2311_v45, %v2779_v59 }
 0x2a5   : > { %v2778_v44 = vmul.f32 0.01, %v2306_v31  ;;  %8512 = vmatprep.mubr.bf16.mxu1 %v12680_v58  ;;  %v2905_v30 = vmax.f32 %v2303_v39, %v2777_v5  ;;  %v12683_v39 = vld [vmem:[#allocation48_spill] sm:$0xff] }
 0x2a6   : > { %v2908_v41 = vmax.f32 %v2314_v43, %v2780_v26 }
 0x2a7   : > { %v2906_v13 = vmax.f32 %v2306_v31, %v2778_v44  ;;  %v8406_v36 = vpop.f32.mrb[16].mxu1  ;;  %5016 = vmatpush1.bf16.msra.mxu1 %v3282_v12  ;;  %v12682_v12 = vld [vmem:[#allocation132_spill] sm:$0xff] }
 0x2a8   : > { %v2327_v61 = vadd.f32 %v8406_v36, %v10648_v53  ;;  %v2318_v51 = vpop.f32.mrb[17].mxu1  ;;  %5017 = vmatprep.subr.bf16.mxu1 %v12503_v15  ;;  %v3284_v3 = vpack.c.bf16 %v2908_v41, %v2907_v32  ;;  %v12684_v47 = vpack.c.bf16 %v12682_v12, %v12683_v39 }
 0x2a9   : > { %v2319_v35 = vadd.f32 %v2318_v51, %v12681_v55  ;;  %v8407_v4 = vpop.f32.mrb[18].mxu1  ;;  %v3283_v14 = vpack.c.bf16 %v2906_v13, %v2905_v30 }
 0x2aa   : > { %v2783_v29 = vmul.f32 0.01, %v2327_v61  ;;  %v2330_v48 = vadd.f32 %v8407_v4, %v10890_v57  ;;  %v2321_v16 = vpop.f32.mrb[19].mxu1 }
 0x2ab   : > { %v2781_v45 = vmul.f32 0.01, %v2319_v35  ;;  %v2322_v34 = vadd.f32 %v2321_v16, %v10877_v17  ;;  %5018 = vmatpush1.bf16.msra.mxu1 %v3283_v14 }
 0x2ac   : > { %v2784_v53 = vmul.f32 0.01, %v2330_v48  ;;  %8513 = vmatmul.mubr.bf16.gmra.mrb[124].mxu1 %v12684_v47  ;;  %5019 = vmatprep.subr.bf16.mxu1 %v12503_v15  ;;  %v2911_v59 = vmax.f32 %v2327_v61, %v2783_v29 }
 0x2ad   : > { %v2782_v21 = vmul.f32 0.01, %v2322_v34  ;;  %5037 = vmatprep.mubr.bf16.mxu1 %v7490_v62  ;;  %v2909_v60 = vmax.f32 %v2319_v35, %v2781_v45 }
 0x2ae   : > { %v2912_v43 = vmax.f32 %v2330_v48, %v2784_v53 }
 0x2af   : > { %v2910_v5 = vmax.f32 %v2322_v34, %v2782_v21  ;;  %v8410_v31 = vpop.f32.mrb[20].mxu1  ;;  %5020 = vmatpush1.bf16.msra.mxu1 %v3284_v3 }
 0x2b0   : > { %v2343_v57 = vadd.f32 %v8410_v31, %v10670_v22  ;;  %v2334_v26 = vpop.f32.mrb[21].mxu1  ;;  %5021 = vmatprep.subr.bf16.mxu1 %v12503_v15  ;;  %v3286_v17 = vpack.c.bf16 %v2912_v43, %v2911_v59 }
 0x2b1   : > { %v2335_v33 = vadd.f32 %v2334_v26, %v10655_v6  ;;  %v8411_v63 = vpop.f32.mrb[22].mxu1  ;;  %v3285_v42 = vpack.c.bf16 %v2910_v5, %v2909_v60 }
 0x2b2   : > { %v2787_v44 = vmul.f32 0.01, %v2343_v57  ;;  %v2346_v58 = vadd.f32 %v8411_v63, %v10914_v19  ;;  %v2337_v32 = vpop.f32.mrb[23].mxu1 }
 0x2b3   : > { %v2785_v41 = vmul.f32 0.01, %v2335_v33  ;;  %v2338_v30 = vadd.f32 %v2337_v32, %v10900_v25  ;;  %5022 = vmatpush1.bf16.msra.mxu1 %v3285_v42 }
 0x2b4   : > { %v2788_v13 = vmul.f32 0.01, %v2346_v58  ;;  %5023 = vmatprep.subr.bf16.mxu1 %v12503_v15  ;;  %v2915_v36 = vmax.f32 %v2343_v57, %v2787_v44 }
 0x2b5   : > { %v2786_v22 = vmul.f32 0.01, %v2338_v30  ;;  %v2913_v51 = vmax.f32 %v2335_v33, %v2785_v41 }
 0x2b6   : > { %v2916_v61 = vmax.f32 %v2346_v58, %v2788_v13  ;;  %v12686_v13 = vld [vmem:[#allocation4_spill] sm:$0xff] }
 0x2b7   : > { %v2914_v3 = vmax.f32 %v2338_v30, %v2786_v22  ;;  %v8414_v55 = vpop.f32.mrb[24].mxu1  ;;  %5024 = vmatpush1.bf16.msra.mxu1 %v3286_v17 }
 0x2b8   : > { %v2359_v6 = vadd.f32 %v8414_v55, %v10692_v18  ;;  %v2350_v35 = vpop.f32.mrb[25].mxu1  ;;  %5025 = vmatprep.subr.bf16.mxu1 %v12503_v15  ;;  %v3288_v19 = vpack.c.bf16 %v2916_v61, %v2915_v36 }
 0x2b9   : > { %v2351_v4 = vadd.f32 %v2350_v35, %v10678_v9  ;;  %v8415_v25 = vpop.f32.mrb[26].mxu1  ;;  %v3287_v14 = vpack.c.bf16 %v2914_v3, %v2913_v51  ;;  %v12687_v51 = vld [vmem:[#allocation46_spill] sm:$0xff]  ;;  %v12688_v35 = vld [vmem:[#allocation32_spill] sm:$0xff] }
 0x2ba   : > { %v2791_v62 = vmul.f32 0.01, %v2359_v6  ;;  %v2362_v29 = vadd.f32 %v8415_v25, %v10935_v28  ;;  %v2353_v48 = vpop.f32.mrb[27].mxu1 }
 0x2bb   : > { %v2789_v16 = vmul.f32 0.01, %v2351_v4  ;;  %v2354_v45 = vadd.f32 %v2353_v48, %v10925_v50  ;;  %5026 = vmatpush1.bf16.msra.mxu1 %v3287_v14  ;;  %v3029_v48 = vld [vmem:[%s11072_s26 + $0x40] sm:$0xff] }
 0x2bc   : > { %v2792_v34 = vmul.f32 0.01, %v2362_v29  ;;  %5027 = vmatprep.subr.bf16.mxu1 %v12503_v15  ;;  %v2919_v53 = vmax.f32 %v2359_v6, %v2791_v62 }
 0x2bd   : > { %v2790_v18 = vmul.f32 0.01, %v2354_v45  ;;  %v2917_v39 = vmax.f32 %v2351_v4, %v2789_v16  ;;  %v3033_v16 = vld [vmem:[%s11072_s26 + $0x60] sm:$0xff] }
 0x2be   : > { %v2920_v12 = vmax.f32 %v2362_v29, %v2792_v34  ;;  %v7489_v29 = vcombine.low %v11118_v8, %v11121_v2 }
 0x2bf   : > { %v2918_v47 = vmax.f32 %v2354_v45, %v2790_v18  ;;  %v8418_v21 = vpop.f32.mrb[28].mxu1  ;;  %5028 = vmatpush1.bf16.msra.mxu1 %v3288_v19 }
 0x2c0   : > { %v2375_v9 = vadd.f32 %v8418_v21, %v10720_v10  ;;  %v2366_v59 = vpop.f32.mrb[29].mxu1  ;;  %5029 = vmatprep.subr.bf16.mxu1 %v12503_v15  ;;  %v3290_v28 = vpack.c.bf16 %v2920_v12, %v2919_v53  ;;  %v12689_v53 = vld [vmem:[#allocation5_spill] sm:$0xff]  ;;  %v12690_v21 = vld [vmem:[#allocation50_spill] sm:$0xff] }
 0x2c1   : > { %v2367_v43 = vadd.f32 %v2366_v59, %v10706_v11  ;;  %v8419_v50 = vpop.f32.mrb[30].mxu1  ;;  %v3289_v60 = vpack.c.bf16 %v2918_v47, %v2917_v39  ;;  %v12685_v11 = vld [vmem:[#allocation42_spill] sm:$0xff] }
 0x2c2   : > { %v2795_v5 = vmul.f32 0.01, %v2375_v9  ;;  %v2378_v31 = vadd.f32 %v8419_v50, %v10948_v52  ;;  %v2369_v57 = vpop.f32.mrb[31].mxu1 }
 0x2c3   : > { %v2793_v26 = vmul.f32 0.01, %v2367_v43  ;;  %v2370_v17 = vadd.f32 %v2369_v57, %v10941_v40  ;;  %5030 = vmatpush1.bf16.msra.mxu1 %v3289_v60  ;;  %v12691_v60 = vld [vmem:[#allocation61_spill] sm:$0xff] }
 0x2c4   : > { %v2796_v33 = vmul.f32 0.01, %v2378_v31  ;;  %5031 = vmatprep.subr.bf16.mxu1 %v12503_v15  ;;  %v2923_v63 = vmax.f32 %v2375_v9, %v2795_v5 }
 0x2c5   : > { %v2794_v10 = vmul.f32 0.01, %v2370_v17  ;;  %v2921_v44 = vmax.f32 %v2367_v43, %v2793_v26  ;;  %v7498_v43 = vcombine.high %v3029_v48, %v3033_v16 }
 0x2c6   : > { %v2924_v42 = vmax.f32 %v2378_v31, %v2796_v33  ;;  %v12692_v31 = vld [vmem:[#allocation56_spill] sm:$0xff] }
 0x2c7   : > { %v2922_v58 = vmax.f32 %v2370_v17, %v2794_v10  ;;  %v8422_v32 = vpop.f32.mrb[32].mxu1  ;;  %5032 = vmatpush1.bf16.msra.mxu1 %v3290_v28 }
 0x2c8   : > { %v2391_v41 = vadd.f32 %v8422_v32, %v12685_v11  ;;  %v2382_v30 = vpop.f32.mrb[33].mxu1  ;;  %5033 = vmatprep.subr.bf16.mxu1 %v12503_v15  ;;  %v3292_v52 = vpack.c.bf16 %v2924_v42, %v2923_v63  ;;  %v7497_v63 = vcombine.low %v3029_v48, %v3033_v16  ;;  %v3037_v42 = vld [vmem:[%s11072_s26 + $0x80] sm:$0xff] }
 0x2c9   : > { %v2383_v40 = vadd.f32 %v2382_v30, %v12686_v13  ;;  %v8423_v22 = vpop.f32.mrb[34].mxu1  ;;  %v3291_v36 = vpack.c.bf16 %v2922_v58, %v2921_v44  ;;  %v3041_v44 = vld [vmem:[%s11072_s26 + $0xa0] sm:$0xff] }
 0x2ca   : > { %v2799_v61 = vmul.f32 0.01, %v2391_v41  ;;  %v2394_v3 = vadd.f32 %v8423_v22, %v12687_v51  ;;  %v2385_v55 = vpop.f32.mrb[35].mxu1  ;;  %v7506_v51 = vcombine.high %v3037_v42, %v3041_v44  ;;  %v7505_v16 = vcombine.low %v3037_v42, %v3041_v44 }
 0x2cb   : > { %v2797_v6 = vmul.f32 0.01, %v2383_v40  ;;  %v2386_v19 = vadd.f32 %v2385_v55, %v12688_v35  ;;  %5034 = vmatpush1.bf16.msra.mxu1 %v3291_v36  ;;  %v12695_v55 = vld [vmem:[#allocation76_spill] sm:$0xff] }
 0x2cc   : > { %v2800_v4 = vmul.f32 0.01, %v2394_v3  ;;  %5035 = vmatprep.subr.bf16.mxu1 %v12503_v15  ;;  %v2927_v14 = vmax.f32 %v2391_v41, %v2799_v61  ;;  %v12693_v41 = vld [vmem:[#allocation7_spill] sm:$0xff] }
 0x2cd   : > { %v2798_v25 = vmul.f32 0.01, %v2386_v19  ;;  %v2925_v45 = vmax.f32 %v2383_v40, %v2797_v6  ;;  %v12694_v40 = vld [vmem:[#allocation6_spill] sm:$0xff] }
 0x2ce   : > { %v2928_v62 = vmax.f32 %v2394_v3, %v2800_v4  ;;  %v12696_v4 = vld [vmem:[#allocation69_spill] sm:$0xff] }
 0x2cf   : > { %v2926_v34 = vmax.f32 %v2386_v19, %v2798_v25  ;;  %v8426_v18 = vpop.f32.mrb[36].mxu1  ;;  %5036 = vmatpush1.bf16.msra.mxu1 %v3292_v52 }
 0x2d0   : > { %v2407_v12 = vadd.f32 %v8426_v18, %v12689_v53  ;;  %v2398_v39 = vpop.f32.mrb[37].mxu1  ;;  %8568 = vmatprep.subr.bf16.mxu1 %v12503_v15  ;;  %v3294_v47 = vpack.c.bf16 %v2928_v62, %v2927_v14 }
 0x2d1   : > { %v2399_v9 = vadd.f32 %v2398_v39, %v12690_v21  ;;  %v8427_v59 = vpop.f32.mrb[38].mxu1  ;;  %v3293_v28 = vpack.c.bf16 %v2926_v34, %v2925_v45  ;;  %v3045_v45 = vld [vmem:[%s11072_s26 + $0xc0] sm:$0xff]  ;;  %v12697_v39 = vld [vmem:[#allocation9_spill] sm:$0xff] }
 0x2d2   : > { %v2803_v50 = vmul.f32 0.01, %v2407_v12  ;;  %v2410_v8 = vadd.f32 %v8427_v59, %v12691_v60  ;;  %v2401_v2 = vpop.f32.mrb[39].mxu1  ;;  %5038 = vmatmul.mubr.bf16.vlgmr.msra.gmra.mrb[128].mxu1 %v7489_v29  ;;  %v3049_v34 = vld [vmem:[%s11072_s26 + $0xe0] sm:$0xff] }
 0x2d3   : > { %v2801_v5 = vmul.f32 0.01, %v2399_v9  ;;  %v2402_v57 = vadd.f32 %v2401_v2, %v12692_v31  ;;  %5295 = vmatpush1.bf16.msra.mxu0 %v3293_v28  ;;  %8584 = vmatpush1.bf16.msra.mxu1 %v3293_v28  ;;  %v12698_v59 = vld [vmem:[#allocation8_spill] sm:$0xff]  ;;  %v7514_v60 = vcombine.high %v3045_v45, %v3049_v34  ;;  %v12699_v2 = vld [vmem:[#allocation90_spill] sm:$0xff]  ;;  %v7513_v44 = vcombine.low %v3045_v45, %v3049_v34 }
 0x2d4   : > { %v2804_v26 = vmul.f32 0.01, %v2410_v8  ;;  %5296 = vmatprep.subr.bf16.mxu0 %v12503_v15  ;;  %8569 = vmatprep.subr.bf16.mxu1 %v12503_v15  ;;  %v2931_v33 = vmax.f32 %v2407_v12, %v2803_v50 }
 0x2d5   : > { %v2802_v17 = vmul.f32 0.01, %v2402_v57  ;;  %5045 = vmatprep.mubr.bf16.mxu1 %v7498_v43  ;;  %v2929_v58 = vmax.f32 %v2399_v9, %v2801_v5 }
 0x2d6   : > { %v2932_v10 = vmax.f32 %v2410_v8, %v2804_v26  ;;  %v12700_v26 = vld [vmem:[#allocation82_spill] sm:$0xff] }
 0x2d7   : > { %v2930_v32 = vmax.f32 %v2402_v57, %v2802_v17  ;;  %v8430_v11 = vpop.f32.mrb[40].mxu1  ;;  %5297 = vmatpush1.bf16.msra.mxu0 %v3294_v47  ;;  %8585 = vmatpush1.bf16.msra.mxu1 %v3294_v47 }
 0x2d8   : > { %v2423_v30 = vadd.f32 %v8430_v11, %v12693_v41  ;;  %v2414_v52 = vpop.f32.mrb[41].mxu1  ;;  %5298 = vmatprep.subr.bf16.mxu0 %v12503_v15  ;;  %8570 = vmatprep.subr.bf16.mxu1 %v12503_v15  ;;  %v3296_v13 = vpack.c.bf16 %v2932_v10, %v2931_v33 }
 0x2d9   : > { %v2415_v22 = vadd.f32 %v2414_v52, %v12694_v40  ;;  %v8431_v36 = vpop.f32.mrb[42].mxu1  ;;  %v3295_v61 = vpack.c.bf16 %v2930_v32, %v2929_v58  ;;  %v3053_v58 = vld [vmem:[%s11072_s26 + $0x100] sm:$0xff]  ;;  %v12701_v52 = vld [vmem:[#allocation11_spill] sm:$0xff] }
 0x2da   : > { %v2807_v3 = vmul.f32 0.01, %v2423_v30  ;;  %v2426_v6 = vadd.f32 %v8431_v36, %v12695_v55  ;;  %v2417_v35 = vpop.f32.mrb[43].mxu1  ;;  %5046 = vmatmul.mubr.bf16.gmra.mrb[132].mxu1 %v7497_v63  ;;  %v3057_v32 = vld [vmem:[%s11072_s26 + $0x120] sm:$0xff]  ;;  %v12702_v36 = vld [vmem:[#allocation10_spill] sm:$0xff] }
 0x2db   : > { %v2805_v19 = vmul.f32 0.01, %v2415_v22  ;;  %v2418_v25 = vadd.f32 %v2417_v35, %v12696_v4  ;;  %5299 = vmatpush1.bf16.msra.mxu0 %v3295_v61  ;;  %8586 = vmatpush1.bf16.msra.mxu1 %v3295_v61  ;;  %v7522_v55 = vcombine.high %v3053_v58, %v3057_v32  ;;  %v12703_v35 = vld [vmem:[#allocation109_spill] sm:$0xff]  ;;  %v7521_v34 = vcombine.low %v3053_v58, %v3057_v32 }
 0x2dc   : > { %v2808_v14 = vmul.f32 0.01, %v2426_v6  ;;  %5300 = vmatprep.subr.bf16.mxu0 %v12503_v15  ;;  %8571 = vmatprep.subr.bf16.mxu1 %v12503_v15  ;;  %v2935_v29 = vmax.f32 %v2423_v30, %v2807_v3 }
 0x2dd   : > { %v2806_v62 = vmul.f32 0.01, %v2418_v25  ;;  %5053 = vmatprep.mubr.bf16.mxu1 %v7506_v51  ;;  %v2933_v18 = vmax.f32 %v2415_v22, %v2805_v19 }
 0x2de   : > { %v2936_v48 = vmax.f32 %v2426_v6, %v2808_v14  ;;  %v12704_v14 = vld [vmem:[#allocation98_spill] sm:$0xff] }
 0x2df   : > { %v2934_v53 = vmax.f32 %v2418_v25, %v2806_v62  ;;  %v8434_v12 = vpop.f32.mrb[44].mxu1  ;;  %5301 = vmatpush1.bf16.msra.mxu0 %v3296_v13  ;;  %8587 = vmatpush1.bf16.msra.mxu1 %v3296_v13 }
 0x2e0   : > { %v2439_v47 = vadd.f32 %v8434_v12, %v12697_v39  ;;  %v2430_v21 = vpop.f32.mrb[45].mxu1  ;;  %5302 = vmatprep.subr.bf16.mxu0 %v12503_v15  ;;  %8572 = vmatprep.subr.bf16.mxu1 %v12503_v15  ;;  %v3298_v9 = vpack.c.bf16 %v2936_v48, %v2935_v29 }
 0x2e1   : > { %v2431_v28 = vadd.f32 %v2430_v21, %v12698_v59  ;;  %v8435_v43 = vpop.f32.mrb[46].mxu1  ;;  %v3297_v50 = vpack.c.bf16 %v2934_v53, %v2933_v18  ;;  %v3061_v18 = vld [vmem:[%s11072_s26 + $0x140] sm:$0xff]  ;;  %v12705_v21 = vld [vmem:[#allocation13_spill] sm:$0xff] }
 0x2e2   : > { %v2811_v8 = vmul.f32 0.01, %v2439_v47  ;;  %v2442_v5 = vadd.f32 %v8435_v43, %v12699_v2  ;;  %v2433_v31 = vpop.f32.mrb[47].mxu1  ;;  %5054 = vmatmul.mubr.bf16.gmra.mrb[136].mxu1 %v7505_v16  ;;  %v3065_v53 = vld [vmem:[%s11072_s26 + $0x160] sm:$0xff] }
 0x2e3   : > { %v2809_v57 = vmul.f32 0.01, %v2431_v28  ;;  %v2434_v17 = vadd.f32 %v2433_v31, %v12700_v26  ;;  %5303 = vmatpush1.bf16.msra.mxu0 %v3297_v50  ;;  %8588 = vmatpush1.bf16.msra.mxu1 %v3297_v50  ;;  %v12706_v43 = vld [vmem:[#allocation12_spill] sm:$0xff]  ;;  %v7530_v2 = vcombine.high %v3061_v18, %v3065_v53  ;;  %v7529_v32 = vcombine.low %v3061_v18, %v3065_v53 }
 0x2e4   : > { %v2812_v33 = vmul.f32 0.01, %v2442_v5  ;;  %5304 = vmatprep.subr.bf16.mxu0 %v12503_v15  ;;  %8573 = vmatprep.subr.bf16.mxu1 %v12503_v15  ;;  %v2939_v63 = vmax.f32 %v2439_v47, %v2811_v8  ;;  %v12707_v31 = vld [vmem:[#allocation124_spill] sm:$0xff] }
 0x2e5   : > { %v2810_v10 = vmul.f32 0.01, %v2434_v17  ;;  %5061 = vmatprep.mubr.bf16.mxu1 %v7514_v60  ;;  %v2937_v11 = vmax.f32 %v2431_v28, %v2809_v57 }
 0x2e6   : > { %v2940_v42 = vmax.f32 %v2442_v5, %v2812_v33  ;;  %v12708_v33 = vld [vmem:[#allocation117_spill] sm:$0xff] }
 0x2e7   : > { %v2938_v41 = vmax.f32 %v2434_v17, %v2810_v10  ;;  %v8438_v30 = vpop.f32.mrb[48].mxu1  ;;  %5305 = vmatpush1.bf16.msra.mxu0 %v3298_v9  ;;  %8589 = vmatpush1.bf16.msra.mxu1 %v3298_v9 }
 0x2e8   : > { %v2455_v13 = vadd.f32 %v8438_v30, %v12701_v52  ;;  %v2446_v40 = vpop.f32.mrb[49].mxu1  ;;  %5306 = vmatprep.subr.bf16.mxu0 %v12503_v15  ;;  %8574 = vmatprep.subr.bf16.mxu1 %v12503_v15  ;;  %v3300_v22 = vpack.c.bf16 %v2940_v42, %v2939_v63 }
 0x2e9   : > { %v2447_v61 = vadd.f32 %v2446_v40, %v12702_v36  ;;  %v8439_v51 = vpop.f32.mrb[50].mxu1  ;;  %v3299_v3 = vpack.c.bf16 %v2938_v41, %v2937_v11  ;;  %v3069_v11 = vld [vmem:[%s11072_s26 + $0x180] sm:$0xff]  ;;  %v12709_v40 = vld [vmem:[#allocation15_spill] sm:$0xff] }
 0x2ea   : > { %v2815_v6 = vmul.f32 0.01, %v2455_v13  ;;  %v2458_v19 = vadd.f32 %v8439_v51, %v12703_v35  ;;  %v2449_v4 = vpop.f32.mrb[51].mxu1  ;;  %5062 = vmatmul.mubr.bf16.gmra.mrb[140].mxu1 %v7513_v44  ;;  %v3073_v41 = vld [vmem:[%s11072_s26 + $0x1a0] sm:$0xff]  ;;  %v12710_v51 = vld [vmem:[#allocation14_spill] sm:$0xff] }
 0x2eb   : > { %v2813_v25 = vmul.f32 0.01, %v2447_v61  ;;  %v2450_v62 = vadd.f32 %v2449_v4, %v12704_v14  ;;  %5307 = vmatpush1.bf16.msra.mxu0 %v3299_v3  ;;  %8590 = vmatpush1.bf16.msra.mxu1 %v3299_v3  ;;  %v7538_v35 = vcombine.high %v3069_v11, %v3073_v41  ;;  %v12711_v4 = vld [vmem:[#allocation133_spill] sm:$0xff]  ;;  %v7537_v53 = vcombine.low %v3069_v11, %v3073_v41 }
 0x2ec   : > { %v2816_v29 = vmul.f32 0.01, %v2458_v19  ;;  %5308 = vmatprep.subr.bf16.mxu0 %v12503_v15  ;;  %8575 = vmatprep.subr.bf16.mxu1 %v12503_v15  ;;  %v2943_v16 = vmax.f32 %v2455_v13, %v2815_v6 }
 0x2ed   : > { %v2814_v48 = vmul.f32 0.01, %v2450_v62  ;;  %5069 = vmatprep.mubr.bf16.mxu1 %v7522_v55  ;;  %v2941_v12 = vmax.f32 %v2447_v61, %v2813_v25 }
 0x2ee   : > { %v2944_v45 = vmax.f32 %v2458_v19, %v2816_v29  ;;  %v12712_v29 = vld [vmem:[#allocation127_spill] sm:$0xff] }
 0x2ef   : > { %v2942_v39 = vmax.f32 %v2450_v62, %v2814_v48  ;;  %v8442_v47 = vpop.f32.mrb[52].mxu1  ;;  %5309 = vmatpush1.bf16.msra.mxu0 %v3300_v22  ;;  %8591 = vmatpush1.bf16.msra.mxu1 %v3300_v22 }
 0x2f0   : > { %v2471_v9 = vadd.f32 %v8442_v47, %v12705_v21  ;;  %v2462_v59 = vpop.f32.mrb[53].mxu1  ;;  %5310 = vmatprep.subr.bf16.mxu0 %v12503_v15  ;;  %8576 = vmatprep.subr.bf16.mxu1 %v12503_v15  ;;  %v3302_v28 = vpack.c.bf16 %v2944_v45, %v2943_v16 }
 0x2f1   : > { %v2463_v50 = vadd.f32 %v2462_v59, %v12706_v43  ;;  %v8443_v60 = vpop.f32.mrb[54].mxu1  ;;  %v3301_v8 = vpack.c.bf16 %v2942_v39, %v2941_v12  ;;  %v3077_v12 = vld [vmem:[%s11072_s26 + $0x1c0] sm:$0xff]  ;;  %v12713_v59 = vld [vmem:[#allocation17_spill] sm:$0xff] }
 0x2f2   : > { %v2819_v5 = vmul.f32 0.01, %v2471_v9  ;;  %v2474_v57 = vadd.f32 %v8443_v60, %v12707_v31  ;;  %v2465_v26 = vpop.f32.mrb[55].mxu1  ;;  %5070 = vmatmul.mubr.bf16.gmra.mrb[144].mxu1 %v7521_v34  ;;  %v3081_v39 = vld [vmem:[%s11072_s26 + $0x1e0] sm:$0xff] }
 0x2f3   : > { %v2817_v17 = vmul.f32 0.01, %v2463_v50  ;;  %v2466_v10 = vadd.f32 %v2465_v26, %v12708_v33  ;;  %5311 = vmatpush1.bf16.msra.mxu0 %v3301_v8  ;;  %8592 = vmatpush1.bf16.msra.mxu1 %v3301_v8  ;;  %v12714_v60 = vld [vmem:[#allocation16_spill] sm:$0xff]  ;;  %v7546_v31 = vcombine.high %v3077_v12, %v3081_v39  ;;  %v12715_v26 = vld [vmem:[#allocation135_spill] sm:$0xff]  ;;  %v7545_v41 = vcombine.low %v3077_v12, %v3081_v39  ;;  %v3030_v39 = vld [vmem:[%s11072_s26 + $0x48] sm:$0xff] }
 0x2f4   : > { %v2820_v63 = vmul.f32 0.01, %v2474_v57  ;;  %5312 = vmatprep.subr.bf16.mxu0 %v12503_v15  ;;  %8577 = vmatprep.subr.bf16.mxu1 %v12503_v15  ;;  %v2947_v44 = vmax.f32 %v2471_v9, %v2819_v5 }
 0x2f5   : > { %v2818_v42 = vmul.f32 0.01, %v2466_v10  ;;  %5077 = vmatprep.mubr.bf16.mxu1 %v7530_v2  ;;  %v2945_v30 = vmax.f32 %v2463_v50, %v2817_v17 }
 0x2f6   : > { %v2948_v58 = vmax.f32 %v2474_v57, %v2820_v63  ;;  %v12716_v63 = vld [vmem:[#allocation134_spill] sm:$0xff] }
 0x2f7   : > { %v2946_v52 = vmax.f32 %v2466_v10, %v2818_v42  ;;  %v8446_v13 = vpop.f32.mrb[56].mxu1  ;;  %5313 = vmatpush1.bf16.msra.mxu0 %v3302_v28  ;;  %8593 = vmatpush1.bf16.msra.mxu1 %v3302_v28 }
 0x2f8   : > { %v2487_v22 = vadd.f32 %v8446_v13, %v12709_v40  ;;  %v2478_v36 = vpop.f32.mrb[57].mxu1  ;;  %5314 = vmatprep.subr.bf16.mxu0 %v12503_v15  ;;  %8578 = vmatprep.subr.bf16.mxu1 %v12503_v15  ;;  %v3304_v61 = vpack.c.bf16 %v2948_v58, %v2947_v44 }
 0x2f9   : > { %v2479_v3 = vadd.f32 %v2478_v36, %v12710_v51  ;;  %v8447_v55 = vpop.f32.mrb[58].mxu1  ;;  %v3303_v6 = vpack.c.bf16 %v2946_v52, %v2945_v30  ;;  %v3085_v30 = vld [vmem:[%s11072_s26 + $0x200] sm:$0xff]  ;;  %v12717_v36 = vld [vmem:[#allocation19_spill] sm:$0xff] }
 0x2fa   : > { %v2823_v19 = vmul.f32 0.01, %v2487_v22  ;;  %v2490_v25 = vadd.f32 %v8447_v55, %v12711_v4  ;;  %v2481_v14 = vpop.f32.mrb[59].mxu1  ;;  %5078 = vmatmul.mubr.bf16.gmra.mrb[148].mxu1 %v7529_v32  ;;  %v3089_v52 = vld [vmem:[%s11072_s26 + $0x220] sm:$0xff]  ;;  %v12718_v55 = vld [vmem:[#allocation18_spill] sm:$0xff] }
 0x2fb   : > { %v2821_v62 = vmul.f32 0.01, %v2479_v3  ;;  %v2482_v48 = vadd.f32 %v2481_v14, %v12712_v29  ;;  %5315 = vmatpush1.bf16.msra.mxu0 %v3303_v6  ;;  %8594 = vmatpush1.bf16.msra.mxu1 %v3303_v6  ;;  %v7554_v4 = vcombine.high %v3085_v30, %v3089_v52  ;;  %v12719_v14 = vld [vmem:[#allocation138_spill] sm:$0xff] }
 0x2fc   : > { %v2824_v16 = vmul.f32 0.01, %v2490_v25  ;;  %5316 = vmatprep.subr.bf16.mxu0 %v12503_v15  ;;  %8579 = vmatprep.subr.bf16.mxu1 %v12503_v15  ;;  %v2951_v34 = vmax.f32 %v2487_v22, %v2823_v19 }
 0x2fd   : > { %v2822_v45 = vmul.f32 0.01, %v2482_v48  ;;  %5085 = vmatprep.mubr.bf16.mxu1 %v7538_v35  ;;  %v2949_v47 = vmax.f32 %v2479_v3, %v2821_v62 }
 0x2fe   : > { %v2952_v18 = vmax.f32 %v2490_v25, %v2824_v16  ;;  %v12720_v16 = vld [vmem:[#allocation136_spill] sm:$0xff] }
 0x2ff   : > { %v2950_v21 = vmax.f32 %v2482_v48, %v2822_v45  ;;  %v8450_v9 = vpop.f32.mrb[60].mxu1  ;;  %5317 = vmatpush1.bf16.msra.mxu0 %v3304_v61  ;;  %8595 = vmatpush1.bf16.msra.mxu1 %v3304_v61 }
 0x300   : > { %v2503_v28 = vadd.f32 %v8450_v9, %v12713_v59  ;;  %v2494_v43 = vpop.f32.mrb[61].mxu1  ;;  %5318 = vmatprep.subr.bf16.mxu0 %v12503_v15  ;;  %8580 = vmatprep.subr.bf16.mxu1 %v12503_v15  ;;  %v3306_v50 = vpack.c.bf16 %v2952_v18, %v2951_v34  ;;  %v3093_v18 = vld [vmem:[%s11072_s26 + $0x240] sm:$0xff]  ;;  %v7553_v59 = vcombine.low %v3085_v30, %v3089_v52 }
 0x301   : > { %v2495_v8 = vadd.f32 %v2494_v43, %v12714_v60  ;;  %v8451_v2 = vpop.f32.mrb[62].mxu1  ;;  %v3305_v5 = vpack.c.bf16 %v2950_v21, %v2949_v47  ;;  %v3034_v47 = vld [vmem:[%s11072_s26 + $0x68] sm:$0xff]  ;;  %v3101_v30 = vld [vmem:[%s11072_s26 + $0x280] sm:$0xff] }
 0x302   : > { %v2827_v57 = vmul.f32 0.01, %v2503_v28  ;;  %v2506_v17 = vadd.f32 %v8451_v2, %v12715_v26  ;;  %v2497_v33 = vpop.f32.mrb[63].mxu1  ;;  %5086 = vmatmul.mubr.bf16.gmra.mrb[152].mxu1 %v7537_v53  ;;  %v3097_v53 = vld [vmem:[%s11072_s26 + $0x260] sm:$0xff] }
 0x303   : > { %v2825_v10 = vmul.f32 0.01, %v2495_v8  ;;  %v2498_v42 = vadd.f32 %v2497_v33, %v12716_v63  ;;  %5319 = vmatpush1.bf16.msra.mxu0 %v3305_v5  ;;  %8596 = vmatpush1.bf16.msra.mxu1 %v3305_v5  ;;  %v7562_v60 = vcombine.high %v3093_v18, %v3097_v53  ;;  %v12722_v26 = vld [vmem:[#allocation20_spill] sm:$0xff] }
 0x304   : > { %v2828_v44 = vmul.f32 0.01, %v2506_v17  ;;  %5320 = vmatprep.subr.bf16.mxu0 %v12503_v15  ;;  %8581 = vmatprep.subr.bf16.mxu1 %v12503_v15  ;;  %v2955_v32 = vmax.f32 %v2503_v28, %v2827_v57  ;;  %v7500_v57 = vcombine.high %v3030_v39, %v3034_v47  ;;  %v3105_v52 = vld [vmem:[%s11072_s26 + $0x2a0] sm:$0xff] }
 0x305   : > { %v2826_v58 = vmul.f32 0.01, %v2498_v42  ;;  %5093 = vmatprep.mubr.bf16.mxu1 %v7546_v31  ;;  %v2953_v13 = vmax.f32 %v2495_v8, %v2825_v10  ;;  %v12721_v8 = vld [vmem:[#allocation21_spill] sm:$0xff] }
 0x306   : > { %v2956_v11 = vmax.f32 %v2506_v17, %v2828_v44 }
 0x307   : > { %v2954_v40 = vmax.f32 %v2498_v42, %v2826_v58  ;;  %v8454_v22 = vpop.f32.mrb[64].mxu1  ;;  %5321 = vmatpush1.bf16.msra.mxu0 %v3306_v50  ;;  %8597 = vmatpush1.bf16.msra.mxu1 %v3306_v50 }
 0x308   : > { %v2519_v61 = vadd.f32 %v8454_v22, %v12717_v36  ;;  %v2510_v51 = vpop.f32.mrb[65].mxu1  ;;  %5322 = vmatprep.subr.bf16.mxu0 %v12503_v15  ;;  %8582 = vmatprep.subr.bf16.mxu1 %v12503_v15  ;;  %v3308_v3 = vpack.c.bf16 %v2956_v11, %v2955_v32  ;;  %v12723_v32 = vld [vmem:[#allocation139_spill] sm:$0xff] }
 0x309   : > { %v2511_v6 = vadd.f32 %v2510_v51, %v12718_v55  ;;  %v8455_v35 = vpop.f32.mrb[66].mxu1  ;;  %v3307_v19 = vpack.c.bf16 %v2954_v40, %v2953_v13  ;;  %v3038_v40 = vld [vmem:[%s11072_s26 + $0x88] sm:$0xff]  ;;  %v7499_v51 = vcombine.low %v3030_v39, %v3034_v47  ;;  %v12724_v55 = vld [vmem:[#allocation23_spill] sm:$0xff]  ;;  %v3109_v39 = vld [vmem:[%s11072_s26 + $0x2c0] sm:$0xff] }
 0x30a   : > { %v2831_v25 = vmul.f32 0.01, %v2519_v61  ;;  %v2522_v62 = vadd.f32 %v8455_v35, %v12719_v14  ;;  %v2513_v29 = vpop.f32.mrb[67].mxu1  ;;  %5094 = vmatmul.mubr.bf16.gmra.mrb[156].mxu1 %v7545_v41  ;;  %v3113_v47 = vld [vmem:[%s11072_s26 + $0x2e0] sm:$0xff] }
 0x30b   : > { %v2829_v48 = vmul.f32 0.01, %v2511_v6  ;;  %v2514_v45 = vadd.f32 %v2513_v29, %v12720_v16  ;;  %5323 = vmatpush1.bf16.msra.mxu0 %v3307_v19  ;;  %8598 = vmatpush1.bf16.msra.mxu1 %v3307_v19 }
 0x30c   : > { %v2832_v34 = vmul.f32 0.01, %v2522_v62  ;;  %5324 = vmatprep.subr.bf16.mxu0 %v12503_v15  ;;  %8583 = vmatprep.subr.bf16.mxu1 %v12503_v15  ;;  %v2959_v21 = vmax.f32 %v2519_v61, %v2831_v25  ;;  %v7561_v61 = vcombine.low %v3093_v18, %v3097_v53  ;;  %v12725_v25 = vld [vmem:[#allocation22_spill] sm:$0xff]  ;;  %v12726_v18 = vld [vmem:[#allocation140_spill] sm:$0xff] }
 0x30d   : > { %v2830_v12 = vmul.f32 0.01, %v2514_v45  ;;  %5101 = vmatprep.mubr.bf16.mxu1 %v7554_v4  ;;  %v2957_v28 = vmax.f32 %v2511_v6, %v2829_v48 }
 0x30e   : > { %v2960_v9 = vmax.f32 %v2522_v62, %v2832_v34 }
 0x30f   : > { %v2958_v43 = vmax.f32 %v2514_v45, %v2830_v12  ;;  %v8458_v50 = vpop.f32.mrb[68].mxu1  ;;  %5325 = vmatpush1.bf16.msra.mxu0 %v3308_v3  ;;  %8599 = vmatpush1.bf16.msra.mxu1 %v3308_v3  ;;  %v7570_v3 = vcombine.high %v3101_v30, %v3105_v52 }
 0x310   : > { %v2535_v2 = vadd.f32 %v8458_v50, %v12721_v8  ;;  %v2526_v5 = vpop.f32.mrb[69].mxu1  ;;  %5583 = vmatprep.subr.bf16.mxu0 %v12503_v15  ;;  %v3310_v31 = vpack.c.bf16 %v2960_v9, %v2959_v21  ;;  %v3046_v9 = vld [vmem:[%s11072_s26 + $0xc8] sm:$0xff] }
 0x311   : > { %v2527_v17 = vadd.f32 %v2526_v5, %v12722_v26  ;;  %v8459_v33 = vpop.f32.mrb[70].mxu1  ;;  %v3309_v10 = vpack.c.bf16 %v2958_v43, %v2957_v28  ;;  %v7578_v5 = vcombine.high %v3109_v39, %v3113_v47 }
 0x312   : > { %v2835_v63 = vmul.f32 0.01, %v2535_v2  ;;  %v2538_v42 = vadd.f32 %v8459_v33, %v10651_v24  ;;  %v2529_v44 = vpop.f32.mrb[71].mxu1  ;;  %5102 = vmatmul.mubr.bf16.gmra.mrb[160].mxu1 %v7553_v59  ;;  %5327 = vmatmul.mubr.bf16.vlgmr.msra.gmra.mrb[16].mxu0 %v7491_v7  ;;  %v3042_v24 = vld [vmem:[%s11072_s26 + $0xa8] sm:$0xff] }
 0x313   : > { %v2833_v58 = vmul.f32 0.01, %v2527_v17  ;;  %v2530_v11 = vadd.f32 %v2529_v44, %v12723_v32  ;;  %5584 = vmatpush1.bf16.msra.mxu0 %v3309_v10  ;;  %5109 = vmatprep.mubr.bf16.mxu1 %v7562_v60  ;;  %v7508_v4 = vcombine.high %v3038_v40, %v3042_v24  ;;  %v3050_v59 = vld [vmem:[%s11072_s26 + $0xe8] sm:$0xff]  ;;  %v7507_v50 = vcombine.low %v3038_v40, %v3042_v24  ;;  %v12728_v10 = vld [vmem:[#allocation24_spill] sm:$0xff] }
 0x314   : > { %v2836_v41 = vmul.f32 0.01, %v2538_v42  ;;  %5585 = vmatprep.subr.bf16.mxu0 %v12503_v15  ;;  %5334 = vmatprep.mubr.bf16.mxu0 %v7500_v57  ;;  %v2963_v22 = vmax.f32 %v2535_v2, %v2835_v63  ;;  %v7516_v33 = vcombine.high %v3046_v9, %v3050_v59  ;;  %v3117_v40 = vld [vmem:[%s11072_s26 + $0x300] sm:$0xff] }
 0x315   : > { %v2834_v13 = vmul.f32 0.01, %v2530_v11  ;;  %v2961_v27 = vmax.f32 %v2527_v17, %v2833_v58  ;;  %v3121_v24 = vld [vmem:[%s11072_s26 + $0x320] sm:$0xff] }
 0x316   : > { %v2964_v36 = vmax.f32 %v2538_v42, %v2836_v41 }
 0x317   : > { %v2962_v46 = vmax.f32 %v2530_v11, %v2834_v13  ;;  %v8462_v7 = vpop.f32.mrb[72].mxu1  ;;  %5586 = vmatpush1.bf16.msra.mxu0 %v3310_v31  ;;  %v12727_v31 = vld [vmem:[#allocation25_spill] sm:$0xff] }
 0x318   : > { %v2551_v6 = vadd.f32 %v8462_v7, %v12724_v55  ;;  %v2542_v35 = vpop.f32.mrb[73].mxu1  ;;  %5587 = vmatprep.subr.bf16.mxu0 %v12503_v15  ;;  %v3312_v19 = vpack.c.bf16 %v2964_v36, %v2963_v22  ;;  %v3054_v36 = vld [vmem:[%s11072_s26 + $0x108] sm:$0xff] }
 0x319   : > { %v2543_v14 = vadd.f32 %v2542_v35, %v12725_v25  ;;  %v8463_v62 = vpop.f32.mrb[74].mxu1  ;;  %v3311_v29 = vpack.c.bf16 %v2962_v46, %v2961_v27  ;;  %v7515_v46 = vcombine.low %v3046_v9, %v3050_v59  ;;  %v12730_v35 = vld [vmem:[#allocation27_spill] sm:$0xff]  ;;  %v3129_v9 = vld [vmem:[%s11072_s26 + $0x360] sm:$0xff] }
 0x31a   : > { %v2839_v48 = vmul.f32 0.01, %v2551_v6  ;;  %v2554_v16 = vadd.f32 %v8463_v62, %v10668_v37  ;;  %v2545_v45 = vpop.f32.mrb[75].mxu1  ;;  %5110 = vmatmul.mubr.bf16.gmra.mrb[164].mxu1 %v7561_v61  ;;  %5335 = vmatmul.mubr.bf16.gmra.mrb[20].mxu0 %v7499_v51  ;;  %v7569_v37 = vcombine.low %v3101_v30, %v3105_v52  ;;  %v12729_v30 = vld [vmem:[#allocation51_spill] sm:$0xff]  ;;  %v3058_v61 = vld [vmem:[%s11072_s26 + $0x128] sm:$0xff]  ;;  %v12731_v62 = vld [vmem:[#allocation26_spill] sm:$0xff] }
 0x31b   : > { %v2837_v34 = vmul.f32 0.01, %v2543_v14  ;;  %v2546_v53 = vadd.f32 %v2545_v45, %v12726_v18  ;;  %5588 = vmatpush1.bf16.msra.mxu0 %v3311_v29  ;;  %5117 = vmatprep.mubr.bf16.mxu1 %v7570_v3 }
 0x31c   : > { %v2840_v12 = vmul.f32 0.01, %v2554_v16  ;;  %5589 = vmatprep.subr.bf16.mxu0 %v12503_v15  ;;  %5342 = vmatprep.mubr.bf16.mxu0 %v7508_v4  ;;  %v2967_v28 = vmax.f32 %v2551_v6, %v2839_v48  ;;  %v7586_v6 = vcombine.high %v3117_v40, %v3121_v24 }
 0x31d   : > { %v2838_v21 = vmul.f32 0.01, %v2546_v53  ;;  %v2965_v60 = vmax.f32 %v2543_v14, %v2837_v34  ;;  %v7524_v14 = vcombine.high %v3054_v36, %v3058_v61 }
 0x31e   : > { %v2968_v43 = vmax.f32 %v2554_v16, %v2840_v12  ;;  %v12732_v12 = vld [vmem:[#allocation52_spill] sm:$0xff] }
 0x31f   : > { %v2966_v8 = vmax.f32 %v2546_v53, %v2838_v21  ;;  %v8466_v2 = vpop.f32.mrb[76].mxu1  ;;  %5590 = vmatpush1.bf16.msra.mxu0 %v3312_v19  ;;  %v3125_v21 = vld [vmem:[%s11072_s26 + $0x340] sm:$0xff] }
 0x320   : > { %v2567_v57 = vadd.f32 %v8466_v2, %v12727_v31  ;;  %v2558_v26 = vpop.f32.mrb[77].mxu1  ;;  %5591 = vmatprep.subr.bf16.mxu0 %v12503_v15  ;;  %v3314_v17 = vpack.c.bf16 %v2968_v43, %v2967_v28  ;;  %v3062_v28 = vld [vmem:[%s11072_s26 + $0x148] sm:$0xff]  ;;  %v7594_v31 = vcombine.high %v3125_v21, %v3129_v9 }
 0x321   : > { %v2559_v63 = vadd.f32 %v2558_v26, %v12728_v10  ;;  %v8467_v42 = vpop.f32.mrb[78].mxu1  ;;  %v3313_v44 = vpack.c.bf16 %v2966_v8, %v2965_v60  ;;  %v3066_v43 = vld [vmem:[%s11072_s26 + $0x168] sm:$0xff]  ;;  %v7523_v60 = vcombine.low %v3054_v36, %v3058_v61 }
 0x322   : > { %v2843_v58 = vmul.f32 0.01, %v2567_v57  ;;  %v2570_v32 = vadd.f32 %v8467_v42, %v10686_v20  ;;  %v2561_v11 = vpop.f32.mrb[79].mxu1  ;;  %5118 = vmatmul.mubr.bf16.gmra.mrb[168].mxu1 %v7569_v37  ;;  %5343 = vmatmul.mubr.bf16.gmra.mrb[24].mxu0 %v7507_v50  ;;  %v7577_v20 = vcombine.low %v3109_v39, %v3113_v47  ;;  %v7532_v10 = vcombine.high %v3062_v28, %v3066_v43  ;;  %v3070_v61 = vld [vmem:[%s11072_s26 + $0x188] sm:$0xff] }
 0x323   : > { %v2841_v41 = vmul.f32 0.01, %v2559_v63  ;;  %v2562_v52 = vadd.f32 %v2561_v11, %v12729_v30  ;;  %5592 = vmatpush1.bf16.msra.mxu0 %v3313_v44  ;;  %5125 = vmatprep.mubr.bf16.mxu1 %v7578_v5 }
 0x324   : > { %v2844_v13 = vmul.f32 0.01, %v2570_v32  ;;  %5593 = vmatprep.subr.bf16.mxu0 %v12503_v15  ;;  %5350 = vmatprep.mubr.bf16.mxu0 %v7516_v33  ;;  %v2971_v51 = vmax.f32 %v2567_v57, %v2843_v58  ;;  %v12733_v57 = vld [vmem:[#allocation29_spill] sm:$0xff] }
 0x325   : > { %v2842_v22 = vmul.f32 0.01, %v2562_v52  ;;  %v2969_v7 = vmax.f32 %v2559_v63, %v2841_v41  ;;  %v12734_v63 = vld [vmem:[#allocation28_spill] sm:$0xff] }
 0x326   : > { %v2972_v27 = vmax.f32 %v2570_v32, %v2844_v13 }
 0x327   : > { %v2970_v3 = vmax.f32 %v2562_v52, %v2842_v22  ;;  %v8470_v55 = vpop.f32.mrb[80].mxu1  ;;  %5594 = vmatpush1.bf16.msra.mxu0 %v3314_v17  ;;  %v12735_v52 = vld [vmem:[#allocation55_spill] sm:$0xff]  ;;  %v3137_v22 = vld [vmem:[%s11072_s26 + $0x3a0] sm:$0xff] }
 0x328   : > { %v2583_v19 = vadd.f32 %v8470_v55, %v12730_v35  ;;  %v2574_v4 = vpop.f32.mrb[81].mxu1  ;;  %5595 = vmatprep.subr.bf16.mxu0 %v12503_v15  ;;  %v3316_v25 = vpack.c.bf16 %v2972_v27, %v2971_v51  ;;  %v3074_v51 = vld [vmem:[%s11072_s26 + $0x1a8] sm:$0xff] }
 0x329   : > { %v2575_v29 = vadd.f32 %v2574_v4, %v12731_v62  ;;  %v8471_v48 = vpop.f32.mrb[82].mxu1  ;;  %v3315_v16 = vpack.c.bf16 %v2970_v3, %v2969_v7 }
 0x32a   : > { %v2847_v45 = vmul.f32 0.01, %v2583_v19  ;;  %v2586_v34 = vadd.f32 %v8471_v48, %v10702_v1  ;;  %v2577_v18 = vpop.f32.mrb[83].mxu1  ;;  %5126 = vmatmul.mubr.bf16.gmra.mrb[172].mxu1 %v7577_v20  ;;  %5351 = vmatmul.mubr.bf16.gmra.mrb[28].mxu0 %v7515_v46  ;;  %v7585_v1 = vcombine.low %v3117_v40, %v3121_v24  ;;  %v3133_v24 = vld [vmem:[%s11072_s26 + $0x380] sm:$0xff]  ;;  %v7531_v46 = vcombine.low %v3062_v28, %v3066_v43  ;;  %v3078_v28 = vld [vmem:[%s11072_s26 + $0x1c8] sm:$0xff] }
 0x32b   : > { %v2845_v53 = vmul.f32 0.01, %v2575_v29  ;;  %v2578_v39 = vadd.f32 %v2577_v18, %v12732_v12  ;;  %5596 = vmatpush1.bf16.msra.mxu0 %v3315_v16  ;;  %5133 = vmatprep.mubr.bf16.mxu1 %v7586_v6  ;;  %v7602_v6 = vcombine.high %v3133_v24, %v3137_v22  ;;  %v12738_v12 = vld [vmem:[#allocation54_spill] sm:$0xff]  ;;  %v3082_v43 = vld [vmem:[%s11072_s26 + $0x1e8] sm:$0xff] }
 0x32c   : > { %v2848_v47 = vmul.f32 0.01, %v2586_v34  ;;  %5597 = vmatprep.subr.bf16.mxu0 %v12503_v15  ;;  %5358 = vmatprep.mubr.bf16.mxu0 %v7524_v14  ;;  %v2975_v37 = vmax.f32 %v2583_v19, %v2847_v45  ;;  %v12736_v19 = vld [vmem:[#allocation49_spill] sm:$0xff]  ;;  %v7540_v14 = vcombine.high %v3070_v61, %v3074_v51 }
 0x32d   : > { %v2846_v59 = vmul.f32 0.01, %v2578_v39  ;;  %v2973_v8 = vmax.f32 %v2575_v29, %v2845_v53  ;;  %v12737_v29 = vld [vmem:[#allocation39_spill] sm:$0xff] }
 0x32e   : > { %v2976_v50 = vmax.f32 %v2586_v34, %v2848_v47 }
 0x32f   : > { %v2974_v2 = vmax.f32 %v2578_v39, %v2846_v59  ;;  %v8474_v5 = vpop.f32.mrb[84].mxu1  ;;  %5598 = vmatpush1.bf16.msra.mxu0 %v3316_v25 }
 0x330   : > { %v2599_v26 = vadd.f32 %v8474_v5, %v12733_v57  ;;  %v2590_v17 = vpop.f32.mrb[85].mxu1  ;;  %5599 = vmatprep.subr.bf16.mxu0 %v12503_v15  ;;  %v3318_v33 = vpack.c.bf16 %v2976_v50, %v2975_v37  ;;  %v12739_v57 = vld [vmem:[#allocation63_spill] sm:$0xff] }
 0x331   : > { %v2591_v42 = vadd.f32 %v2590_v17, %v12734_v63  ;;  %v8475_v44 = vpop.f32.mrb[86].mxu1  ;;  %v3317_v58 = vpack.c.bf16 %v2974_v2, %v2973_v8  ;;  %v12740_v63 = vld [vmem:[#allocation53_spill] sm:$0xff] }
 0x332   : > { %v2851_v32 = vmul.f32 0.01, %v2599_v26  ;;  %v2602_v11 = vadd.f32 %v8475_v44, %v10718_v54  ;;  %v2593_v41 = vpop.f32.mrb[87].mxu1  ;;  %5134 = vmatmul.mubr.bf16.gmra.mrb[176].mxu1 %v7585_v1  ;;  %5359 = vmatmul.mubr.bf16.gmra.mrb[32].mxu0 %v7523_v60  ;;  %v7593_v54 = vcombine.low %v3125_v21, %v3129_v9  ;;  %v3141_v21 = vld [vmem:[%s11072_s26 + $0x3c0] sm:$0xff]  ;;  %v7539_v1 = vcombine.low %v3070_v61, %v3074_v51  ;;  %v3090_v61 = vld [vmem:[%s11072_s26 + $0x228] sm:$0xff] }
 0x333   : > { %v2849_v30 = vmul.f32 0.01, %v2591_v42  ;;  %v2594_v13 = vadd.f32 %v2593_v41, %v12735_v52  ;;  %5600 = vmatpush1.bf16.msra.mxu0 %v3317_v58  ;;  %5141 = vmatprep.mubr.bf16.mxu1 %v7594_v31  ;;  %v3145_v9 = vld [vmem:[%s11072_s26 + $0x3e0] sm:$0xff] }
 0x334   : > { %v2852_v40 = vmul.f32 0.01, %v2602_v11  ;;  %5601 = vmatprep.subr.bf16.mxu0 %v12503_v15  ;;  %5366 = vmatprep.mubr.bf16.mxu0 %v7532_v10  ;;  %v2979_v27 = vmax.f32 %v2599_v26, %v2851_v32  ;;  %v7610_v5 = vcombine.high %v3141_v21, %v3145_v9 }
 0x335   : > { %v2850_v36 = vmul.f32 0.01, %v2594_v13  ;;  %v2977_v7 = vmax.f32 %v2591_v42, %v2849_v30  ;;  %v12741_v30 = vld [vmem:[#allocation60_spill] sm:$0xff] }
 0x336   : > { %v2980_v20 = vmax.f32 %v2602_v11, %v2852_v40  ;;  %v3149_v40 = vld [vmem:[%s11072_s26 + $0x400] sm:$0xff] }
 0x337   : > { %v2978_v3 = vmax.f32 %v2594_v13, %v2850_v36  ;;  %v8478_v55 = vpop.f32.mrb[88].mxu1  ;;  %5602 = vmatpush1.bf16.msra.mxu0 %v3318_v33  ;;  %v7548_v33 = vcombine.high %v3078_v28, %v3082_v43  ;;  %v3086_v36 = vld [vmem:[%s11072_s26 + $0x208] sm:$0xff] }
 0x338   : > { %v3320_v35 = vpack.c.bf16 %v2980_v20, %v2979_v27  ;;  %v2615_v4 = vadd.f32 %v8478_v55, %v12736_v19  ;;  %v2606_v25 = vpop.f32.mrb[89].mxu1  ;;  %5603 = vmatprep.subr.bf16.mxu0 %v12503_v15  ;;  %v7547_v20 = vcombine.low %v3078_v28, %v3082_v43 }
 0x339   : > { %v3319_v62 = vpack.c.bf16 %v2978_v3, %v2977_v7  ;;  %v2607_v48 = vadd.f32 %v2606_v25, %v12737_v29  ;;  %v8479_v16 = vpop.f32.mrb[90].mxu1 }
 0x33a   : > { %v2855_v45 = vmul.f32 0.01, %v2615_v4  ;;  %v2618_v34 = vadd.f32 %v8479_v16, %v10737_v56  ;;  %v2609_v18 = vpop.f32.mrb[91].mxu1  ;;  %5142 = vmatmul.mubr.bf16.gmra.mrb[180].mxu1 %v7593_v54  ;;  %5367 = vmatmul.mubr.bf16.gmra.mrb[36].mxu0 %v7531_v46  ;;  %v7601_v56 = vcombine.low %v3133_v24, %v3137_v22  ;;  %v3153_v24 = vld [vmem:[%s11072_s26 + $0x420] sm:$0xff]  ;;  %v12744_v16 = vld [vmem:[#allocation79_spill] sm:$0xff] }
 0x33b   : > { %v2853_v53 = vmul.f32 0.01, %v2607_v48  ;;  %v2610_v39 = vadd.f32 %v2609_v18, %v12738_v12  ;;  %5604 = vmatpush1.bf16.msra.mxu0 %v3319_v62  ;;  %5149 = vmatprep.mubr.bf16.mxu1 %v7602_v6  ;;  %v7618_v3 = vcombine.high %v3149_v40, %v3153_v24  ;;  %v12742_v6 = vld [vmem:[#allocation58_spill] sm:$0xff] }
 0x33c   : > { %v2856_v47 = vmul.f32 0.01, %v2618_v34  ;;  %5605 = vmatprep.subr.bf16.mxu0 %v12503_v15  ;;  %5374 = vmatprep.mubr.bf16.mxu0 %v7540_v14  ;;  %v2983_v37 = vmax.f32 %v2615_v4, %v2855_v45  ;;  %v7556_v4 = vcombine.high %v3086_v36, %v3090_v61  ;;  %v12743_v14 = vld [vmem:[#allocation57_spill] sm:$0xff] }
 0x33d   : > { %v2854_v59 = vmul.f32 0.01, %v2610_v39  ;;  %v2981_v60 = vmax.f32 %v2607_v48, %v2853_v53  ;;  %v12745_v53 = vld [vmem:[#allocation80_spill] sm:$0xff] }
 0x33e   : > { %v2984_v50 = vmax.f32 %v2618_v34, %v2856_v47 }
 0x33f   : > { %v2982_v8 = vmax.f32 %v2610_v39, %v2854_v59  ;;  %v8482_v2 = vpop.f32.mrb[92].mxu1  ;;  %5606 = vmatpush1.bf16.msra.mxu0 %v3320_v35  ;;  %v3157_v39 = vld [vmem:[%s11072_s26 + $0x440] sm:$0xff]  ;;  %v3098_v59 = vld [vmem:[%s11072_s26 + $0x268] sm:$0xff] }
 0x340   : > { %v3322_v31 = vpack.c.bf16 %v2984_v50, %v2983_v37  ;;  %v2631_v26 = vadd.f32 %v8482_v2, %v12739_v57  ;;  %v2622_v17 = vpop.f32.mrb[93].mxu1  ;;  %5607 = vmatprep.subr.bf16.mxu0 %v12503_v15  ;;  %v7617_v50 = vcombine.low %v3149_v40, %v3153_v24  ;;  %v12746_v57 = vld [vmem:[#allocation62_spill] sm:$0xff]  ;;  %v3169_v24 = vld [vmem:[%s11072_s26 + $0x4a0] sm:$0xff] }
 0x341   : > { %v3321_v10 = vpack.c.bf16 %v2982_v8, %v2981_v60  ;;  %v2623_v42 = vadd.f32 %v2622_v17, %v12740_v63  ;;  %v8483_v44 = vpop.f32.mrb[94].mxu1 }
 0x342   : > { %v2859_v58 = vmul.f32 0.01, %v2631_v26  ;;  %v2634_v32 = vadd.f32 %v8483_v44, %v10757_v0  ;;  %v2625_v11 = vpop.f32.mrb[95].mxu1  ;;  %5150 = vmatmul.mubr.bf16.gmra.mrb[184].mxu1 %v7601_v56  ;;  %5375 = vmatmul.mubr.bf16.gmra.mrb[40].mxu0 %v7539_v1  ;;  %v7609_v0 = vcombine.low %v3141_v21, %v3145_v9  ;;  %v3161_v21 = vld [vmem:[%s11072_s26 + $0x460] sm:$0xff]  ;;  %v3094_v9 = vld [vmem:[%s11072_s26 + $0x248] sm:$0xff]  ;;  %v7555_v56 = vcombine.low %v3086_v36, %v3090_v61 }
 0x343   : > { %v2857_v41 = vmul.f32 0.01, %v2623_v42  ;;  %v2626_v52 = vadd.f32 %v2625_v11, %v12741_v30  ;;  %5608 = vmatpush1.bf16.msra.mxu0 %v3321_v10  ;;  %5157 = vmatprep.mubr.bf16.mxu1 %v7610_v5  ;;  %v7626_v2 = vcombine.high %v3157_v39, %v3161_v21  ;;  %v7564_v5 = vcombine.high %v3094_v9, %v3098_v59  ;;  %v12747_v10 = vld [vmem:[#allocation59_spill] sm:$0xff]  ;;  %v12749_v30 = vld [vmem:[#allocation81_spill] sm:$0xff] }
 0x344   : > { %v2860_v13 = vmul.f32 0.01, %v2634_v32  ;;  %5609 = vmatprep.subr.bf16.mxu0 %v12503_v15  ;;  %5382 = vmatprep.mubr.bf16.mxu0 %v7548_v33  ;;  %v2987_v51 = vmax.f32 %v2631_v26, %v2859_v58  ;;  %v12748_v58 = vld [vmem:[#allocation83_spill] sm:$0xff]  ;;  %v3106_v36 = vld [vmem:[%s11072_s26 + $0x2a8] sm:$0xff] }
 0x345   : > { %v2858_v22 = vmul.f32 0.01, %v2626_v52  ;;  %v2985_v54 = vmax.f32 %v2623_v42, %v2857_v41 }
 0x346   : > { %v2988_v27 = vmax.f32 %v2634_v32, %v2860_v13  ;;  %v3165_v13 = vld [vmem:[%s11072_s26 + $0x480] sm:$0xff] }
 0x347   : > { %v2986_v46 = vmax.f32 %v2626_v52, %v2858_v22  ;;  %v8486_v7 = vpop.f32.mrb[96].mxu1  ;;  %5610 = vmatpush1.bf16.msra.mxu0 %v3322_v31  ;;  %v3102_v22 = vld [vmem:[%s11072_s26 + $0x288] sm:$0xff] }
 0x348   : > { %v3324_v55 = vpack.c.bf16 %v2988_v27, %v2987_v51  ;;  %v2647_v35 = vadd.f32 %v8486_v7, %v12742_v6  ;;  %v2638_v19 = vpop.f32.mrb[97].mxu1  ;;  %5611 = vmatprep.subr.bf16.mxu0 %v12503_v15 }
 0x349   : > { %v3323_v25 = vpack.c.bf16 %v2986_v46, %v2985_v54  ;;  %v2639_v62 = vadd.f32 %v2638_v19, %v12743_v14  ;;  %v8487_v29 = vpop.f32.mrb[98].mxu1  ;;  %v12751_v14 = vld [vmem:[#allocation65_spill] sm:$0xff] }
 0x34a   : > { %v2863_v48 = vmul.f32 0.01, %v2647_v35  ;;  %v2650_v45 = vadd.f32 %v8487_v29, %v12744_v16  ;;  %v2641_v34 = vpop.f32.mrb[99].mxu1  ;;  %5158 = vmatmul.mubr.bf16.gmra.mrb[188].mxu1 %v7609_v0  ;;  %5383 = vmatmul.mubr.bf16.gmra.mrb[44].mxu0 %v7547_v20  ;;  %v7625_v0 = vcombine.low %v3157_v39, %v3161_v21  ;;  %v7563_v20 = vcombine.low %v3094_v9, %v3098_v59  ;;  %v12752_v16 = vld [vmem:[#allocation84_spill] sm:$0xff]  ;;  %v3110_v9 = vld [vmem:[%s11072_s26 + $0x2c8] sm:$0xff] }
 0x34b   : > { %v2861_v18 = vmul.f32 0.01, %v2639_v62  ;;  %v2642_v12 = vadd.f32 %v2641_v34, %v12745_v53  ;;  %5612 = vmatpush1.bf16.msra.mxu0 %v3323_v25  ;;  %5165 = vmatprep.mubr.bf16.mxu1 %v7618_v3  ;;  %v7634_v3 = vcombine.high %v3165_v13, %v3169_v24  ;;  %v12753_v53 = vld [vmem:[#allocation86_spill] sm:$0xff]  ;;  %v3173_v39 = vld [vmem:[%s11072_s26 + $0x4c0] sm:$0xff]  ;;  %v3114_v59 = vld [vmem:[%s11072_s26 + $0x2e8] sm:$0xff] }
 0x34c   : > { %v2864_v47 = vmul.f32 0.01, %v2650_v45  ;;  %5613 = vmatprep.subr.bf16.mxu0 %v12503_v15  ;;  %5390 = vmatprep.mubr.bf16.mxu0 %v7556_v4  ;;  %v2991_v43 = vmax.f32 %v2647_v35, %v2863_v48  ;;  %v12750_v35 = vld [vmem:[#allocation64_spill] sm:$0xff] }
 0x34d   : > { %v2862_v28 = vmul.f32 0.01, %v2642_v12  ;;  %v2989_v1 = vmax.f32 %v2639_v62, %v2861_v18  ;;  %v3177_v21 = vld [vmem:[%s11072_s26 + $0x4e0] sm:$0xff] }
 0x34e   : > { %v2992_v37 = vmax.f32 %v2650_v45, %v2864_v47 }
 0x34f   : > { %v2990_v60 = vmax.f32 %v2642_v12, %v2862_v28  ;;  %v8490_v8 = vpop.f32.mrb[100].mxu1  ;;  %5614 = vmatpush1.bf16.msra.mxu0 %v3324_v55  ;;  %v7572_v55 = vcombine.high %v3102_v22, %v3106_v36 }
 0x350   : > { %v11326_v31 = vpack.c.bf16 %v2992_v37, %v2991_v43  ;;  %v2663_v26 = vadd.f32 %v8490_v8, %v12746_v57  ;;  %v2654_v17 = vpop.f32.mrb[101].mxu1  ;;  %5872 = vmatprep.subr.bf16.mxu0 %v12503_v15 }
 0x351   : > { %v11330_v33 = vpack.c.bf16 %v2990_v60, %v2989_v1  ;;  %v2655_v63 = vadd.f32 %v2654_v17, %v12747_v10  ;;  %v8491_v42 = vpop.f32.mrb[102].mxu1 }
 0x352   : > { %v2867_v44 = vmul.f32 0.01, %v2663_v26  ;;  %v2666_v32 = vadd.f32 %v8491_v42, %v12748_v58  ;;  %v2657_v11 = vpop.f32.mrb[103].mxu1  ;;  %5166 = vmatmul.mubr.bf16.gmra.mrb[192].mxu1 %v7617_v50  ;;  %5391 = vmatmul.mubr.bf16.gmra.mrb[48].mxu0 %v7555_v56  ;;  %v7633_v50 = vcombine.low %v3165_v13, %v3169_v24  ;;  %v7571_v56 = vcombine.low %v3102_v22, %v3106_v36  ;;  %v12755_v42 = vld [vmem:[#allocation66_spill] sm:$0xff]  ;;  %v12757_v13 = vld [vmem:[#allocation87_spill] sm:$0xff]  ;;  %v3181_v24 = vld [vmem:[%s11072_s26 + $0x500] sm:$0xff] }
 0x353   : > { %v2865_v41 = vmul.f32 0.01, %v2655_v63  ;;  %v2658_v52 = vadd.f32 %v2657_v11, %v12749_v30  ;;  %5173 = vmatprep.mubr.bf16.mxu1 %v7626_v2  ;;  %5398 = vmatprep.mubr.bf16.mxu0 %v7564_v5  ;;  %v7642_v2 = vcombine.high %v3173_v39, %v3177_v21  ;;  %v7580_v5 = vcombine.high %v3110_v9, %v3114_v59  ;;  %v12756_v11 = vld [vmem:[#allocation88_spill] sm:$0xff] }
 0x354   : > { %v2868_v40 = vmul.f32 0.01, %v2666_v32  ;;  %v2995_v51 = vmax.f32 %v2663_v26, %v2867_v44  ;;  %v12754_v26 = vld [vmem:[#allocation67_spill] sm:$0xff]  ;;  %v3185_v36 = vld [vmem:[%s11072_s26 + $0x520] sm:$0xff] }
 0x355   : > { %v2866_v61 = vmul.f32 0.01, %v2658_v52  ;;  %v2993_v54 = vmax.f32 %v2655_v63, %v2865_v41 }
 0x356   : > { %v2996_v27 = vmax.f32 %v2666_v32, %v2868_v40 }
 0x357   : > { %v2994_v46 = vmax.f32 %v2658_v52, %v2866_v61  ;;  %v8494_v7 = vpop.f32.mrb[104].mxu1  ;;  %v3118_v61 = vld [vmem:[%s11072_s26 + $0x308] sm:$0xff] }
 0x358   : > { %v11339_v6 = vpack.c.bf16 %v2996_v27, %v2995_v51  ;;  %v2679_v19 = vadd.f32 %v8494_v7, %v12750_v35  ;;  %v2670_v4 = vpop.f32.mrb[105].mxu1  ;;  %v3122_v51 = vld [vmem:[%s11072_s26 + $0x328] sm:$0xff]  ;;  %v7650_v35 = vcombine.high %v3181_v24, %v3185_v36 }
 0x359   : > { %v11342_v25 = vpack.c.bf16 %v2994_v46, %v2993_v54  ;;  %v2671_v62 = vadd.f32 %v2670_v4, %v12751_v14  ;;  %v8495_v29 = vpop.f32.mrb[106].mxu1  ;;  %v7641_v54 = vcombine.low %v3173_v39, %v3177_v21  ;;  %v7579_v46 = vcombine.low %v3110_v9, %v3114_v59  ;;  %v12758_v14 = vld [vmem:[#allocation68_spill] sm:$0xff]  ;;  %v12761_v21 = vld [vmem:[#allocation91_spill] sm:$0xff] }
 0x35a   : > { %v2871_v48 = vmul.f32 0.01, %v2679_v19  ;;  %v2682_v45 = vadd.f32 %v8495_v29, %v12752_v16  ;;  %v2673_v34 = vpop.f32.mrb[107].mxu1  ;;  %5174 = vmatmul.mubr.bf16.gmra.mrb[196].mxu1 %v7625_v0  ;;  %5399 = vmatmul.mubr.bf16.gmra.mrb[52].mxu0 %v7563_v20  ;;  %v12759_v16 = vld [vmem:[#allocation70_spill] sm:$0xff]  ;;  %v3189_v59 = vld [vmem:[%s11072_s26 + $0x540] sm:$0xff] }
 0x35b   : > { %v2869_v18 = vmul.f32 0.01, %v2671_v62  ;;  %v2674_v12 = vadd.f32 %v2673_v34, %v12753_v53  ;;  %5181 = vmatprep.mubr.bf16.mxu1 %v7634_v3  ;;  %5406 = vmatprep.mubr.bf16.mxu0 %v7572_v55  ;;  %v12760_v53 = vld [vmem:[#allocation89_spill] sm:$0xff] }
 0x35c   : > { %v2872_v47 = vmul.f32 0.01, %v2682_v45  ;;  %v2999_v43 = vmax.f32 %v2679_v19, %v2871_v48  ;;  %v7588_v19 = vcombine.high %v3118_v61, %v3122_v51 }
 0x35d   : > { %v2870_v28 = vmul.f32 0.01, %v2674_v12  ;;  %v2997_v1 = vmax.f32 %v2671_v62, %v2869_v18 }
 0x35e   : > { %v3000_v37 = vmax.f32 %v2682_v45, %v2872_v47 }
 0x35f   : > { %v2998_v60 = vmax.f32 %v2674_v12, %v2870_v28  ;;  %v8498_v8 = vpop.f32.mrb[108].mxu1 }
 0x360   : > { %v11351_v57 = vpack.c.bf16 %v3000_v37, %v2999_v43  ;;  %v2695_v17 = vadd.f32 %v8498_v8, %v12754_v26  ;;  %v2686_v10 = vpop.f32.mrb[109].mxu1  ;;  %v3193_v43 = vld [vmem:[%s11072_s26 + $0x560] sm:$0xff]  ;;  %v3126_v37 = vld [vmem:[%s11072_s26 + $0x348] sm:$0xff]  ;;  %v7649_v8 = vcombine.low %v3181_v24, %v3185_v36 }
 0x361   : > { %v11354_v63 = vpack.c.bf16 %v2998_v60, %v2997_v1  ;;  %v2687_v44 = vadd.f32 %v2686_v10, %v12755_v42  ;;  %v8499_v58 = vpop.f32.mrb[110].mxu1  ;;  %v7658_v10 = vcombine.high %v3189_v59, %v3193_v43  ;;  %v12764_v24 = vld [vmem:[#allocation93_spill] sm:$0xff] }
 0x362   : > { %v2875_v32 = vmul.f32 0.01, %v2695_v17  ;;  %v2698_v41 = vadd.f32 %v8499_v58, %v12756_v11  ;;  %v2689_v30 = vpop.f32.mrb[111].mxu1  ;;  %5182 = vmatmul.mubr.bf16.gmra.mrb[200].mxu1 %v7633_v50  ;;  %5407 = vmatmul.mubr.bf16.gmra.mrb[56].mxu0 %v7571_v56  ;;  %v3130_v50 = vld [vmem:[%s11072_s26 + $0x368] sm:$0xff]  ;;  %v12762_v58 = vld [vmem:[#allocation72_spill] sm:$0xff] }
 0x363   : > { %v2873_v52 = vmul.f32 0.01, %v2687_v44  ;;  %v2690_v40 = vadd.f32 %v2689_v30, %v12757_v13  ;;  %5189 = vmatprep.mubr.bf16.mxu1 %v7642_v2  ;;  %5414 = vmatprep.mubr.bf16.mxu0 %v7580_v5  ;;  %v7587_v2 = vcombine.low %v3118_v61, %v3122_v51  ;;  %v7596_v42 = vcombine.high %v3126_v37, %v3130_v50  ;;  %v12763_v30 = vld [vmem:[#allocation71_spill] sm:$0xff]  ;;  %v12765_v51 = vld [vmem:[#allocation92_spill] sm:$0xff] }
 0x364   : > { %v2876_v22 = vmul.f32 0.01, %v2698_v41  ;;  %v3003_v0 = vmax.f32 %v2695_v17, %v2875_v32 }
 0x365   : > { %v2874_v27 = vmul.f32 0.01, %v2690_v40  ;;  %v3001_v7 = vmax.f32 %v2687_v44, %v2873_v52 }
 0x366   : > { %v3004_v20 = vmax.f32 %v2698_v41, %v2876_v22 }
 0x367   : > { %v3002_v3 = vmax.f32 %v2690_v40, %v2874_v27  ;;  %v8502_v55 = vpop.f32.mrb[112].mxu1 }
 0x368   : > { %v11363_v4 = vpack.c.bf16 %v3004_v20, %v3003_v0  ;;  %v2711_v62 = vadd.f32 %v8502_v55, %v12758_v14  ;;  %v2702_v29 = vpop.f32.mrb[113].mxu1  ;;  %v3197_v0 = vld [vmem:[%s11072_s26 + $0x580] sm:$0xff]  ;;  %v7595_v14 = vcombine.low %v3126_v37, %v3130_v50 }
 0x369   : > { %v11366_v48 = vpack.c.bf16 %v3002_v3, %v3001_v7  ;;  %v2703_v45 = vadd.f32 %v2702_v29, %v12759_v16  ;;  %v8503_v34 = vpop.f32.mrb[114].mxu1  ;;  %v3138_v7 = vld [vmem:[%s11072_s26 + $0x3a8] sm:$0xff] }
 0x36a   : > { %v2879_v18 = vmul.f32 0.01, %v2711_v62  ;;  %v2714_v12 = vadd.f32 %v8503_v34, %v12760_v53  ;;  %v2705_v39 = vpop.f32.mrb[115].mxu1  ;;  %5190 = vmatmul.mubr.bf16.gmra.mrb[204].mxu1 %v7641_v54  ;;  %5415 = vmatmul.mubr.bf16.gmra.mrb[60].mxu0 %v7579_v46  ;;  %v3201_v54 = vld [vmem:[%s11072_s26 + $0x5a0] sm:$0xff]  ;;  %v3134_v46 = vld [vmem:[%s11072_s26 + $0x388] sm:$0xff] }
 0x36b   : > { %v2877_v47 = vmul.f32 0.01, %v2703_v45  ;;  %v2706_v9 = vadd.f32 %v2705_v39, %v12761_v21  ;;  %5197 = vmatprep.mubr.bf16.mxu1 %v7650_v35  ;;  %5422 = vmatprep.mubr.bf16.mxu0 %v7588_v19  ;;  %v7657_v19 = vcombine.low %v3189_v59, %v3193_v43  ;;  %v7604_v34 = vcombine.high %v3134_v46, %v3138_v7  ;;  %v12766_v53 = vld [vmem:[#allocation73_spill] sm:$0xff]  ;;  %v12767_v21 = vld [vmem:[#allocation75_spill] sm:$0xff] }
 0x36c   : > { %v2880_v28 = vmul.f32 0.01, %v2714_v12  ;;  %v3007_v1 = vmax.f32 %v2711_v62, %v2879_v18 }
 0x36d   : > { %v2878_v56 = vmul.f32 0.01, %v2706_v9  ;;  %v3005_v5 = vmax.f32 %v2703_v45, %v2877_v47  ;;  %v7666_v45 = vcombine.high %v3197_v0, %v3201_v54 }
 0x36e   : > { %v3008_v60 = vmax.f32 %v2714_v12, %v2880_v28 }
 0x36f   : > { %v3006_v26 = vmax.f32 %v2706_v9, %v2878_v56  ;;  %v8506_v17 = vpop.f32.mrb[116].mxu1 }
 0x370   : > { %v11375_v44 = vpack.c.bf16 %v3008_v60, %v3007_v1  ;;  %v2727_v32 = vadd.f32 %v8506_v17, %v12762_v58  ;;  %v2718_v11 = vpop.f32.mrb[117].mxu1  ;;  %v3205_v1 = vld [vmem:[%s11072_s26 + $0x5c0] sm:$0xff]  ;;  %v7603_v58 = vcombine.low %v3134_v46, %v3138_v7 }
 0x371   : > { %v11378_v41 = vpack.c.bf16 %v3006_v26, %v3005_v5  ;;  %v2719_v52 = vadd.f32 %v2718_v11, %v12763_v30  ;;  %v8507_v13 = vpop.f32.mrb[118].mxu1  ;;  %v3146_v5 = vld [vmem:[%s11072_s26 + $0x3e8] sm:$0xff] }
 0x372   : > { %v2883_v40 = vmul.f32 0.01, %v2727_v32  ;;  %v2730_v22 = vadd.f32 %v8507_v13, %v12764_v24  ;;  %v2721_v36 = vpop.f32.mrb[119].mxu1  ;;  %5198 = vmatmul.mubr.bf16.gmra.mrb[208].mxu1 %v7649_v8  ;;  %5423 = vmatmul.mubr.bf16.gmra.mrb[64].mxu0 %v7587_v2  ;;  %v3209_v8 = vld [vmem:[%s11072_s26 + $0x5e0] sm:$0xff]  ;;  %v3142_v2 = vld [vmem:[%s11072_s26 + $0x3c8] sm:$0xff] }
 0x373   : > { %v2881_v61 = vmul.f32 0.01, %v2719_v52  ;;  %v2722_v27 = vadd.f32 %v2721_v36, %v12765_v51  ;;  %5205 = vmatprep.mubr.bf16.mxu1 %v7658_v10  ;;  %5430 = vmatprep.mubr.bf16.mxu0 %v7596_v42  ;;  %v7665_v42 = vcombine.low %v3197_v0, %v3201_v54  ;;  %v7674_v30 = vcombine.high %v3205_v1, %v3209_v8 }
 0x374   : > { %v2884_v20 = vmul.f32 0.01, %v2730_v22  ;;  %v3011_v55 = vmax.f32 %v2727_v32, %v2883_v40 }
 0x375   : > { %v2882_v3 = vmul.f32 0.01, %v2722_v27  ;;  %v3009_v62 = vmax.f32 %v2719_v52, %v2881_v61  ;;  %v7612_v52 = vcombine.high %v3142_v2, %v3146_v5  ;;  %v12769_v61 = vld [vmem:[#allocation77_spill] sm:$0xff] }
 0x376   : > { %v3012_v35 = vmax.f32 %v2730_v22, %v2884_v20  ;;  %v2218_v22 = vpop.permute.xlu1 %2217 }
 0x377   : > { %v3010_v29 = vmax.f32 %v2722_v27, %v2882_v3  ;;  %v8510_v16 = vpop.f32.mrb[120].mxu1  ;;  %v3213_v3 = vld [vmem:[%s11072_s26 + $0x600] sm:$0xff] }
 0x378   : > { %v11387_v18 = vpack.c.bf16 %v3012_v35, %v3011_v55  ;;  %v2743_v12 = vadd.f32 %v8510_v16, %v12766_v53  ;;  %v2734_v39 = vpop.f32.mrb[121].mxu1  ;;  %v3217_v35 = vld [vmem:[%s11072_s26 + $0x620] sm:$0xff] }
 0x379   : > { %v11390_v47 = vpack.c.bf16 %v3010_v29, %v3009_v62  ;;  %v2735_v9 = vadd.f32 %v2734_v39, %v12767_v21  ;;  %v8511_v59 = vpop.f32.mrb[122].mxu1  ;;  %v7682_v39 = vcombine.high %v3213_v3, %v3217_v35 }
 0x37a   : > { %v2887_v28 = vmul.f32 0.01, %v2743_v12  ;;  %v2746_v43 = vadd.f32 %v8511_v59, %v11081_v38  ;;  %v2737_v37 = vpop.f32.mrb[123].mxu1  ;;  %5206 = vmatmul.mubr.bf16.gmra.mrb[212].mxu1 %v7657_v19  ;;  %5431 = vmatmul.mubr.bf16.gmra.mrb[68].mxu0 %v7595_v14  ;;  %v3150_v19 = vld [vmem:[%s11072_s26 + $0x408] sm:$0xff]  ;;  %v3221_v59 = vld [vmem:[%s11072_s26 + $0x640] sm:$0xff] }
 0x37b   : > { %v2885_v50 = vmul.f32 0.01, %v2735_v9  ;;  %v2738_v56 = vadd.f32 %v2737_v37, %v11058_v49  ;;  %5213 = vmatprep.mubr.bf16.mxu1 %v7666_v45  ;;  %5438 = vmatprep.mubr.bf16.mxu0 %v7604_v34  ;;  %v12768_v49 = vld [vmem:[#allocation78_spill] sm:$0xff]  ;;  %v3154_v14 = vld [vmem:[%s11072_s26 + $0x428] sm:$0xff]  ;;  %v7673_v45 = vcombine.low %v3205_v1, %v3209_v8  ;;  %v7611_v34 = vcombine.low %v3142_v2, %v3146_v5  ;;  %v3229_v8 = vld [vmem:[%s11072_s26 + $0x680] sm:$0xff] }
 0x37c   : > { %v2888_v60 = vmul.f32 0.01, %v2746_v43  ;;  %v3015_v17 = vmax.f32 %v2743_v12, %v2887_v28  ;;  %v3225_v28 = vld [vmem:[%s11072_s26 + $0x660] sm:$0xff]  ;;  %v3162_v37 = vld [vmem:[%s11072_s26 + $0x468] sm:$0xff] }
 0x37d   : > { %v2886_v26 = vmul.f32 0.01, %v2738_v56  ;;  %v3013_v32 = vmax.f32 %v2735_v9, %v2885_v50  ;;  %v7681_v50 = vcombine.low %v3213_v3, %v3217_v35  ;;  %v7690_v1 = vcombine.high %v3221_v59, %v3225_v28  ;;  %v3233_v2 = vld [vmem:[%s11072_s26 + $0x6a0] sm:$0xff]  ;;  %v3166_v5 = vld [vmem:[%s11072_s26 + $0x488] sm:$0xff] }
 0x37e   : > { %v3016_v10 = vmax.f32 %v2746_v43, %v2888_v60  ;;  %v3158_v43 = vld [vmem:[%s11072_s26 + $0x448] sm:$0xff] }
 0x37f   : > { %v3014_v38 = vmax.f32 %v2738_v56, %v2886_v26  ;;  %v8514_v11 = vpop.f32.mrb[124].mxu1  ;;  %v7619_v56 = vcombine.low %v3150_v19, %v3154_v14  ;;  %v7628_v60 = vcombine.high %v3158_v43, %v3162_v37  ;;  %v3170_v26 = vld [vmem:[%s11072_s26 + $0x4a8] sm:$0xff] }
 0x380   : > { %v11399_v13 = vpack.c.bf16 %v3016_v10, %v3015_v17  ;;  %v2759_v40 = vadd.f32 %v8514_v11, %v12768_v49  ;;  %v2750_v24 = vpop.f32.mrb[125].mxu1  ;;  %v7689_v17 = vcombine.low %v3221_v59, %v3225_v28  ;;  %v7627_v10 = vcombine.low %v3158_v43, %v3162_v37  ;;  %v3174_v11 = vld [vmem:[%s11072_s26 + $0x4c8] sm:$0xff]  ;;  %v3261_v28 = vld [vmem:[%s11072_s26 + $0x780] sm:$0xff] }
 0x381   : > { %v11402_v36 = vpack.c.bf16 %v3014_v38, %v3013_v32  ;;  %v2751_v51 = vadd.f32 %v2750_v24, %v12769_v61  ;;  %v8515_v27 = vpop.f32.mrb[126].mxu1  ;;  %v3237_v32 = vld [vmem:[%s11072_s26 + $0x6c0] sm:$0xff]  ;;  %v7635_v49 = vcombine.low %v3166_v5, %v3170_v26  ;;  %v3198_v37 = vld [vmem:[%s11072_s26 + $0x588] sm:$0xff] }
 0x382   : > { %v2891_v0 = vmul.f32 0.01, %v2759_v40  ;;  %v2762_v20 = vadd.f32 %v8515_v27, %v2218_v22  ;;  %v2753_v54 = vpop.f32.mrb[127].mxu1  ;;  %5214 = vmatmul.mubr.bf16.gmra.mrb[216].mxu1 %v7665_v42  ;;  %5439 = vmatmul.mubr.bf16.gmra.mrb[72].mxu0 %v7603_v58  ;;  %v7698_v42 = vcombine.high %v3229_v8, %v3233_v2  ;;  %v7636_v58 = vcombine.high %v3166_v5, %v3170_v26  ;;  %v3241_v38 = vld [vmem:[%s11072_s26 + $0x6e0] sm:$0xff]  ;;  %v3186_v27 = vld [vmem:[%s11072_s26 + $0x528] sm:$0xff] }
 0x383   : > { %v2889_v46 = vmul.f32 0.01, %v2751_v51  ;;  %v2754_v7 = vadd.f32 %v2753_v54, %v11100_v23  ;;  %5221 = vmatprep.mubr.bf16.mxu1 %v7674_v30  ;;  %5446 = vmatprep.mubr.bf16.mxu0 %v7612_v52  ;;  %v7620_v23 = vcombine.high %v3150_v19, %v3154_v14  ;;  %v3178_v30 = vld [vmem:[%s11072_s26 + $0x4e8] sm:$0xff]  ;;  %v7697_v52 = vcombine.low %v3229_v8, %v3233_v2  ;;  %v3245_v22 = vld [vmem:[%s11072_s26 + $0x700] sm:$0xff] }
 0x384   : > { %v2892_v55 = vmul.f32 0.01, %v2762_v20  ;;  %v3019_v29 = vmax.f32 %v2759_v40, %v2891_v0  ;;  %v7706_v40 = vcombine.high %v3237_v32, %v3241_v38  ;;  %v7644_v24 = vcombine.high %v3174_v11, %v3178_v30  ;;  %v3249_v61 = vld [vmem:[%s11072_s26 + $0x720] sm:$0xff] }
 0x385   : > { %v2890_v62 = vmul.f32 0.01, %v2754_v7  ;;  %v3017_v53 = vmax.f32 %v2751_v51, %v2889_v46  ;;  %v3182_v51 = vld [vmem:[%s11072_s26 + $0x508] sm:$0xff]  ;;  %v7705_v54 = vcombine.low %v3237_v32, %v3241_v38  ;;  %v7643_v46 = vcombine.low %v3174_v11, %v3178_v30  ;;  %v3253_v19 = vld [vmem:[%s11072_s26 + $0x740] sm:$0xff] }
 0x386   : > { %v3020_v16 = vmax.f32 %v2762_v20, %v2892_v55  ;;  %v7714_v3 = vcombine.high %v3245_v22, %v3249_v61  ;;  %v7652_v55 = vcombine.high %v3182_v51, %v3186_v27  ;;  %v3257_v14 = vld [vmem:[%s11072_s26 + $0x760] sm:$0xff]  ;;  %v3210_v32 = vld [vmem:[%s11072_s26 + $0x5e8] sm:$0xff] }
 0x387   : > { %v3018_v12 = vmax.f32 %v2754_v7, %v2890_v62  ;;  %v3190_v62 = vld [vmem:[%s11072_s26 + $0x548] sm:$0xff]  ;;  %v3265_v43 = vld [vmem:[%s11072_s26 + $0x7a0] sm:$0xff] }
 0x388   : > { %v11410_v21 = vpack.c.bf16 %v3020_v16, %v3019_v29  ;;  %v3194_v29 = vld [vmem:[%s11072_s26 + $0x568] sm:$0xff]  ;;  %v7730_v5 = vcombine.high %v3261_v28, %v3265_v43  ;;  %v7729_v30 = vcombine.low %v3261_v28, %v3265_v43 }
 0x389   : > { %v11412_v9 = vpack.c.bf16 %v3018_v12, %v3017_v53  ;;  %v7651_v53 = vcombine.low %v3182_v51, %v3186_v27  ;;  %v7659_v8 = vcombine.low %v3190_v62, %v3194_v29  ;;  %v3218_v51 = vld [vmem:[%s11072_s26 + $0x628] sm:$0xff]  ;;  %v3023_v27 = vld [vmem:[%s11072_s26 + $0x10] sm:$0xff] }
 0x38a   : > { %5222 = vmatmul.mubr.bf16.gmra.mrb[220].mxu1 %v7673_v45  ;;  %5447 = vmatmul.mubr.bf16.gmra.mrb[76].mxu0 %v7611_v34  ;;  %v7713_v34 = vcombine.low %v3245_v22, %v3249_v61  ;;  %v3214_v61 = vld [vmem:[%s11072_s26 + $0x608] sm:$0xff] }
 0x38b   : > { %5229 = vmatprep.mubr.bf16.mxu1 %v7682_v39  ;;  %5454 = vmatprep.mubr.bf16.mxu0 %v7620_v23  ;;  %v7722_v39 = vcombine.high %v3253_v19, %v3257_v14  ;;  %v7660_v23 = vcombine.high %v3190_v62, %v3194_v29  ;;  %v3222_v29 = vld [vmem:[%s11072_s26 + $0x648] sm:$0xff] }
 0x392   : > { %5230 = vmatmul.mubr.bf16.gmra.mrb[224].mxu1 %v7681_v50  ;;  %5455 = vmatmul.mubr.bf16.gmra.mrb[80].mxu0 %v7619_v56  ;;  %v3202_v50 = vld [vmem:[%s11072_s26 + $0x5a8] sm:$0xff] }
 0x393   : > { %5237 = vmatprep.mubr.bf16.mxu1 %v7690_v1  ;;  %5462 = vmatprep.mubr.bf16.mxu0 %v7628_v60  ;;  %v7721_v60 = vcombine.low %v3253_v19, %v3257_v14  ;;  %v7668_v26 = vcombine.high %v3198_v37, %v3202_v50  ;;  %v7684_v19 = vcombine.high %v3214_v61, %v3218_v51 }
 0x39a   : > { %5238 = vmatmul.mubr.bf16.gmra.mrb[228].mxu1 %v7689_v17  ;;  %5463 = vmatmul.mubr.bf16.gmra.mrb[84].mxu0 %v7627_v10  ;;  %v3269_v10 = vld [vmem:[%s11072_s26 + $0x7c0] sm:$0xff] }
 0x39b   : > { %5245 = vmatprep.mubr.bf16.mxu1 %v7698_v42  ;;  %5470 = vmatprep.mubr.bf16.mxu0 %v7636_v58  ;;  %v3273_v42 = vld [vmem:[%s11072_s26 + $0x7e0] sm:$0xff]  ;;  %v3206_v58 = vld [vmem:[%s11072_s26 + $0x5c8] sm:$0xff] }
 0x3a2   : > { %5246 = vmatmul.mubr.bf16.gmra.mrb[232].mxu1 %v7697_v52  ;;  %5471 = vmatmul.mubr.bf16.gmra.mrb[88].mxu0 %v7635_v49  ;;  %v7667_v52 = vcombine.low %v3198_v37, %v3202_v50 }
 0x3a3   : > { %5253 = vmatprep.mubr.bf16.mxu1 %v7706_v40  ;;  %5478 = vmatprep.mubr.bf16.mxu0 %v7644_v24  ;;  %v7738_v40 = vcombine.high %v3269_v10, %v3273_v42  ;;  %v7676_v24 = vcombine.high %v3206_v58, %v3210_v32 }
 0x3a5   : > { %v11430_v0 = vpop.f32.mrb[128].mxu1 }
 0x3a6   : > { %v5041_v20 = vpop.f32.mrb[129].mxu1 }
 0x3a7   : > { %v11432_v7 = vpop.f32.mrb[130].mxu1  ;;  %v3027_v20 = vld [vmem:[%s11072_s26 + $0x30] sm:$0xff] }
 0x3a8   : > { %v5044_v35 = vpop.f32.mrb[131].mxu1  ;;  %v7494_v14 = vcombine.high %v3023_v27, %v3027_v20  ;;  %v7493_v28 = vcombine.low %v3023_v27, %v3027_v20 }
 0x3aa   : > { %5254 = vmatmul.mubr.bf16.gmra.mrb[236].mxu1 %v7705_v54  ;;  %5479 = vmatmul.mubr.bf16.gmra.mrb[92].mxu0 %v7643_v46 }
 0x3ab   : > { %5261 = vmatprep.mubr.bf16.mxu1 %v7714_v3  ;;  %5486 = vmatprep.mubr.bf16.mxu0 %v7652_v55  ;;  %v7737_v3 = vcombine.low %v3269_v10, %v3273_v42  ;;  %v7675_v55 = vcombine.low %v3206_v58, %v3210_v32 }
 0x3ad   : > { %v11438_v16 = vpop.f32.mrb[132].mxu1 }
 0x3ae   : > { %v5049_v45 = vpop.f32.mrb[133].mxu1 }
 0x3af   : > { %v11440_v12 = vpop.f32.mrb[134].mxu1  ;;  %v3226_v45 = vld [vmem:[%s11072_s26 + $0x668] sm:$0xff] }
 0x3b0   : > { %v5052_v59 = vpop.f32.mrb[135].mxu1  ;;  %v7692_v37 = vcombine.high %v3222_v29, %v3226_v45  ;;  %v7691_v42 = vcombine.low %v3222_v29, %v3226_v45 }
 0x3b1   : > { %v7683_v59 = vcombine.low %v3214_v61, %v3218_v51 }
 0x3b2   : > { %5262 = vmatmul.mubr.bf16.gmra.mrb[240].mxu1 %v7713_v34  ;;  %5487 = vmatmul.mubr.bf16.gmra.mrb[96].mxu0 %v7651_v53  ;;  %v3031_v53 = vld [vmem:[%s11072_s26 + $0x50] sm:$0xff] }
 0x3b3   : > { %5269 = vmatprep.mubr.bf16.mxu1 %v7722_v39  ;;  %5494 = vmatprep.mubr.bf16.mxu0 %v7660_v23  ;;  %v3035_v39 = vld [vmem:[%s11072_s26 + $0x70] sm:$0xff] }
 0x3b4   : > { %v7501_v58 = vcombine.low %v3031_v53, %v3035_v39 }
 0x3b5   : > { %v11446_v56 = vpop.f32.mrb[136].mxu1 }
 0x3b6   : > { %v5057_v1 = vpop.f32.mrb[137].mxu1 }
 0x3b7   : > { %v11448_v2 = vpop.f32.mrb[138].mxu1  ;;  %v7502_v1 = vcombine.high %v3031_v53, %v3035_v39 }
 0x3b8   : > { %v5060_v17 = vpop.f32.mrb[139].mxu1 }
 0x3b9   : > { %v3043_v17 = vld [vmem:[%s11072_s26 + $0xb0] sm:$0xff] }
 0x3ba   : > { %5270 = vmatmul.mubr.bf16.gmra.mrb[244].mxu1 %v7721_v60  ;;  %5495 = vmatmul.mubr.bf16.gmra.mrb[100].mxu0 %v7659_v8  ;;  %v3230_v60 = vld [vmem:[%s11072_s26 + $0x688] sm:$0xff] }
 0x3bb   : > { %5277 = vmatprep.mubr.bf16.mxu1 %v7730_v5  ;;  %5502 = vmatprep.mubr.bf16.mxu0 %v7668_v26  ;;  %v3234_v8 = vld [vmem:[%s11072_s26 + $0x6a8] sm:$0xff]  ;;  %v3039_v26 = vld [vmem:[%s11072_s26 + $0x90] sm:$0xff] }
 0x3bc   : > { %v7700_v32 = vcombine.high %v3230_v60, %v3234_v8  ;;  %v7699_v51 = vcombine.low %v3230_v60, %v3234_v8  ;;  %v7509_v27 = vcombine.low %v3039_v26, %v3043_v17 }
 0x3bd   : > { %v11454_v38 = vpop.f32.mrb[140].mxu1 }
 0x3be   : > { %v5065_v11 = vpop.f32.mrb[141].mxu1 }
 0x3bf   : > { %v11456_v49 = vpop.f32.mrb[142].mxu1 }
 0x3c0   : > { %v5068_v22 = vpop.f32.mrb[143].mxu1 }
 0x3c1   : > { %v3051_v22 = vld [vmem:[%s11072_s26 + $0xf0] sm:$0xff] }
 0x3c2   : > { %5278 = vmatmul.mubr.bf16.gmra.mrb[248].mxu1 %v7729_v30  ;;  %5503 = vmatmul.mubr.bf16.gmra.mrb[104].mxu0 %v7667_v52  ;;  %v7510_v30 = vcombine.high %v3039_v26, %v3043_v17  ;;  %v3238_v52 = vld [vmem:[%s11072_s26 + $0x6c8] sm:$0xff] }
 0x3c3   : > { %5285 = vmatprep.mubr.bf16.mxu1 %v7738_v40  ;;  %5510 = vmatprep.mubr.bf16.mxu0 %v7676_v24  ;;  %v3242_v40 = vld [vmem:[%s11072_s26 + $0x6e8] sm:$0xff] }
 0x3c4   : > { %v7708_v20 = vcombine.high %v3238_v52, %v3242_v40  ;;  %v7707_v45 = vcombine.low %v3238_v52, %v3242_v40 }
 0x3c5   : > { %v11462_v54 = vpop.f32.mrb[144].mxu1 }
 0x3c6   : > { %v5073_v46 = vpop.f32.mrb[145].mxu1 }
 0x3c7   : > { %v11464_v35 = vpop.f32.mrb[146].mxu1 }
 0x3c8   : > { %v5076_v62 = vpop.f32.mrb[147].mxu1 }
 0x3c9   : > { %v3059_v62 = vld [vmem:[%s11072_s26 + $0x130] sm:$0xff] }
 0x3ca   : > { %5286 = vmatmul.mubr.bf16.gmra.mrb[252].mxu1 %v7737_v3  ;;  %5511 = vmatmul.mubr.bf16.gmra.mrb[108].mxu0 %v7675_v55  ;;  %v3246_v55 = vld [vmem:[%s11072_s26 + $0x708] sm:$0xff] }
 0x3cb   : > { %5518 = vmatprep.mubr.bf16.mxu1 %v7684_v19  ;;  %5615 = vmatprep.mubr.bf16.mxu0 %v7494_v14  ;;  %v3250_v19 = vld [vmem:[%s11072_s26 + $0x728] sm:$0xff] }
 0x3cc   : > { %v7716_v39 = vcombine.high %v3246_v55, %v3250_v19  ;;  %v7715_v8 = vcombine.low %v3246_v55, %v3250_v19 }
 0x3cd   : > { %v11468_v34 = vpop.f32.mrb[148].mxu1 }
 0x3ce   : > { %v5081_v23 = vpop.f32.mrb[149].mxu1 }
 0x3cf   : > { %v11472_v43 = vpop.f32.mrb[150].mxu1 }
 0x3d0   : > { %v5084_v50 = vpop.f32.mrb[151].mxu1 }
 0x3d2   : > { %5519 = vmatmul.mubr.bf16.vlgmr.msra.gmra.mrb[224].mxu1 %v7683_v59  ;;  %5616 = vmatmul.mubr.bf16.vlgmr.msra.gmra.mrb[16].mxu0 %v7493_v28  ;;  %v3254_v28 = vld [vmem:[%s11072_s26 + $0x748] sm:$0xff] }
 0x3d3   : > { %5873 = vmatpush1.bf16.msra.mxu0 %v11330_v33  ;;  %5526 = vmatprep.mubr.bf16.mxu1 %v7692_v37  ;;  %v3258_v37 = vld [vmem:[%s11072_s26 + $0x768] sm:$0xff] }
 0x3d4   : > { %5874 = vmatprep.subr.bf16.mxu0 %v12503_v15  ;;  %5623 = vmatprep.mubr.bf16.mxu0 %v7502_v1  ;;  %v3067_v1 = vld [vmem:[%s11072_s26 + $0x170] sm:$0xff]  ;;  %v7724_v17 = vcombine.high %v3254_v28, %v3258_v37  ;;  %v7723_v40 = vcombine.low %v3254_v28, %v3258_v37 }
 0x3d5   : > { %v11478_v5 = vpop.f32.mrb[152].mxu1 }
 0x3d6   : > { %v5089_v10 = vpop.f32.mrb[153].mxu1 }
 0x3d7   : > { %5875 = vmatpush1.bf16.msra.mxu0 %v11326_v31  ;;  %v11483_v33 = vpop.f32.mrb[154].mxu1  ;;  %v3047_v31 = vld [vmem:[%s11072_s26 + $0xd0] sm:$0xff] }
 0x3d8   : > { %5876 = vmatprep.subr.bf16.mxu0 %v12503_v15  ;;  %v5092_v11 = vpop.f32.mrb[155].mxu1  ;;  %v7518_v3 = vcombine.high %v3047_v31, %v3051_v22  ;;  %v7517_v53 = vcombine.low %v3047_v31, %v3051_v22 }
 0x3da   : > { %5527 = vmatmul.mubr.bf16.gmra.mrb[228].mxu1 %v7691_v42  ;;  %5624 = vmatmul.mubr.bf16.gmra.mrb[20].mxu0 %v7501_v58  ;;  %v3262_v58 = vld [vmem:[%s11072_s26 + $0x788] sm:$0xff] }
 0x3db   : > { %5877 = vmatpush1.bf16.msra.mxu0 %v11342_v25  ;;  %5534 = vmatprep.mubr.bf16.mxu1 %v7700_v32  ;;  %v3266_v32 = vld [vmem:[%s11072_s26 + $0x7a8] sm:$0xff] }
 0x3dc   : > { %5878 = vmatprep.subr.bf16.mxu0 %v12503_v15  ;;  %5631 = vmatprep.mubr.bf16.mxu0 %v7510_v30  ;;  %v3075_v30 = vld [vmem:[%s11072_s26 + $0x1b0] sm:$0xff]  ;;  %v7732_v22 = vcombine.high %v3262_v58, %v3266_v32  ;;  %v7731_v19 = vcombine.low %v3262_v58, %v3266_v32 }
 0x3dd   : > { %v11490_v24 = vpop.f32.mrb[156].mxu1  ;;  %v3107_v58 = vld [vmem:[%s11072_s26 + $0x2b0] sm:$0xff] }
 0x3de   : > { %v5097_v61 = vpop.f32.mrb[157].mxu1 }
 0x3df   : > { %5879 = vmatpush1.bf16.msra.mxu0 %v11339_v6  ;;  %v11495_v25 = vpop.f32.mrb[158].mxu1  ;;  %v3055_v6 = vld [vmem:[%s11072_s26 + $0x110] sm:$0xff] }
 0x3e0   : > { %5880 = vmatprep.subr.bf16.mxu0 %v12503_v15  ;;  %v5100_v46 = vpop.f32.mrb[159].mxu1  ;;  %v7526_v59 = vcombine.high %v3055_v6, %v3059_v62  ;;  %v7525_v26 = vcombine.low %v3055_v6, %v3059_v62 }
 0x3e2   : > { %5535 = vmatmul.mubr.bf16.gmra.mrb[232].mxu1 %v7699_v51  ;;  %5632 = vmatmul.mubr.bf16.gmra.mrb[24].mxu0 %v7509_v27  ;;  %v3270_v27 = vld [vmem:[%s11072_s26 + $0x7c8] sm:$0xff] }
 0x3e3   : > { %5881 = vmatpush1.bf16.msra.mxu0 %v11354_v63  ;;  %5542 = vmatprep.mubr.bf16.mxu1 %v7708_v20  ;;  %v3274_v20 = vld [vmem:[%s11072_s26 + $0x7e8] sm:$0xff] }
 0x3e4   : > { %5882 = vmatprep.subr.bf16.mxu0 %v12503_v15  ;;  %5639 = vmatprep.mubr.bf16.mxu0 %v7518_v3  ;;  %v3083_v3 = vld [vmem:[%s11072_s26 + $0x1f0] sm:$0xff] }
 0x3e5   : > { %v11502_v14 = vpop.f32.mrb[160].mxu1 }
 0x3e6   : > { %v5105_v29 = vpop.f32.mrb[161].mxu1 }
 0x3e7   : > { %5883 = vmatpush1.bf16.msra.mxu0 %v11351_v57  ;;  %v11507_v63 = vpop.f32.mrb[162].mxu1  ;;  %v3063_v57 = vld [vmem:[%s11072_s26 + $0x150] sm:$0xff] }
 0x3e8   : > { %5884 = vmatprep.subr.bf16.mxu0 %v12503_v15  ;;  %v5108_v23 = vpop.f32.mrb[163].mxu1  ;;  %v7534_v42 = vcombine.high %v3063_v57, %v3067_v1  ;;  %v7533_v31 = vcombine.low %v3063_v57, %v3067_v1  ;;  %v3095_v1 = vld [vmem:[%s11072_s26 + $0x250] sm:$0xff] }
 0x3ea   : > { %5543 = vmatmul.mubr.bf16.gmra.mrb[236].mxu1 %v7707_v45  ;;  %5640 = vmatmul.mubr.bf16.gmra.mrb[28].mxu0 %v7517_v53  ;;  %v3087_v53 = vld [vmem:[%s11072_s26 + $0x210] sm:$0xff] }
 0x3eb   : > { %5885 = vmatpush1.bf16.msra.mxu0 %v11366_v48  ;;  %5550 = vmatprep.mubr.bf16.mxu1 %v7716_v39  ;;  %v3091_v39 = vld [vmem:[%s11072_s26 + $0x230] sm:$0xff] }
 0x3ec   : > { %5886 = vmatprep.subr.bf16.mxu0 %v12503_v15  ;;  %5647 = vmatprep.mubr.bf16.mxu0 %v7526_v59  ;;  %v7739_v59 = vcombine.low %v3270_v27, %v3274_v20  ;;  %v7558_v57 = vcombine.high %v3087_v53, %v3091_v39 }
 0x3ed   : > { %v11514_v50 = vpop.f32.mrb[164].mxu1 }
 0x3ee   : > { %v5113_v60 = vpop.f32.mrb[165].mxu1 }
 0x3ef   : > { %5887 = vmatpush1.bf16.msra.mxu0 %v11363_v4  ;;  %v11519_v48 = vpop.f32.mrb[166].mxu1  ;;  %v3071_v4 = vld [vmem:[%s11072_s26 + $0x190] sm:$0xff] }
 0x3f0   : > { %5888 = vmatprep.subr.bf16.mxu0 %v12503_v15  ;;  %v5116_v10 = vpop.f32.mrb[167].mxu1  ;;  %v7542_v51 = vcombine.high %v3071_v4, %v3075_v30  ;;  %v7541_v6 = vcombine.low %v3071_v4, %v3075_v30  ;;  %v3099_v60 = vld [vmem:[%s11072_s26 + $0x270] sm:$0xff] }
 0x3f1   : > { %v7566_v10 = vcombine.high %v3095_v1, %v3099_v60  ;;  %v7565_v4 = vcombine.low %v3095_v1, %v3099_v60 }
 0x3f2   : > { %5551 = vmatmul.mubr.bf16.gmra.mrb[240].mxu1 %v7715_v8  ;;  %5648 = vmatmul.mubr.bf16.gmra.mrb[32].mxu0 %v7525_v26  ;;  %v7557_v26 = vcombine.low %v3087_v53, %v3091_v39  ;;  %v3127_v39 = vld [vmem:[%s11072_s26 + $0x350] sm:$0xff] }
 0x3f3   : > { %5889 = vmatpush1.bf16.msra.mxu0 %v11378_v41  ;;  %5558 = vmatprep.mubr.bf16.mxu1 %v7724_v17 }
 0x3f4   : > { %5890 = vmatprep.subr.bf16.mxu0 %v12503_v15  ;;  %5655 = vmatprep.mubr.bf16.mxu0 %v7534_v42 }
 0x3f5   : > { %v11526_v11 = vpop.f32.mrb[168].mxu1 }
 0x3f6   : > { %v5121_v52 = vpop.f32.mrb[169].mxu1 }
 0x3f7   : > { %5891 = vmatpush1.bf16.msra.mxu0 %v11375_v44  ;;  %v11531_v41 = vpop.f32.mrb[170].mxu1  ;;  %v3079_v44 = vld [vmem:[%s11072_s26 + $0x1d0] sm:$0xff] }
 0x3f8   : > { %5892 = vmatprep.subr.bf16.mxu0 %v12503_v15  ;;  %v5124_v61 = vpop.f32.mrb[171].mxu1  ;;  %v7550_v45 = vcombine.high %v3079_v44, %v3083_v3  ;;  %v7549_v28 = vcombine.low %v3079_v44, %v3083_v3  ;;  %v3119_v3 = vld [vmem:[%s11072_s26 + $0x310] sm:$0xff] }
 0x3fa   : > { %5559 = vmatmul.mubr.bf16.gmra.mrb[244].mxu1 %v7723_v40  ;;  %5656 = vmatmul.mubr.bf16.gmra.mrb[36].mxu0 %v7533_v31  ;;  %v3111_v40 = vld [vmem:[%s11072_s26 + $0x2d0] sm:$0xff] }
 0x3fb   : > { %5893 = vmatpush1.bf16.msra.mxu0 %v11390_v47  ;;  %5566 = vmatprep.mubr.bf16.mxu1 %v7732_v22  ;;  %v7740_v47 = vcombine.high %v3270_v27, %v3274_v20  ;;  %v3115_v31 = vld [vmem:[%s11072_s26 + $0x2f0] sm:$0xff] }
 0x3fc   : > { %5894 = vmatprep.subr.bf16.mxu0 %v12503_v15  ;;  %5663 = vmatprep.mubr.bf16.mxu0 %v7542_v51  ;;  %v7582_v20 = vcombine.high %v3111_v40, %v3115_v31 }
 0x3fd   : > { %v11538_v46 = vpop.f32.mrb[172].mxu1 }
 0x3fe   : > { %v5129_v55 = vpop.f32.mrb[173].mxu1 }
 0x3ff   : > { %5895 = vmatpush1.bf16.msra.mxu0 %v11387_v18  ;;  %v11543_v62 = vpop.f32.mrb[174].mxu1  ;;  %v3123_v55 = vld [vmem:[%s11072_s26 + $0x330] sm:$0xff] }
 0x400   : > { %5896 = vmatprep.subr.bf16.mxu0 %v12503_v15  ;;  %v5132_v29 = vpop.f32.mrb[175].mxu1 }
 0x402   : > { %5567 = vmatmul.mubr.bf16.gmra.mrb[248].mxu1 %v7731_v19  ;;  %5664 = vmatmul.mubr.bf16.gmra.mrb[40].mxu0 %v7541_v6 }
 0x403   : > { %5897 = vmatpush1.bf16.msra.mxu0 %v11402_v36  ;;  %5574 = vmatprep.mubr.bf16.mxu1 %v7740_v47  ;;  %v7581_v47 = vcombine.low %v3111_v40, %v3115_v31 }
 0x404   : > { %5898 = vmatprep.subr.bf16.mxu0 %v12503_v15  ;;  %5671 = vmatprep.mubr.bf16.mxu0 %v7550_v45  ;;  %v7590_v45 = vcombine.high %v3119_v3, %v3123_v55 }
 0x405   : > { %v11550_v18 = vpop.f32.mrb[176].mxu1 }
 0x406   : > { %v5137_v23 = vpop.f32.mrb[177].mxu1 }
 0x407   : > { %5899 = vmatpush1.bf16.msra.mxu0 %v11399_v13  ;;  %v11553_v37 = vpop.f32.mrb[178].mxu1  ;;  %v3131_v23 = vld [vmem:[%s11072_s26 + $0x370] sm:$0xff] }
 0x408   : > { %5900 = vmatprep.subr.bf16.mxu0 %v12503_v15  ;;  %v5140_v36 = vpop.f32.mrb[179].mxu1  ;;  %v7598_v1 = vcombine.high %v3127_v39, %v3131_v23 }
 0x40a   : > { %5575 = vmatmul.mubr.bf16.gmra.mrb[252].mxu1 %v7739_v59  ;;  %5672 = vmatmul.mubr.bf16.gmra.mrb[44].mxu0 %v7549_v28 }
 0x40b   : > { %5901 = vmatpush1.bf16.msra.mxu0 %v11412_v9  ;;  %5679 = vmatprep.mubr.bf16.mxu0 %v7558_v57  ;;  %v3103_v9 = vld [vmem:[%s11072_s26 + $0x290] sm:$0xff]  ;;  %v7589_v57 = vcombine.low %v3119_v3, %v3123_v55 }
 0x40c   : > { %5902 = vmatprep.subr.bf16.mxu0 %v12503_v15  ;;  %v7574_v52 = vcombine.high %v3103_v9, %v3107_v58  ;;  %v7573_v51 = vcombine.low %v3103_v9, %v3107_v58  ;;  %v7597_v9 = vcombine.low %v3127_v39, %v3131_v23  ;;  %v3151_v3 = vld [vmem:[%s11072_s26 + $0x410] sm:$0xff] }
 0x40d   : > { %v11560_v8 = vpop.f32.mrb[180].mxu1  ;;  %v3155_v55 = vld [vmem:[%s11072_s26 + $0x430] sm:$0xff] }
 0x40e   : > { %v5145_v13 = vpop.f32.mrb[181].mxu1  ;;  %v7622_v39 = vcombine.high %v3151_v3, %v3155_v55 }
 0x40f   : > { %5903 = vmatpush1.bf16.msra.mxu0 %v11410_v21  ;;  %v11563_v17 = vpop.f32.mrb[182].mxu1  ;;  %v3135_v13 = vld [vmem:[%s11072_s26 + $0x390] sm:$0xff] }
 0x410   : > { %v5148_v42 = vpop.f32.mrb[183].mxu1 }
 0x412   : > { %5680 = vmatmul.mubr.bf16.gmra.mrb[48].mxu0 %v7557_v26  ;;  %v3139_v26 = vld [vmem:[%s11072_s26 + $0x3b0] sm:$0xff] }
 0x413   : > { %5687 = vmatprep.mubr.bf16.mxu0 %v7566_v10 }
 0x415   : > { %v11567_v32 = vpop.f32.mrb[184].mxu1 }
 0x416   : > { %v5153_v15 = vpop.f32.mrb[185].mxu1 }
 0x417   : > { %v11569_v30 = vpop.f32.mrb[186].mxu1  ;;  %v7606_v15 = vcombine.high %v3135_v13, %v3139_v26 }
 0x418   : > { %12770 = vst [vmem:[#allocation96_spill] sm:$0xff] %v11569_v30  ;;  %v5156_v21 = vpop.f32.mrb[187].mxu1 }
 0x419   : > { %v3147_v21 = vld [vmem:[%s11072_s26 + $0x3f0] sm:$0xff] }
 0x41a   : > { %5688 = vmatmul.mubr.bf16.gmra.mrb[52].mxu0 %v7565_v4 }
 0x41b   : > { %5695 = vmatprep.mubr.bf16.mxu0 %v7574_v52  ;;  %v3143_v52 = vld [vmem:[%s11072_s26 + $0x3d0] sm:$0xff] }
 0x41d   : > { %v11573_v22 = vpop.f32.mrb[188].mxu1 }
 0x41e   : > { %12771 = vst [vmem:[#allocation94_spill] sm:$0xff] %v11573_v22  ;;  %v5161_v61 = vpop.f32.mrb[189].mxu1 }
 0x41f   : > { %v11575_v27 = vpop.f32.mrb[190].mxu1  ;;  %v7605_v61 = vcombine.low %v3135_v13, %v3139_v26  ;;  %v7621_v13 = vcombine.low %v3151_v3, %v3155_v55  ;;  %v3175_v3 = vld [vmem:[%s11072_s26 + $0x4d0] sm:$0xff] }
 0x420   : > { %12772 = vst [vmem:[#allocation97_spill] sm:$0xff] %v11575_v27  ;;  %v5164_v44 = vpop.f32.mrb[191].mxu1  ;;  %v3179_v55 = vld [vmem:[%s11072_s26 + $0x4f0] sm:$0xff] }
 0x422   : > { %5696 = vmatmul.mubr.bf16.gmra.mrb[56].mxu0 %v7573_v51 }
 0x423   : > { %5703 = vmatprep.mubr.bf16.mxu0 %v7582_v20  ;;  %v7614_v20 = vcombine.high %v3143_v52, %v3147_v21 }
 0x425   : > { %v11579_v19 = vpop.f32.mrb[192].mxu1 }
 0x426   : > { %12773 = vst [vmem:[#allocation100_spill] sm:$0xff] %v11579_v19  ;;  %v5169_v6 = vpop.f32.mrb[193].mxu1 }
 0x427   : > { %v11581_v29 = vpop.f32.mrb[194].mxu1 }
 0x428   : > { %12774 = vst [vmem:[#allocation99_spill] sm:$0xff] %v11581_v29  ;;  %v5172_v53 = vpop.f32.mrb[195].mxu1 }
 0x42a   : > { %5704 = vmatmul.mubr.bf16.gmra.mrb[60].mxu0 %v7581_v47 }
 0x42b   : > { %5711 = vmatprep.mubr.bf16.mxu0 %v7590_v45  ;;  %v7613_v45 = vcombine.low %v3143_v52, %v3147_v21 }
 0x42d   : > { %v11585_v59 = vpop.f32.mrb[196].mxu1 }
 0x42e   : > { %12775 = vst [vmem:[#allocation102_spill] sm:$0xff] %v11585_v59  ;;  %v5177_v28 = vpop.f32.mrb[197].mxu1 }
 0x42f   : > { %v11587_v36 = vpop.f32.mrb[198].mxu1  ;;  %v3159_v28 = vld [vmem:[%s11072_s26 + $0x450] sm:$0xff] }
 0x430   : > { %12776 = vst [vmem:[#allocation101_spill] sm:$0xff] %v11587_v36  ;;  %v5180_v60 = vpop.f32.mrb[199].mxu1 }
 0x432   : > { %5712 = vmatmul.mubr.bf16.gmra.mrb[64].mxu0 %v7589_v57  ;;  %v3163_v57 = vld [vmem:[%s11072_s26 + $0x470] sm:$0xff] }
 0x433   : > { %5719 = vmatprep.mubr.bf16.mxu0 %v7598_v1 }
 0x435   : > { %v11591_v10 = vpop.f32.mrb[200].mxu1 }
 0x436   : > { %12777 = vst [vmem:[#allocation104_spill] sm:$0xff] %v11591_v10  ;;  %v5185_v42 = vpop.f32.mrb[201].mxu1 }
 0x437   : > { %v11593_v58 = vpop.f32.mrb[202].mxu1  ;;  %v7630_v42 = vcombine.high %v3159_v28, %v3163_v57 }
 0x438   : > { %12778 = vst [vmem:[#allocation103_spill] sm:$0xff] %v11593_v58  ;;  %v5188_v4 = vpop.f32.mrb[203].mxu1 }
 0x439   : > { %v3171_v4 = vld [vmem:[%s11072_s26 + $0x4b0] sm:$0xff] }
 0x43a   : > { %5720 = vmatmul.mubr.bf16.gmra.mrb[68].mxu0 %v7597_v9 }
 0x43b   : > { %5727 = vmatprep.mubr.bf16.mxu0 %v7606_v15  ;;  %v3167_v15 = vld [vmem:[%s11072_s26 + $0x490] sm:$0xff] }
 0x43d   : > { %v11597_v40 = vpop.f32.mrb[204].mxu1 }
 0x43e   : > { %12779 = vst [vmem:[#allocation106_spill] sm:$0xff] %v11597_v40  ;;  %v5193_v31 = vpop.f32.mrb[205].mxu1 }
 0x43f   : > { %v11599_v51 = vpop.f32.mrb[206].mxu1  ;;  %v7629_v31 = vcombine.low %v3159_v28, %v3163_v57  ;;  %v3183_v57 = vld [vmem:[%s11072_s26 + $0x510] sm:$0xff] }
 0x440   : > { %12780 = vst [vmem:[#allocation105_spill] sm:$0xff] %v11599_v51  ;;  %v5196_v44 = vpop.f32.mrb[207].mxu1 }
 0x442   : > { %5728 = vmatmul.mubr.bf16.gmra.mrb[72].mxu0 %v7605_v61 }
 0x443   : > { %5735 = vmatprep.mubr.bf16.mxu0 %v7614_v20  ;;  %v7638_v20 = vcombine.high %v3167_v15, %v3171_v4 }
 0x445   : > { %v11603_v6 = vpop.f32.mrb[208].mxu1 }
 0x446   : > { %12781 = vst [vmem:[#allocation108_spill] sm:$0xff] %v11603_v6  ;;  %v5201_v47 = vpop.f32.mrb[209].mxu1  ;;  %v3248_v6 = vld [vmem:[%s11072_s26 + $0x718] sm:$0xff] }
 0x447   : > { %v11605_v53 = vpop.f32.mrb[210].mxu1 }
 0x448   : > { %12782 = vst [vmem:[#allocation107_spill] sm:$0xff] %v11605_v53  ;;  %v5204_v23 = vpop.f32.mrb[211].mxu1 }
 0x44a   : > { %5736 = vmatmul.mubr.bf16.gmra.mrb[76].mxu0 %v7613_v45 }
 0x44b   : > { %5743 = vmatprep.mubr.bf16.mxu0 %v7622_v39  ;;  %v7637_v39 = vcombine.low %v3167_v15, %v3171_v4  ;;  %v3199_v4 = vld [vmem:[%s11072_s26 + $0x590] sm:$0xff] }
 0x44d   : > { %v11609_v1 = vpop.f32.mrb[212].mxu1 }
 0x44e   : > { %12783 = vst [vmem:[#allocation111_spill] sm:$0xff] %v11609_v1  ;;  %v5209_v60 = vpop.f32.mrb[213].mxu1 }
 0x44f   : > { %v11611_v26 = vpop.f32.mrb[214].mxu1  ;;  %v7646_v60 = vcombine.high %v3175_v3, %v3179_v55 }
 0x450   : > { %12784 = vst [vmem:[#allocation110_spill] sm:$0xff] %v11611_v26  ;;  %v5212_v9 = vpop.f32.mrb[215].mxu1 }
 0x452   : > { %5744 = vmatmul.mubr.bf16.gmra.mrb[80].mxu0 %v7621_v13  ;;  %v3187_v13 = vld [vmem:[%s11072_s26 + $0x530] sm:$0xff] }
 0x453   : > { %5751 = vmatprep.mubr.bf16.mxu0 %v7630_v42  ;;  %v7645_v42 = vcombine.low %v3175_v3, %v3179_v55  ;;  %v7654_v9 = vcombine.high %v3183_v57, %v3187_v13  ;;  %v3207_v3 = vld [vmem:[%s11072_s26 + $0x5d0] sm:$0xff] }
 0x454   : > { %v3211_v55 = vld [vmem:[%s11072_s26 + $0x5f0] sm:$0xff] }
 0x455   : > { %v11615_v52 = vpop.f32.mrb[216].mxu1 }
 0x456   : > { %12785 = vst [vmem:[#allocation113_spill] sm:$0xff] %v11615_v52  ;;  %v5217_v21 = vpop.f32.mrb[217].mxu1 }
 0x457   : > { %v11617_v61 = vpop.f32.mrb[218].mxu1  ;;  %v3191_v21 = vld [vmem:[%s11072_s26 + $0x550] sm:$0xff] }
 0x458   : > { %12786 = vst [vmem:[#allocation30_spill] sm:$0xff] %v11617_v61  ;;  %v5220_v44 = vpop.f32.mrb[219].mxu1 }
 0x459   : > { %v3203_v44 = vld [vmem:[%s11072_s26 + $0x5b0] sm:$0xff] }
 0x45a   : > { %5752 = vmatmul.mubr.bf16.gmra.mrb[84].mxu0 %v7629_v31  ;;  %v3195_v31 = vld [vmem:[%s11072_s26 + $0x570] sm:$0xff] }
 0x45b   : > { %5759 = vmatprep.mubr.bf16.mxu0 %v7638_v20  ;;  %v7653_v20 = vcombine.low %v3183_v57, %v3187_v13  ;;  %v7662_v15 = vcombine.high %v3191_v21, %v3195_v31  ;;  %v3215_v57 = vld [vmem:[%s11072_s26 + $0x610] sm:$0xff] }
 0x45c   : > { %v3219_v13 = vld [vmem:[%s11072_s26 + $0x630] sm:$0xff] }
 0x45d   : > { %v11621_v47 = vpop.f32.mrb[220].mxu1 }
 0x45e   : > { %12787 = vst [vmem:[#allocation114_spill] sm:$0xff] %v11621_v47  ;;  %v5225_v45 = vpop.f32.mrb[221].mxu1 }
 0x45f   : > { %v11623_v23 = vpop.f32.mrb[222].mxu1  ;;  %v7661_v45 = vcombine.low %v3191_v21, %v3195_v31  ;;  %v3223_v21 = vld [vmem:[%s11072_s26 + $0x650] sm:$0xff] }
 0x460   : > { %12788 = vst [vmem:[#allocation31_spill] sm:$0xff] %v11623_v23  ;;  %v5228_v28 = vpop.f32.mrb[223].mxu1  ;;  %v3227_v31 = vld [vmem:[%s11072_s26 + $0x670] sm:$0xff] }
 0x461   : > { %v7678_v28 = vcombine.high %v3207_v3, %v3211_v55 }
 0x462   : > { %5760 = vmatmul.mubr.bf16.gmra.mrb[88].mxu0 %v7637_v39  ;;  %v7670_v39 = vcombine.high %v3199_v4, %v3203_v44 }
 0x463   : > { %5767 = vmatprep.mubr.bf16.mxu0 %v7646_v60  ;;  %v7669_v60 = vcombine.low %v3199_v4, %v3203_v44  ;;  %v3231_v4 = vld [vmem:[%s11072_s26 + $0x690] sm:$0xff] }
 0x464   : > { %v3235_v44 = vld [vmem:[%s11072_s26 + $0x6b0] sm:$0xff] }
 0x46a   : > { %5768 = vmatmul.mubr.bf16.gmra.mrb[92].mxu0 %v7645_v42  ;;  %v7677_v42 = vcombine.low %v3207_v3, %v3211_v55  ;;  %v3239_v3 = vld [vmem:[%s11072_s26 + $0x6d0] sm:$0xff] }
 0x46b   : > { %5775 = vmatprep.mubr.bf16.mxu0 %v7654_v9  ;;  %v7686_v9 = vcombine.high %v3215_v57, %v3219_v13  ;;  %v3243_v55 = vld [vmem:[%s11072_s26 + $0x6f0] sm:$0xff] }
 0x472   : > { %5776 = vmatmul.mubr.bf16.gmra.mrb[96].mxu0 %v7653_v20  ;;  %v7685_v20 = vcombine.low %v3215_v57, %v3219_v13  ;;  %v3247_v57 = vld [vmem:[%s11072_s26 + $0x710] sm:$0xff] }
 0x473   : > { %5783 = vmatprep.mubr.bf16.mxu0 %v7662_v15  ;;  %v7694_v15 = vcombine.high %v3223_v21, %v3227_v31  ;;  %v3251_v13 = vld [vmem:[%s11072_s26 + $0x730] sm:$0xff] }
 0x47a   : > { %5784 = vmatmul.mubr.bf16.gmra.mrb[100].mxu0 %v7661_v45  ;;  %v7693_v45 = vcombine.low %v3223_v21, %v3227_v31  ;;  %v7718_v21 = vcombine.high %v3247_v57, %v3251_v13 }
 0x47b   : > { %5791 = vmatprep.mubr.bf16.mxu0 %v7670_v39  ;;  %v7702_v39 = vcombine.high %v3231_v4, %v3235_v44 }
 0x482   : > { %5792 = vmatmul.mubr.bf16.gmra.mrb[104].mxu0 %v7669_v60  ;;  %v7701_v60 = vcombine.low %v3231_v4, %v3235_v44 }
 0x483   : > { %5799 = vmatprep.mubr.bf16.mxu0 %v7678_v28  ;;  %v7710_v28 = vcombine.high %v3239_v3, %v3243_v55 }
 0x48a   : > { %5800 = vmatmul.mubr.bf16.gmra.mrb[108].mxu0 %v7677_v42 }
 0x48b   : > { %5807 = vmatprep.mubr.bf16.mxu0 %v7686_v9 }
 0x492   : > { %5808 = vmatmul.mubr.bf16.gmra.mrb[112].mxu0 %v7685_v20  ;;  %v7709_v20 = vcombine.low %v3239_v3, %v3243_v55  ;;  %v3263_v55 = vld [vmem:[%s11072_s26 + $0x790] sm:$0xff] }
 0x493   : > { %5815 = vmatprep.mubr.bf16.mxu0 %v7694_v15 }
 0x49a   : > { %5816 = vmatmul.mubr.bf16.gmra.mrb[116].mxu0 %v7693_v45  ;;  %v3255_v45 = vld [vmem:[%s11072_s26 + $0x750] sm:$0xff] }
 0x49b   : > { %5823 = vmatprep.mubr.bf16.mxu0 %v7702_v39  ;;  %v3259_v39 = vld [vmem:[%s11072_s26 + $0x770] sm:$0xff] }
 0x4a2   : > { %5824 = vmatmul.mubr.bf16.gmra.mrb[120].mxu0 %v7701_v60  ;;  %v7717_v60 = vcombine.low %v3247_v57, %v3251_v13  ;;  %v3271_v13 = vld [vmem:[%s11072_s26 + $0x7d0] sm:$0xff] }
 0x4a3   : > { %5831 = vmatprep.mubr.bf16.mxu0 %v7710_v28 }
 0x4a5   : > { %v11643_v42 = vpop.f32.mrb[224].mxu1 }
 0x4a6   : > { %12789 = vst [vmem:[#allocation115_spill] sm:$0xff] %v11643_v42  ;;  %v5522_v9 = vpop.f32.mrb[225].mxu1 }
 0x4a7   : > { %v11645_v15 = vpop.f32.mrb[226].mxu1  ;;  %v7726_v9 = vcombine.high %v3255_v45, %v3259_v39 }
 0x4a8   : > { %12790 = vst [vmem:[#allocation33_spill] sm:$0xff] %v11645_v15  ;;  %v5525_v31 = vpop.f32.mrb[227].mxu1  ;;  %v3267_v15 = vld [vmem:[%s11072_s26 + $0x7b0] sm:$0xff] }
 0x4aa   : > { %5832 = vmatmul.mubr.bf16.gmra.mrb[124].mxu0 %v7709_v20 }
 0x4ab   : > { %5839 = vmatprep.mubr.bf16.mxu0 %v7718_v21  ;;  %v7725_v21 = vcombine.low %v3255_v45, %v3259_v39  ;;  %v3024_v39 = vld [vmem:[%s11072_s26 + $0x18] sm:$0xff] }
 0x4ad   : > { %v11649_v4 = vpop.f32.mrb[228].mxu1 }
 0x4ae   : > { %12791 = vst [vmem:[#allocation116_spill] sm:$0xff] %v11649_v4  ;;  %v5530_v44 = vpop.f32.mrb[229].mxu1 }
 0x4af   : > { %v11651_v28 = vpop.f32.mrb[230].mxu1  ;;  %v7734_v44 = vcombine.high %v3263_v55, %v3267_v15 }
 0x4b0   : > { %12792 = vst [vmem:[#allocation34_spill] sm:$0xff] %v11651_v28  ;;  %v5533_v3 = vpop.f32.mrb[231].mxu1  ;;  %v3275_v28 = vld [vmem:[%s11072_s26 + $0x7f0] sm:$0xff] }
 0x4b2   : > { %5840 = vmatmul.mubr.bf16.gmra.mrb[128].mxu0 %v7717_v60 }
 0x4b3   : > { %5847 = vmatprep.mubr.bf16.mxu0 %v7726_v9  ;;  %v7733_v9 = vcombine.low %v3263_v55, %v3267_v15  ;;  %v3032_v55 = vld [vmem:[%s11072_s26 + $0x58] sm:$0xff] }
 0x4b5   : > { %v11655_v42 = vpop.f32.mrb[232].mxu1 }
 0x4b6   : > { %12793 = vst [vmem:[#allocation118_spill] sm:$0xff] %v11655_v42  ;;  %v5538_v20 = vpop.f32.mrb[233].mxu1 }
 0x4b7   : > { %v11657_v31 = vpop.f32.mrb[234].mxu1  ;;  %v7742_v20 = vcombine.high %v3271_v13, %v3275_v28 }
 0x4b8   : > { %12794 = vst [vmem:[#allocation35_spill] sm:$0xff] %v11657_v31  ;;  %v5541_v57 = vpop.f32.mrb[235].mxu1  ;;  %v3028_v31 = vld [vmem:[%s11072_s26 + $0x38] sm:$0xff] }
 0x4ba   : > { %5848 = vmatmul.mubr.bf16.gmra.mrb[132].mxu0 %v7725_v21 }
 0x4bb   : > { %5855 = vmatprep.mubr.bf16.mxu0 %v7734_v44  ;;  %v7741_v44 = vcombine.low %v3271_v13, %v3275_v28  ;;  %v3040_v13 = vld [vmem:[%s11072_s26 + $0x98] sm:$0xff] }
 0x4bd   : > { %v11661_v4 = vpop.f32.mrb[236].mxu1 }
 0x4be   : > { %12795 = vst [vmem:[#allocation119_spill] sm:$0xff] %v11661_v4  ;;  %v5546_v60 = vpop.f32.mrb[237].mxu1 }
 0x4bf   : > { %v11663_v3 = vpop.f32.mrb[238].mxu1  ;;  %v7496_v60 = vcombine.high %v3024_v39, %v3028_v31 }
 0x4c0   : > { %12796 = vst [vmem:[#allocation36_spill] sm:$0xff] %v11663_v3  ;;  %v5549_v45 = vpop.f32.mrb[239].mxu1  ;;  %v3036_v3 = vld [vmem:[%s11072_s26 + $0x78] sm:$0xff] }
 0x4c2   : > { %5856 = vmatmul.mubr.bf16.gmra.mrb[136].mxu0 %v7733_v9 }
 0x4c3   : > { %5863 = vmatprep.mubr.bf16.mxu0 %v7742_v20  ;;  %v7495_v20 = vcombine.low %v3024_v39, %v3028_v31  ;;  %v3048_v39 = vld [vmem:[%s11072_s26 + $0xd8] sm:$0xff] }
 0x4c5   : > { %v11667_v42 = vpop.f32.mrb[240].mxu1 }
 0x4c6   : > { %12797 = vst [vmem:[#allocation120_spill] sm:$0xff] %v11667_v42  ;;  %v5554_v21 = vpop.f32.mrb[241].mxu1 }
 0x4c7   : > { %v11669_v57 = vpop.f32.mrb[242].mxu1  ;;  %v7504_v21 = vcombine.high %v3032_v55, %v3036_v3 }
 0x4c8   : > { %12798 = vst [vmem:[#allocation37_spill] sm:$0xff] %v11669_v57  ;;  %v5557_v15 = vpop.f32.mrb[243].mxu1  ;;  %v3044_v57 = vld [vmem:[%s11072_s26 + $0xb8] sm:$0xff] }
 0x4ca   : > { %5864 = vmatmul.mubr.bf16.gmra.mrb[140].mxu0 %v7741_v44 }
 0x4cb   : > { %5904 = vmatprep.mubr.bf16.mxu0 %v7496_v60  ;;  %v7503_v60 = vcombine.low %v3032_v55, %v3036_v3  ;;  %v3056_v55 = vld [vmem:[%s11072_s26 + $0x118] sm:$0xff] }
 0x4cd   : > { %v11673_v4 = vpop.f32.mrb[244].mxu1 }
 0x4ce   : > { %12799 = vst [vmem:[#allocation121_spill] sm:$0xff] %v11673_v4  ;;  %v5562_v9 = vpop.f32.mrb[245].mxu1 }
 0x4cf   : > { %v11675_v45 = vpop.f32.mrb[246].mxu1  ;;  %v7512_v9 = vcombine.high %v3040_v13, %v3044_v57 }
 0x4d0   : > { %12800 = vst [vmem:[#allocation38_spill] sm:$0xff] %v11675_v45  ;;  %v5565_v28 = vpop.f32.mrb[247].mxu1  ;;  %v3052_v45 = vld [vmem:[%s11072_s26 + $0xf8] sm:$0xff] }
 0x4d1   : > { %v7511_v28 = vcombine.low %v3040_v13, %v3044_v57  ;;  %v3072_v13 = vld [vmem:[%s11072_s26 + $0x198] sm:$0xff] }
 0x4d2   : > { %5905 = vmatmul.mubr.bf16.vlgmr.msra.gmra.mrb[16].mxu0 %v7495_v20 }
 0x4d3   : > { %5912 = vmatprep.mubr.bf16.mxu0 %v7504_v21 }
 0x4d5   : > { %v11679_v42 = vpop.f32.mrb[248].mxu1 }
 0x4d6   : > { %12801 = vst [vmem:[#allocation123_spill] sm:$0xff] %v11679_v42  ;;  %v5570_v44 = vpop.f32.mrb[249].mxu1  ;;  %v3228_v42 = vld [vmem:[%s11072_s26 + $0x678] sm:$0xff] }
 0x4d7   : > { %v11681_v15 = vpop.f32.mrb[250].mxu1  ;;  %v7520_v44 = vcombine.high %v3048_v39, %v3052_v45 }
 0x4d8   : > { %12802 = vst [vmem:[#allocation40_spill] sm:$0xff] %v11681_v15  ;;  %v5573_v31 = vpop.f32.mrb[251].mxu1  ;;  %v3064_v15 = vld [vmem:[%s11072_s26 + $0x158] sm:$0xff] }
 0x4d9   : > { %v3060_v31 = vld [vmem:[%s11072_s26 + $0x138] sm:$0xff] }
 0x4da   : > { %5913 = vmatmul.mubr.bf16.gmra.mrb[20].mxu0 %v7503_v60  ;;  %v7519_v60 = vcombine.low %v3048_v39, %v3052_v45  ;;  %v3080_v45 = vld [vmem:[%s11072_s26 + $0x1d8] sm:$0xff] }
 0x4db   : > { %5920 = vmatprep.mubr.bf16.mxu0 %v7512_v9  ;;  %v7528_v9 = vcombine.high %v3056_v55, %v3060_v31  ;;  %v3084_v39 = vld [vmem:[%s11072_s26 + $0x1f8] sm:$0xff] }
 0x4dd   : > { %v11685_v20 = vpop.f32.mrb[252].mxu1 }
 0x4de   : > { %12803 = vst [vmem:[#allocation41_spill] sm:$0xff] %v11685_v20  ;;  %v5578_v21 = vpop.f32.mrb[253].mxu1  ;;  %v3068_v20 = vld [vmem:[%s11072_s26 + $0x178] sm:$0xff] }
 0x4df   : > { %v11687_v4 = vpop.f32.mrb[254].mxu1  ;;  %v7527_v21 = vcombine.low %v3056_v55, %v3060_v31  ;;  %v7536_v57 = vcombine.high %v3064_v15, %v3068_v20  ;;  %v3088_v55 = vld [vmem:[%s11072_s26 + $0x218] sm:$0xff] }
 0x4e0   : > { %12804 = vst [vmem:[#allocation125_spill] sm:$0xff] %v11687_v4  ;;  %v5581_v3 = vpop.f32.mrb[255].mxu1  ;;  %v3092_v31 = vld [vmem:[%s11072_s26 + $0x238] sm:$0xff]  ;;  %v11729_v4 = vpop.permute.xlu0 %3487 }
 0x4e1   : > { %v3076_v3 = vld [vmem:[%s11072_s26 + $0x1b8] sm:$0xff] }
 0x4e2   : > { %5921 = vmatmul.mubr.bf16.gmra.mrb[24].mxu0 %v7511_v28  ;;  %v7535_v28 = vcombine.low %v3064_v15, %v3068_v20  ;;  %v3096_v15 = vld [vmem:[%s11072_s26 + $0x258] sm:$0xff] }
 0x4e3   : > { %5928 = vmatprep.mubr.bf16.mxu0 %v7520_v44  ;;  %v7544_v44 = vcombine.high %v3072_v13, %v3076_v3  ;;  %v3100_v20 = vld [vmem:[%s11072_s26 + $0x278] sm:$0xff] }
 0x4ea   : > { %5929 = vmatmul.mubr.bf16.gmra.mrb[28].mxu0 %v7519_v60  ;;  %v7543_v60 = vcombine.low %v3072_v13, %v3076_v3  ;;  %v3104_v13 = vld [vmem:[%s11072_s26 + $0x298] sm:$0xff] }
 0x4eb   : > { %5936 = vmatprep.mubr.bf16.mxu0 %v7528_v9  ;;  %v7552_v9 = vcombine.high %v3080_v45, %v3084_v39  ;;  %v3108_v3 = vld [vmem:[%s11072_s26 + $0x2b8] sm:$0xff] }
 0x4f2   : > { %5937 = vmatmul.mubr.bf16.gmra.mrb[32].mxu0 %v7527_v21  ;;  %v7551_v21 = vcombine.low %v3080_v45, %v3084_v39  ;;  %v3112_v45 = vld [vmem:[%s11072_s26 + $0x2d8] sm:$0xff] }
 0x4f3   : > { %5944 = vmatprep.mubr.bf16.mxu0 %v7536_v57  ;;  %v7560_v57 = vcombine.high %v3088_v55, %v3092_v31  ;;  %v3116_v39 = vld [vmem:[%s11072_s26 + $0x2f8] sm:$0xff] }
 0x4fa   : > { %5945 = vmatmul.mubr.bf16.gmra.mrb[36].mxu0 %v7535_v28  ;;  %v7559_v28 = vcombine.low %v3088_v55, %v3092_v31  ;;  %v3120_v55 = vld [vmem:[%s11072_s26 + $0x318] sm:$0xff] }
 0x4fb   : > { %5952 = vmatprep.mubr.bf16.mxu0 %v7544_v44  ;;  %v7568_v44 = vcombine.high %v3096_v15, %v3100_v20  ;;  %v3124_v31 = vld [vmem:[%s11072_s26 + $0x338] sm:$0xff] }
 0x502   : > { %5953 = vmatmul.mubr.bf16.gmra.mrb[40].mxu0 %v7543_v60  ;;  %v7567_v60 = vcombine.low %v3096_v15, %v3100_v20  ;;  %v3128_v15 = vld [vmem:[%s11072_s26 + $0x358] sm:$0xff] }
 0x503   : > { %5960 = vmatprep.mubr.bf16.mxu0 %v7552_v9  ;;  %v7576_v9 = vcombine.high %v3104_v13, %v3108_v3  ;;  %v3132_v20 = vld [vmem:[%s11072_s26 + $0x378] sm:$0xff] }
 0x50a   : > { %5961 = vmatmul.mubr.bf16.gmra.mrb[44].mxu0 %v7551_v21  ;;  %v7575_v21 = vcombine.low %v3104_v13, %v3108_v3  ;;  %v3136_v13 = vld [vmem:[%s11072_s26 + $0x398] sm:$0xff] }
 0x50b   : > { %5968 = vmatprep.mubr.bf16.mxu0 %v7560_v57  ;;  %v7584_v57 = vcombine.high %v3112_v45, %v3116_v39  ;;  %v3140_v3 = vld [vmem:[%s11072_s26 + $0x3b8] sm:$0xff] }
 0x512   : > { %5969 = vmatmul.mubr.bf16.gmra.mrb[48].mxu0 %v7559_v28  ;;  %v7583_v28 = vcombine.low %v3112_v45, %v3116_v39  ;;  %v3144_v45 = vld [vmem:[%s11072_s26 + $0x3d8] sm:$0xff] }
 0x513   : > { %5976 = vmatprep.mubr.bf16.mxu0 %v7568_v44  ;;  %v7592_v44 = vcombine.high %v3120_v55, %v3124_v31  ;;  %v3148_v39 = vld [vmem:[%s11072_s26 + $0x3f8] sm:$0xff] }
 0x51a   : > { %5977 = vmatmul.mubr.bf16.gmra.mrb[52].mxu0 %v7567_v60  ;;  %v7591_v60 = vcombine.low %v3120_v55, %v3124_v31  ;;  %v3152_v55 = vld [vmem:[%s11072_s26 + $0x418] sm:$0xff] }
 0x51b   : > { %5984 = vmatprep.mubr.bf16.mxu0 %v7576_v9  ;;  %v7600_v9 = vcombine.high %v3128_v15, %v3132_v20  ;;  %v3156_v31 = vld [vmem:[%s11072_s26 + $0x438] sm:$0xff] }
 0x522   : > { %5985 = vmatmul.mubr.bf16.gmra.mrb[56].mxu0 %v7575_v21  ;;  %v7599_v21 = vcombine.low %v3128_v15, %v3132_v20  ;;  %v3160_v15 = vld [vmem:[%s11072_s26 + $0x458] sm:$0xff] }
 0x523   : > { %5992 = vmatprep.mubr.bf16.mxu0 %v7584_v57  ;;  %v7608_v57 = vcombine.high %v3136_v13, %v3140_v3  ;;  %v3164_v20 = vld [vmem:[%s11072_s26 + $0x478] sm:$0xff] }
 0x52a   : > { %5993 = vmatmul.mubr.bf16.gmra.mrb[60].mxu0 %v7583_v28  ;;  %v7607_v28 = vcombine.low %v3136_v13, %v3140_v3  ;;  %v3168_v13 = vld [vmem:[%s11072_s26 + $0x498] sm:$0xff] }
 0x52b   : > { %6000 = vmatprep.mubr.bf16.mxu0 %v7592_v44  ;;  %v7616_v44 = vcombine.high %v3144_v45, %v3148_v39  ;;  %v3172_v3 = vld [vmem:[%s11072_s26 + $0x4b8] sm:$0xff] }
 0x532   : > { %6001 = vmatmul.mubr.bf16.gmra.mrb[64].mxu0 %v7591_v60  ;;  %v7615_v60 = vcombine.low %v3144_v45, %v3148_v39  ;;  %v3176_v45 = vld [vmem:[%s11072_s26 + $0x4d8] sm:$0xff] }
 0x533   : > { %6008 = vmatprep.mubr.bf16.mxu0 %v7600_v9  ;;  %v7624_v9 = vcombine.high %v3152_v55, %v3156_v31  ;;  %v3180_v39 = vld [vmem:[%s11072_s26 + $0x4f8] sm:$0xff] }
 0x53a   : > { %6009 = vmatmul.mubr.bf16.gmra.mrb[68].mxu0 %v7599_v21  ;;  %v7623_v21 = vcombine.low %v3152_v55, %v3156_v31  ;;  %v3184_v55 = vld [vmem:[%s11072_s26 + $0x518] sm:$0xff] }
 0x53b   : > { %6016 = vmatprep.mubr.bf16.mxu0 %v7608_v57  ;;  %v7632_v57 = vcombine.high %v3160_v15, %v3164_v20  ;;  %v3188_v31 = vld [vmem:[%s11072_s26 + $0x538] sm:$0xff] }
 0x542   : > { %6017 = vmatmul.mubr.bf16.gmra.mrb[72].mxu0 %v7607_v28  ;;  %v7631_v28 = vcombine.low %v3160_v15, %v3164_v20  ;;  %v3192_v15 = vld [vmem:[%s11072_s26 + $0x558] sm:$0xff] }
 0x543   : > { %6024 = vmatprep.mubr.bf16.mxu0 %v7616_v44  ;;  %v7640_v44 = vcombine.high %v3168_v13, %v3172_v3  ;;  %v3196_v20 = vld [vmem:[%s11072_s26 + $0x578] sm:$0xff] }
 0x54a   : > { %6025 = vmatmul.mubr.bf16.gmra.mrb[76].mxu0 %v7615_v60  ;;  %v7639_v60 = vcombine.low %v3168_v13, %v3172_v3  ;;  %v3200_v13 = vld [vmem:[%s11072_s26 + $0x598] sm:$0xff] }
 0x54b   : > { %6032 = vmatprep.mubr.bf16.mxu0 %v7624_v9  ;;  %v7648_v9 = vcombine.high %v3176_v45, %v3180_v39  ;;  %v3204_v3 = vld [vmem:[%s11072_s26 + $0x5b8] sm:$0xff] }
 0x552   : > { %6033 = vmatmul.mubr.bf16.gmra.mrb[80].mxu0 %v7623_v21  ;;  %v7647_v21 = vcombine.low %v3176_v45, %v3180_v39  ;;  %v3208_v45 = vld [vmem:[%s11072_s26 + $0x5d8] sm:$0xff] }
 0x553   : > { %6040 = vmatprep.mubr.bf16.mxu0 %v7632_v57  ;;  %v7656_v57 = vcombine.high %v3184_v55, %v3188_v31  ;;  %v3212_v39 = vld [vmem:[%s11072_s26 + $0x5f8] sm:$0xff] }
 0x55a   : > { %6041 = vmatmul.mubr.bf16.gmra.mrb[84].mxu0 %v7631_v28  ;;  %v7655_v28 = vcombine.low %v3184_v55, %v3188_v31  ;;  %v11731_v55 = vpop.permute.xlu1 %3492  ;;  %v3216_v31 = vld [vmem:[%s11072_s26 + $0x618] sm:$0xff] }
 0x55b   : > { %6048 = vmatprep.mubr.bf16.mxu0 %v7640_v44  ;;  %v7664_v44 = vcombine.high %v3192_v15, %v3196_v20 }
 0x562   : > { %6049 = vmatmul.mubr.bf16.gmra.mrb[88].mxu0 %v7639_v60  ;;  %v7663_v60 = vcombine.low %v3192_v15, %v3196_v20  ;;  %v3408_v15 = vpop.permute.xlu0 %3407 }
 0x563   : > { %6056 = vmatprep.mubr.bf16.mxu0 %v7648_v9  ;;  %v7672_v9 = vcombine.high %v3200_v13, %v3204_v3 }
 0x56a   : > { %6057 = vmatmul.mubr.bf16.gmra.mrb[92].mxu0 %v7647_v21  ;;  %v7671_v21 = vcombine.low %v3200_v13, %v3204_v3  ;;  %v11737_v13 = vpop.permute.xlu0 %3497 }
 0x56b   : > { %6064 = vmatprep.mubr.bf16.mxu0 %v7656_v57  ;;  %v7680_v57 = vcombine.high %v3208_v45, %v3212_v39 }
 0x56e   : > { %v3418_v23 = vpop.permute.xlu0 %3417 }
 0x56f   : > { %v5048_v59 = vadd.f32 %v11438_v16, %v3418_v23 }
 0x572   : > { %6065 = vmatmul.mubr.bf16.gmra.mrb[96].mxu0 %v7655_v28  ;;  %v3220_v28 = vld [vmem:[%s11072_s26 + $0x638] sm:$0xff] }
 0x573   : > { %6072 = vmatprep.mubr.bf16.mxu0 %v7664_v44  ;;  %v7679_v44 = vcombine.low %v3208_v45, %v3212_v39  ;;  %v7688_v20 = vcombine.high %v3216_v31, %v3220_v28  ;;  %v7687_v3 = vcombine.low %v3216_v31, %v3220_v28  ;;  %v3232_v45 = vld [vmem:[%s11072_s26 + $0x698] sm:$0xff] }
 0x574   : > { %v3236_v39 = vld [vmem:[%s11072_s26 + $0x6b8] sm:$0xff] }
 0x575   : > { %v3240_v31 = vld [vmem:[%s11072_s26 + $0x6d8] sm:$0xff]  ;;  %v7703_v26 = vcombine.low %v3232_v45, %v3236_v39 }
 0x576   : > { %v3244_v28 = vld [vmem:[%s11072_s26 + $0x6f8] sm:$0xff] }
 0x577   : > { %v7711_v58 = vcombine.low %v3240_v31, %v3244_v28 }
 0x57a   : > { %6073 = vmatmul.mubr.bf16.gmra.mrb[100].mxu0 %v7663_v60  ;;  %v3413_v60 = vpop.permute.xlu1 %3412 }
 0x57b   : > { %6080 = vmatprep.mubr.bf16.mxu0 %v7672_v9  ;;  %v3224_v9 = vld [vmem:[%s11072_s26 + $0x658] sm:$0xff] }
 0x57c   : > { %v7695_v61 = vcombine.low %v3224_v9, %v3228_v42 }
 0x582   : > { %6081 = vmatmul.mubr.bf16.gmra.mrb[104].mxu0 %v7671_v21  ;;  %v11739_v21 = vpop.permute.xlu1 %3502 }
 0x583   : > { %6088 = vmatprep.mubr.bf16.mxu0 %v7680_v57  ;;  %v7696_v57 = vcombine.high %v3224_v9, %v3228_v42  ;;  %v3252_v42 = vld [vmem:[%s11072_s26 + $0x738] sm:$0xff] }
 0x584   : > { %v7720_v10 = vcombine.high %v3248_v6, %v3252_v42 }
 0x586   : > { %v3423_v47 = vpop.permute.xlu1 %3422 }
 0x58a   : > { %6089 = vmatmul.mubr.bf16.gmra.mrb[108].mxu0 %v7679_v44  ;;  %v7704_v44 = vcombine.high %v3232_v45, %v3236_v39  ;;  %v11745_v52 = vpop.permute.xlu1 %3512 }
 0x58b   : > { %6096 = vmatprep.mubr.bf16.mxu0 %v7688_v20  ;;  %v11743_v20 = vpop.permute.xlu0 %3507 }
 0x58e   : > { %v3433_v53 = vpop.permute.xlu1 %3432 }
 0x58f   : > { %v3428_v1 = vpop.permute.xlu0 %3427 }
 0x592   : > { %6097 = vmatmul.mubr.bf16.gmra.mrb[112].mxu0 %v7687_v3  ;;  %v7712_v3 = vcombine.high %v3240_v31, %v3244_v28  ;;  %v11755_v45 = vpop.permute.xlu1 %3522  ;;  %v5051_v28 = vadd.f32 %v11440_v12, %v3423_v47  ;;  %v9031_v47 = vld [vmem:[%s11767_s29 + $0x4] ss:$16 sps:$4 sm:$0xff]  }
 0x593   : > { %6104 = vmatprep.mubr.bf16.mxu0 %v7696_v57  ;;  %v5040_v57 = vadd.f32 %v11430_v0, %v3408_v15  ;;  %v11752_v9 = vpop.permute.xlu0 %3517  ;;  %6641 = vmatprep.mubr.bf16.mxu1 %v9031_v47 }
 0x597   : > { %v3438_v15 = vpop.permute.xlu0 %3437 }
 0x59a   : > { %6105 = vmatmul.mubr.bf16.gmra.mrb[116].mxu0 %v7695_v61  ;;  %v5043_v61 = vadd.f32 %v11432_v7, %v3413_v60  ;;  %v3256_v60 = vld [vmem:[%s11072_s26 + $0x758] sm:$0xff] }
 0x59b   : > { %6112 = vmatprep.mubr.bf16.mxu0 %v7704_v44  ;;  %v11769_v12 = vpop.permute.xlu0 %3527 }
 0x5a2   : > { %6113 = vmatmul.mubr.bf16.gmra.mrb[120].mxu0 %v7703_v26 }
 0x5a3   : > { %6120 = vmatprep.mubr.bf16.mxu0 %v7712_v3 }
 0x5a5   : > { %v5906_v51 = vpop.f32.mrb[16].mxu0 }
 0x5a6   : > { %v8601_v40 = vadd.f32 %v5906_v51, %v5040_v57  ;;  %v5908_v44 = vpop.f32.mrb[17].mxu0  ;;  %v3260_v57 = vld [vmem:[%s11072_s26 + $0x778] sm:$0xff] }
 0x5a7   : > { %v5909_v39 = vpop.f32.mrb[18].mxu0  ;;  %v3443_v44 = vpop.permute.xlu1 %3442 }
 0x5a8   : > { %v6161_v26 = vmul.f32 0.01, %v8601_v40  ;;  %v8603_v3 = vadd.f32 %v5909_v39, %v5043_v61  ;;  %v5911_v36 = vpop.f32.mrb[19].mxu0  ;;  %v7719_v39 = vcombine.low %v3248_v6, %v3252_v42  ;;  %v5056_v42 = vadd.f32 %v11446_v56, %v3428_v1 }
 0x5a9   : > { %v5064_v1 = vadd.f32 %v11454_v38, %v3438_v15 }
 0x5aa   : > { %v6162_v0 = vmul.f32 0.01, %v8603_v3  ;;  %6121 = vmatmul.mubr.bf16.gmra.mrb[124].mxu0 %v7711_v58  ;;  %v6225_v7 = vmax.f32 %v8601_v40, %v6161_v26 }
 0x5ab   : > { %6128 = vmatprep.mubr.bf16.mxu0 %v7720_v10  ;;  %v7728_v10 = vcombine.high %v3256_v60, %v3260_v57  ;;  %v11774_v6 = vpop.permute.xlu1 %3532 }
 0x5ac   : > { %v6226_v51 = vmax.f32 %v8603_v3, %v6162_v0  ;;  %v3268_v3 = vld [vmem:[%s11072_s26 + $0x7b8] sm:$0xff] }
 0x5ad   : > { %v5914_v31 = vpop.f32.mrb[20].mxu0 }
 0x5ae   : > { %v11761_v29 = vpack.c.bf16 %v6226_v51, %v6225_v7  ;;  %v8605_v36 = vadd.f32 %v5914_v31, %v5048_v59  ;;  %v5916_v61 = vpop.f32.mrb[21].mxu0  ;;  %v3264_v59 = vld [vmem:[%s11072_s26 + $0x798] sm:$0xff]  ;;  %v5059_v31 = vadd.f32 %v11448_v2, %v3433_v53 }
 0x5af   : > { %v5917_v58 = vpop.f32.mrb[22].mxu0  ;;  %v7736_v27 = vcombine.high %v3264_v59, %v3268_v3  ;;  %v3453_v30 = vpop.permute.xlu1 %3452 }
 0x5b0   : > { %v6163_v16 = vmul.f32 0.01, %v8605_v36  ;;  %v8607_v40 = vadd.f32 %v5917_v58, %v5051_v28  ;;  %v5919_v23 = vpop.f32.mrb[23].mxu0 }
 0x5b1   : > { %v3448_v23 = vpop.permute.xlu0 %3447 }
 0x5b2   : > { %v6164_v26 = vmul.f32 0.01, %v8607_v40  ;;  %6129 = vmatmul.mubr.bf16.gmra.mrb[128].mxu0 %v7719_v39  ;;  %v6227_v0 = vmax.f32 %v8605_v36, %v6163_v16  ;;  %v7727_v39 = vcombine.low %v3256_v60, %v3260_v57  ;;  %v3272_v36 = vld [vmem:[%s11072_s26 + $0x7d8] sm:$0xff]  ;;  %v5067_v60 = vadd.f32 %v11456_v49, %v3443_v44 }
 0x5b3   : > { %6136 = vmatprep.mubr.bf16.mxu0 %v7728_v10  ;;  %v3276_v16 = vld [vmem:[%s11072_s26 + $0x7f8] sm:$0xff]  ;;  %s768_s26 = scalar_lea.vmem %s12091_s11, %s12857_s30 }
 0x5b4   : > { %v6228_v7 = vmax.f32 %v8607_v40, %v6164_v26 }
 0x5b5   : > { %v5922_v51 = vpop.f32.mrb[24].mxu0  ;;  %v11783_v40 = vpop.permute.xlu0 %3537 }
 0x5b6   : > { %v11778_v28 = vpack.c.bf16 %v6228_v7, %v6227_v0  ;;  %v8609_v61 = vadd.f32 %v5922_v51, %v5056_v42  ;;  %v5924_v58 = vpop.f32.mrb[25].mxu0  ;;  %v7735_v0 = vcombine.low %v3264_v59, %v3268_v3  ;;  %v11788_v7 = vpop.permute.xlu1 %3542 }
 0x5b7   : > { %v5925_v19 = vpop.f32.mrb[26].mxu0  ;;  %v5072_v58 = vadd.f32 %v11462_v54, %v3448_v23 }
 0x5b8   : > { %v6165_v22 = vmul.f32 0.01, %v8609_v61  ;;  %v8611_v10 = vadd.f32 %v5925_v19, %v5059_v31  ;;  %v5927_v47 = vpop.f32.mrb[27].mxu0 }
 0x5b9   : > { %v5075_v47 = vadd.f32 %v11464_v35, %v3453_v30 }
 0x5ba   : > { %v6166_v56 = vmul.f32 0.01, %v8611_v10  ;;  %6137 = vmatmul.mubr.bf16.gmra.mrb[132].mxu0 %v7727_v39  ;;  %v6229_v2 = vmax.f32 %v8609_v61, %v6165_v22  ;;  %v3458_v61 = vpop.permute.xlu0 %3457  ;;  %v3463_v44 = vpop.permute.xlu1 %3462 }
 0x5bb   : > { %6144 = vmatprep.mubr.bf16.mxu0 %v7736_v27  ;;  %v7744_v27 = vcombine.high %v3272_v36, %v3276_v16  ;;  %v5080_v23 = vadd.f32 %v11468_v34, %v3458_v61  ;;  %v5083_v30 = vadd.f32 %v11472_v43, %v3463_v44 }
 0x5bc   : > { %v6230_v53 = vmax.f32 %v8611_v10, %v6166_v56 }
 0x5bd   : > { %v5930_v26 = vpop.f32.mrb[28].mxu0 }
 0x5be   : > { %v11786_v57 = vpack.c.bf16 %v6230_v53, %v6229_v2  ;;  %v8613_v42 = vadd.f32 %v5930_v26, %v5064_v1  ;;  %v5932_v19 = vpop.f32.mrb[29].mxu0  ;;  %v7743_v1 = vcombine.low %v3272_v36, %v3276_v16  ;;  %v11796_v54 = vpop.permute.xlu1 %3552 }
 0x5bf   : > { %v5933_v51 = vpop.f32.mrb[30].mxu0  ;;  %v11794_v19 = vpop.permute.xlu0 %3547 }
 0x5c0   : > { %v6167_v31 = vmul.f32 0.01, %v8613_v42  ;;  %v8615_v38 = vadd.f32 %v5933_v51, %v5067_v60  ;;  %v5935_v22 = vpop.f32.mrb[31].mxu0 }
 0x5c2   : > { %v6168_v15 = vmul.f32 0.01, %v8615_v38  ;;  %6145 = vmatmul.mubr.bf16.gmra.mrb[136].mxu0 %v7735_v0  ;;  %v6231_v39 = vmax.f32 %v8613_v42, %v6167_v31 }
 0x5c3   : > { %6152 = vmatprep.mubr.bf16.mxu0 %v7744_v27  ;;  %v3468_v31 = vpop.permute.xlu0 %3467 }
 0x5c4   : > { %v6232_v49 = vmax.f32 %v8615_v38, %v6168_v15 }
 0x5c5   : > { %v5938_v10 = vpop.f32.mrb[32].mxu0 }
 0x5c6   : > { %v11792_v59 = vpack.c.bf16 %v6232_v49, %v6231_v39  ;;  %v8617_v3 = vadd.f32 %v5938_v10, %v5072_v58  ;;  %v5940_v56 = vpop.f32.mrb[33].mxu0  ;;  %v3473_v39 = vpop.permute.xlu1 %3472  ;;  %v5088_v10 = vadd.f32 %v11478_v5, %v3468_v31 }
 0x5c7   : > { %v5941_v2 = vpop.f32.mrb[34].mxu0  ;;  %v11803_v61 = vpop.permute.xlu0 %3557  ;;  %v5091_v43 = vadd.f32 %v11483_v33, %v3473_v39 }
 0x5c8   : > { %v6169_v53 = vmul.f32 0.01, %v8617_v3  ;;  %v8619_v26 = vadd.f32 %v5941_v2, %v5075_v47  ;;  %v5943_v60 = vpop.f32.mrb[35].mxu0 }
 0x5ca   : > { %v6170_v0 = vmul.f32 0.01, %v8619_v26  ;;  %6153 = vmatmul.mubr.bf16.gmra.mrb[140].mxu0 %v7743_v1  ;;  %v6233_v42 = vmax.f32 %v8617_v3, %v6169_v53  ;;  %v11808_v2 = vpop.permute.xlu1 %3562 }
 0x5cc   : > { %v6234_v51 = vmax.f32 %v8619_v26, %v6170_v0 }
 0x5cd   : > { %v5946_v35 = vpop.f32.mrb[36].mxu0 }
 0x5ce   : > { %v11800_v27 = vpack.c.bf16 %v6234_v51, %v6233_v42  ;;  %v8621_v36 = vadd.f32 %v5946_v35, %v5080_v23  ;;  %v5948_v16 = vpop.f32.mrb[37].mxu0  ;;  %v3478_v42 = vpop.permute.xlu0 %3477 }
 0x5cf   : > { %v5949_v38 = vpop.f32.mrb[38].mxu0  ;;  %v5096_v5 = vadd.f32 %v11490_v24, %v3478_v42 }
 0x5d0   : > { %v6171_v22 = vmul.f32 0.01, %v8621_v36  ;;  %v8623_v15 = vadd.f32 %v5949_v38, %v5083_v30  ;;  %v5951_v58 = vpop.f32.mrb[39].mxu0  ;;  %v3483_v30 = vpop.permute.xlu1 %3482 }
 0x5d1   : > { %v5099_v33 = vadd.f32 %v11495_v25, %v3483_v30 }
 0x5d2   : > { %v6172_v49 = vmul.f32 0.01, %v8623_v15  ;;  %v6235_v47 = vmax.f32 %v8621_v36, %v6171_v22 }
 0x5d4   : > { %v6236_v34 = vmax.f32 %v8623_v15, %v6172_v49 }
 0x5d5   : > { %v5954_v3 = vpop.f32.mrb[40].mxu0 }
 0x5d6   : > { %v11806_v44 = vpack.c.bf16 %v6236_v34, %v6235_v47  ;;  %v8625_v56 = vadd.f32 %v5954_v3, %v5088_v10  ;;  %v5956_v1 = vpop.f32.mrb[41].mxu0  ;;  %v5104_v10 = vadd.f32 %v11502_v14, %v11729_v4  ;;  %v5107_v3 = vadd.f32 %v11507_v63, %v11731_v55 }
 0x5d7   : > { %v5957_v53 = vpop.f32.mrb[42].mxu0 }
 0x5d8   : > { %v6173_v26 = vmul.f32 0.01, %v8625_v56  ;;  %v8627_v60 = vadd.f32 %v5957_v53, %v5091_v43  ;;  %v5959_v0 = vpop.f32.mrb[43].mxu0 }
 0x5da   : > { %v6174_v23 = vmul.f32 0.01, %v8627_v60  ;;  %v6237_v51 = vmax.f32 %v8625_v56, %v6173_v26 }
 0x5dc   : > { %v6238_v35 = vmax.f32 %v8627_v60, %v6174_v23  ;;  %v5112_v23 = vadd.f32 %v11514_v50, %v11737_v13  ;;  %v5120_v50 = vadd.f32 %v11526_v11, %v11743_v20  ;;  %v5128_v11 = vadd.f32 %v11538_v46, %v11752_v9  ;;  %v11837_v46 = vpop.permute.xlu1 %3652 }
 0x5dd   : > { %v5962_v36 = vpop.f32.mrb[44].mxu0  ;;  %v5136_v9 = vadd.f32 %v11550_v18, %v11769_v12  ;;  %v5144_v18 = vadd.f32 %v11560_v8, %v11783_v40 }
 0x5de   : > { %v11812_v16 = vpack.c.bf16 %v6238_v35, %v6237_v51  ;;  %v8629_v31 = vadd.f32 %v5962_v36, %v5096_v5  ;;  %v5964_v38 = vpop.f32.mrb[45].mxu0  ;;  %v5115_v5 = vadd.f32 %v11519_v48, %v11739_v21  ;;  %v5123_v48 = vadd.f32 %v11531_v41, %v11745_v52 }
 0x5df   : > { %v5965_v22 = vpop.f32.mrb[46].mxu0  ;;  %v5131_v41 = vadd.f32 %v11543_v62, %v11755_v45 }
 0x5e0   : > { %v6175_v15 = vmul.f32 0.01, %v8629_v31  ;;  %v8631_v58 = vadd.f32 %v5965_v22, %v5099_v33  ;;  %v5967_v39 = vpop.f32.mrb[47].mxu0 }
 0x5e2   : > { %v6176_v49 = vmul.f32 0.01, %v8631_v58  ;;  %v6239_v47 = vmax.f32 %v8629_v31, %v6175_v15 }
 0x5e4   : > { %v6240_v24 = vmax.f32 %v8631_v58, %v6176_v49 }
 0x5e5   : > { %v5970_v34 = vpop.f32.mrb[48].mxu0 }
 0x5e6   : > { %v11818_v43 = vpack.c.bf16 %v6240_v24, %v6239_v47  ;;  %v8633_v25 = vadd.f32 %v5970_v34, %v5104_v10  ;;  %v5972_v56 = vpop.f32.mrb[49].mxu0 }
 0x5e7   : > { %v5973_v1 = vpop.f32.mrb[50].mxu0 }
 0x5e8   : > { %v6177_v53 = vmul.f32 0.01, %v8633_v25  ;;  %v8635_v26 = vadd.f32 %v5973_v1, %v5107_v3  ;;  %v5975_v60 = vpop.f32.mrb[51].mxu0 }
 0x5e9   : > { %v11834_v60 = vpop.permute.xlu0 %3647 }
 0x5ea   : > { %v6178_v0 = vmul.f32 0.01, %v8635_v26  ;;  %v6241_v42 = vmax.f32 %v8633_v25, %v6177_v53 }
 0x5ec   : > { %v6242_v14 = vmax.f32 %v8635_v26, %v6178_v0 }
 0x5ed   : > { %v5978_v4 = vpop.f32.mrb[52].mxu0 }
 0x5ee   : > { %v8637_v51 = vadd.f32 %v5978_v4, %v5112_v23  ;;  %v5980_v63 = vpop.f32.mrb[53].mxu0  ;;  %v6329_v55 = vpack.c.bf16 %v6242_v14, %v6241_v42  ;;  %v5139_v23 = vadd.f32 %v11553_v37, %v11774_v6  ;;  %v5147_v6 = vadd.f32 %v11563_v17, %v11788_v7 }
 0x5ef   : > { %v5981_v35 = vpop.f32.mrb[54].mxu0 }
 0x5f0   : > { %v6179_v30 = vmul.f32 0.01, %v8637_v51  ;;  %v8639_v36 = vadd.f32 %v5981_v35, %v5115_v5  ;;  %v5983_v33 = vpop.f32.mrb[55].mxu0  ;;  %8199 = vmatprep.subr.bf16.mxu1 %v6329_v55  ;;  %v3568_v5 = vpop.permute.xlu0 %3567 }
 0x5f1   : > { %8200 = vmatpush3.bf16.msra.mxu1 %v11761_v29  ;;  %v3573_v35 = vpop.permute.xlu1 %3572 }
 0x5f2   : > { %v6180_v31 = vmul.f32 0.01, %v8639_v36  ;;  %v6243_v13 = vmax.f32 %v8637_v51, %v6179_v30 }
 0x5f4   : > { %v6244_v38 = vmax.f32 %v8639_v36, %v6180_v31  ;;  %v11846_v33 = vpop.permute.xlu0 %3657 }
 0x5f5   : > { %v5986_v22 = vpop.f32.mrb[56].mxu0 }
 0x5f6   : > { %v8641_v21 = vadd.f32 %v5986_v22, %v5120_v50  ;;  %v5988_v15 = vpop.f32.mrb[57].mxu0  ;;  %v6330_v58 = vpack.c.bf16 %v6244_v38, %v6243_v13  ;;  %v11850_v38 = vpop.permute.xlu1 %3662 }
 0x5f7   : > { %v5989_v39 = vpop.f32.mrb[58].mxu0  ;;  %v5152_v15 = vadd.f32 %v11567_v32, %v11794_v19 }
 0x5f8   : > { %v6181_v49 = vmul.f32 0.01, %v8641_v21  ;;  %v8643_v10 = vadd.f32 %v5989_v39, %v5123_v48  ;;  %v5991_v47 = vpop.f32.mrb[59].mxu0  ;;  %8201 = vmatprep.subr.bf16.mxu1 %v6330_v58  ;;  %v3578_v40 = vpop.permute.xlu0 %3577 }
 0x5f9   : > { %8202 = vmatpush3.bf16.msra.mxu1 %v11778_v28 }
 0x5fa   : > { %v6182_v29 = vmul.f32 0.01, %v8643_v10  ;;  %v6245_v20 = vmax.f32 %v8641_v21, %v6181_v49  ;;  %v3583_v17 = vpop.permute.xlu1 %3582  ;;  %v12805_v49 = vld [vmem:[#allocation96_spill] sm:$0xff] }
 0x5fc   : > { %v6246_v24 = vmax.f32 %v8643_v10, %v6182_v29  ;;  %v5155_v10 = vadd.f32 %v12805_v49, %v11796_v54 }
 0x5fd   : > { %v5994_v34 = vpop.f32.mrb[60].mxu0 }
 0x5fe   : > { %v8645_v52 = vadd.f32 %v5994_v34, %v5128_v11  ;;  %v5996_v3 = vpop.f32.mrb[61].mxu0  ;;  %v6331_v25 = vpack.c.bf16 %v6246_v24, %v6245_v20  ;;  %v11860_v19 = vpop.permute.xlu1 %3672 }
 0x5ff   : > { %v5997_v56 = vpop.f32.mrb[62].mxu0 }
 0x600   : > { %v6183_v1 = vmul.f32 0.01, %v8645_v52  ;;  %v8647_v53 = vadd.f32 %v5997_v56, %v5131_v41  ;;  %v5999_v26 = vpop.f32.mrb[63].mxu0  ;;  %8203 = vmatprep.subr.bf16.mxu1 %v6331_v25 }
 0x601   : > { %8204 = vmatpush3.bf16.msra.mxu1 %v11786_v57 }
 0x602   : > { %v6184_v28 = vmul.f32 0.01, %v8647_v53  ;;  %v6247_v0 = vmax.f32 %v8645_v52, %v6183_v1  ;;  %v12806_v52 = vld [vmem:[#allocation94_spill] sm:$0xff]  ;;  %v12807_v1 = vld [vmem:[#allocation97_spill] sm:$0xff] }
 0x603   : > { %v5160_v3 = vadd.f32 %v12806_v52, %v11803_v61  ;;  %v12808_v61 = vld [vmem:[#allocation100_spill] sm:$0xff] }
 0x604   : > { %v6248_v62 = vmax.f32 %v8647_v53, %v6184_v28  ;;  %v5163_v53 = vadd.f32 %v12807_v1, %v11808_v2  ;;  %v12812_v52 = vld [vmem:[#allocation104_spill] sm:$0xff] }
 0x605   : > { %v6002_v45 = vpop.f32.mrb[64].mxu0 }
 0x606   : > { %v8649_v42 = vadd.f32 %v6002_v45, %v5136_v9  ;;  %v6004_v14 = vpop.f32.mrb[65].mxu0  ;;  %v6332_v4 = vpack.c.bf16 %v6248_v62, %v6247_v0 }
 0x607   : > { %v6005_v51 = vpop.f32.mrb[66].mxu0 }
 0x608   : > { %v6185_v63 = vmul.f32 0.01, %v8649_v42  ;;  %v8651_v55 = vadd.f32 %v6005_v51, %v5139_v23  ;;  %v6007_v57 = vpop.f32.mrb[67].mxu0  ;;  %8205 = vmatprep.subr.bf16.mxu1 %v6332_v4  ;;  %v5168_v4 = vadd.f32 %v12808_v61, %v3568_v5  ;;  %v9034_v5 = vld [vmem:[%s11767_s29 + $0x24] ss:$16 sps:$4 sm:$0xff]  }
 0x609   : > { %8206 = vmatpush3.bf16.msra.mxu1 %v11792_v59  ;;  %v12809_v57 = vld [vmem:[#allocation99_spill] sm:$0xff] }
 0x60a   : > { %v6186_v30 = vmul.f32 0.01, %v8651_v55  ;;  %v6249_v12 = vmax.f32 %v8649_v42, %v6185_v63  ;;  %v3593_v42 = vpop.permute.xlu1 %3592 }
 0x60c   : > { %v6250_v36 = vmax.f32 %v8651_v55, %v6186_v30  ;;  %v5171_v30 = vadd.f32 %v12809_v57, %v3573_v35 }
 0x60d   : > { %v6010_v37 = vpop.f32.mrb[68].mxu0 }
 0x60e   : > { %v8653_v31 = vadd.f32 %v6010_v37, %v5144_v18  ;;  %v6012_v50 = vpop.f32.mrb[69].mxu0  ;;  %v6333_v13 = vpack.c.bf16 %v6250_v36, %v6249_v12  ;;  %v11871_v37 = vpop.permute.xlu1 %3682 }
 0x60f   : > { %v6013_v22 = vpop.f32.mrb[70].mxu0 }
 0x610   : > { %v6187_v48 = vmul.f32 0.01, %v8653_v31  ;;  %v8655_v59 = vadd.f32 %v6013_v22, %v5147_v6  ;;  %v6015_v21 = vpop.f32.mrb[71].mxu0  ;;  %8207 = vmatprep.subr.bf16.mxu1 %v6333_v13  ;;  %v9029_v13 = vld [vmem:[%s11767_s29] ss:$16 sps:$4 sm:$0xff]  }
 0x611   : > { %8208 = vmatpush3.bf16.msra.mxu1 %v11800_v27  ;;  %v11857_v27 = vpop.permute.xlu0 %3667 }
 0x612   : > { %v6188_v8 = vmul.f32 0.01, %v8655_v59  ;;  %v6251_v58 = vmax.f32 %v8653_v31, %v6187_v48 }
 0x614   : > { %v6252_v39 = vmax.f32 %v8655_v59, %v6188_v8  ;;  %v12810_v59 = vld [vmem:[#allocation102_spill] sm:$0xff] }
 0x615   : > { %v6018_v7 = vpop.f32.mrb[72].mxu0  ;;  %v3588_v0 = vpop.permute.xlu0 %3587  ;;  %v5176_v21 = vadd.f32 %v12810_v59, %v3578_v40  ;;  %v9037_v40 = vld [vmem:[%s11767_s29 + $0x44] ss:$16 sps:$4 sm:$0xff]  }
 0x616   : > { %v8657_v47 = vadd.f32 %v6018_v7, %v5152_v15  ;;  %v6020_v29 = vpop.f32.mrb[73].mxu0  ;;  %v6334_v11 = vpack.c.bf16 %v6252_v39, %v6251_v58  ;;  %v3603_v15 = vpop.permute.xlu1 %3602  ;;  %v12811_v39 = vld [vmem:[#allocation101_spill] sm:$0xff]  ;;  %v9043_v59 = vld [vmem:[%s11767_s29 + $0x84] ss:$16 sps:$4 sm:$0xff]  }
 0x617   : > { %v6021_v20 = vpop.f32.mrb[74].mxu0  ;;  %v5179_v7 = vadd.f32 %v12811_v39, %v3583_v17 }
 0x618   : > { %v6189_v24 = vmul.f32 0.01, %v8657_v47  ;;  %v8659_v34 = vadd.f32 %v6021_v20, %v5155_v10  ;;  %v6023_v41 = vpop.f32.mrb[75].mxu0  ;;  %8209 = vmatprep.subr.bf16.mxu1 %v6334_v11 }
 0x619   : > { %8210 = vmatpush3.bf16.msra.mxu1 %v11806_v44  ;;  %v11868_v2 = vpop.permute.xlu0 %3677 }
 0x61a   : > { %v6190_v32 = vmul.f32 0.01, %v8659_v34  ;;  %v6253_v25 = vmax.f32 %v8657_v47, %v6189_v24  ;;  %v9032_v24 = vld [vmem:[%s11767_s29 + $0x20] ss:$16 sps:$4 sm:$0xff]  }
 0x61c   : > { %v6254_v54 = vmax.f32 %v8659_v34, %v6190_v32  ;;  %v11884_v32 = vpop.permute.xlu1 %3692 }
 0x61d   : > { %v6026_v56 = vpop.f32.mrb[76].mxu0  ;;  %v3598_v48 = vpop.permute.xlu0 %3597 }
 0x61e   : > { %v8661_v26 = vadd.f32 %v6026_v56, %v5160_v3  ;;  %v6028_v28 = vpop.f32.mrb[77].mxu0  ;;  %v6335_v9 = vpack.c.bf16 %v6254_v54, %v6253_v25  ;;  %v5184_v3 = vadd.f32 %v12812_v52, %v3588_v0  ;;  %v12813_v56 = vld [vmem:[#allocation103_spill] sm:$0xff]  ;;  %v9040_v0 = vld [vmem:[%s11767_s29 + $0x64] ss:$16 sps:$4 sm:$0xff]  }
 0x61f   : > { %v6029_v62 = vpop.f32.mrb[78].mxu0  ;;  %v5187_v1 = vadd.f32 %v12813_v56, %v3593_v42 }
 0x620   : > { %v6191_v45 = vmul.f32 0.01, %v8661_v26  ;;  %v8663_v23 = vadd.f32 %v6029_v62, %v5163_v53  ;;  %v6031_v44 = vpop.f32.mrb[79].mxu0  ;;  %8211 = vmatprep.subr.bf16.mxu1 %v6335_v9  ;;  %v3613_v61 = vpop.permute.xlu1 %3612 }
 0x621   : > { %8212 = vmatpush3.bf16.msra.mxu1 %v11812_v16  ;;  %v11881_v34 = vpop.permute.xlu0 %3687 }
 0x622   : > { %v6192_v14 = vmul.f32 0.01, %v8663_v23  ;;  %v6255_v51 = vmax.f32 %v8661_v26, %v6191_v45 }
 0x624   : > { %v6256_v63 = vmax.f32 %v8663_v23, %v6192_v14  ;;  %v9035_v14 = vld [vmem:[%s11767_s29 + $0x40] ss:$16 sps:$4 sm:$0xff]  }
 0x625   : > { %v6034_v55 = vpop.f32.mrb[80].mxu0  ;;  %v3608_v9 = vpop.permute.xlu0 %3607 }
 0x626   : > { %v8665_v18 = vadd.f32 %v6034_v55, %v5168_v4  ;;  %v6036_v12 = vpop.f32.mrb[81].mxu0  ;;  %v6336_v36 = vpack.c.bf16 %v6256_v63, %v6255_v51  ;;  %v12814_v51 = vld [vmem:[#allocation106_spill] sm:$0xff] }
 0x627   : > { %v6037_v6 = vpop.f32.mrb[82].mxu0  ;;  %v5192_v63 = vadd.f32 %v12814_v51, %v3598_v48  ;;  %v9038_v48 = vld [vmem:[%s11767_s29 + $0x60] ss:$16 sps:$4 sm:$0xff]  }
 0x628   : > { %v6193_v31 = vmul.f32 0.01, %v8665_v18  ;;  %v8667_v16 = vadd.f32 %v6037_v6, %v5171_v30  ;;  %v6039_v50 = vpop.f32.mrb[83].mxu0  ;;  %8213 = vmatprep.subr.bf16.mxu1 %v6336_v36 }
 0x629   : > { %8214 = vmatpush3.bf16.msra.mxu1 %v11818_v43  ;;  %v11893_v42 = vpop.permute.xlu0 %3697 }
 0x62a   : > { %v6194_v22 = vmul.f32 0.01, %v8667_v16  ;;  %v6257_v35 = vmax.f32 %v8665_v18, %v6193_v31  ;;  %v12815_v18 = vld [vmem:[#allocation105_spill] sm:$0xff] }
 0x62b   : > { %v5195_v12 = vadd.f32 %v12815_v18, %v3603_v15  ;;  %v9049_v18 = vld [vmem:[%s11767_s29 + $0xc4] ss:$16 sps:$4 sm:$0xff]  }
 0x62c   : > { %v6258_v8 = vmax.f32 %v8667_v16, %v6194_v22  ;;  %6642 = vmatmul.mubr.bf16.vlgmr.msra.gmra.mrb[0].mxu1 %v9029_v13  ;;  %v11898_v16 = vpop.permute.xlu1 %3702 }
 0x62d   : > { %v6042_v58 = vpop.f32.mrb[84].mxu0  ;;  %6649 = vmatprep.mubr.bf16.mxu1 %v9034_v5 }
 0x62e   : > { %v11878_v49 = vpack.c.bf16 %v6258_v8, %v6257_v35  ;;  %v8669_v10 = vadd.f32 %v6042_v58, %v5176_v21  ;;  %v6044_v47 = vpop.f32.mrb[85].mxu0  ;;  %v3618_v35 = vpop.permute.xlu0 %3617  ;;  %v12816_v8 = vld [vmem:[#allocation108_spill] sm:$0xff] }
 0x62f   : > { %v6045_v43 = vpop.f32.mrb[86].mxu0  ;;  %v5200_v58 = vadd.f32 %v12816_v8, %v3608_v9  ;;  %v12817_v47 = vld [vmem:[#allocation107_spill] sm:$0xff] }
 0x630   : > { %v6195_v29 = vmul.f32 0.01, %v8669_v10  ;;  %v8671_v11 = vadd.f32 %v6045_v43, %v5179_v7  ;;  %v6047_v20 = vpop.f32.mrb[87].mxu0  ;;  %v3623_v7 = vpop.permute.xlu1 %3622  ;;  %v5203_v43 = vadd.f32 %v12817_v47, %v3613_v61  ;;  %v9047_v47 = vld [vmem:[%s11767_s29 + $0xc0] ss:$16 sps:$4 sm:$0xff]  }
 0x632   : > { %v6196_v41 = vmul.f32 0.01, %v8671_v11  ;;  %v6259_v25 = vmax.f32 %v8669_v10, %v6195_v29 }
 0x634   : > { %v6260_v17 = vmax.f32 %v8671_v11, %v6196_v41  ;;  %6650 = vmatmul.mubr.bf16.gmra.mrb[4].mxu1 %v9032_v24  ;;  %v11910_v56 = vpop.permute.xlu1 %3712 }
 0x635   : > { %v6050_v54 = vpop.f32.mrb[88].mxu0  ;;  %6657 = vmatprep.mubr.bf16.mxu1 %v9037_v40 }
 0x636   : > { %v11888_v53 = vpack.c.bf16 %v6260_v17, %v6259_v25  ;;  %v8673_v26 = vadd.f32 %v6050_v54, %v5184_v3  ;;  %v6052_v28 = vpop.f32.mrb[89].mxu0  ;;  %v9041_v3 = vld [vmem:[%s11767_s29 + $0x80] ss:$16 sps:$4 sm:$0xff]   ;;  %v11907_v25 = vpop.permute.xlu0 %3707  ;;  %v9046_v17 = vld [vmem:[%s11767_s29 + $0xa4] ss:$16 sps:$4 sm:$0xff]  }
 0x637   : > { %v6053_v62 = vpop.f32.mrb[90].mxu0 }
 0x638   : > { %v6197_v45 = vmul.f32 0.01, %v8673_v26  ;;  %v8675_v23 = vadd.f32 %v6053_v62, %v5187_v1  ;;  %v6055_v44 = vpop.f32.mrb[91].mxu0  ;;  %v12818_v1 = vld [vmem:[#allocation111_spill] sm:$0xff] }
 0x63a   : > { %v6198_v4 = vmul.f32 0.01, %v8675_v23  ;;  %v6261_v55 = vmax.f32 %v8673_v26, %v6197_v45  ;;  %v5208_v26 = vadd.f32 %v12818_v1, %v3618_v35  ;;  %v12819_v45 = vld [vmem:[#allocation110_spill] sm:$0xff] }
 0x63c   : > { %v6262_v57 = vmax.f32 %v8675_v23, %v6198_v4  ;;  %6658 = vmatmul.mubr.bf16.gmra.mrb[8].mxu1 %v9035_v14  ;;  %v5211_v23 = vadd.f32 %v12819_v45, %v3623_v7 }
 0x63d   : > { %v6058_v30 = vpop.f32.mrb[92].mxu0  ;;  %6665 = vmatprep.mubr.bf16.mxu1 %v9040_v0  ;;  %v3628_v0 = vpop.permute.xlu0 %3627 }
 0x63e   : > { %v11896_v36 = vpack.c.bf16 %v6262_v57, %v6261_v55  ;;  %v8677_v6 = vadd.f32 %v6058_v30, %v5192_v63  ;;  %v6060_v31 = vpop.f32.mrb[93].mxu0  ;;  %v9044_v57 = vld [vmem:[%s11767_s29 + $0xa0] ss:$16 sps:$4 sm:$0xff]   ;;  %v3633_v30 = vpop.permute.xlu1 %3632 }
 0x63f   : > { %v6061_v50 = vpop.f32.mrb[94].mxu0 }
 0x640   : > { %v6199_v13 = vmul.f32 0.01, %v8677_v6  ;;  %v8679_v5 = vadd.f32 %v6061_v50, %v5195_v12  ;;  %v6063_v22 = vpop.f32.mrb[95].mxu0 }
 0x642   : > { %v6200_v21 = vmul.f32 0.01, %v8679_v5  ;;  %v6263_v39 = vmax.f32 %v8677_v6, %v6199_v13  ;;  %v12820_v6 = vld [vmem:[#allocation113_spill] sm:$0xff] }
 0x643   : > { %v5216_v31 = vadd.f32 %v12820_v6, %v3628_v0  ;;  %v9055_v0 = vld [vmem:[%s11767_s29 + $0xc] ss:$16 sps:$4 sm:$0xff]  }
 0x644   : > { %v6264_v15 = vmax.f32 %v8679_v5, %v6200_v21  ;;  %6666 = vmatmul.mubr.bf16.gmra.mrb[12].mxu1 %v9038_v48  ;;  %v11919_v5 = vpop.permute.xlu0 %3717  ;;  %v12821_v48 = vld [vmem:[#allocation30_spill] sm:$0xff] }
 0x645   : > { %v6066_v10 = vpop.f32.mrb[96].mxu0  ;;  %6673 = vmatprep.mubr.bf16.mxu1 %v9043_v59  ;;  %v5219_v59 = vadd.f32 %v12821_v48, %v3633_v30 }
 0x646   : > { %v11904_v29 = vpack.c.bf16 %v6264_v15, %v6263_v39  ;;  %v8681_v11 = vadd.f32 %v6066_v10, %v5200_v58  ;;  %v6068_v20 = vpop.f32.mrb[97].mxu0  ;;  %v11924_v58 = vpop.permute.xlu1 %3722 }
 0x647   : > { %v6069_v24 = vpop.f32.mrb[98].mxu0 }
 0x648   : > { %v6201_v40 = vmul.f32 0.01, %v8681_v11  ;;  %v8683_v41 = vadd.f32 %v6069_v24, %v5203_v43  ;;  %v6071_v52 = vpop.f32.mrb[99].mxu0  ;;  %v9052_v43 = vld [vmem:[%s11767_s29 + $0xe4] ss:$16 sps:$4 sm:$0xff]   ;;  %v3638_v20 = vpop.permute.xlu0 %3637 }
 0x649   : > { %v12822_v24 = vld [vmem:[#allocation114_spill] sm:$0xff] }
 0x64a   : > { %v6202_v54 = vmul.f32 0.01, %v8683_v41  ;;  %v6265_v28 = vmax.f32 %v8681_v11, %v6201_v40  ;;  %v5224_v40 = vadd.f32 %v12822_v24, %v3638_v20 }
 0x64c   : > { %v6266_v9 = vmax.f32 %v8683_v41, %v6202_v54  ;;  %6674 = vmatmul.mubr.bf16.gmra.mrb[16].mxu1 %v9041_v3  ;;  %v3643_v3 = vpop.permute.xlu1 %3642  ;;  %v12823_v54 = vld [vmem:[#allocation31_spill] sm:$0xff] }
 0x64d   : > { %v6074_v62 = vpop.f32.mrb[100].mxu0  ;;  %6681 = vmatprep.mubr.bf16.mxu1 %v9046_v17  ;;  %v5227_v1 = vadd.f32 %v12823_v54, %v3643_v3  ;;  %v12828_v3 = vld [vmem:[#allocation118_spill] sm:$0xff] }
 0x64e   : > { %v11914_v44 = vpack.c.bf16 %v6266_v9, %v6265_v28  ;;  %v8685_v14 = vadd.f32 %v6074_v62, %v5208_v26  ;;  %v6076_v61 = vpop.f32.mrb[101].mxu0 }
 0x64f   : > { %v6077_v4 = vpop.f32.mrb[102].mxu0  ;;  %v9050_v61 = vld [vmem:[%s11767_s29 + $0xe0] ss:$16 sps:$4 sm:$0xff]  }
 0x650   : > { %v6203_v51 = vmul.f32 0.01, %v8685_v14  ;;  %v8687_v63 = vadd.f32 %v6077_v4, %v5211_v23  ;;  %v6079_v55 = vpop.f32.mrb[103].mxu0 }
 0x652   : > { %v6204_v12 = vmul.f32 0.01, %v8687_v63  ;;  %v6267_v50 = vmax.f32 %v8685_v14, %v6203_v51  ;;  %v12824_v51 = vld [vmem:[#allocation115_spill] sm:$0xff] }
 0x654   : > { %v6268_v13 = vmax.f32 %v8687_v63, %v6204_v12  ;;  %6682 = vmatmul.mubr.bf16.gmra.mrb[20].mxu1 %v9044_v57  ;;  %v8696_v63 = vadd.f32 %v12824_v51, %v11834_v60 }
 0x655   : > { %v6082_v22 = vpop.f32.mrb[104].mxu0  ;;  %6689 = vmatprep.mubr.bf16.mxu1 %v9049_v18  ;;  %v12825_v18 = vld [vmem:[#allocation33_spill] sm:$0xff] }
 0x656   : > { %v11922_v21 = vpack.c.bf16 %v6268_v13, %v6267_v50  ;;  %v8689_v35 = vadd.f32 %v6082_v22, %v5216_v31  ;;  %v6084_v8 = vpop.f32.mrb[105].mxu0  ;;  %v8698_v12 = vadd.f32 %v12825_v18, %v11837_v46 }
 0x657   : > { %v6085_v39 = vpop.f32.mrb[106].mxu0  ;;  %v12826_v8 = vld [vmem:[#allocation116_spill] sm:$0xff] }
 0x658   : > { %v6205_v15 = vmul.f32 0.01, %v8689_v35  ;;  %v8691_v7 = vadd.f32 %v6085_v39, %v5219_v59  ;;  %v6087_v10 = vpop.f32.mrb[107].mxu0  ;;  %v8700_v60 = vadd.f32 %v12826_v8, %v11846_v33  ;;  %v8704_v33 = vadd.f32 %v12828_v3, %v11857_v27 }
 0x659   : > { %v12827_v10 = vld [vmem:[#allocation34_spill] sm:$0xff] }
 0x65a   : > { %v6206_v11 = vmul.f32 0.01, %v8691_v7  ;;  %v6269_v41 = vmax.f32 %v8689_v35, %v6205_v15 }
 0x65c   : > { %v6270_v52 = vmax.f32 %v8691_v7, %v6206_v11  ;;  %6690 = vmatmul.mubr.bf16.gmra.mrb[24].mxu1 %v9047_v47  ;;  %v8702_v47 = vadd.f32 %v12827_v10, %v11850_v38 }
 0x65d   : > { %v6090_v17 = vpop.f32.mrb[108].mxu0  ;;  %6697 = vmatprep.mubr.bf16.mxu1 %v9052_v43 }
 0x65e   : > { %v11930_v26 = vpack.c.bf16 %v6270_v52, %v6269_v41  ;;  %v8693_v28 = vadd.f32 %v6090_v17, %v5224_v40  ;;  %v6092_v9 = vpop.f32.mrb[109].mxu0 }
 0x65f   : > { %v6093_v62 = vpop.f32.mrb[110].mxu0 }
 0x660   : > { %v6207_v45 = vmul.f32 0.01, %v8693_v28  ;;  %v8695_v23 = vadd.f32 %v6093_v62, %v5227_v1  ;;  %v6095_v14 = vpop.f32.mrb[111].mxu0 }
 0x662   : > { %v6208_v4 = vmul.f32 0.01, %v8695_v23  ;;  %v6271_v55 = vmax.f32 %v8693_v28, %v6207_v45  ;;  %v12829_v28 = vld [vmem:[#allocation35_spill] sm:$0xff] }
 0x663   : > { %v8706_v38 = vadd.f32 %v12829_v28, %v11860_v19 }
 0x664   : > { %v6272_v57 = vmax.f32 %v8695_v23, %v6208_v4  ;;  %6698 = vmatmul.mubr.bf16.gmra.mrb[28].mxu1 %v9050_v61  ;;  %v12830_v4 = vld [vmem:[#allocation119_spill] sm:$0xff] }
 0x665   : > { %v6098_v30 = vpop.f32.mrb[112].mxu0  ;;  %6738 = vmatprep.mubr.bf16.mxu1 %v9055_v0  ;;  %v8708_v27 = vadd.f32 %v12830_v4, %v11868_v2 }
 0x666   : > { %v11938_v6 = vpack.c.bf16 %v6272_v57, %v6271_v55  ;;  %v8697_v31 = vadd.f32 %v8696_v63, %v6098_v30  ;;  %v6100_v50 = vpop.f32.mrb[113].mxu0  ;;  %v12831_v57 = vld [vmem:[#allocation36_spill] sm:$0xff] }
 0x667   : > { %v6101_v13 = vpop.f32.mrb[114].mxu0  ;;  %v8710_v19 = vadd.f32 %v12831_v57, %v11871_v37 }
 0x668   : > { %v6209_v22 = vmul.f32 0.01, %v8697_v31  ;;  %v8699_v48 = vadd.f32 %v8698_v12, %v6101_v13  ;;  %v6103_v59 = vpop.f32.mrb[115].mxu0 }
 0x66a   : > { %v6210_v35 = vmul.f32 0.01, %v8699_v48  ;;  %v6273_v39 = vmax.f32 %v8697_v31, %v6209_v22 }
 0x66c   : > { %v6274_v15 = vmax.f32 %v8699_v48, %v6210_v35  ;;  %v12832_v48 = vld [vmem:[#allocation120_spill] sm:$0xff] }
 0x66d   : > { %v6106_v7 = vpop.f32.mrb[116].mxu0  ;;  %v8712_v2 = vadd.f32 %v12832_v48, %v11881_v34 }
 0x66e   : > { %v8701_v43 = vadd.f32 %v8700_v60, %v6106_v7  ;;  %v6108_v46 = vpop.f32.mrb[117].mxu0  ;;  %v6345_v11 = vpack.c.bf16 %v6274_v15, %v6273_v39  ;;  %v12833_v60 = vld [vmem:[#allocation37_spill] sm:$0xff] }
 0x66f   : > { %v6109_v20 = vpop.f32.mrb[118].mxu0  ;;  %v8714_v37 = vadd.f32 %v12833_v60, %v11884_v32  ;;  %v9064_v60 = vld [vmem:[%s11767_s29 + $0x6c] ss:$16 sps:$4 sm:$0xff]  }
 0x670   : > { %v6211_v24 = vmul.f32 0.01, %v8701_v43  ;;  %v8703_v40 = vadd.f32 %v8702_v47, %v6109_v20  ;;  %v6111_v41 = vpop.f32.mrb[119].mxu0  ;;  %8263 = vmatprep.subr.bf16.mxu1 %v6345_v11  ;;  %v12834_v11 = vld [vmem:[#allocation121_spill] sm:$0xff] }
 0x671   : > { %8264 = vmatpush3.bf16.msra.mxu1 %v11878_v49  ;;  %v8716_v34 = vadd.f32 %v12834_v11, %v11893_v42  ;;  %v12835_v41 = vld [vmem:[#allocation38_spill] sm:$0xff] }
 0x672   : > { %v6212_v52 = vmul.f32 0.01, %v8703_v40  ;;  %v6275_v17 = vmax.f32 %v8701_v43, %v6211_v24  ;;  %v8718_v32 = vadd.f32 %v12835_v41, %v11898_v16 }
 0x674   : > { %v6276_v54 = vmax.f32 %v8703_v40, %v6212_v52 }
 0x675   : > { %v6114_v1 = vpop.f32.mrb[120].mxu0 }
 0x676   : > { %v8705_v9 = vadd.f32 %v8704_v33, %v6114_v1  ;;  %v6116_v62 = vpop.f32.mrb[121].mxu0  ;;  %v6346_v45 = vpack.c.bf16 %v6276_v54, %v6275_v17 }
 0x677   : > { %v6117_v23 = vpop.f32.mrb[122].mxu0 }
 0x678   : > { %v6213_v14 = vmul.f32 0.01, %v8705_v9  ;;  %v8707_v61 = vadd.f32 %v8706_v38, %v6117_v23  ;;  %v6119_v0 = vpop.f32.mrb[123].mxu0  ;;  %8265 = vmatprep.subr.bf16.mxu1 %v6346_v45  ;;  %v12836_v38 = vld [vmem:[#allocation123_spill] sm:$0xff]  ;;  %v12837_v23 = vld [vmem:[#allocation40_spill] sm:$0xff] }
 0x679   : > { %8266 = vmatpush3.bf16.msra.mxu1 %v11888_v53  ;;  %v8720_v42 = vadd.f32 %v12836_v38, %v11907_v25  ;;  %v8722_v16 = vadd.f32 %v12837_v23, %v11910_v56 }
 0x67a   : > { %v6214_v49 = vmul.f32 0.01, %v8707_v61  ;;  %v6277_v51 = vmax.f32 %v8705_v9, %v6213_v14 }
 0x67c   : > { %v6278_v63 = vmax.f32 %v8707_v61, %v6214_v49 }
 0x67d   : > { %v6122_v55 = vpop.f32.mrb[124].mxu0 }
 0x67e   : > { %v8709_v30 = vadd.f32 %v8708_v27, %v6122_v55  ;;  %v6124_v18 = vpop.f32.mrb[125].mxu0  ;;  %v6347_v12 = vpack.c.bf16 %v6278_v63, %v6277_v51  ;;  %v12838_v63 = vld [vmem:[#allocation41_spill] sm:$0xff] }
 0x67f   : > { %v6125_v31 = vpop.f32.mrb[126].mxu0  ;;  %v8724_v25 = vadd.f32 %v12838_v63, %v11919_v5 }
 0x680   : > { %v6215_v50 = vmul.f32 0.01, %v8709_v30  ;;  %v8711_v13 = vadd.f32 %v8710_v19, %v6125_v31  ;;  %v6127_v22 = vpop.f32.mrb[127].mxu0  ;;  %8267 = vmatprep.subr.bf16.mxu1 %v6347_v12 }
 0x681   : > { %8268 = vmatpush3.bf16.msra.mxu1 %v11896_v36 }
 0x682   : > { %v6216_v53 = vmul.f32 0.01, %v8711_v13  ;;  %v6279_v59 = vmax.f32 %v8709_v30, %v6215_v50  ;;  %v12839_v30 = vld [vmem:[#allocation125_spill] sm:$0xff] }
 0x683   : > { %v8726_v56 = vadd.f32 %v12839_v30, %v11924_v58 }
 0x684   : > { %v6280_v35 = vmax.f32 %v8711_v13, %v6216_v53 }
 0x685   : > { %v6130_v8 = vpop.f32.mrb[128].mxu0 }
 0x686   : > { %v8713_v39 = vadd.f32 %v8712_v2, %v6130_v8  ;;  %v6132_v15 = vpop.f32.mrb[129].mxu0  ;;  %v6348_v7 = vpack.c.bf16 %v6280_v35, %v6279_v59  ;;  %v9053_v2 = vld [vmem:[%s11767_s29 + $0x8] ss:$16 sps:$4 sm:$0xff]   ;;  %v9058_v59 = vld [vmem:[%s11767_s29 + $0x2c] ss:$16 sps:$4 sm:$0xff]  }
 0x687   : > { %v6133_v10 = vpop.f32.mrb[130].mxu0  ;;  %v9056_v35 = vld [vmem:[%s11767_s29 + $0x28] ss:$16 sps:$4 sm:$0xff]   ;;  %v9061_v8 = vld [vmem:[%s11767_s29 + $0x4c] ss:$16 sps:$4 sm:$0xff]  }
 0x688   : > { %v6217_v47 = vmul.f32 0.01, %v8713_v39  ;;  %v8715_v43 = vadd.f32 %v8714_v37, %v6133_v10  ;;  %v6135_v46 = vpop.f32.mrb[131].mxu0  ;;  %8269 = vmatprep.subr.bf16.mxu1 %v6348_v7  ;;  %v9062_v37 = vld [vmem:[%s11767_s29 + $0x68] ss:$16 sps:$4 sm:$0xff]  }
 0x689   : > { %8270 = vmatpush3.bf16.msra.mxu1 %v11904_v29  ;;  %v9070_v15 = vld [vmem:[%s11767_s29 + $0xac] ss:$16 sps:$4 sm:$0xff]   ;;  %v9068_v7 = vld [vmem:[%s11767_s29 + $0xa8] ss:$16 sps:$4 sm:$0xff]  }
 0x68a   : > { %v6218_v36 = vmul.f32 0.01, %v8715_v43  ;;  %v6281_v20 = vmax.f32 %v8713_v39, %v6217_v47  ;;  %v9065_v39 = vld [vmem:[%s11767_s29 + $0x88] ss:$16 sps:$4 sm:$0xff]   ;;  %v9073_v10 = vld [vmem:[%s11767_s29 + $0xcc] ss:$16 sps:$4 sm:$0xff]  }
 0x68b   : > { %v9071_v47 = vld [vmem:[%s11767_s29 + $0xc8] ss:$16 sps:$4 sm:$0xff]  }
 0x68c   : > { %v6282_v24 = vmax.f32 %v8715_v43, %v6218_v36  ;;  %v9076_v43 = vld [vmem:[%s11767_s29 + $0xec] ss:$16 sps:$4 sm:$0xff]   ;;  %v9074_v46 = vld [vmem:[%s11767_s29 + $0xe8] ss:$16 sps:$4 sm:$0xff]  }
 0x68d   : > { %v6138_v40 = vpop.f32.mrb[132].mxu0 }
 0x68e   : > { %v8717_v52 = vadd.f32 %v8716_v34, %v6138_v40  ;;  %v6140_v3 = vpop.f32.mrb[133].mxu0  ;;  %v6349_v33 = vpack.c.bf16 %v6282_v24, %v6281_v20 }
 0x68f   : > { %v6141_v17 = vpop.f32.mrb[134].mxu0 }
 0x690   : > { %v6219_v54 = vmul.f32 0.01, %v8717_v52  ;;  %v8719_v1 = vadd.f32 %v8718_v32, %v6141_v17  ;;  %v6143_v28 = vpop.f32.mrb[135].mxu0  ;;  %8271 = vmatprep.subr.bf16.mxu1 %v6349_v33 }
 0x691   : > { %8272 = vmatpush3.bf16.msra.mxu1 %v11914_v44 }
 0x692   : > { %v6220_v29 = vmul.f32 0.01, %v8719_v1  ;;  %v6283_v9 = vmax.f32 %v8717_v52, %v6219_v54 }
 0x694   : > { %v6284_v62 = vmax.f32 %v8719_v1, %v6220_v29 }
 0x695   : > { %v6146_v45 = vpop.f32.mrb[136].mxu0 }
 0x696   : > { %v8721_v14 = vadd.f32 %v8720_v42, %v6146_v45  ;;  %v6148_v61 = vpop.f32.mrb[137].mxu0  ;;  %v6350_v0 = vpack.c.bf16 %v6284_v62, %v6283_v9 }
 0x697   : > { %v6149_v49 = vpop.f32.mrb[138].mxu0 }
 0x698   : > { %v6221_v4 = vmul.f32 0.01, %v8721_v14  ;;  %v8723_v27 = vadd.f32 %v8722_v16, %v6149_v49  ;;  %v6151_v51 = vpop.f32.mrb[139].mxu0  ;;  %8273 = vmatprep.subr.bf16.mxu1 %v6350_v0 }
 0x699   : > { %8274 = vmatpush3.bf16.msra.mxu1 %v11922_v21 }
 0x69a   : > { %v6222_v44 = vmul.f32 0.01, %v8723_v27  ;;  %v6285_v55 = vmax.f32 %v8721_v14, %v6221_v4 }
 0x69c   : > { %v6286_v57 = vmax.f32 %v8723_v27, %v6222_v44 }
 0x69d   : > { %v6154_v19 = vpop.f32.mrb[140].mxu0 }
 0x69e   : > { %v8725_v18 = vadd.f32 %v8724_v25, %v6154_v19  ;;  %v6156_v12 = vpop.f32.mrb[141].mxu0  ;;  %v6351_v31 = vpack.c.bf16 %v6286_v57, %v6285_v55 }
 0x69f   : > { %v6157_v50 = vpop.f32.mrb[142].mxu0 }
 0x6a0   : > { %v6223_v13 = vmul.f32 0.01, %v8725_v18  ;;  %v8727_v21 = vadd.f32 %v8726_v56, %v6157_v50  ;;  %v6159_v22 = vpop.f32.mrb[143].mxu0  ;;  %8275 = vmatprep.subr.bf16.mxu1 %v6351_v31 }
 0x6a1   : > { %8276 = vmatpush3.bf16.msra.mxu1 %v11930_v26  ;;  %v9059_v26 = vld [vmem:[%s11767_s29 + $0x48] ss:$16 sps:$4 sm:$0xff]  }
 0x6a2   : > { %v6224_v5 = vmul.f32 0.01, %v8727_v21  ;;  %v6287_v53 = vmax.f32 %v8725_v18, %v6223_v13 }
 0x6a4   : > { %v6288_v48 = vmax.f32 %v8727_v21, %v6224_v5 }
 0x6a6   : > { %v6352_v58 = vpack.c.bf16 %v6288_v48, %v6287_v53 }
 0x6a8   : > { %8277 = vmatprep.subr.bf16.mxu1 %v6352_v58  ;;  %v9077_v58 = vld [vmem:[%s12021_s19] sm:$0xff]  }
 0x6a9   : > { %8278 = vmatpush3.bf16.msra.mxu1 %v11938_v6  ;;  %v9067_v6 = vld [vmem:[%s11767_s29 + $0x8c] ss:$16 sps:$4 sm:$0xff]   ;;  %s778_s29 = scalar_lea.vmem %s12093_s13, %s7479_s27 }
 0x6ac   : > { %6739 = vmatmul.mubr.bf16.vlgmr.msra.gmra.mrb[32].mxu1 %v9053_v2 }
 0x6ad   : > { %6746 = vmatprep.mubr.bf16.mxu1 %v9058_v59  ;;  %v6372_v59 = vpop.permute.xlu0 %6371 }
 0x6b4   : > { %6747 = vmatmul.mubr.bf16.gmra.mrb[36].mxu1 %v9056_v35 }
 0x6b5   : > { %6754 = vmatprep.mubr.bf16.mxu1 %v9061_v8 }
 0x6bc   : > { %6755 = vmatmul.mubr.bf16.gmra.mrb[40].mxu1 %v9059_v26 }
 0x6bd   : > { %6762 = vmatprep.mubr.bf16.mxu1 %v9064_v60 }
 0x6c4   : > { %6763 = vmatmul.mubr.bf16.gmra.mrb[44].mxu1 %v9062_v37  ;;  %v6377_v37 = vpop.permute.xlu1 %6376 }
 0x6c5   : > { %6770 = vmatprep.mubr.bf16.mxu1 %v9067_v6 }
 0x6cc   : > { %6771 = vmatmul.mubr.bf16.gmra.mrb[48].mxu1 %v9065_v39 }
 0x6cd   : > { %6778 = vmatprep.mubr.bf16.mxu1 %v9070_v15 }
 0x6d4   : > { %6779 = vmatmul.mubr.bf16.gmra.mrb[52].mxu1 %v9068_v7 }
 0x6d5   : > { %6786 = vmatprep.mubr.bf16.mxu1 %v9073_v10 }
 0x6dc   : > { %6787 = vmatmul.mubr.bf16.gmra.mrb[56].mxu1 %v9071_v47 }
 0x6dd   : > { %6794 = vmatprep.mubr.bf16.mxu1 %v9076_v43 }
 0x6e4   : > { %6795 = vmatmul.mubr.bf16.gmra.mrb[60].mxu1 %v9074_v46 }
 0x6e5   : > { %8532 = vmatprep.mubr.bf16.mxu1 %v9077_v58 }
 0x6ff   : > { %v8215_v36 = vpop.f32.mrb[0].mxu1 }
 0x700   : > { %v8216_v11 = vpop.f32.mrb[1].mxu1 }
 0x701   : > { %v8217_v34 = vadd.f32 %v8216_v11, %v8215_v36  ;;  %v8218_v20 = vpop.f32.mrb[2].mxu1  ;;  %v6382_v36 = vpop.permute.xlu0 %6381 }
 0x702   : > { %v8219_v24 = vpop.f32.mrb[3].mxu1 }
 0x703   : > { %v8220_v40 = vadd.f32 %v8219_v24, %v8218_v20  ;;  %v6644_v8 = vadd.f32 %v8217_v34, %v6372_v59 }
 0x705   : > { %v6647_v39 = vadd.f32 %v8220_v40, %v6377_v37 }
 0x707   : > { %v8221_v41 = vpop.f32.mrb[4].mxu1 }
 0x708   : > { %v8222_v32 = vpop.f32.mrb[5].mxu1 }
 0x709   : > { %v8223_v52 = vadd.f32 %v8222_v32, %v8221_v41  ;;  %v8224_v3 = vpop.f32.mrb[6].mxu1 }
 0x70a   : > { %v8225_v33 = vpop.f32.mrb[7].mxu1 }
 0x70b   : > { %v11991_v17 = vadd.f32 %v8225_v33, %v8224_v3  ;;  %v6652_v20 = vadd.f32 %v8223_v52, %v6382_v36  ;;  %v6387_v33 = vpop.permute.xlu1 %6386 }
 0x70f   : > { %v8227_v54 = vpop.f32.mrb[8].mxu1 }
 0x710   : > { %v8228_v1 = vpop.f32.mrb[9].mxu1 }
 0x711   : > { %v11993_v28 = vadd.f32 %v8228_v1, %v8227_v54  ;;  %v8230_v29 = vpop.f32.mrb[10].mxu1  ;;  %v6655_v54 = vadd.f32 %v11991_v17, %v6387_v33 }
 0x712   : > { %v8231_v38 = vpop.f32.mrb[11].mxu1 }
 0x713   : > { %v11995_v42 = vadd.f32 %v8231_v38, %v8230_v29 }
 0x717   : > { %v8233_v9 = vpop.f32.mrb[12].mxu1 }
 0x718   : > { %v8234_v62 = vpop.f32.mrb[13].mxu1 }
 0x719   : > { %v11997_v45 = vadd.f32 %v8234_v62, %v8233_v9  ;;  %v8236_v23 = vpop.f32.mrb[14].mxu1 }
 0x71a   : > { %v8237_v16 = vpop.f32.mrb[15].mxu1 }
 0x71b   : > { %v11999_v14 = vadd.f32 %v8237_v16, %v8236_v23  ;;  %v6392_v16 = vpop.permute.xlu0 %6391 }
 0x71c   : > { %v6660_v52 = vadd.f32 %v11993_v28, %v6392_v16 }
 0x71f   : > { %v8239_v61 = vpop.f32.mrb[16].mxu1 }
 0x720   : > { %v8240_v0 = vpop.f32.mrb[17].mxu1 }
 0x721   : > { %v12001_v49 = vadd.f32 %v8240_v0, %v8239_v61  ;;  %v8242_v4 = vpop.f32.mrb[18].mxu1 }
 0x722   : > { %v8243_v27 = vpop.f32.mrb[19].mxu1 }
 0x723   : > { %v12003_v51 = vadd.f32 %v8243_v27, %v8242_v4 }
 0x727   : > { %v8245_v44 = vpop.f32.mrb[20].mxu1 }
 0x728   : > { %v8246_v63 = vpop.f32.mrb[21].mxu1 }
 0x729   : > { %v12005_v25 = vadd.f32 %v8246_v63, %v8245_v44  ;;  %v8248_v55 = vpop.f32.mrb[22].mxu1  ;;  %v6397_v63 = vpop.permute.xlu1 %6396 }
 0x72a   : > { %v8249_v57 = vpop.f32.mrb[23].mxu1  ;;  %v6663_v17 = vadd.f32 %v11995_v42, %v6397_v63 }
 0x72b   : > { %v12007_v19 = vadd.f32 %v8249_v57, %v8248_v55 }
 0x72f   : > { %v8251_v30 = vpop.f32.mrb[24].mxu1 }
 0x730   : > { %v8252_v56 = vpop.f32.mrb[25].mxu1 }
 0x731   : > { %v12009_v18 = vadd.f32 %v8252_v56, %v8251_v30  ;;  %v8254_v12 = vpop.f32.mrb[26].mxu1 }
 0x732   : > { %v8255_v31 = vpop.f32.mrb[27].mxu1 }
 0x733   : > { %v12011_v50 = vadd.f32 %v8255_v31, %v8254_v12 }
 0x737   : > { %v8257_v13 = vpop.f32.mrb[28].mxu1 }
 0x738   : > { %v8258_v21 = vpop.f32.mrb[29].mxu1 }
 0x739   : > { %v12013_v22 = vadd.f32 %v8258_v21, %v8257_v13  ;;  %v8260_v5 = vpop.f32.mrb[30].mxu1 }
 0x73a   : > { %v8261_v53 = vpop.f32.mrb[31].mxu1 }
 0x73b   : > { %v12015_v48 = vadd.f32 %v8261_v53, %v8260_v5  ;;  %v6402_v5 = vpop.permute.xlu0 %6401 }
 0x73c   : > { %v6668_v28 = vadd.f32 %v11997_v45, %v6402_v5 }
 0x77f   : > { %v8279_v2 = vpop.f32.mrb[32].mxu1 }
 0x780   : > { %v8280_v35 = vpop.f32.mrb[33].mxu1 }
 0x781   : > { %v8281_v26 = vadd.f32 %v8280_v35, %v8279_v2  ;;  %v8282_v60 = vpop.f32.mrb[34].mxu1 }
 0x782   : > { %v8283_v6 = vpop.f32.mrb[35].mxu1 }
 0x783   : > { %v6741_v15 = vadd.f32 %v8281_v26, %v6644_v8  ;;  %v8284_v7 = vadd.f32 %v8283_v6, %v8282_v60  ;;  %v6407_v8 = vpop.permute.xlu1 %6406 }
 0x784   : > { %v6671_v42 = vadd.f32 %v11999_v14, %v6407_v8 }
 0x785   : > { %v6803_v10 = vmul.f32 0.01, %v6741_v15  ;;  %v6744_v47 = vadd.f32 %v8284_v7, %v6647_v39 }
 0x787   : > { %v6804_v43 = vmul.f32 0.01, %v6744_v47  ;;  %v8285_v46 = vpop.f32.mrb[36].mxu1  ;;  %v6819_v24 = vmax.f32 %v6741_v15, %v6803_v10 }
 0x788   : > { %v8286_v11 = vpop.f32.mrb[37].mxu1 }
 0x789   : > { %v6820_v41 = vmax.f32 %v6744_v47, %v6804_v43  ;;  %v8287_v32 = vadd.f32 %v8286_v11, %v8285_v46  ;;  %v8288_v3 = vpop.f32.mrb[38].mxu1  ;;  %v6412_v47 = vpop.permute.xlu0 %6411 }
 0x78a   : > { %v8289_v34 = vpop.f32.mrb[39].mxu1  ;;  %v6676_v45 = vadd.f32 %v12001_v49, %v6412_v47 }
 0x78b   : > { %v6749_v1 = vadd.f32 %v8287_v32, %v6652_v20  ;;  %v8290_v29 = vadd.f32 %v8289_v34, %v8288_v3  ;;  %v6851_v40 = vpack.c.bf16 %v6820_v41, %v6819_v24  ;;  %v6417_v24 = vpop.permute.xlu1 %6416 }
 0x78c   : > { %v6679_v14 = vadd.f32 %v12003_v51, %v6417_v24  ;;  %v9078_v24 = vld [vmem:[%s12021_s19 + $0x8] sm:$0xff]  }
 0x78d   : > { %v6805_v38 = vmul.f32 0.01, %v6749_v1  ;;  %v6752_v9 = vadd.f32 %v8290_v29, %v6655_v54  ;;  %8516 = vmatprep.subr.bf16.mxu1 %v6851_v40 }
 0x78e   : > { %8517 = vmatpush3.bf16.msra.mxu1 %v6851_v40  ;;  %v6422_v40 = vpop.permute.xlu0 %6421 }
 0x78f   : > { %v6806_v62 = vmul.f32 0.01, %v6752_v9  ;;  %v8291_v23 = vpop.f32.mrb[40].mxu1  ;;  %v6821_v0 = vmax.f32 %v6749_v1, %v6805_v38  ;;  %v6684_v49 = vadd.f32 %v12005_v25, %v6422_v40 }
 0x790   : > { %v8292_v61 = vpop.f32.mrb[41].mxu1 }
 0x791   : > { %v6822_v4 = vmax.f32 %v6752_v9, %v6806_v62  ;;  %v8293_v27 = vadd.f32 %v8292_v61, %v8291_v23  ;;  %v8294_v44 = vpop.f32.mrb[42].mxu1  ;;  %v6427_v61 = vpop.permute.xlu1 %6426 }
 0x792   : > { %v8295_v55 = vpop.f32.mrb[43].mxu1  ;;  %v6687_v51 = vadd.f32 %v12007_v19, %v6427_v61 }
 0x793   : > { %v6757_v57 = vadd.f32 %v8293_v27, %v6660_v52  ;;  %v8296_v30 = vadd.f32 %v8295_v55, %v8294_v44  ;;  %v6852_v56 = vpack.c.bf16 %v6822_v4, %v6821_v0 }
 0x795   : > { %v6807_v12 = vmul.f32 0.01, %v6757_v57  ;;  %v6760_v31 = vadd.f32 %v8296_v30, %v6663_v17  ;;  %8518 = vmatprep.subr.bf16.mxu1 %v6852_v56 }
 0x796   : > { %8519 = vmatpush3.bf16.msra.mxu1 %v6852_v56 }
 0x797   : > { %v6808_v13 = vmul.f32 0.01, %v6760_v31  ;;  %v8297_v21 = vpop.f32.mrb[44].mxu1  ;;  %v6823_v58 = vmax.f32 %v6757_v57, %v6807_v12  ;;  %v6432_v57 = vpop.permute.xlu0 %6431 }
 0x798   : > { %v8298_v53 = vpop.f32.mrb[45].mxu1  ;;  %v6692_v25 = vadd.f32 %v12009_v18, %v6432_v57 }
 0x799   : > { %v6824_v2 = vmax.f32 %v6760_v31, %v6808_v13  ;;  %v8299_v59 = vadd.f32 %v8298_v53, %v8297_v21  ;;  %v8300_v35 = vpop.f32.mrb[46].mxu1  ;;  %v6437_v21 = vpop.permute.xlu1 %6436 }
 0x79a   : > { %v8301_v26 = vpop.f32.mrb[47].mxu1  ;;  %v6695_v19 = vadd.f32 %v12011_v50, %v6437_v21 }
 0x79b   : > { %v6765_v60 = vadd.f32 %v8299_v59, %v6668_v28  ;;  %v8302_v37 = vadd.f32 %v8301_v26, %v8300_v35  ;;  %v6853_v6 = vpack.c.bf16 %v6824_v2, %v6823_v58  ;;  %v6442_v26 = vpop.permute.xlu0 %6441 }
 0x79c   : > { %v6700_v18 = vadd.f32 %v12013_v22, %v6442_v26 }
 0x79d   : > { %v6809_v39 = vmul.f32 0.01, %v6765_v60  ;;  %v6768_v15 = vadd.f32 %v8302_v37, %v6671_v42  ;;  %8520 = vmatprep.subr.bf16.mxu1 %v6853_v6 }
 0x79e   : > { %8521 = vmatpush3.bf16.msra.mxu1 %v6853_v6 }
 0x79f   : > { %v6810_v7 = vmul.f32 0.01, %v6768_v15  ;;  %v8303_v10 = vpop.f32.mrb[48].mxu1  ;;  %v6825_v46 = vmax.f32 %v6765_v60, %v6809_v39 }
 0x7a0   : > { %v8304_v43 = vpop.f32.mrb[49].mxu1 }
 0x7a1   : > { %v6826_v36 = vmax.f32 %v6768_v15, %v6810_v7  ;;  %v8305_v11 = vadd.f32 %v8304_v43, %v8303_v10  ;;  %v8306_v20 = vpop.f32.mrb[50].mxu1  ;;  %v6447_v15 = vpop.permute.xlu1 %6446 }
 0x7a2   : > { %v8307_v41 = vpop.f32.mrb[51].mxu1  ;;  %v6703_v7 = vadd.f32 %v12015_v48, %v6447_v15  ;;  %v9079_v48 = vld [vmem:[%s12021_s19 + $0x10] sm:$0xff]  }
 0x7a3   : > { %v6773_v32 = vadd.f32 %v8305_v11, %v6676_v45  ;;  %v8308_v3 = vadd.f32 %v8307_v41, %v8306_v20  ;;  %v6854_v33 = vpack.c.bf16 %v6826_v36, %v6825_v46  ;;  %v9080_v41 = vld [vmem:[%s12021_s19 + $0x18] sm:$0xff]  }
 0x7a5   : > { %v6811_v34 = vmul.f32 0.01, %v6773_v32  ;;  %v6776_v54 = vadd.f32 %v8308_v3, %v6679_v14  ;;  %8522 = vmatprep.subr.bf16.mxu1 %v6854_v33  ;;  %v9081_v14 = vld [vmem:[%s12021_s19 + $0x20] sm:$0xff]   ;;  %v9083_v3 = vld [vmem:[%s12021_s19 + $0x30] sm:$0xff]  }
 0x7a6   : > { %8523 = vmatpush3.bf16.msra.mxu1 %v6854_v33  ;;  %v9084_v33 = vld [vmem:[%s12021_s19 + $0x38] sm:$0xff]  }
 0x7a7   : > { %v6812_v1 = vmul.f32 0.01, %v6776_v54  ;;  %v8309_v29 = vpop.f32.mrb[52].mxu1  ;;  %v6827_v9 = vmax.f32 %v6773_v32, %v6811_v34  ;;  %v9082_v32 = vld [vmem:[%s12021_s19 + $0x28] sm:$0xff]   ;;  %v9138_v34 = vmov 0.0  }
 0x7a8   : > { %v8310_v38 = vpop.f32.mrb[53].mxu1 }
 0x7a9   : > { %v6828_v62 = vmax.f32 %v6776_v54, %v6812_v1  ;;  %v8311_v23 = vadd.f32 %v8310_v38, %v8309_v29  ;;  %v8312_v16 = vpop.f32.mrb[54].mxu1  ;;  %v6878_v54 = vpop.permute.xlu0 %6877 }
 0x7aa   : > { %v8313_v52 = vpop.f32.mrb[55].mxu1  ;;  %v6883_v1 = vpop.permute.xlu1 %6882 }
 0x7ab   : > { %v6781_v0 = vadd.f32 %v8311_v23, %v6684_v49  ;;  %v8314_v4 = vadd.f32 %v8313_v52, %v8312_v16  ;;  %v6855_v27 = vpack.c.bf16 %v6828_v62, %v6827_v9 }
 0x7ad   : > { %v6813_v44 = vmul.f32 0.01, %v6781_v0  ;;  %v6784_v63 = vadd.f32 %v8314_v4, %v6687_v51  ;;  %8524 = vmatprep.subr.bf16.mxu1 %v6855_v27  ;;  %v6888_v29 = vpop.permute.xlu0 %6887 }
 0x7ae   : > { %8525 = vmatpush3.bf16.msra.mxu1 %v6855_v27  ;;  %v6893_v40 = vpop.permute.xlu1 %6892 }
 0x7af   : > { %v6814_v55 = vmul.f32 0.01, %v6784_v63  ;;  %v8315_v17 = vpop.f32.mrb[56].mxu1  ;;  %v6829_v56 = vmax.f32 %v6781_v0, %v6813_v44 }
 0x7b0   : > { %v8316_v30 = vpop.f32.mrb[57].mxu1 }
 0x7b1   : > { %v6830_v12 = vmax.f32 %v6784_v63, %v6814_v55  ;;  %v8317_v31 = vadd.f32 %v8316_v30, %v8315_v17  ;;  %v8318_v13 = vpop.f32.mrb[58].mxu1  ;;  %v6898_v38 = vpop.permute.xlu0 %6897 }
 0x7b2   : > { %v8319_v5 = vpop.f32.mrb[59].mxu1  ;;  %v6903_v49 = vpop.permute.xlu1 %6902 }
 0x7b3   : > { %v6789_v53 = vadd.f32 %v8317_v31, %v6692_v25  ;;  %v8320_v28 = vadd.f32 %v8319_v5, %v8318_v13  ;;  %v6856_v58 = vpack.c.bf16 %v6830_v12, %v6829_v56 }
 0x7b5   : > { %v6815_v2 = vmul.f32 0.01, %v6789_v53  ;;  %v6792_v59 = vadd.f32 %v8320_v28, %v6695_v19  ;;  %8526 = vmatprep.subr.bf16.mxu1 %v6856_v58  ;;  %v6908_v9 = vpop.permute.xlu0 %6907 }
 0x7b6   : > { %8527 = vmatpush3.bf16.msra.mxu1 %v6856_v58  ;;  %v6913_v61 = vpop.permute.xlu1 %6912 }
 0x7b7   : > { %v6816_v35 = vmul.f32 0.01, %v6792_v59  ;;  %v8321_v8 = vpop.f32.mrb[60].mxu1  ;;  %v6831_v60 = vmax.f32 %v6789_v53, %v6815_v2 }
 0x7b8   : > { %v8322_v42 = vpop.f32.mrb[61].mxu1 }
 0x7b9   : > { %v6832_v37 = vmax.f32 %v6792_v59, %v6816_v35  ;;  %v8323_v6 = vadd.f32 %v8322_v42, %v8321_v8  ;;  %v8324_v39 = vpop.f32.mrb[62].mxu1  ;;  %v6918_v17 = vpop.permute.xlu0 %6917 }
 0x7ba   : > { %v8325_v50 = vpop.f32.mrb[63].mxu1  ;;  %v6923_v56 = vpop.permute.xlu1 %6922 }
 0x7bb   : > { %v6797_v10 = vadd.f32 %v8323_v6, %v6700_v18  ;;  %v8326_v47 = vadd.f32 %v8325_v50, %v8324_v39  ;;  %v6857_v43 = vpack.c.bf16 %v6832_v37, %v6831_v60 }
 0x7bd   : > { %v6817_v45 = vmul.f32 0.01, %v6797_v10  ;;  %v6800_v46 = vadd.f32 %v8326_v47, %v6703_v7  ;;  %8528 = vmatprep.subr.bf16.mxu1 %v6857_v43  ;;  %v6928_v8 = vpop.permute.xlu0 %6927 }
 0x7be   : > { %8529 = vmatpush3.bf16.msra.mxu1 %v6857_v43  ;;  %v6933_v60 = vpop.permute.xlu1 %6932 }
 0x7bf   : > { %v6818_v22 = vmul.f32 0.01, %v6800_v46  ;;  %v6833_v36 = vmax.f32 %v6797_v10, %v6817_v45 }
 0x7c1   : > { %v6834_v11 = vmax.f32 %v6800_v46, %v6818_v22  ;;  %v6938_v45 = vpop.permute.xlu0 %6937 }
 0x7c3   : > { %v6858_v20 = vpack.c.bf16 %v6834_v11, %v6833_v36 }
 0x7c5   : > { %8530 = vmatprep.subr.bf16.mxu1 %v6858_v20 }
 0x7c6   : > { %8531 = vmatpush3.bf16.msra.mxu1 %v6858_v20 }
 0x7c7   : > { %8548 = vmatprep.subr.bf16.mxu1 %v9138_v34 }
 0x7c9   : > { %8533 = vmatmul.mubr.bf16.vlgmr.msra.gmra.mrb[64].mxu1 %v9078_v24 }
 0x7ca   : > { %8536 = vmatprep.mubr.bf16.mxu1 %v9079_v48  ;;  %v6943_v48 = vpop.permute.xlu1 %6942 }
 0x7d1   : > { %8537 = vmatmul.mubr.bf16.gmra.mrb[68].mxu1 %v9080_v41 }
 0x7d2   : > { %8540 = vmatprep.mubr.bf16.mxu1 %v9081_v14 }
 0x7d9   : > { %8541 = vmatmul.mubr.bf16.gmra.mrb[72].mxu1 %v9082_v32 }
 0x7da   : > { %8544 = vmatprep.mubr.bf16.mxu1 %v9083_v3 }
 0x7e1   : > { %8545 = vmatmul.mubr.bf16.gmra.mrb[76].mxu1 %v9084_v33 }
 0x7e2   : > { %8564 = vmatprep.mubr.msk.bf16.mxu1 %vm9139_vm2, %v9138_v34 }
 0x89c   : > { %v8534_v62 = vpop.f32.mrb[64].mxu1 }
 0x89d   : > { %v7046_v23 = vadd.f32 %v8534_v62, %v6888_v29  ;;  %v7037_v16 = vpop.f32.mrb[65].mxu1 }
 0x89e   : > { %v7038_v52 = vadd.f32 %v7037_v16, %v6878_v54  ;;  %v8535_v51 = vpop.f32.mrb[66].mxu1 }
 0x89f   : > { %v7102_v0 = vmul.f32 0.01, %v7046_v23  ;;  %v7049_v4 = vadd.f32 %v8535_v51, %v6893_v40  ;;  %v7040_v27 = vpop.f32.mrb[67].mxu1 }
 0x8a0   : > { %v7100_v44 = vmul.f32 0.01, %v7038_v52  ;;  %v7041_v63 = vadd.f32 %v7040_v27, %v6883_v1  ;;  %v6948_v1 = vpop.permute.xlu0 %6947 }
 0x8a1   : > { %v7103_v55 = vmul.f32 0.01, %v7049_v4  ;;  %v7118_v30 = vmax.f32 %v7046_v23, %v7102_v0  ;;  %v6953_v23 = vpop.permute.xlu1 %6952 }
 0x8a2   : > { %v7101_v57 = vmul.f32 0.01, %v7041_v63  ;;  %v7116_v12 = vmax.f32 %v7038_v52, %v7100_v44 }
 0x8a3   : > { %v7119_v25 = vmax.f32 %v7049_v4, %v7103_v55 }
 0x8a4   : > { %v7117_v31 = vmax.f32 %v7041_v63, %v7101_v57  ;;  %v8538_v13 = vpop.f32.mrb[68].mxu1 }
 0x8a5   : > { %v7134_v21 = vpack.c.bf16 %v7119_v25, %v7118_v30  ;;  %v7062_v5 = vadd.f32 %v8538_v13, %v6908_v9  ;;  %v7053_v19 = vpop.f32.mrb[69].mxu1  ;;  %v7145_v13 = vpop.permute.xlu0 %7144 }
 0x8a6   : > { %v7133_v53 = vpack.c.bf16 %v7117_v31, %v7116_v12  ;;  %v7054_v28 = vadd.f32 %v7053_v19, %v6898_v38  ;;  %v8539_v58 = vpop.f32.mrb[70].mxu1  ;;  %v7132_v31 = vld [vmem:[%s768_s26] sm:$0x1] }
 0x8a7   : > { %v7106_v2 = vmul.f32 0.01, %v7062_v5  ;;  %v7065_v59 = vadd.f32 %v8539_v58, %v6913_v61  ;;  %v7056_v35 = vpop.f32.mrb[71].mxu1 }
 0x8a8   : > { %v7104_v26 = vmul.f32 0.01, %v7054_v28  ;;  %v7057_v42 = vadd.f32 %v7056_v35, %v6903_v49  ;;  %8549 = vmatpush3.bf16.msra.mxu1 %v7133_v53 }
 0x8a9   : > { %v7107_v18 = vmul.f32 0.01, %v7065_v59  ;;  %8550 = vmatprep.subr.bf16.mxu1 %v9138_v34  ;;  %v7122_v6 = vmax.f32 %v7062_v5, %v7106_v2 }
 0x8aa   : > { %v7105_v37 = vmul.f32 0.01, %v7057_v42  ;;  %v7120_v15 = vmax.f32 %v7054_v28, %v7104_v26 }
 0x8ab   : > { %v7123_v39 = vmax.f32 %v7065_v59, %v7107_v18 }
 0x8ac   : > { %v7121_v50 = vmax.f32 %v7057_v42, %v7105_v37  ;;  %v8542_v7 = vpop.f32.mrb[72].mxu1  ;;  %8551 = vmatpush3.bf16.msra.mxu1 %v7134_v21 }
 0x8ad   : > { %v7136_v10 = vpack.c.bf16 %v7123_v39, %v7122_v6  ;;  %v7078_v47 = vadd.f32 %v8542_v7, %v6928_v8  ;;  %v7069_v43 = vpop.f32.mrb[73].mxu1  ;;  %8552 = vmatprep.subr.bf16.mxu1 %v9138_v34 }
 0x8ae   : > { %v7135_v46 = vpack.c.bf16 %v7121_v50, %v7120_v15  ;;  %v7070_v22 = vadd.f32 %v7069_v43, %v6918_v17  ;;  %v8543_v36 = vpop.f32.mrb[74].mxu1 }
 0x8af   : > { %v7110_v11 = vmul.f32 0.01, %v7078_v47  ;;  %v7081_v20 = vadd.f32 %v8543_v36, %v6933_v60  ;;  %v7072_v24 = vpop.f32.mrb[75].mxu1 }
 0x8b0   : > { %v7108_v41 = vmul.f32 0.01, %v7070_v22  ;;  %v7073_v14 = vadd.f32 %v7072_v24, %v6923_v56  ;;  %8553 = vmatpush3.bf16.msra.mxu1 %v7135_v46 }
 0x8b1   : > { %v7111_v32 = vmul.f32 0.01, %v7081_v20  ;;  %8554 = vmatprep.subr.bf16.mxu1 %v9138_v34  ;;  %v7126_v33 = vmax.f32 %v7078_v47, %v7110_v11 }
 0x8b2   : > { %v7109_v3 = vmul.f32 0.01, %v7073_v14  ;;  %v7124_v29 = vmax.f32 %v7070_v22, %v7108_v41 }
 0x8b3   : > { %v7127_v54 = vmax.f32 %v7081_v20, %v7111_v32 }
 0x8b4   : > { %v7125_v40 = vmax.f32 %v7073_v14, %v7109_v3  ;;  %v8546_v38 = vpop.f32.mrb[76].mxu1  ;;  %8555 = vmatpush3.bf16.msra.mxu1 %v7136_v10 }
 0x8b5   : > { %v7138_v49 = vpack.c.bf16 %v7127_v54, %v7126_v33  ;;  %v7094_v9 = vadd.f32 %v8546_v38, %v6948_v1  ;;  %v7085_v62 = vpop.f32.mrb[77].mxu1  ;;  %8556 = vmatprep.subr.bf16.mxu1 %v9138_v34 }
 0x8b6   : > { %v7137_v16 = vpack.c.bf16 %v7125_v40, %v7124_v29  ;;  %v7086_v61 = vadd.f32 %v7085_v62, %v6938_v45  ;;  %v8547_v52 = vpop.f32.mrb[78].mxu1 }
 0x8b7   : > { %v7114_v51 = vmul.f32 0.01, %v7094_v9  ;;  %v7097_v0 = vadd.f32 %v8547_v52, %v6953_v23  ;;  %v7088_v4 = vpop.f32.mrb[79].mxu1 }
 0x8b8   : > { %v7112_v27 = vmul.f32 0.01, %v7086_v61  ;;  %v7089_v44 = vadd.f32 %v7088_v4, %v6943_v48  ;;  %8557 = vmatpush3.bf16.msra.mxu1 %v7137_v16 }
 0x8b9   : > { %v7115_v63 = vmul.f32 0.01, %v7097_v0  ;;  %8558 = vmatprep.subr.bf16.mxu1 %v9138_v34  ;;  %v7130_v17 = vmax.f32 %v7094_v9, %v7114_v51 }
 0x8ba   : > { %v7113_v55 = vmul.f32 0.01, %v7089_v44  ;;  %v7128_v30 = vmax.f32 %v7086_v61, %v7112_v27 }
 0x8bb   : > { %v7131_v57 = vmax.f32 %v7097_v0, %v7115_v63 }
 0x8bc   : > { %v7129_v25 = vmax.f32 %v7089_v44, %v7113_v55  ;;  %8559 = vmatpush3.bf16.msra.mxu1 %v7138_v49 }
 0x8bd   : > { %v7140_v56 = vpack.c.bf16 %v7131_v57, %v7130_v17  ;;  %8560 = vmatprep.subr.bf16.mxu1 %v9138_v34 }
 0x8be   : > { %v7139_v12 = vpack.c.bf16 %v7129_v25, %v7128_v30 }
 0x8c0   : > { %8561 = vmatpush3.bf16.msra.mxu1 %v7139_v12 }
 0x8c1   : > { %8562 = vmatprep.subr.bf16.mxu1 %v9138_v34 }
 0x8c4   : > { %8563 = vmatpush3.bf16.msra.mxu1 %v7140_v56 }
 0x8c7   : > { %8565 = vmatmul.mubr.bf16.vlgmr.msra.gmra.mrb[80].mxu1 %v7132_v31 }
 0x99a   : > { %v7181_v21 = vpop.f32.mrb[80].mxu1 }
 0x99b   : > { %v7182_v5 = vadd.f32 %v7181_v21, %v7145_v13  ;;  %v8566_v19 = vpop.f32.mrb[81].mxu1 }
 0x99c   : > { %v7184_v53 = vpop.f32.mrb[82].mxu1 }
 0x99d   : > { %7187 = vst [vmem:[%s778_s29] sm:$0x3] %v7182_v5  ;;  %v7189_v34 = vrot.slane %v7182_v5, 7  ;;  %v8567_v28 = vpop.f32.mrb[83].mxu1 }
 0x99f   : > { %v7191_v58 = vsub.f32 %v7182_v5, %v7189_v34 }
 0x9a1   : > { %v7785_v2 = vmul.f32 -1.442695, %v7191_v58 }
 0x9a3   : > { %9093 = vpow2.f32 %v7785_v2 }
 0x9ad   : > { %v9094_v59 = vpop.eup %9093 }
 0x9ae   : > { %v7195_v35 = vadd.f32 1.0, %v9094_v59 }
 0x9b0   : > { %9095 = vrcp.f32 %v7195_v35 }
 0x9ba   : > { %v9096_v8 = vpop.eup %9095 }
 0x9bb   : > { %7198 = vst [vmem:[%s785_s18 - $0x1] sm:$0x2] %v9096_v8 }
 0x9bc PF: > { %s25_s17 = sadd.s32 1, %s9135_s17   ;;  %s12840_s22 = sld [smem:[#allocation2_spill]] }
 0x9bd   : > { %p22_p8 = scmp.ge.s32.totalorder %s25_s17, 6   ;;  %s12841_s19 = sld [smem:[#allocation3_spill]] }
 0x9be   : > { %s12842_s29 = smov %s9127_s15  ;;  %s12843_s30 = smov %s9131_s16 }
 0x9bf   :  { %24 = sbr.rel (!%p22_p8) target bundleno = 3 (0x3), region = 150 }
 0x9c2   : > { %s12844_s15 = smov %s12840_s22 }
 0x9c3   : > { %s12845_s16 = smov %s12841_s19 }

</bundles_post_ra>
